<compile_context>
chip_gen: v6e
topology: v6e:2x2x1
jax: 0.10.0
libtpu: 0.0.40
codegen_flags: <defaults>
</compile_context>

<pallas_src>
import math

import jax
import jax.numpy as jnp
from jax.experimental import pallas as pl

KERNEL_SET = (2, 3, 5, 7)
DILATION_EXP = 2
BN_EPS = 1e-5
LANE = 128            # TPU vreg lane width; batch lanes are zero-padded up to this.


class Config:
    feature_dim = 4
    target_dims = None
    seq_len = 28
    win_size = 8
    n_layers = 2
    hidden_dim = 32
    is_graph_conv = True
    is_skip = True
    is_residual = True
    dropout = 0.0


def _receptive_field(n_layers, kmax=max(KERNEL_SET), de=DILATION_EXP):
    if de > 1:
        return int(1 + (kmax - 1) * (de ** n_layers - 1) / (de - 1))
    return n_layers * (kmax - 1) + 1


# ----------------------------------------------------------------------------
# Deterministic parameter init (mirrors the PyTorch module's structure)
# ----------------------------------------------------------------------------
def init_params(key, cfg):
    Fdim = cfg.feature_dim if cfg.target_dims is None else 1
    H = cfg.hidden_dim
    T = cfg.seq_len - cfg.win_size                 # encoder seq_length (= total_t_len)

    n_layers = cfg.n_layers
    rf = _receptive_field(n_layers)
    while rf > T:
        n_layers -= 1
        rf = _receptive_field(n_layers)
    assert rf <= T

    keys = iter(jax.random.split(key, 256))

    def conv_init(cout, cin, k):
        s = 1.0 / math.sqrt(cin * k)
        w = jax.random.uniform(next(keys), (cout, cin, k), jnp.float32, -s, s)
        b = jax.random.uniform(next(keys), (cout,), jnp.float32, -s, s)
        return w, b

    params = {
        "start": conv_init(H, Fdim, 1),
        "skip0": conv_init(H, H, T),
        "skipE": conv_init(H, H, T - rf + 1),
        "layers": [],
    }
    new_dilation = 1
    for i in range(1, n_layers + 1):
        rf_i = _receptive_field(i)
        t_len_i = T - rf_i + 1
        tconv = [conv_init(H // len(KERNEL_SET), H, k) for k in KERNEL_SET]
        skip = conv_init(H, H, t_len_i)
        bn = dict(
            gamma=jax.random.uniform(next(keys), (H,), jnp.float32, 0.8, 1.2),
            beta=jax.random.uniform(next(keys), (H,), jnp.float32, -0.1, 0.1),
            mean=jax.random.uniform(next(keys), (H,), jnp.float32, -0.1, 0.1),
            var=jax.random.uniform(next(keys), (H,), jnp.float32, 0.5, 1.5),
        )
        params["layers"].append(dict(tconv=tconv, skip=skip, bn=bn, dilation=new_dilation))
        new_dilation *= DILATION_EXP

    meta = dict(n_layers=n_layers, receptive_field=rf, total_t_len=T)
    return params, meta


# ----------------------------------------------------------------------------
# Wrapper-side parameter packing / folding (done once, outside the kernel)
# ----------------------------------------------------------------------------
def pack_params(params, meta, cfg):
    """Returns (w_all, vecs, layer_meta).

    w_all : (n_blocks, H, H) f32 — one (H, H) weight block per conv tap, in the
            order [start, skip0 taps, (tconv taps, skip taps) per layer, skipE
            taps].  Input-channel axis zero-padded to H where Cin < H; the
            dilated-inception bank is pre-combined with per-branch zero rows so
            the whole TConv is kmax per-tap blocks.
    vecs  : (H, 3 + 4*L) f32; columns = [start_b, skip0_b,
            (tconv_b, skip_b, bn_scale, bn_shift) per layer, skipE_b]
    layer_meta : static per-layer dict(dilation, t_in, t_out)
    """
    H = cfg.hidden_dim
    T = meta["total_t_len"]
    kmax = max(KERNEL_SET)
    H4 = H // len(KERNEL_SET)

    blocks, vec_cols, layer_meta = [], [], []

    def add_conv(w, b):
        O, Cin, K = w.shape
        assert O == H and Cin <= H
        for k in range(K):
            blocks.append(jnp.zeros((H, H), jnp.float32).at[:, :Cin].set(w[:, :, k]))
        vec_cols.append(b)

    add_conv(*params["start"])                    # 1 block
    add_conv(*params["skip0"])                    # T blocks

    t_cur = T
    for lp in params["layers"]:
        d = lp["dilation"]
        t_out = t_cur - (kmax - 1) * d
        # Dilated-inception bank: for tap m, branch with kernel k contributes
        # w[:, :, m - (kmax - k)] iff m >= kmax - k (truncate-to-shortest).
        for m in range(kmax):
            blk = jnp.zeros((H, H), jnp.float32)
            for idx, ((w, _b), k) in enumerate(zip(lp["tconv"], KERNEL_SET)):
                kp = m - (kmax - k)
                if 0 <= kp < k:
                    blk = blk.at[idx * H4:(idx + 1) * H4, :].set(w[:, :, kp])
            blocks.append(blk)
        vec_cols.append(jnp.concatenate([b for (_w, b) in lp["tconv"]]))

        add_conv(*lp["skip"])                     # t_out blocks

        bn = lp["bn"]                             # eval-mode BN folded to scale/shift
        scale = bn["gamma"] * jax.lax.rsqrt(bn["var"] + BN_EPS)
        shift = bn["beta"] - bn["mean"] * scale
        vec_cols.append(scale)
        vec_cols.append(shift)

        layer_meta.append(dict(dilation=d, t_in=t_cur, t_out=t_out))
        t_cur = t_out

    add_conv(*params["skipE"])                    # t_cur blocks

    w_all = jnp.stack(blocks, axis=0).astype(jnp.float32)       # (n_blocks, H, H)
    vecs = jnp.stack(vec_cols, axis=1).astype(jnp.float32)      # (H, 3 + 4L)
    return w_all, vecs, tuple(layer_meta)


# ----------------------------------------------------------------------------
# The single fused Pallas kernel: whole encoder, both paths, full batch
# ----------------------------------------------------------------------------
def _make_fused_kernel(H, T, layer_meta, n_layers, is_skip, is_residual):
    kmax = max(KERNEL_SET)

    def kernel(x_ref, w_ref, vecs_ref, out_ref):
        def vec(i):                               # (H,1) column -> lane-broadcast
            return vecs_ref[:, i:i + 1]

        def conv(xv, w0, n_taps, bias, dilation, t_out):
            """Conv1d as an unrolled per-tap sum of small MXU matmuls.

            Each tap operand xv[:, off : off + t_out*LANE] is a 128-lane
            aligned zero-cost view; w_ref[w0 + m] is a free static first-axis
            index into the packed (n_blocks, H, H) weight array.  No im2col
            concatenation, no relayout copies.
            """
            acc = jnp.dot(w_ref[w0], xv[:, :t_out * LANE],
                          preferred_element_type=jnp.float32)
            for m in range(1, n_taps):
                off = m * dilation * LANE
                acc = acc + jnp.dot(w_ref[w0 + m], xv[:, off:off + t_out * LANE],
                                    preferred_element_type=jnp.float32)
            return acc + bias

        xv = x_ref[...]                           # (H, T*LANE), channel/lane padded

        blk = 0
        xv = conv(xv, blk, 1, vec(0), 1, T)       # start 1x1 conv -> (H, T*LANE)
        blk += 1

        skip = None
        if is_skip:                               # dropout(p=0) in eval: no-op
            skip = conv(xv, blk, T, vec(1), 1, 1)            # (H, LANE)
        blk += T

        t_cur = T
        for li, lm in enumerate(layer_meta):
            d, t_out = lm["dilation"], lm["t_out"]
            res = xv
            # TConv (dilated inception, is_filter=False): kmax per-tap matmuls.
            xv = conv(xv, blk, kmax, vec(2 + 4 * li), d, t_out)
            blk += kmax
            if is_skip:
                skip = skip + conv(xv, blk, t_out, vec(3 + 4 * li), 1, 1)
            blk += t_out
            # eval BatchNorm (folded scale/shift), ReLU, then residual add.
            y = jnp.maximum(xv * vec(4 + 4 * li) + vec(5 + 4 * li), 0.0)
            if is_residual:
                y = y + res[:, (t_cur - t_out) * LANE:]       # aligned tail view
            xv = y
            t_cur = t_out

        skip_e = conv(xv, blk, t_cur, vec(2 + 4 * n_layers), 1, 1)    # (H, LANE)
        out_ref[...] = skip_e + skip if is_skip else skip_e           # dense store

    return kernel


def make_forward(cfg, meta, layer_meta):
    H = cfg.hidden_dim
    Fdim = cfg.feature_dim if cfg.target_dims is None else 1
    T = meta["total_t_len"]
    L = meta["n_layers"]
    W = cfg.win_size
    kmax = max(KERNEL_SET)

    kernel = _make_fused_kernel(H, T, layer_meta, L, cfg.is_skip, cfg.is_residual)

    def forward(x, w_all, vecs):
        """TCNFeatureEncoder.forward: x (B, seq_len, F) -> ((B,1,H), (B,1,H))."""
        B = x.shape[0]
        Beff = 2 * B                          # context + suspect stacked on batch
        assert Beff <= LANE and Fdim <= H

        ctx = x[:, :T, :]                     # == x[:, :-win_size, :]
        sus = x[:, W:, :]
        xb = jnp.concatenate([ctx, sus], axis=0).astype(jnp.float32)   # (Beff, T, F)
        # Lane-aligned layout: x2[c, t*LANE + b] = xb[b, t, c]; batch lanes
        # zero-padded Beff -> LANE and channels zero-padded Fdim -> H.
        x3 = jnp.transpose(xb, (2, 1, 0))                              # (F, T, Beff)
        x3 = jnp.pad(x3, ((0, H - Fdim), (0, 0), (0, LANE - Beff)))
        x2 = x3.reshape(H, T * LANE)

        # Advisory cost hint for XLA's scheduler (launch-bound ~µs kernel).
        n_lanes = 2 * T * LANE                                         # start + skip0
        for lm in layer_meta:
            n_lanes += (kmax + 1) * lm["t_out"] * LANE                 # tconv + skip_i
        n_lanes += layer_meta[-1]["t_out"] * LANE                      # skipE
        cost = pl.CostEstimate(
            flops=2 * H * H * n_lanes,
            transcendentals=0,
            bytes_accessed=4 * (x2.size + w_all.size + vecs.size + H * LANE))

        out = pl.pallas_call(
            kernel,
            out_shape=jax.ShapeDtypeStruct((H, LANE), jnp.float32),
            cost_estimate=cost,
        )(x2, w_all, vecs)                    # 3 input DMAs; all arrays in VMEM

        states = out[:, :Beff].T              # (Beff, H)  == skip.squeeze(-1)
        return states[:B, None, :], states[B:, None, :]   # .unsqueeze(1)

    return forward


# ----------------------------------------------------------------------------
# Pure-JAX (XLA) reference mirroring the PyTorch forward op-by-op (for checking)
# ----------------------------------------------------------------------------
def _ref_conv1d(x, w, b, dilation=1):
    K = w.shape[-1]
    t_out = x.shape[-1] - (K - 1) * dilation
    acc = jnp.zeros((x.shape[0], w.shape[0], t_out), jnp.float32)
    for k in range(K):
        acc = acc + jnp.einsum(
            "oc,bct->bot", w[:, :, k],
            x[:, :, k * dilation:k * dilation + t_out],
            precision=jax.lax.Precision.HIGHEST)
    return acc + b[None, :, None]


def _ref_encoder(x_btf, params, cfg):
    kmax = max(KERNEL_SET)
    x = jnp.transpose(x_btf, (0, 2, 1)).astype(jnp.float32)
    x = _ref_conv1d(x, *params["start"])
    skip = _ref_conv1d(x, *params["skip0"]) if cfg.is_skip else None
    for lp in params["layers"]:
        d = lp["dilation"]
        residual = x
        t_out = x.shape[-1] - (kmax - 1) * d
        outs = [_ref_conv1d(x, w, b, dilation=d)[:, :, -t_out:]
                for (w, b), _k in zip(lp["tconv"], KERNEL_SET)]
        x = jnp.concatenate(outs, axis=1)
        if cfg.is_skip:
            skip = skip + _ref_conv1d(x, *lp["skip"])
        bn = lp["bn"]
        inv = jax.lax.rsqrt(bn["var"] + BN_EPS)
        x = (x - bn["mean"][None, :, None]) * inv[None, :, None] \
            * bn["gamma"][None, :, None] + bn["beta"][None, :, None]
        x = jnp.maximum(x, 0.0)
        if cfg.is_residual:
            x = x + residual[:, :, -x.shape[-1]:]
    skip_e = _ref_conv1d(x, *params["skipE"])
    skip = skip_e + skip if cfg.is_skip else skip_e
    return jnp.transpose(skip, (0, 2, 1))     # (B, 1, H)


def _ref_forward(x, params, cfg, meta):
    T = meta["total_t_len"]
    return (_ref_encoder(x[:, :T, :], params, cfg),
            _ref_encoder(x[:, cfg.win_size:, :], params, cfg))


# ----------------------------------------------------------------------------
if __name__ == "__main__":
    cfg = Config()
    key = jax.random.PRNGKey(0)
    pkey, xkey = jax.random.split(key)

    params, meta = init_params(pkey, cfg)
    w_all, vecs, layer_meta = pack_params(params, meta, cfg)

    x = jax.random.normal(xkey, (2, cfg.seq_len, cfg.feature_dim), dtype=jnp.float32)

    forward = jax.jit(make_forward(cfg, meta, layer_meta))
    context_state, suspect_state = forward(x, w_all, vecs)
    context_state = jax.block_until_ready(context_state)
    suspect_state = jax.block_until_ready(suspect_state)

    assert context_state.shape == (2, 1, cfg.hidden_dim), context_state.shape
    assert suspect_state.shape == (2, 1, cfg.hidden_dim), suspect_state.shape
    assert bool(jnp.all(jnp.isfinite(context_state)))
    assert bool(jnp.all(jnp.isfinite(suspect_state)))

    # Cross-check the fused Pallas kernel against the pure-JAX reference.
    # Tolerance: the MXU f32 path at default precision is internally
    # bf16-decomposed, while the reference einsum uses Precision.HIGHEST.
    ref_ctx, ref_sus = _ref_forward(x, params, cfg, meta)
    assert bool(jnp.allclose(context_state, ref_ctx, atol=5e-3, rtol=5e-3)), \
        float(jnp.max(jnp.abs(context_state - ref_ctx)))
    assert bool(jnp.allclose(suspect_state, ref_sus, atol=5e-3, rtol=5e-3)), \
        float(jnp.max(jnp.abs(suspect_state - ref_sus)))

    print("KERNEL_OK")
</pallas_src>

<mosaic_0001>
module attributes {stable_mosaic.version = 11 : i64} {
  func.func @kernel(%arg0: memref<32x2560xf32, #tpu.memory_space<vmem>>, %arg1: memref<53x32x32xf32, #tpu.memory_space<vmem>>, %arg2: memref<32x11xf32, #tpu.memory_space<vmem>>, %arg3: memref<32x128xf32, #tpu.memory_space<vmem>>) attributes {dimension_semantics = [], scalar_prefetch = 0 : i64, scratch_operands = 0 : i64, tpu.core_type = #tpu.core_type<tc>} {
    %c0 = arith.constant 0 : index
    %c0_0 = arith.constant 0 : index
    %0 = vector.load %arg0[%c0, %c0_0] : memref<32x2560xf32, #tpu.memory_space<vmem>>, vector<32x2560xf32>
    %c0_1 = arith.constant 0 : index
    %c0_2 = arith.constant 0 : index
    %1 = vector.load %arg2[%c0_1, %c0_2] : memref<32x11xf32, #tpu.memory_space<vmem>>, vector<32x1xf32>
    %c0_3 = arith.constant 0 : index
    %c0_4 = arith.constant 0 : index
    %c0_5 = arith.constant 0 : index
    %2 = vector.load %arg1[%c0_3, %c0_4, %c0_5] : memref<53x32x32xf32, #tpu.memory_space<vmem>>, vector<1x32x32xf32>
    %3 = vector.shape_cast %2 : vector<1x32x32xf32> to vector<32x32xf32>
    %cst = arith.constant dense<0.000000e+00> : vector<32x2560xf32>
    %4 = tpu.matmul %3, %0, %cst {dimension_numbers = #tpu.dot_dimension_numbers<[1], [0], [0], [1], [0, 0, 1, 1], [], []>} : vector<32x32xf32>, vector<32x2560xf32>, vector<32x2560xf32> -> vector<32x2560xf32>
    %5 = vector.broadcast %1 : vector<32x1xf32> to vector<32x2560xf32>
    %6 = arith.addf %4, %5 : vector<32x2560xf32>
    %c0_6 = arith.constant 0 : index
    %c1 = arith.constant 1 : index
    %7 = vector.load %arg2[%c0_6, %c1] : memref<32x11xf32, #tpu.memory_space<vmem>>, vector<32x1xf32>
    %c1_7 = arith.constant 1 : index
    %c0_8 = arith.constant 0 : index
    %c0_9 = arith.constant 0 : index
    %8 = vector.load %arg1[%c1_7, %c0_8, %c0_9] : memref<53x32x32xf32, #tpu.memory_space<vmem>>, vector<1x32x32xf32>
    %9 = vector.shape_cast %8 : vector<1x32x32xf32> to vector<32x32xf32>
    %10 = vector.extract_strided_slice %6 {offsets = [0, 0], sizes = [32, 128], strides = [1, 1]} : vector<32x2560xf32> to vector<32x128xf32>
    %cst_10 = arith.constant dense<0.000000e+00> : vector<32x128xf32>
    %11 = tpu.matmul %9, %10, %cst_10 {dimension_numbers = #tpu.dot_dimension_numbers<[1], [0], [0], [1], [0, 0, 1, 1], [], []>} : vector<32x32xf32>, vector<32x128xf32>, vector<32x128xf32> -> vector<32x128xf32>
    %c2 = arith.constant 2 : index
    %c0_11 = arith.constant 0 : index
    %c0_12 = arith.constant 0 : index
    %12 = vector.load %arg1[%c2, %c0_11, %c0_12] : memref<53x32x32xf32, #tpu.memory_space<vmem>>, vector<1x32x32xf32>
    %13 = vector.shape_cast %12 : vector<1x32x32xf32> to vector<32x32xf32>
    %14 = vector.extract_strided_slice %6 {offsets = [0, 128], sizes = [32, 128], strides = [1, 1]} : vector<32x2560xf32> to vector<32x128xf32>
    %cst_13 = arith.constant dense<0.000000e+00> : vector<32x128xf32>
    %15 = tpu.matmul %13, %14, %cst_13 {dimension_numbers = #tpu.dot_dimension_numbers<[1], [0], [0], [1], [0, 0, 1, 1], [], []>} : vector<32x32xf32>, vector<32x128xf32>, vector<32x128xf32> -> vector<32x128xf32>
    %16 = arith.addf %11, %15 : vector<32x128xf32>
    %c3 = arith.constant 3 : index
    %c0_14 = arith.constant 0 : index
    %c0_15 = arith.constant 0 : index
    %17 = vector.load %arg1[%c3, %c0_14, %c0_15] : memref<53x32x32xf32, #tpu.memory_space<vmem>>, vector<1x32x32xf32>
    %18 = vector.shape_cast %17 : vector<1x32x32xf32> to vector<32x32xf32>
    %19 = vector.extract_strided_slice %6 {offsets = [0, 256], sizes = [32, 128], strides = [1, 1]} : vector<32x2560xf32> to vector<32x128xf32>
    %cst_16 = arith.constant dense<0.000000e+00> : vector<32x128xf32>
    %20 = tpu.matmul %18, %19, %cst_16 {dimension_numbers = #tpu.dot_dimension_numbers<[1], [0], [0], [1], [0, 0, 1, 1], [], []>} : vector<32x32xf32>, vector<32x128xf32>, vector<32x128xf32> -> vector<32x128xf32>
    %21 = arith.addf %16, %20 : vector<32x128xf32>
    %c4 = arith.constant 4 : index
    %c0_17 = arith.constant 0 : index
    %c0_18 = arith.constant 0 : index
    %22 = vector.load %arg1[%c4, %c0_17, %c0_18] : memref<53x32x32xf32, #tpu.memory_space<vmem>>, vector<1x32x32xf32>
    %23 = vector.shape_cast %22 : vector<1x32x32xf32> to vector<32x32xf32>
    %24 = vector.extract_strided_slice %6 {offsets = [0, 384], sizes = [32, 128], strides = [1, 1]} : vector<32x2560xf32> to vector<32x128xf32>
    %cst_19 = arith.constant dense<0.000000e+00> : vector<32x128xf32>
    %25 = tpu.matmul %23, %24, %cst_19 {dimension_numbers = #tpu.dot_dimension_numbers<[1], [0], [0], [1], [0, 0, 1, 1], [], []>} : vector<32x32xf32>, vector<32x128xf32>, vector<32x128xf32> -> vector<32x128xf32>
    %26 = arith.addf %21, %25 : vector<32x128xf32>
    %c5 = arith.constant 5 : index
    %c0_20 = arith.constant 0 : index
    %c0_21 = arith.constant 0 : index
    %27 = vector.load %arg1[%c5, %c0_20, %c0_21] : memref<53x32x32xf32, #tpu.memory_space<vmem>>, vector<1x32x32xf32>
    %28 = vector.shape_cast %27 : vector<1x32x32xf32> to vector<32x32xf32>
    %29 = vector.extract_strided_slice %6 {offsets = [0, 512], sizes = [32, 128], strides = [1, 1]} : vector<32x2560xf32> to vector<32x128xf32>
    %cst_22 = arith.constant dense<0.000000e+00> : vector<32x128xf32>
    %30 = tpu.matmul %28, %29, %cst_22 {dimension_numbers = #tpu.dot_dimension_numbers<[1], [0], [0], [1], [0, 0, 1, 1], [], []>} : vector<32x32xf32>, vector<32x128xf32>, vector<32x128xf32> -> vector<32x128xf32>
    %31 = arith.addf %26, %30 : vector<32x128xf32>
    %c6 = arith.constant 6 : index
    %c0_23 = arith.constant 0 : index
    %c0_24 = arith.constant 0 : index
    %32 = vector.load %arg1[%c6, %c0_23, %c0_24] : memref<53x32x32xf32, #tpu.memory_space<vmem>>, vector<1x32x32xf32>
    %33 = vector.shape_cast %32 : vector<1x32x32xf32> to vector<32x32xf32>
    %34 = vector.extract_strided_slice %6 {offsets = [0, 640], sizes = [32, 128], strides = [1, 1]} : vector<32x2560xf32> to vector<32x128xf32>
    %cst_25 = arith.constant dense<0.000000e+00> : vector<32x128xf32>
    %35 = tpu.matmul %33, %34, %cst_25 {dimension_numbers = #tpu.dot_dimension_numbers<[1], [0], [0], [1], [0, 0, 1, 1], [], []>} : vector<32x32xf32>, vector<32x128xf32>, vector<32x128xf32> -> vector<32x128xf32>
    %36 = arith.addf %31, %35 : vector<32x128xf32>
    %c7 = arith.constant 7 : index
    %c0_26 = arith.constant 0 : index
    %c0_27 = arith.constant 0 : index
    %37 = vector.load %arg1[%c7, %c0_26, %c0_27] : memref<53x32x32xf32, #tpu.memory_space<vmem>>, vector<1x32x32xf32>
    %38 = vector.shape_cast %37 : vector<1x32x32xf32> to vector<32x32xf32>
    %39 = vector.extract_strided_slice %6 {offsets = [0, 768], sizes = [32, 128], strides = [1, 1]} : vector<32x2560xf32> to vector<32x128xf32>
    %cst_28 = arith.constant dense<0.000000e+00> : vector<32x128xf32>
    %40 = tpu.matmul %38, %39, %cst_28 {dimension_numbers = #tpu.dot_dimension_numbers<[1], [0], [0], [1], [0, 0, 1, 1], [], []>} : vector<32x32xf32>, vector<32x128xf32>, vector<32x128xf32> -> vector<32x128xf32>
    %41 = arith.addf %36, %40 : vector<32x128xf32>
    %c8 = arith.constant 8 : index
    %c0_29 = arith.constant 0 : index
    %c0_30 = arith.constant 0 : index
    %42 = vector.load %arg1[%c8, %c0_29, %c0_30] : memref<53x32x32xf32, #tpu.memory_space<vmem>>, vector<1x32x32xf32>
    %43 = vector.shape_cast %42 : vector<1x32x32xf32> to vector<32x32xf32>
    %44 = vector.extract_strided_slice %6 {offsets = [0, 896], sizes = [32, 128], strides = [1, 1]} : vector<32x2560xf32> to vector<32x128xf32>
    %cst_31 = arith.constant dense<0.000000e+00> : vector<32x128xf32>
    %45 = tpu.matmul %43, %44, %cst_31 {dimension_numbers = #tpu.dot_dimension_numbers<[1], [0], [0], [1], [0, 0, 1, 1], [], []>} : vector<32x32xf32>, vector<32x128xf32>, vector<32x128xf32> -> vector<32x128xf32>
    %46 = arith.addf %41, %45 : vector<32x128xf32>
    %c9 = arith.constant 9 : index
    %c0_32 = arith.constant 0 : index
    %c0_33 = arith.constant 0 : index
    %47 = vector.load %arg1[%c9, %c0_32, %c0_33] : memref<53x32x32xf32, #tpu.memory_space<vmem>>, vector<1x32x32xf32>
    %48 = vector.shape_cast %47 : vector<1x32x32xf32> to vector<32x32xf32>
    %49 = vector.extract_strided_slice %6 {offsets = [0, 1024], sizes = [32, 128], strides = [1, 1]} : vector<32x2560xf32> to vector<32x128xf32>
    %cst_34 = arith.constant dense<0.000000e+00> : vector<32x128xf32>
    %50 = tpu.matmul %48, %49, %cst_34 {dimension_numbers = #tpu.dot_dimension_numbers<[1], [0], [0], [1], [0, 0, 1, 1], [], []>} : vector<32x32xf32>, vector<32x128xf32>, vector<32x128xf32> -> vector<32x128xf32>
    %51 = arith.addf %46, %50 : vector<32x128xf32>
    %c10 = arith.constant 10 : index
    %c0_35 = arith.constant 0 : index
    %c0_36 = arith.constant 0 : index
    %52 = vector.load %arg1[%c10, %c0_35, %c0_36] : memref<53x32x32xf32, #tpu.memory_space<vmem>>, vector<1x32x32xf32>
    %53 = vector.shape_cast %52 : vector<1x32x32xf32> to vector<32x32xf32>
    %54 = vector.extract_strided_slice %6 {offsets = [0, 1152], sizes = [32, 128], strides = [1, 1]} : vector<32x2560xf32> to vector<32x128xf32>
    %cst_37 = arith.constant dense<0.000000e+00> : vector<32x128xf32>
    %55 = tpu.matmul %53, %54, %cst_37 {dimension_numbers = #tpu.dot_dimension_numbers<[1], [0], [0], [1], [0, 0, 1, 1], [], []>} : vector<32x32xf32>, vector<32x128xf32>, vector<32x128xf32> -> vector<32x128xf32>
    %56 = arith.addf %51, %55 : vector<32x128xf32>
    %c11 = arith.constant 11 : index
    %c0_38 = arith.constant 0 : index
    %c0_39 = arith.constant 0 : index
    %57 = vector.load %arg1[%c11, %c0_38, %c0_39] : memref<53x32x32xf32, #tpu.memory_space<vmem>>, vector<1x32x32xf32>
    %58 = vector.shape_cast %57 : vector<1x32x32xf32> to vector<32x32xf32>
    %59 = vector.extract_strided_slice %6 {offsets = [0, 1280], sizes = [32, 128], strides = [1, 1]} : vector<32x2560xf32> to vector<32x128xf32>
    %cst_40 = arith.constant dense<0.000000e+00> : vector<32x128xf32>
    %60 = tpu.matmul %58, %59, %cst_40 {dimension_numbers = #tpu.dot_dimension_numbers<[1], [0], [0], [1], [0, 0, 1, 1], [], []>} : vector<32x32xf32>, vector<32x128xf32>, vector<32x128xf32> -> vector<32x128xf32>
    %61 = arith.addf %56, %60 : vector<32x128xf32>
    %c12 = arith.constant 12 : index
    %c0_41 = arith.constant 0 : index
    %c0_42 = arith.constant 0 : index
    %62 = vector.load %arg1[%c12, %c0_41, %c0_42] : memref<53x32x32xf32, #tpu.memory_space<vmem>>, vector<1x32x32xf32>
    %63 = vector.shape_cast %62 : vector<1x32x32xf32> to vector<32x32xf32>
    %64 = vector.extract_strided_slice %6 {offsets = [0, 1408], sizes = [32, 128], strides = [1, 1]} : vector<32x2560xf32> to vector<32x128xf32>
    %cst_43 = arith.constant dense<0.000000e+00> : vector<32x128xf32>
    %65 = tpu.matmul %63, %64, %cst_43 {dimension_numbers = #tpu.dot_dimension_numbers<[1], [0], [0], [1], [0, 0, 1, 1], [], []>} : vector<32x32xf32>, vector<32x128xf32>, vector<32x128xf32> -> vector<32x128xf32>
    %66 = arith.addf %61, %65 : vector<32x128xf32>
    %c13 = arith.constant 13 : index
    %c0_44 = arith.constant 0 : index
    %c0_45 = arith.constant 0 : index
    %67 = vector.load %arg1[%c13, %c0_44, %c0_45] : memref<53x32x32xf32, #tpu.memory_space<vmem>>, vector<1x32x32xf32>
    %68 = vector.shape_cast %67 : vector<1x32x32xf32> to vector<32x32xf32>
    %69 = vector.extract_strided_slice %6 {offsets = [0, 1536], sizes = [32, 128], strides = [1, 1]} : vector<32x2560xf32> to vector<32x128xf32>
    %cst_46 = arith.constant dense<0.000000e+00> : vector<32x128xf32>
    %70 = tpu.matmul %68, %69, %cst_46 {dimension_numbers = #tpu.dot_dimension_numbers<[1], [0], [0], [1], [0, 0, 1, 1], [], []>} : vector<32x32xf32>, vector<32x128xf32>, vector<32x128xf32> -> vector<32x128xf32>
    %71 = arith.addf %66, %70 : vector<32x128xf32>
    %c14 = arith.constant 14 : index
    %c0_47 = arith.constant 0 : index
    %c0_48 = arith.constant 0 : index
    %72 = vector.load %arg1[%c14, %c0_47, %c0_48] : memref<53x32x32xf32, #tpu.memory_space<vmem>>, vector<1x32x32xf32>
    %73 = vector.shape_cast %72 : vector<1x32x32xf32> to vector<32x32xf32>
    %74 = vector.extract_strided_slice %6 {offsets = [0, 1664], sizes = [32, 128], strides = [1, 1]} : vector<32x2560xf32> to vector<32x128xf32>
    %cst_49 = arith.constant dense<0.000000e+00> : vector<32x128xf32>
    %75 = tpu.matmul %73, %74, %cst_49 {dimension_numbers = #tpu.dot_dimension_numbers<[1], [0], [0], [1], [0, 0, 1, 1], [], []>} : vector<32x32xf32>, vector<32x128xf32>, vector<32x128xf32> -> vector<32x128xf32>
    %76 = arith.addf %71, %75 : vector<32x128xf32>
    %c15 = arith.constant 15 : index
    %c0_50 = arith.constant 0 : index
    %c0_51 = arith.constant 0 : index
    %77 = vector.load %arg1[%c15, %c0_50, %c0_51] : memref<53x32x32xf32, #tpu.memory_space<vmem>>, vector<1x32x32xf32>
    %78 = vector.shape_cast %77 : vector<1x32x32xf32> to vector<32x32xf32>
    %79 = vector.extract_strided_slice %6 {offsets = [0, 1792], sizes = [32, 128], strides = [1, 1]} : vector<32x2560xf32> to vector<32x128xf32>
    %cst_52 = arith.constant dense<0.000000e+00> : vector<32x128xf32>
    %80 = tpu.matmul %78, %79, %cst_52 {dimension_numbers = #tpu.dot_dimension_numbers<[1], [0], [0], [1], [0, 0, 1, 1], [], []>} : vector<32x32xf32>, vector<32x128xf32>, vector<32x128xf32> -> vector<32x128xf32>
    %81 = arith.addf %76, %80 : vector<32x128xf32>
    %c16 = arith.constant 16 : index
    %c0_53 = arith.constant 0 : index
    %c0_54 = arith.constant 0 : index
    %82 = vector.load %arg1[%c16, %c0_53, %c0_54] : memref<53x32x32xf32, #tpu.memory_space<vmem>>, vector<1x32x32xf32>
    %83 = vector.shape_cast %82 : vector<1x32x32xf32> to vector<32x32xf32>
    %84 = vector.extract_strided_slice %6 {offsets = [0, 1920], sizes = [32, 128], strides = [1, 1]} : vector<32x2560xf32> to vector<32x128xf32>
    %cst_55 = arith.constant dense<0.000000e+00> : vector<32x128xf32>
    %85 = tpu.matmul %83, %84, %cst_55 {dimension_numbers = #tpu.dot_dimension_numbers<[1], [0], [0], [1], [0, 0, 1, 1], [], []>} : vector<32x32xf32>, vector<32x128xf32>, vector<32x128xf32> -> vector<32x128xf32>
    %86 = arith.addf %81, %85 : vector<32x128xf32>
    %c17 = arith.constant 17 : index
    %c0_56 = arith.constant 0 : index
    %c0_57 = arith.constant 0 : index
    %87 = vector.load %arg1[%c17, %c0_56, %c0_57] : memref<53x32x32xf32, #tpu.memory_space<vmem>>, vector<1x32x32xf32>
    %88 = vector.shape_cast %87 : vector<1x32x32xf32> to vector<32x32xf32>
    %89 = vector.extract_strided_slice %6 {offsets = [0, 2048], sizes = [32, 128], strides = [1, 1]} : vector<32x2560xf32> to vector<32x128xf32>
    %cst_58 = arith.constant dense<0.000000e+00> : vector<32x128xf32>
    %90 = tpu.matmul %88, %89, %cst_58 {dimension_numbers = #tpu.dot_dimension_numbers<[1], [0], [0], [1], [0, 0, 1, 1], [], []>} : vector<32x32xf32>, vector<32x128xf32>, vector<32x128xf32> -> vector<32x128xf32>
    %91 = arith.addf %86, %90 : vector<32x128xf32>
    %c18 = arith.constant 18 : index
    %c0_59 = arith.constant 0 : index
    %c0_60 = arith.constant 0 : index
    %92 = vector.load %arg1[%c18, %c0_59, %c0_60] : memref<53x32x32xf32, #tpu.memory_space<vmem>>, vector<1x32x32xf32>
    %93 = vector.shape_cast %92 : vector<1x32x32xf32> to vector<32x32xf32>
    %94 = vector.extract_strided_slice %6 {offsets = [0, 2176], sizes = [32, 128], strides = [1, 1]} : vector<32x2560xf32> to vector<32x128xf32>
    %cst_61 = arith.constant dense<0.000000e+00> : vector<32x128xf32>
    %95 = tpu.matmul %93, %94, %cst_61 {dimension_numbers = #tpu.dot_dimension_numbers<[1], [0], [0], [1], [0, 0, 1, 1], [], []>} : vector<32x32xf32>, vector<32x128xf32>, vector<32x128xf32> -> vector<32x128xf32>
    %96 = arith.addf %91, %95 : vector<32x128xf32>
    %c19 = arith.constant 19 : index
    %c0_62 = arith.constant 0 : index
    %c0_63 = arith.constant 0 : index
    %97 = vector.load %arg1[%c19, %c0_62, %c0_63] : memref<53x32x32xf32, #tpu.memory_space<vmem>>, vector<1x32x32xf32>
    %98 = vector.shape_cast %97 : vector<1x32x32xf32> to vector<32x32xf32>
    %99 = vector.extract_strided_slice %6 {offsets = [0, 2304], sizes = [32, 128], strides = [1, 1]} : vector<32x2560xf32> to vector<32x128xf32>
    %cst_64 = arith.constant dense<0.000000e+00> : vector<32x128xf32>
    %100 = tpu.matmul %98, %99, %cst_64 {dimension_numbers = #tpu.dot_dimension_numbers<[1], [0], [0], [1], [0, 0, 1, 1], [], []>} : vector<32x32xf32>, vector<32x128xf32>, vector<32x128xf32> -> vector<32x128xf32>
    %101 = arith.addf %96, %100 : vector<32x128xf32>
    %c20 = arith.constant 20 : index
    %c0_65 = arith.constant 0 : index
    %c0_66 = arith.constant 0 : index
    %102 = vector.load %arg1[%c20, %c0_65, %c0_66] : memref<53x32x32xf32, #tpu.memory_space<vmem>>, vector<1x32x32xf32>
    %103 = vector.shape_cast %102 : vector<1x32x32xf32> to vector<32x32xf32>
    %104 = vector.extract_strided_slice %6 {offsets = [0, 2432], sizes = [32, 128], strides = [1, 1]} : vector<32x2560xf32> to vector<32x128xf32>
    %cst_67 = arith.constant dense<0.000000e+00> : vector<32x128xf32>
    %105 = tpu.matmul %103, %104, %cst_67 {dimension_numbers = #tpu.dot_dimension_numbers<[1], [0], [0], [1], [0, 0, 1, 1], [], []>} : vector<32x32xf32>, vector<32x128xf32>, vector<32x128xf32> -> vector<32x128xf32>
    %106 = arith.addf %101, %105 : vector<32x128xf32>
    %107 = vector.broadcast %7 : vector<32x1xf32> to vector<32x128xf32>
    %108 = arith.addf %106, %107 : vector<32x128xf32>
    %c0_68 = arith.constant 0 : index
    %c2_69 = arith.constant 2 : index
    %109 = vector.load %arg2[%c0_68, %c2_69] : memref<32x11xf32, #tpu.memory_space<vmem>>, vector<32x1xf32>
    %c21 = arith.constant 21 : index
    %c0_70 = arith.constant 0 : index
    %c0_71 = arith.constant 0 : index
    %110 = vector.load %arg1[%c21, %c0_70, %c0_71] : memref<53x32x32xf32, #tpu.memory_space<vmem>>, vector<1x32x32xf32>
    %111 = vector.shape_cast %110 : vector<1x32x32xf32> to vector<32x32xf32>
    %112 = vector.extract_strided_slice %6 {offsets = [0, 0], sizes = [32, 1792], strides = [1, 1]} : vector<32x2560xf32> to vector<32x1792xf32>
    %cst_72 = arith.constant dense<0.000000e+00> : vector<32x1792xf32>
    %113 = tpu.matmul %111, %112, %cst_72 {dimension_numbers = #tpu.dot_dimension_numbers<[1], [0], [0], [1], [0, 0, 1, 1], [], []>} : vector<32x32xf32>, vector<32x1792xf32>, vector<32x1792xf32> -> vector<32x1792xf32>
    %c22 = arith.constant 22 : index
    %c0_73 = arith.constant 0 : index
    %c0_74 = arith.constant 0 : index
    %114 = vector.load %arg1[%c22, %c0_73, %c0_74] : memref<53x32x32xf32, #tpu.memory_space<vmem>>, vector<1x32x32xf32>
    %115 = vector.shape_cast %114 : vector<1x32x32xf32> to vector<32x32xf32>
    %116 = vector.extract_strided_slice %6 {offsets = [0, 128], sizes = [32, 1792], strides = [1, 1]} : vector<32x2560xf32> to vector<32x1792xf32>
    %cst_75 = arith.constant dense<0.000000e+00> : vector<32x1792xf32>
    %117 = tpu.matmul %115, %116, %cst_75 {dimension_numbers = #tpu.dot_dimension_numbers<[1], [0], [0], [1], [0, 0, 1, 1], [], []>} : vector<32x32xf32>, vector<32x1792xf32>, vector<32x1792xf32> -> vector<32x1792xf32>
    %118 = arith.addf %113, %117 : vector<32x1792xf32>
    %c23 = arith.constant 23 : index
    %c0_76 = arith.constant 0 : index
    %c0_77 = arith.constant 0 : index
    %119 = vector.load %arg1[%c23, %c0_76, %c0_77] : memref<53x32x32xf32, #tpu.memory_space<vmem>>, vector<1x32x32xf32>
    %120 = vector.shape_cast %119 : vector<1x32x32xf32> to vector<32x32xf32>
    %121 = vector.extract_strided_slice %6 {offsets = [0, 256], sizes = [32, 1792], strides = [1, 1]} : vector<32x2560xf32> to vector<32x1792xf32>
    %cst_78 = arith.constant dense<0.000000e+00> : vector<32x1792xf32>
    %122 = tpu.matmul %120, %121, %cst_78 {dimension_numbers = #tpu.dot_dimension_numbers<[1], [0], [0], [1], [0, 0, 1, 1], [], []>} : vector<32x32xf32>, vector<32x1792xf32>, vector<32x1792xf32> -> vector<32x1792xf32>
    %123 = arith.addf %118, %122 : vector<32x1792xf32>
    %c24 = arith.constant 24 : index
    %c0_79 = arith.constant 0 : index
    %c0_80 = arith.constant 0 : index
    %124 = vector.load %arg1[%c24, %c0_79, %c0_80] : memref<53x32x32xf32, #tpu.memory_space<vmem>>, vector<1x32x32xf32>
    %125 = vector.shape_cast %124 : vector<1x32x32xf32> to vector<32x32xf32>
    %126 = vector.extract_strided_slice %6 {offsets = [0, 384], sizes = [32, 1792], strides = [1, 1]} : vector<32x2560xf32> to vector<32x1792xf32>
    %cst_81 = arith.constant dense<0.000000e+00> : vector<32x1792xf32>
    %127 = tpu.matmul %125, %126, %cst_81 {dimension_numbers = #tpu.dot_dimension_numbers<[1], [0], [0], [1], [0, 0, 1, 1], [], []>} : vector<32x32xf32>, vector<32x1792xf32>, vector<32x1792xf32> -> vector<32x1792xf32>
    %128 = arith.addf %123, %127 : vector<32x1792xf32>
    %c25 = arith.constant 25 : index
    %c0_82 = arith.constant 0 : index
    %c0_83 = arith.constant 0 : index
    %129 = vector.load %arg1[%c25, %c0_82, %c0_83] : memref<53x32x32xf32, #tpu.memory_space<vmem>>, vector<1x32x32xf32>
    %130 = vector.shape_cast %129 : vector<1x32x32xf32> to vector<32x32xf32>
    %131 = vector.extract_strided_slice %6 {offsets = [0, 512], sizes = [32, 1792], strides = [1, 1]} : vector<32x2560xf32> to vector<32x1792xf32>
    %cst_84 = arith.constant dense<0.000000e+00> : vector<32x1792xf32>
    %132 = tpu.matmul %130, %131, %cst_84 {dimension_numbers = #tpu.dot_dimension_numbers<[1], [0], [0], [1], [0, 0, 1, 1], [], []>} : vector<32x32xf32>, vector<32x1792xf32>, vector<32x1792xf32> -> vector<32x1792xf32>
    %133 = arith.addf %128, %132 : vector<32x1792xf32>
    %c26 = arith.constant 26 : index
    %c0_85 = arith.constant 0 : index
    %c0_86 = arith.constant 0 : index
    %134 = vector.load %arg1[%c26, %c0_85, %c0_86] : memref<53x32x32xf32, #tpu.memory_space<vmem>>, vector<1x32x32xf32>
    %135 = vector.shape_cast %134 : vector<1x32x32xf32> to vector<32x32xf32>
    %136 = vector.extract_strided_slice %6 {offsets = [0, 640], sizes = [32, 1792], strides = [1, 1]} : vector<32x2560xf32> to vector<32x1792xf32>
    %cst_87 = arith.constant dense<0.000000e+00> : vector<32x1792xf32>
    %137 = tpu.matmul %135, %136, %cst_87 {dimension_numbers = #tpu.dot_dimension_numbers<[1], [0], [0], [1], [0, 0, 1, 1], [], []>} : vector<32x32xf32>, vector<32x1792xf32>, vector<32x1792xf32> -> vector<32x1792xf32>
    %138 = arith.addf %133, %137 : vector<32x1792xf32>
    %c27 = arith.constant 27 : index
    %c0_88 = arith.constant 0 : index
    %c0_89 = arith.constant 0 : index
    %139 = vector.load %arg1[%c27, %c0_88, %c0_89] : memref<53x32x32xf32, #tpu.memory_space<vmem>>, vector<1x32x32xf32>
    %140 = vector.shape_cast %139 : vector<1x32x32xf32> to vector<32x32xf32>
    %141 = vector.extract_strided_slice %6 {offsets = [0, 768], sizes = [32, 1792], strides = [1, 1]} : vector<32x2560xf32> to vector<32x1792xf32>
    %cst_90 = arith.constant dense<0.000000e+00> : vector<32x1792xf32>
    %142 = tpu.matmul %140, %141, %cst_90 {dimension_numbers = #tpu.dot_dimension_numbers<[1], [0], [0], [1], [0, 0, 1, 1], [], []>} : vector<32x32xf32>, vector<32x1792xf32>, vector<32x1792xf32> -> vector<32x1792xf32>
    %143 = arith.addf %138, %142 : vector<32x1792xf32>
    %144 = vector.broadcast %109 : vector<32x1xf32> to vector<32x1792xf32>
    %145 = arith.addf %143, %144 : vector<32x1792xf32>
    %c0_91 = arith.constant 0 : index
    %c3_92 = arith.constant 3 : index
    %146 = vector.load %arg2[%c0_91, %c3_92] : memref<32x11xf32, #tpu.memory_space<vmem>>, vector<32x1xf32>
    %c28 = arith.constant 28 : index
    %c0_93 = arith.constant 0 : index
    %c0_94 = arith.constant 0 : index
    %147 = vector.load %arg1[%c28, %c0_93, %c0_94] : memref<53x32x32xf32, #tpu.memory_space<vmem>>, vector<1x32x32xf32>
    %148 = vector.shape_cast %147 : vector<1x32x32xf32> to vector<32x32xf32>
    %149 = vector.extract_strided_slice %145 {offsets = [0, 0], sizes = [32, 128], strides = [1, 1]} : vector<32x1792xf32> to vector<32x128xf32>
    %cst_95 = arith.constant dense<0.000000e+00> : vector<32x128xf32>
    %150 = tpu.matmul %148, %149, %cst_95 {dimension_numbers = #tpu.dot_dimension_numbers<[1], [0], [0], [1], [0, 0, 1, 1], [], []>} : vector<32x32xf32>, vector<32x128xf32>, vector<32x128xf32> -> vector<32x128xf32>
    %c29 = arith.constant 29 : index
    %c0_96 = arith.constant 0 : index
    %c0_97 = arith.constant 0 : index
    %151 = vector.load %arg1[%c29, %c0_96, %c0_97] : memref<53x32x32xf32, #tpu.memory_space<vmem>>, vector<1x32x32xf32>
    %152 = vector.shape_cast %151 : vector<1x32x32xf32> to vector<32x32xf32>
    %153 = vector.extract_strided_slice %145 {offsets = [0, 128], sizes = [32, 128], strides = [1, 1]} : vector<32x1792xf32> to vector<32x128xf32>
    %cst_98 = arith.constant dense<0.000000e+00> : vector<32x128xf32>
    %154 = tpu.matmul %152, %153, %cst_98 {dimension_numbers = #tpu.dot_dimension_numbers<[1], [0], [0], [1], [0, 0, 1, 1], [], []>} : vector<32x32xf32>, vector<32x128xf32>, vector<32x128xf32> -> vector<32x128xf32>
    %155 = arith.addf %150, %154 : vector<32x128xf32>
    %c30 = arith.constant 30 : index
    %c0_99 = arith.constant 0 : index
    %c0_100 = arith.constant 0 : index
    %156 = vector.load %arg1[%c30, %c0_99, %c0_100] : memref<53x32x32xf32, #tpu.memory_space<vmem>>, vector<1x32x32xf32>
    %157 = vector.shape_cast %156 : vector<1x32x32xf32> to vector<32x32xf32>
    %158 = vector.extract_strided_slice %145 {offsets = [0, 256], sizes = [32, 128], strides = [1, 1]} : vector<32x1792xf32> to vector<32x128xf32>
    %cst_101 = arith.constant dense<0.000000e+00> : vector<32x128xf32>
    %159 = tpu.matmul %157, %158, %cst_101 {dimension_numbers = #tpu.dot_dimension_numbers<[1], [0], [0], [1], [0, 0, 1, 1], [], []>} : vector<32x32xf32>, vector<32x128xf32>, vector<32x128xf32> -> vector<32x128xf32>
    %160 = arith.addf %155, %159 : vector<32x128xf32>
    %c31 = arith.constant 31 : index
    %c0_102 = arith.constant 0 : index
    %c0_103 = arith.constant 0 : index
    %161 = vector.load %arg1[%c31, %c0_102, %c0_103] : memref<53x32x32xf32, #tpu.memory_space<vmem>>, vector<1x32x32xf32>
    %162 = vector.shape_cast %161 : vector<1x32x32xf32> to vector<32x32xf32>
    %163 = vector.extract_strided_slice %145 {offsets = [0, 384], sizes = [32, 128], strides = [1, 1]} : vector<32x1792xf32> to vector<32x128xf32>
    %cst_104 = arith.constant dense<0.000000e+00> : vector<32x128xf32>
    %164 = tpu.matmul %162, %163, %cst_104 {dimension_numbers = #tpu.dot_dimension_numbers<[1], [0], [0], [1], [0, 0, 1, 1], [], []>} : vector<32x32xf32>, vector<32x128xf32>, vector<32x128xf32> -> vector<32x128xf32>
    %165 = arith.addf %160, %164 : vector<32x128xf32>
    %c32 = arith.constant 32 : index
    %c0_105 = arith.constant 0 : index
    %c0_106 = arith.constant 0 : index
    %166 = vector.load %arg1[%c32, %c0_105, %c0_106] : memref<53x32x32xf32, #tpu.memory_space<vmem>>, vector<1x32x32xf32>
    %167 = vector.shape_cast %166 : vector<1x32x32xf32> to vector<32x32xf32>
    %168 = vector.extract_strided_slice %145 {offsets = [0, 512], sizes = [32, 128], strides = [1, 1]} : vector<32x1792xf32> to vector<32x128xf32>
    %cst_107 = arith.constant dense<0.000000e+00> : vector<32x128xf32>
    %169 = tpu.matmul %167, %168, %cst_107 {dimension_numbers = #tpu.dot_dimension_numbers<[1], [0], [0], [1], [0, 0, 1, 1], [], []>} : vector<32x32xf32>, vector<32x128xf32>, vector<32x128xf32> -> vector<32x128xf32>
    %170 = arith.addf %165, %169 : vector<32x128xf32>
    %c33 = arith.constant 33 : index
    %c0_108 = arith.constant 0 : index
    %c0_109 = arith.constant 0 : index
    %171 = vector.load %arg1[%c33, %c0_108, %c0_109] : memref<53x32x32xf32, #tpu.memory_space<vmem>>, vector<1x32x32xf32>
    %172 = vector.shape_cast %171 : vector<1x32x32xf32> to vector<32x32xf32>
    %173 = vector.extract_strided_slice %145 {offsets = [0, 640], sizes = [32, 128], strides = [1, 1]} : vector<32x1792xf32> to vector<32x128xf32>
    %cst_110 = arith.constant dense<0.000000e+00> : vector<32x128xf32>
    %174 = tpu.matmul %172, %173, %cst_110 {dimension_numbers = #tpu.dot_dimension_numbers<[1], [0], [0], [1], [0, 0, 1, 1], [], []>} : vector<32x32xf32>, vector<32x128xf32>, vector<32x128xf32> -> vector<32x128xf32>
    %175 = arith.addf %170, %174 : vector<32x128xf32>
    %c34 = arith.constant 34 : index
    %c0_111 = arith.constant 0 : index
    %c0_112 = arith.constant 0 : index
    %176 = vector.load %arg1[%c34, %c0_111, %c0_112] : memref<53x32x32xf32, #tpu.memory_space<vmem>>, vector<1x32x32xf32>
    %177 = vector.shape_cast %176 : vector<1x32x32xf32> to vector<32x32xf32>
    %178 = vector.extract_strided_slice %145 {offsets = [0, 768], sizes = [32, 128], strides = [1, 1]} : vector<32x1792xf32> to vector<32x128xf32>
    %cst_113 = arith.constant dense<0.000000e+00> : vector<32x128xf32>
    %179 = tpu.matmul %177, %178, %cst_113 {dimension_numbers = #tpu.dot_dimension_numbers<[1], [0], [0], [1], [0, 0, 1, 1], [], []>} : vector<32x32xf32>, vector<32x128xf32>, vector<32x128xf32> -> vector<32x128xf32>
    %180 = arith.addf %175, %179 : vector<32x128xf32>
    %c35 = arith.constant 35 : index
    %c0_114 = arith.constant 0 : index
    %c0_115 = arith.constant 0 : index
    %181 = vector.load %arg1[%c35, %c0_114, %c0_115] : memref<53x32x32xf32, #tpu.memory_space<vmem>>, vector<1x32x32xf32>
    %182 = vector.shape_cast %181 : vector<1x32x32xf32> to vector<32x32xf32>
    %183 = vector.extract_strided_slice %145 {offsets = [0, 896], sizes = [32, 128], strides = [1, 1]} : vector<32x1792xf32> to vector<32x128xf32>
    %cst_116 = arith.constant dense<0.000000e+00> : vector<32x128xf32>
    %184 = tpu.matmul %182, %183, %cst_116 {dimension_numbers = #tpu.dot_dimension_numbers<[1], [0], [0], [1], [0, 0, 1, 1], [], []>} : vector<32x32xf32>, vector<32x128xf32>, vector<32x128xf32> -> vector<32x128xf32>
    %185 = arith.addf %180, %184 : vector<32x128xf32>
    %c36 = arith.constant 36 : index
    %c0_117 = arith.constant 0 : index
    %c0_118 = arith.constant 0 : index
    %186 = vector.load %arg1[%c36, %c0_117, %c0_118] : memref<53x32x32xf32, #tpu.memory_space<vmem>>, vector<1x32x32xf32>
    %187 = vector.shape_cast %186 : vector<1x32x32xf32> to vector<32x32xf32>
    %188 = vector.extract_strided_slice %145 {offsets = [0, 1024], sizes = [32, 128], strides = [1, 1]} : vector<32x1792xf32> to vector<32x128xf32>
    %cst_119 = arith.constant dense<0.000000e+00> : vector<32x128xf32>
    %189 = tpu.matmul %187, %188, %cst_119 {dimension_numbers = #tpu.dot_dimension_numbers<[1], [0], [0], [1], [0, 0, 1, 1], [], []>} : vector<32x32xf32>, vector<32x128xf32>, vector<32x128xf32> -> vector<32x128xf32>
    %190 = arith.addf %185, %189 : vector<32x128xf32>
    %c37 = arith.constant 37 : index
    %c0_120 = arith.constant 0 : index
    %c0_121 = arith.constant 0 : index
    %191 = vector.load %arg1[%c37, %c0_120, %c0_121] : memref<53x32x32xf32, #tpu.memory_space<vmem>>, vector<1x32x32xf32>
    %192 = vector.shape_cast %191 : vector<1x32x32xf32> to vector<32x32xf32>
    %193 = vector.extract_strided_slice %145 {offsets = [0, 1152], sizes = [32, 128], strides = [1, 1]} : vector<32x1792xf32> to vector<32x128xf32>
    %cst_122 = arith.constant dense<0.000000e+00> : vector<32x128xf32>
    %194 = tpu.matmul %192, %193, %cst_122 {dimension_numbers = #tpu.dot_dimension_numbers<[1], [0], [0], [1], [0, 0, 1, 1], [], []>} : vector<32x32xf32>, vector<32x128xf32>, vector<32x128xf32> -> vector<32x128xf32>
    %195 = arith.addf %190, %194 : vector<32x128xf32>
    %c38 = arith.constant 38 : index
    %c0_123 = arith.constant 0 : index
    %c0_124 = arith.constant 0 : index
    %196 = vector.load %arg1[%c38, %c0_123, %c0_124] : memref<53x32x32xf32, #tpu.memory_space<vmem>>, vector<1x32x32xf32>
    %197 = vector.shape_cast %196 : vector<1x32x32xf32> to vector<32x32xf32>
    %198 = vector.extract_strided_slice %145 {offsets = [0, 1280], sizes = [32, 128], strides = [1, 1]} : vector<32x1792xf32> to vector<32x128xf32>
    %cst_125 = arith.constant dense<0.000000e+00> : vector<32x128xf32>
    %199 = tpu.matmul %197, %198, %cst_125 {dimension_numbers = #tpu.dot_dimension_numbers<[1], [0], [0], [1], [0, 0, 1, 1], [], []>} : vector<32x32xf32>, vector<32x128xf32>, vector<32x128xf32> -> vector<32x128xf32>
    %200 = arith.addf %195, %199 : vector<32x128xf32>
    %c39 = arith.constant 39 : index
    %c0_126 = arith.constant 0 : index
    %c0_127 = arith.constant 0 : index
    %201 = vector.load %arg1[%c39, %c0_126, %c0_127] : memref<53x32x32xf32, #tpu.memory_space<vmem>>, vector<1x32x32xf32>
    %202 = vector.shape_cast %201 : vector<1x32x32xf32> to vector<32x32xf32>
    %203 = vector.extract_strided_slice %145 {offsets = [0, 1408], sizes = [32, 128], strides = [1, 1]} : vector<32x1792xf32> to vector<32x128xf32>
    %cst_128 = arith.constant dense<0.000000e+00> : vector<32x128xf32>
    %204 = tpu.matmul %202, %203, %cst_128 {dimension_numbers = #tpu.dot_dimension_numbers<[1], [0], [0], [1], [0, 0, 1, 1], [], []>} : vector<32x32xf32>, vector<32x128xf32>, vector<32x128xf32> -> vector<32x128xf32>
    %205 = arith.addf %200, %204 : vector<32x128xf32>
    %c40 = arith.constant 40 : index
    %c0_129 = arith.constant 0 : index
    %c0_130 = arith.constant 0 : index
    %206 = vector.load %arg1[%c40, %c0_129, %c0_130] : memref<53x32x32xf32, #tpu.memory_space<vmem>>, vector<1x32x32xf32>
    %207 = vector.shape_cast %206 : vector<1x32x32xf32> to vector<32x32xf32>
    %208 = vector.extract_strided_slice %145 {offsets = [0, 1536], sizes = [32, 128], strides = [1, 1]} : vector<32x1792xf32> to vector<32x128xf32>
    %cst_131 = arith.constant dense<0.000000e+00> : vector<32x128xf32>
    %209 = tpu.matmul %207, %208, %cst_131 {dimension_numbers = #tpu.dot_dimension_numbers<[1], [0], [0], [1], [0, 0, 1, 1], [], []>} : vector<32x32xf32>, vector<32x128xf32>, vector<32x128xf32> -> vector<32x128xf32>
    %210 = arith.addf %205, %209 : vector<32x128xf32>
    %c41 = arith.constant 41 : index
    %c0_132 = arith.constant 0 : index
    %c0_133 = arith.constant 0 : index
    %211 = vector.load %arg1[%c41, %c0_132, %c0_133] : memref<53x32x32xf32, #tpu.memory_space<vmem>>, vector<1x32x32xf32>
    %212 = vector.shape_cast %211 : vector<1x32x32xf32> to vector<32x32xf32>
    %213 = vector.extract_strided_slice %145 {offsets = [0, 1664], sizes = [32, 128], strides = [1, 1]} : vector<32x1792xf32> to vector<32x128xf32>
    %cst_134 = arith.constant dense<0.000000e+00> : vector<32x128xf32>
    %214 = tpu.matmul %212, %213, %cst_134 {dimension_numbers = #tpu.dot_dimension_numbers<[1], [0], [0], [1], [0, 0, 1, 1], [], []>} : vector<32x32xf32>, vector<32x128xf32>, vector<32x128xf32> -> vector<32x128xf32>
    %215 = arith.addf %210, %214 : vector<32x128xf32>
    %216 = vector.broadcast %146 : vector<32x1xf32> to vector<32x128xf32>
    %217 = arith.addf %215, %216 : vector<32x128xf32>
    %218 = arith.addf %108, %217 : vector<32x128xf32>
    %c0_135 = arith.constant 0 : index
    %c4_136 = arith.constant 4 : index
    %219 = vector.load %arg2[%c0_135, %c4_136] : memref<32x11xf32, #tpu.memory_space<vmem>>, vector<32x1xf32>
    %220 = vector.broadcast %219 : vector<32x1xf32> to vector<32x1792xf32>
    %221 = arith.mulf %145, %220 : vector<32x1792xf32>
    %c0_137 = arith.constant 0 : index
    %c5_138 = arith.constant 5 : index
    %222 = vector.load %arg2[%c0_137, %c5_138] : memref<32x11xf32, #tpu.memory_space<vmem>>, vector<32x1xf32>
    %223 = vector.broadcast %222 : vector<32x1xf32> to vector<32x1792xf32>
    %224 = arith.addf %221, %223 : vector<32x1792xf32>
    %cst_139 = arith.constant 0.000000e+00 : f32
    %225 = vector.broadcast %cst_139 : f32 to vector<32x1792xf32>
    %226 = arith.maximumf %224, %225 : vector<32x1792xf32>
    %227 = vector.extract_strided_slice %6 {offsets = [0, 768], sizes = [32, 1792], strides = [1, 1]} : vector<32x2560xf32> to vector<32x1792xf32>
    %228 = arith.addf %226, %227 : vector<32x1792xf32>
    %c0_140 = arith.constant 0 : index
    %c6_141 = arith.constant 6 : index
    %229 = vector.load %arg2[%c0_140, %c6_141] : memref<32x11xf32, #tpu.memory_space<vmem>>, vector<32x1xf32>
    %c42 = arith.constant 42 : index
    %c0_142 = arith.constant 0 : index
    %c0_143 = arith.constant 0 : index
    %230 = vector.load %arg1[%c42, %c0_142, %c0_143] : memref<53x32x32xf32, #tpu.memory_space<vmem>>, vector<1x32x32xf32>
    %231 = vector.shape_cast %230 : vector<1x32x32xf32> to vector<32x32xf32>
    %232 = vector.extract_strided_slice %228 {offsets = [0, 0], sizes = [32, 256], strides = [1, 1]} : vector<32x1792xf32> to vector<32x256xf32>
    %cst_144 = arith.constant dense<0.000000e+00> : vector<32x256xf32>
    %233 = tpu.matmul %231, %232, %cst_144 {dimension_numbers = #tpu.dot_dimension_numbers<[1], [0], [0], [1], [0, 0, 1, 1], [], []>} : vector<32x32xf32>, vector<32x256xf32>, vector<32x256xf32> -> vector<32x256xf32>
    %c43 = arith.constant 43 : index
    %c0_145 = arith.constant 0 : index
    %c0_146 = arith.constant 0 : index
    %234 = vector.load %arg1[%c43, %c0_145, %c0_146] : memref<53x32x32xf32, #tpu.memory_space<vmem>>, vector<1x32x32xf32>
    %235 = vector.shape_cast %234 : vector<1x32x32xf32> to vector<32x32xf32>
    %236 = vector.extract_strided_slice %228 {offsets = [0, 256], sizes = [32, 256], strides = [1, 1]} : vector<32x1792xf32> to vector<32x256xf32>
    %cst_147 = arith.constant dense<0.000000e+00> : vector<32x256xf32>
    %237 = tpu.matmul %235, %236, %cst_147 {dimension_numbers = #tpu.dot_dimension_numbers<[1], [0], [0], [1], [0, 0, 1, 1], [], []>} : vector<32x32xf32>, vector<32x256xf32>, vector<32x256xf32> -> vector<32x256xf32>
    %238 = arith.addf %233, %237 : vector<32x256xf32>
    %c44 = arith.constant 44 : index
    %c0_148 = arith.constant 0 : index
    %c0_149 = arith.constant 0 : index
    %239 = vector.load %arg1[%c44, %c0_148, %c0_149] : memref<53x32x32xf32, #tpu.memory_space<vmem>>, vector<1x32x32xf32>
    %240 = vector.shape_cast %239 : vector<1x32x32xf32> to vector<32x32xf32>
    %241 = vector.extract_strided_slice %228 {offsets = [0, 512], sizes = [32, 256], strides = [1, 1]} : vector<32x1792xf32> to vector<32x256xf32>
    %cst_150 = arith.constant dense<0.000000e+00> : vector<32x256xf32>
    %242 = tpu.matmul %240, %241, %cst_150 {dimension_numbers = #tpu.dot_dimension_numbers<[1], [0], [0], [1], [0, 0, 1, 1], [], []>} : vector<32x32xf32>, vector<32x256xf32>, vector<32x256xf32> -> vector<32x256xf32>
    %243 = arith.addf %238, %242 : vector<32x256xf32>
    %c45 = arith.constant 45 : index
    %c0_151 = arith.constant 0 : index
    %c0_152 = arith.constant 0 : index
    %244 = vector.load %arg1[%c45, %c0_151, %c0_152] : memref<53x32x32xf32, #tpu.memory_space<vmem>>, vector<1x32x32xf32>
    %245 = vector.shape_cast %244 : vector<1x32x32xf32> to vector<32x32xf32>
    %246 = vector.extract_strided_slice %228 {offsets = [0, 768], sizes = [32, 256], strides = [1, 1]} : vector<32x1792xf32> to vector<32x256xf32>
    %cst_153 = arith.constant dense<0.000000e+00> : vector<32x256xf32>
    %247 = tpu.matmul %245, %246, %cst_153 {dimension_numbers = #tpu.dot_dimension_numbers<[1], [0], [0], [1], [0, 0, 1, 1], [], []>} : vector<32x32xf32>, vector<32x256xf32>, vector<32x256xf32> -> vector<32x256xf32>
    %248 = arith.addf %243, %247 : vector<32x256xf32>
    %c46 = arith.constant 46 : index
    %c0_154 = arith.constant 0 : index
    %c0_155 = arith.constant 0 : index
    %249 = vector.load %arg1[%c46, %c0_154, %c0_155] : memref<53x32x32xf32, #tpu.memory_space<vmem>>, vector<1x32x32xf32>
    %250 = vector.shape_cast %249 : vector<1x32x32xf32> to vector<32x32xf32>
    %251 = vector.extract_strided_slice %228 {offsets = [0, 1024], sizes = [32, 256], strides = [1, 1]} : vector<32x1792xf32> to vector<32x256xf32>
    %cst_156 = arith.constant dense<0.000000e+00> : vector<32x256xf32>
    %252 = tpu.matmul %250, %251, %cst_156 {dimension_numbers = #tpu.dot_dimension_numbers<[1], [0], [0], [1], [0, 0, 1, 1], [], []>} : vector<32x32xf32>, vector<32x256xf32>, vector<32x256xf32> -> vector<32x256xf32>
    %253 = arith.addf %248, %252 : vector<32x256xf32>
    %c47 = arith.constant 47 : index
    %c0_157 = arith.constant 0 : index
    %c0_158 = arith.constant 0 : index
    %254 = vector.load %arg1[%c47, %c0_157, %c0_158] : memref<53x32x32xf32, #tpu.memory_space<vmem>>, vector<1x32x32xf32>
    %255 = vector.shape_cast %254 : vector<1x32x32xf32> to vector<32x32xf32>
    %256 = vector.extract_strided_slice %228 {offsets = [0, 1280], sizes = [32, 256], strides = [1, 1]} : vector<32x1792xf32> to vector<32x256xf32>
    %cst_159 = arith.constant dense<0.000000e+00> : vector<32x256xf32>
    %257 = tpu.matmul %255, %256, %cst_159 {dimension_numbers = #tpu.dot_dimension_numbers<[1], [0], [0], [1], [0, 0, 1, 1], [], []>} : vector<32x32xf32>, vector<32x256xf32>, vector<32x256xf32> -> vector<32x256xf32>
    %258 = arith.addf %253, %257 : vector<32x256xf32>
    %c48 = arith.constant 48 : index
    %c0_160 = arith.constant 0 : index
    %c0_161 = arith.constant 0 : index
    %259 = vector.load %arg1[%c48, %c0_160, %c0_161] : memref<53x32x32xf32, #tpu.memory_space<vmem>>, vector<1x32x32xf32>
    %260 = vector.shape_cast %259 : vector<1x32x32xf32> to vector<32x32xf32>
    %261 = vector.extract_strided_slice %228 {offsets = [0, 1536], sizes = [32, 256], strides = [1, 1]} : vector<32x1792xf32> to vector<32x256xf32>
    %cst_162 = arith.constant dense<0.000000e+00> : vector<32x256xf32>
    %262 = tpu.matmul %260, %261, %cst_162 {dimension_numbers = #tpu.dot_dimension_numbers<[1], [0], [0], [1], [0, 0, 1, 1], [], []>} : vector<32x32xf32>, vector<32x256xf32>, vector<32x256xf32> -> vector<32x256xf32>
    %263 = arith.addf %258, %262 : vector<32x256xf32>
    %264 = vector.broadcast %229 : vector<32x1xf32> to vector<32x256xf32>
    %265 = arith.addf %263, %264 : vector<32x256xf32>
    %c0_163 = arith.constant 0 : index
    %c7_164 = arith.constant 7 : index
    %266 = vector.load %arg2[%c0_163, %c7_164] : memref<32x11xf32, #tpu.memory_space<vmem>>, vector<32x1xf32>
    %c49 = arith.constant 49 : index
    %c0_165 = arith.constant 0 : index
    %c0_166 = arith.constant 0 : index
    %267 = vector.load %arg1[%c49, %c0_165, %c0_166] : memref<53x32x32xf32, #tpu.memory_space<vmem>>, vector<1x32x32xf32>
    %268 = vector.shape_cast %267 : vector<1x32x32xf32> to vector<32x32xf32>
    %269 = vector.extract_strided_slice %265 {offsets = [0, 0], sizes = [32, 128], strides = [1, 1]} : vector<32x256xf32> to vector<32x128xf32>
    %cst_167 = arith.constant dense<0.000000e+00> : vector<32x128xf32>
    %270 = tpu.matmul %268, %269, %cst_167 {dimension_numbers = #tpu.dot_dimension_numbers<[1], [0], [0], [1], [0, 0, 1, 1], [], []>} : vector<32x32xf32>, vector<32x128xf32>, vector<32x128xf32> -> vector<32x128xf32>
    %c50 = arith.constant 50 : index
    %c0_168 = arith.constant 0 : index
    %c0_169 = arith.constant 0 : index
    %271 = vector.load %arg1[%c50, %c0_168, %c0_169] : memref<53x32x32xf32, #tpu.memory_space<vmem>>, vector<1x32x32xf32>
    %272 = vector.shape_cast %271 : vector<1x32x32xf32> to vector<32x32xf32>
    %273 = vector.extract_strided_slice %265 {offsets = [0, 128], sizes = [32, 128], strides = [1, 1]} : vector<32x256xf32> to vector<32x128xf32>
    %cst_170 = arith.constant dense<0.000000e+00> : vector<32x128xf32>
    %274 = tpu.matmul %272, %273, %cst_170 {dimension_numbers = #tpu.dot_dimension_numbers<[1], [0], [0], [1], [0, 0, 1, 1], [], []>} : vector<32x32xf32>, vector<32x128xf32>, vector<32x128xf32> -> vector<32x128xf32>
    %275 = arith.addf %270, %274 : vector<32x128xf32>
    %276 = vector.broadcast %266 : vector<32x1xf32> to vector<32x128xf32>
    %277 = arith.addf %275, %276 : vector<32x128xf32>
    %278 = arith.addf %218, %277 : vector<32x128xf32>
    %c0_171 = arith.constant 0 : index
    %c8_172 = arith.constant 8 : index
    %279 = vector.load %arg2[%c0_171, %c8_172] : memref<32x11xf32, #tpu.memory_space<vmem>>, vector<32x1xf32>
    %280 = vector.broadcast %279 : vector<32x1xf32> to vector<32x256xf32>
    %281 = arith.mulf %265, %280 : vector<32x256xf32>
    %c0_173 = arith.constant 0 : index
    %c9_174 = arith.constant 9 : index
    %282 = vector.load %arg2[%c0_173, %c9_174] : memref<32x11xf32, #tpu.memory_space<vmem>>, vector<32x1xf32>
    %283 = vector.broadcast %282 : vector<32x1xf32> to vector<32x256xf32>
    %284 = arith.addf %281, %283 : vector<32x256xf32>
    %cst_175 = arith.constant 0.000000e+00 : f32
    %285 = vector.broadcast %cst_175 : f32 to vector<32x256xf32>
    %286 = arith.maximumf %284, %285 : vector<32x256xf32>
    %287 = vector.extract_strided_slice %228 {offsets = [0, 1536], sizes = [32, 256], strides = [1, 1]} : vector<32x1792xf32> to vector<32x256xf32>
    %288 = arith.addf %286, %287 : vector<32x256xf32>
    %c0_176 = arith.constant 0 : index
    %c10_177 = arith.constant 10 : index
    %289 = vector.load %arg2[%c0_176, %c10_177] : memref<32x11xf32, #tpu.memory_space<vmem>>, vector<32x1xf32>
    %c51 = arith.constant 51 : index
    %c0_178 = arith.constant 0 : index
    %c0_179 = arith.constant 0 : index
    %290 = vector.load %arg1[%c51, %c0_178, %c0_179] : memref<53x32x32xf32, #tpu.memory_space<vmem>>, vector<1x32x32xf32>
    %291 = vector.shape_cast %290 : vector<1x32x32xf32> to vector<32x32xf32>
    %292 = vector.extract_strided_slice %288 {offsets = [0, 0], sizes = [32, 128], strides = [1, 1]} : vector<32x256xf32> to vector<32x128xf32>
    %cst_180 = arith.constant dense<0.000000e+00> : vector<32x128xf32>
    %293 = tpu.matmul %291, %292, %cst_180 {dimension_numbers = #tpu.dot_dimension_numbers<[1], [0], [0], [1], [0, 0, 1, 1], [], []>} : vector<32x32xf32>, vector<32x128xf32>, vector<32x128xf32> -> vector<32x128xf32>
    %c52 = arith.constant 52 : index
    %c0_181 = arith.constant 0 : index
    %c0_182 = arith.constant 0 : index
    %294 = vector.load %arg1[%c52, %c0_181, %c0_182] : memref<53x32x32xf32, #tpu.memory_space<vmem>>, vector<1x32x32xf32>
    %295 = vector.shape_cast %294 : vector<1x32x32xf32> to vector<32x32xf32>
    %296 = vector.extract_strided_slice %288 {offsets = [0, 128], sizes = [32, 128], strides = [1, 1]} : vector<32x256xf32> to vector<32x128xf32>
    %cst_183 = arith.constant dense<0.000000e+00> : vector<32x128xf32>
    %297 = tpu.matmul %295, %296, %cst_183 {dimension_numbers = #tpu.dot_dimension_numbers<[1], [0], [0], [1], [0, 0, 1, 1], [], []>} : vector<32x32xf32>, vector<32x128xf32>, vector<32x128xf32> -> vector<32x128xf32>
    %298 = arith.addf %293, %297 : vector<32x128xf32>
    %299 = vector.broadcast %289 : vector<32x1xf32> to vector<32x128xf32>
    %300 = arith.addf %298, %299 : vector<32x128xf32>
    %301 = arith.addf %300, %278 : vector<32x128xf32>
    %c0_184 = arith.constant 0 : index
    %c0_185 = arith.constant 0 : index
    %302 = vector.load %arg3[%c0_184, %c0_185] : memref<32x128xf32, #tpu.memory_space<vmem>>, vector<32x128xf32>
    tpu.vector_store %arg3[%c0_184, %c0_185], %301 {strides = array<i32>} : memref<32x128xf32, #tpu.memory_space<vmem>>, vector<32x128xf32>,
    return
  }
}

</mosaic_0001>

<bundles_post_ra>
// kernel: forward.1
= control target key start
LH: loop header
LB: loop body
LE: loop exit
PB: predicated region body
PF: predicated region fallthrough
CT: control target
= control target key end

     0   :  { %v17682_v3 = vmov 0.0   ;;  %vm122_vm0 = vcmask 261120   ;;  %s17678_s0 = inlined_call_operand.vmem [shape: f32[32,2560], index: 0, kind: input, shape index: {}]   ;;  %s17679_s1 = inlined_call_operand.vmem [shape: f32[53,32,32], index: 1, kind: input, shape index: {}]   ;;  %s17680_s2 = inlined_call_operand.vmem [shape: f32[32,11], index: 2, kind: input, shape index: {}]   ;;  %s17681_s3 = inlined_call_operand.vmem [shape: f32[32,128], index: 3, kind: output, shape index: {}]  }
   0x1   :  { %v75_v0 = vld [vmem:[%s17678_s0 + $0x1e8] sm:$0xff]  ;;  %v77_v1 = vld [vmem:[%s17678_s0 + $0x1f8] sm:$0xff]  ;;  %v74_v2 = vld [vmem:[%s17678_s0 + $0x1e0] sm:$0xff]  ;;  %199 = vmatprep.mubr.f32.mxu0 %v17682_v3  ;;  %288 = vmatprep.mubr.f32.mxu1 %v17682_v3 }
   0x2   :  { %159 = vmatprep.subr.mxu0 %v75_v0  ;;  %248 = vmatprep.subr.mxu1 %v77_v1  ;;  %v76_v4 = vld [vmem:[%s17678_s0 + $0x1f0] sm:$0xff]  ;;  %v55_v5 = vld [vmem:[%s17678_s0 + $0x148] sm:$0xff]  ;;  %v57_v6 = vld [vmem:[%s17678_s0 + $0x158] sm:$0xff] }
   0x3   :  { %160 = vmatpush1.msra.mxu0 %v74_v2  ;;  %249 = vmatpush1.msra.mxu1 %v76_v4  ;;  %v54_v7 = vld [vmem:[%s17678_s0 + $0x140] sm:$0xff]  ;;  %v56_v8 = vld [vmem:[%s17678_s0 + $0x150] sm:$0xff]  ;;  %v35_v9 = vld [vmem:[%s17678_s0 + $0xa8] sm:$0xff] }
   0x4   :  { %161 = vmatprep.subr.mxu0 %v55_v5  ;;  %250 = vmatprep.subr.mxu1 %v57_v6  ;;  %v37_v10 = vld [vmem:[%s17678_s0 + $0xb8] sm:$0xff]  ;;  %v34_v11 = vld [vmem:[%s17678_s0 + $0xa0] sm:$0xff]  ;;  %v36_v12 = vld [vmem:[%s17678_s0 + $0xb0] sm:$0xff] }
   0x5   :  { %162 = vmatpush1.msra.mxu0 %v54_v7  ;;  %251 = vmatpush1.msra.mxu1 %v56_v8  ;;  %v15_v13 = vld [vmem:[%s17678_s0 + $0x8] sm:$0xff]  ;;  %v17_v14 = vld [vmem:[%s17678_s0 + $0x18] sm:$0xff]  ;;  %v14_v15 = vld [vmem:[%s17678_s0] sm:$0xff] }
   0x6   :  { %163 = vmatprep.subr.mxu0 %v35_v9  ;;  %252 = vmatprep.subr.mxu1 %v37_v10  ;;  %v16_v16 = vld [vmem:[%s17678_s0 + $0x10] sm:$0xff]  ;;  %v12668_v17 = vld [vmem:[%s17679_s1] sm:$0xff]  ;;  %v79_v18 = vld [vmem:[%s17678_s0 + $0x208] sm:$0xff] }
   0x7   :  { %164 = vmatpush1.msra.mxu0 %v34_v11  ;;  %253 = vmatpush1.msra.mxu1 %v36_v12  ;;  %v81_v19 = vld [vmem:[%s17678_s0 + $0x218] sm:$0xff]  ;;  %v78_v20 = vld [vmem:[%s17678_s0 + $0x200] sm:$0xff]  ;;  %v80_v21 = vld [vmem:[%s17678_s0 + $0x210] sm:$0xff] }
   0x8   :  { %165 = vmatprep.subr.mxu0 %v15_v13  ;;  %254 = vmatprep.subr.mxu1 %v17_v14  ;;  %v12691_v22 = vld [vmem:[%s17679_s1 + $0x8] sm:$0xff]  ;;  %v61_v24 = vld [vmem:[%s17678_s0 + $0x178] sm:$0xff]  ;;  %v58_v25 = vld [vmem:[%s17678_s0 + $0x160] sm:$0xff] }
   0x9   :  { %166 = vmatpush1.msra.mxu0 %v14_v15  ;;  %255 = vmatpush1.msra.mxu1 %v16_v16  ;;  %v59_v23 = vld [vmem:[%s17678_s0 + $0x168] sm:$0xff]  ;;  %v60_v26 = vld [vmem:[%s17678_s0 + $0x170] sm:$0xff]  ;;  %v41_v29 = vld [vmem:[%s17678_s0 + $0xd8] sm:$0xff] }
   0xa   :  { %11079 = vmatmul.mubr.msk.f32.vlgmr.msra.gmra.mxu0 %vm122_vm0, %v12668_v17  ;;  %11083 = vmatmul.mubr.msk.f32.vlgmr.msra.gmra.mxu1 %vm122_vm0, %v12668_v17  ;;  %v12714_v27 = vld [vmem:[%s17679_s1 + $0x10] sm:$0xff]  ;;  %v39_v28 = vld [vmem:[%s17678_s0 + $0xc8] sm:$0xff]  ;;  %v38_v30 = vld [vmem:[%s17678_s0 + $0xc0] sm:$0xff] }
   0xb   :  { %205 = vmatprep.mubr.f32.mxu0 %v17682_v3  ;;  %294 = vmatprep.mubr.f32.mxu1 %v17682_v3  ;;  %v40_v31 = vld [vmem:[%s17678_s0 + $0xd0] sm:$0xff]  ;;  %v12737_v32 = vld [vmem:[%s17679_s1 + $0x18] sm:$0xff]  ;;  %v19_v33 = vld [vmem:[%s17678_s0 + $0x28] sm:$0xff] }
   0xc   :  { %337 = vmatprep.subr.mxu0 %v79_v18  ;;  %426 = vmatprep.subr.mxu1 %v81_v19  ;;  %v21_v34 = vld [vmem:[%s17678_s0 + $0x38] sm:$0xff]  ;;  %v18_v35 = vld [vmem:[%s17678_s0 + $0x20] sm:$0xff]  ;;  %v20_v36 = vld [vmem:[%s17678_s0 + $0x30] sm:$0xff] }
   0xd   :  { %338 = vmatpush1.msra.mxu0 %v78_v20  ;;  %427 = vmatpush1.msra.mxu1 %v80_v21  ;;  %v83_v37 = vld [vmem:[%s17678_s0 + $0x228] sm:$0xff]  ;;  %v85_v38 = vld [vmem:[%s17678_s0 + $0x238] sm:$0xff]  ;;  %v82_v39 = vld [vmem:[%s17678_s0 + $0x220] sm:$0xff] }
   0xe   :  { %11080 = vmatmul.mubr.msk.f32.gmra.mxu0 %vm122_vm0, %v12691_v22  ;;  %11084 = vmatmul.mubr.msk.f32.gmra.mxu1 %vm122_vm0, %v12691_v22  ;;  %v84_v40 = vld [vmem:[%s17678_s0 + $0x230] sm:$0xff]  ;;  %v63_v41 = vld [vmem:[%s17678_s0 + $0x188] sm:$0xff]  ;;  %v65_v42 = vld [vmem:[%s17678_s0 + $0x198] sm:$0xff] }
   0xf   :  { %211 = vmatprep.mubr.f32.mxu0 %v17682_v3  ;;  %300 = vmatprep.mubr.f32.mxu1 %v17682_v3  ;;  %v62_v43 = vld [vmem:[%s17678_s0 + $0x180] sm:$0xff]  ;;  %v64_v44 = vld [vmem:[%s17678_s0 + $0x190] sm:$0xff]  ;;  %v43_v45 = vld [vmem:[%s17678_s0 + $0xe8] sm:$0xff] }
  0x10   :  { %339 = vmatprep.subr.mxu0 %v59_v23  ;;  %428 = vmatprep.subr.mxu1 %v61_v24  ;;  %v45_v46 = vld [vmem:[%s17678_s0 + $0xf8] sm:$0xff]  ;;  %v42_v47 = vld [vmem:[%s17678_s0 + $0xe0] sm:$0xff]  ;;  %v44_v48 = vld [vmem:[%s17678_s0 + $0xf0] sm:$0xff] }
  0x11   :  { %340 = vmatpush1.msra.mxu0 %v58_v25  ;;  %429 = vmatpush1.msra.mxu1 %v60_v26  ;;  %v23_v49 = vld [vmem:[%s17678_s0 + $0x48] sm:$0xff]  ;;  %v25_v50 = vld [vmem:[%s17678_s0 + $0x58] sm:$0xff]  ;;  %v22_v51 = vld [vmem:[%s17678_s0 + $0x40] sm:$0xff]  ;;  %v12584_v25 = vmov 0  }
  0x12   :  { %11081 = vmatmul.mubr.msk.f32.gmra.mxu0 %vm122_vm0, %v12714_v27  ;;  %11085 = vmatmul.mubr.msk.f32.gmra.mxu1 %vm122_vm0, %v12714_v27  ;;  %v24_v52 = vld [vmem:[%s17678_s0 + $0x50] sm:$0xff]  ;;  %v87_v53 = vld [vmem:[%s17678_s0 + $0x248] sm:$0xff]  ;;  %v89_v54 = vld [vmem:[%s17678_s0 + $0x258] sm:$0xff] }
  0x13   :  { %217 = vmatprep.mubr.f32.mxu0 %v17682_v3  ;;  %306 = vmatprep.mubr.f32.mxu1 %v17682_v3  ;;  %v86_v55 = vld [vmem:[%s17678_s0 + $0x240] sm:$0xff]  ;;  %v88_v56 = vld [vmem:[%s17678_s0 + $0x250] sm:$0xff]  ;;  %v67_v57 = vld [vmem:[%s17678_s0 + $0x1a8] sm:$0xff] }
  0x14   :  { %341 = vmatprep.subr.mxu0 %v39_v28  ;;  %430 = vmatprep.subr.mxu1 %v41_v29  ;;  %v69_v58 = vld [vmem:[%s17678_s0 + $0x1b8] sm:$0xff]  ;;  %v66_v59 = vld [vmem:[%s17678_s0 + $0x1a0] sm:$0xff]  ;;  %v68_v60 = vld [vmem:[%s17678_s0 + $0x1b0] sm:$0xff] }
  0x15   :  { %342 = vmatpush1.msra.mxu0 %v38_v30  ;;  %431 = vmatpush1.msra.mxu1 %v40_v31  ;;  %v47_v61 = vld [vmem:[%s17678_s0 + $0x108] sm:$0xff]  ;;  %v49_v62 = vld [vmem:[%s17678_s0 + $0x118] sm:$0xff]  ;;  %v46_v63 = vld [vmem:[%s17678_s0 + $0x100] sm:$0xff] }
  0x16   :  { %11082 = vmatmul.mubr.msk.f32.gmra.mxu0 %vm122_vm0, %v12737_v32  ;;  %11086 = vmatmul.mubr.msk.f32.gmra.mxu1 %vm122_vm0, %v12737_v32  ;;  %v48_v0 = vld [vmem:[%s17678_s0 + $0x110] sm:$0xff]  ;;  %v27_v1 = vld [vmem:[%s17678_s0 + $0x68] sm:$0xff]  ;;  %v29_v2 = vld [vmem:[%s17678_s0 + $0x78] sm:$0xff] }
  0x17   :  { %343 = vmatprep.subr.mxu0 %v19_v33  ;;  %432 = vmatprep.subr.mxu1 %v21_v34  ;;  %v26_v4 = vld [vmem:[%s17678_s0 + $0x60] sm:$0xff]  ;;  %v28_v5 = vld [vmem:[%s17678_s0 + $0x70] sm:$0xff]  ;;  %v91_v6 = vld [vmem:[%s17678_s0 + $0x268] sm:$0xff] }
  0x18   :  { %344 = vmatpush1.msra.mxu0 %v18_v35  ;;  %377 = vmatprep.mubr.f32.mxu0 %v17682_v3  ;;  %v93_v7 = vld [vmem:[%s17678_s0 + $0x278] sm:$0xff]  ;;  %v90_v8 = vld [vmem:[%s17678_s0 + $0x260] sm:$0xff]  ;;  %v92_v9 = vld [vmem:[%s17678_s0 + $0x270] sm:$0xff] }
  0x19   :  { %433 = vmatpush1.msra.mxu1 %v20_v36  ;;  %466 = vmatprep.mubr.f32.mxu1 %v17682_v3  ;;  %v71_v10 = vld [vmem:[%s17678_s0 + $0x1c8] sm:$0xff]  ;;  %v73_v11 = vld [vmem:[%s17678_s0 + $0x1d8] sm:$0xff]  ;;  %v70_v12 = vld [vmem:[%s17678_s0 + $0x1c0] sm:$0xff] }
  0x1a   :  { %11087 = vmatmul.mubr.msk.f32.vlgmr.msra.gmra.mxu0 %vm122_vm0, %v12668_v17  ;;  %11091 = vmatmul.mubr.msk.f32.vlgmr.msra.gmra.mxu1 %vm122_vm0, %v12668_v17  ;;  %v72_v13 = vld [vmem:[%s17678_s0 + $0x1d0] sm:$0xff]  ;;  %v51_v14 = vld [vmem:[%s17678_s0 + $0x128] sm:$0xff]  ;;  %v53_v15 = vld [vmem:[%s17678_s0 + $0x138] sm:$0xff] }
  0x1b   :  { %383 = vmatprep.mubr.f32.mxu0 %v17682_v3  ;;  %472 = vmatprep.mubr.f32.mxu1 %v17682_v3  ;;  %v50_v16 = vld [vmem:[%s17678_s0 + $0x120] sm:$0xff]  ;;  %v52_v18 = vld [vmem:[%s17678_s0 + $0x130] sm:$0xff]  ;;  %v31_v19 = vld [vmem:[%s17678_s0 + $0x88] sm:$0xff] }
  0x1c   :  { %515 = vmatprep.subr.mxu0 %v83_v37  ;;  %604 = vmatprep.subr.mxu1 %v85_v38  ;;  %v33_v20 = vld [vmem:[%s17678_s0 + $0x98] sm:$0xff]  ;;  %v30_v21 = vld [vmem:[%s17678_s0 + $0x80] sm:$0xff]  ;;  %v32_v23 = vld [vmem:[%s17678_s0 + $0x90] sm:$0xff] }
  0x1d   :  { %516 = vmatpush1.msra.mxu0 %v82_v39  ;;  %605 = vmatpush1.msra.mxu1 %v84_v40  ;;  %v95_v24 = vld [vmem:[%s17680_s2 + $0x8] sm:$0xff]  ;;  %v97_v26 = vld [vmem:[%s17680_s2 + $0x18] sm:$0xff]  ;;  %v94_v28 = vld [vmem:[%s17680_s2] sm:$0xff] }
  0x1e   :  { %11088 = vmatmul.mubr.msk.f32.gmra.mxu0 %vm122_vm0, %v12691_v22  ;;  %11092 = vmatmul.mubr.msk.f32.gmra.mxu1 %vm122_vm0, %v12691_v22 }
  0x1f   :  { %389 = vmatprep.mubr.f32.mxu0 %v17682_v3  ;;  %478 = vmatprep.mubr.f32.mxu1 %v17682_v3 }
  0x20   :  { %517 = vmatprep.subr.mxu0 %v63_v41  ;;  %606 = vmatprep.subr.mxu1 %v65_v42  ;;  %v12585_v42 = vmov 2  }
  0x21   :  { %518 = vmatpush1.msra.mxu0 %v62_v43  ;;  %607 = vmatpush1.msra.mxu1 %v64_v44 }
  0x22   :  { %11089 = vmatmul.mubr.msk.f32.gmra.mxu0 %vm122_vm0, %v12714_v27  ;;  %11093 = vmatmul.mubr.msk.f32.gmra.mxu1 %vm122_vm0, %v12714_v27 }
  0x23   :  { %395 = vmatprep.mubr.f32.mxu0 %v17682_v3  ;;  %484 = vmatprep.mubr.f32.mxu1 %v17682_v3 }
  0x24   :  { %519 = vmatprep.subr.mxu0 %v43_v45  ;;  %608 = vmatprep.subr.mxu1 %v45_v46 }
  0x25   :  { %520 = vmatpush1.msra.mxu0 %v42_v47  ;;  %609 = vmatpush1.msra.mxu1 %v44_v48 }
  0x26   :  { %11090 = vmatmul.mubr.msk.f32.gmra.mxu0 %vm122_vm0, %v12737_v32  ;;  %11094 = vmatmul.mubr.msk.f32.gmra.mxu1 %vm122_vm0, %v12737_v32 }
  0x27   :  { %521 = vmatprep.subr.mxu0 %v23_v49  ;;  %610 = vmatprep.subr.mxu1 %v25_v50 }
  0x28   :  { %522 = vmatpush1.msra.mxu0 %v22_v51  ;;  %555 = vmatprep.mubr.f32.mxu0 %v17682_v3 }
  0x29   :  { %611 = vmatpush1.msra.mxu1 %v24_v52  ;;  %644 = vmatprep.mubr.f32.mxu1 %v17682_v3 }
  0x2a   :  { %11095 = vmatmul.mubr.msk.f32.vlgmr.msra.gmra.mxu0 %vm122_vm0, %v12668_v17  ;;  %11099 = vmatmul.mubr.msk.f32.vlgmr.msra.gmra.mxu1 %vm122_vm0, %v12668_v17 }
  0x2b   :  { %561 = vmatprep.mubr.f32.mxu0 %v17682_v3  ;;  %650 = vmatprep.mubr.f32.mxu1 %v17682_v3 }
  0x2c   :  { %693 = vmatprep.subr.mxu0 %v87_v53  ;;  %782 = vmatprep.subr.mxu1 %v89_v54 }
  0x2d   :  { %694 = vmatpush1.msra.mxu0 %v86_v55  ;;  %783 = vmatpush1.msra.mxu1 %v88_v56 }
  0x2e   :  { %11096 = vmatmul.mubr.msk.f32.gmra.mxu0 %vm122_vm0, %v12691_v22  ;;  %11100 = vmatmul.mubr.msk.f32.gmra.mxu1 %vm122_vm0, %v12691_v22 }
  0x2f   :  { %567 = vmatprep.mubr.f32.mxu0 %v17682_v3  ;;  %656 = vmatprep.mubr.f32.mxu1 %v17682_v3 }
  0x30   :  { %695 = vmatprep.subr.mxu0 %v67_v57  ;;  %784 = vmatprep.subr.mxu1 %v69_v58 }
  0x31   :  { %696 = vmatpush1.msra.mxu0 %v66_v59  ;;  %785 = vmatpush1.msra.mxu1 %v68_v60 }
  0x32   :  { %11097 = vmatmul.mubr.msk.f32.gmra.mxu0 %vm122_vm0, %v12714_v27  ;;  %11101 = vmatmul.mubr.msk.f32.gmra.mxu1 %vm122_vm0, %v12714_v27 }
  0x33   :  { %573 = vmatprep.mubr.f32.mxu0 %v17682_v3  ;;  %662 = vmatprep.mubr.f32.mxu1 %v17682_v3 }
  0x34   :  { %697 = vmatprep.subr.mxu0 %v47_v61  ;;  %786 = vmatprep.subr.mxu1 %v49_v62 }
  0x35   :  { %698 = vmatpush1.msra.mxu0 %v46_v63  ;;  %787 = vmatpush1.msra.mxu1 %v48_v0 }
  0x36   :  { %11098 = vmatmul.mubr.msk.f32.gmra.mxu0 %vm122_vm0, %v12737_v32  ;;  %11102 = vmatmul.mubr.msk.f32.gmra.mxu1 %vm122_vm0, %v12737_v32 }
  0x37   :  { %699 = vmatprep.subr.mxu0 %v27_v1  ;;  %788 = vmatprep.subr.mxu1 %v29_v2  ;;  %v11120_v1 = vld [vmem:[%s17679_s1 + $0x28] sm:$0xff] }
  0x38   :  { %700 = vmatpush1.msra.mxu0 %v26_v4  ;;  %733 = vmatprep.mubr.f32.mxu0 %v17682_v3  ;;  %v11124_v4 = vld [vmem:[%s17679_s1 + $0x48] sm:$0xff] }
  0x39   :  { %789 = vmatpush1.msra.mxu1 %v28_v5  ;;  %822 = vmatprep.mubr.f32.mxu1 %v17682_v3 }
  0x3a   :  { %11103 = vmatmul.mubr.msk.f32.vlgmr.msra.gmra.mxu0 %vm122_vm0, %v12668_v17  ;;  %11107 = vmatmul.mubr.msk.f32.vlgmr.msra.gmra.mxu1 %vm122_vm0, %v12668_v17 }
  0x3b   :  { %739 = vmatprep.mubr.f32.mxu0 %v17682_v3  ;;  %828 = vmatprep.mubr.f32.mxu1 %v17682_v3 }
  0x3c   :  { %871 = vmatprep.subr.mxu0 %v91_v6  ;;  %960 = vmatprep.subr.mxu1 %v93_v7 }
  0x3d   :  { %872 = vmatpush1.msra.mxu0 %v90_v8  ;;  %961 = vmatpush1.msra.mxu1 %v92_v9 }
  0x3e   :  { %11104 = vmatmul.mubr.msk.f32.gmra.mxu0 %vm122_vm0, %v12691_v22  ;;  %11108 = vmatmul.mubr.msk.f32.gmra.mxu1 %vm122_vm0, %v12691_v22 }
  0x3f   :  { %745 = vmatprep.mubr.f32.mxu0 %v17682_v3  ;;  %834 = vmatprep.mubr.f32.mxu1 %v17682_v3 }
  0x40   :  { %873 = vmatprep.subr.mxu0 %v71_v10  ;;  %962 = vmatprep.subr.mxu1 %v73_v11 }
  0x41   :  { %874 = vmatpush1.msra.mxu0 %v70_v12  ;;  %963 = vmatpush1.msra.mxu1 %v72_v13  ;;  %v11125_v13 = vld [vmem:[%s17679_s1 + $0x50] sm:$0xff] }
  0x42   :  { %11105 = vmatmul.mubr.msk.f32.gmra.mxu0 %vm122_vm0, %v12714_v27  ;;  %11109 = vmatmul.mubr.msk.f32.gmra.mxu1 %vm122_vm0, %v12714_v27 }
  0x43   :  { %751 = vmatprep.mubr.f32.mxu0 %v17682_v3  ;;  %840 = vmatprep.mubr.f32.mxu1 %v17682_v3 }
  0x44   :  { %875 = vmatprep.subr.mxu0 %v51_v14  ;;  %964 = vmatprep.subr.mxu1 %v53_v15  ;;  %v11121_v14 = vld [vmem:[%s17679_s1 + $0x30] sm:$0xff] }
  0x45   :  { %876 = vmatpush1.msra.mxu0 %v50_v16  ;;  %965 = vmatpush1.msra.mxu1 %v52_v18  ;;  %v11126_v18 = vld [vmem:[%s17679_s1 + $0x58] sm:$0xff] }
  0x46   :  { %11106 = vmatmul.mubr.msk.f32.gmra.mxu0 %vm122_vm0, %v12737_v32  ;;  %11110 = vmatmul.mubr.msk.f32.gmra.mxu1 %vm122_vm0, %v12737_v32 }
  0x47   :  { %877 = vmatprep.subr.mxu0 %v31_v19  ;;  %966 = vmatprep.subr.mxu1 %v33_v20  ;;  %v11122_v19 = vld [vmem:[%s17679_s1 + $0x38] sm:$0xff] }
  0x48   :  { %878 = vmatpush1.msra.mxu0 %v30_v21  ;;  %911 = vmatprep.mubr.f32.mxu0 %v17682_v3 }
  0x49   :  { %967 = vmatpush1.msra.mxu1 %v32_v23  ;;  %1000 = vmatprep.mubr.f32.mxu1 %v17682_v3 }
  0x4a   :  { %12552 = vset.pattern.permute.xlu1 %v12584_v25  ;;  %11111 = vmatmul.mubr.msk.f32.vlgmr.msra.gmra.mxu0 %vm122_vm0, %v12668_v17 }
  0x4b   :  { %11115 = vmatmul.mubr.msk.f32.vlgmr.msra.gmra.mxu1 %vm122_vm0, %v12668_v17  ;;  %109 = vperm.xlu1 %12552, %v95_v24   ;;  %v96_v17 = vld [vmem:[%s17680_s2 + $0x10] sm:$0xff] }
  0x4c   :  { %917 = vmatprep.mubr.f32.mxu0 %v17682_v3  ;;  %1006 = vmatprep.mubr.f32.mxu1 %v17682_v3 }
  0x4d   :  { %12551 = vset.pattern.permute.xlu0 %v12584_v25 }
  0x4e   :  { %11112 = vmatmul.mubr.msk.f32.gmra.mxu0 %vm122_vm0, %v12691_v22  ;;  %119 = vperm.xlu0 %12551, %v97_v26  }
  0x4f   :  { %11116 = vmatmul.mubr.msk.f32.gmra.mxu1 %vm122_vm0, %v12691_v22  ;;  %104 = vperm.xlu1 %12552, %v94_v28   ;;  %v11119_v22 = vld [vmem:[%s17679_s1 + $0x20] sm:$0xff] }
  0x50   :  { %923 = vmatprep.mubr.f32.mxu0 %v17682_v3  ;;  %1012 = vmatprep.mubr.f32.mxu1 %v17682_v3 }
  0x52   :  { %11113 = vmatmul.mubr.msk.f32.gmra.mxu0 %vm122_vm0, %v12714_v27  ;;  %114 = vperm.xlu0 %12551, %v96_v17  }
  0x53   :  { %11117 = vmatmul.mubr.msk.f32.gmra.mxu1 %vm122_vm0, %v12714_v27  ;;  %929 = vmatprep.mubr.f32.mxu0 %v17682_v3  ;;  %v11123_v27 = vld [vmem:[%s17679_s1 + $0x40] sm:$0xff] }
  0x54   :  { %1018 = vmatprep.mubr.f32.mxu1 %v17682_v3  ;;  %12554 = vset.pattern.permute.xlu1 %v12585_v42 }
  0x55   :  { %7926 = vperm.xlu1 %12554, %v96_v17  }
  0x56   :  { %11114 = vmatmul.mubr.msk.f32.gmra.mxu0 %vm122_vm0, %v12737_v32  ;;  %12553 = vset.pattern.permute.xlu0 %v12585_v42  ;;  %v11145_v42 = vld [vmem:[%s17679_s1 + $0x90] sm:$0xff] }
  0x57   :  { %11118 = vmatmul.mubr.msk.f32.gmra.mxu1 %vm122_vm0, %v12737_v32  ;;  %12015 = vmatprep.mubr.msk.f32.mxu0 %vm122_vm0, %v11123_v27 }
  0x58   :  { %12029 = vmatprep.mubr.msk.f32.mxu1 %vm122_vm0, %v11119_v22  ;;  %7930 = vperm.xlu0 %12553, %v97_v26   ;;  %v11135_v26 = vld [vmem:[%s17679_s1 + $0x60] sm:$0xff] }
  0x59   :  { %7922 = vperm.xlu1 %12554, %v95_v24   ;;  %v11143_v22 = vld [vmem:[%s17679_s1 + $0x80] sm:$0xff] }
  0x5c   :  { %7918 = vperm.xlu0 %12553, %v94_v28  }
  0xc6   :  { %v13023_v40 = vpop.permute.xlu1 %109 }
  0xc9   :  { %v13021_v35 = vpop.permute.xlu0 %119 }
  0xca   :  { %v201_v29 = vpop.f32.mrf.mxu0  ;;  %v13015_v30 = vpop.f32.mrf.mxu1 }
  0xcb   :  { %v13037_v52 = vpop.permute.xlu1 %104 }
  0xcc   :  { %v203_v31 = vpop.f32.mrf.mxu0  ;;  %v13017_v33 = vpop.f32.mrf.mxu1  ;;  %v13057_v58 = vadd.f32 %v201_v29, %v13037_v52  ;;  %v13155_v28 = vadd.f32 %v13015_v30, %v13037_v52  ;;  %v11136_v30 = vld [vmem:[%s17679_s1 + $0x68] sm:$0xff] }
  0xcd   :  { %v13025_v44 = vpop.permute.xlu0 %114  ;;  %v13071_v62 = vadd.f32 %v203_v31, %v13037_v52  ;;  %v13138_v21 = vadd.f32 %v13017_v33, %v13037_v52  ;;  %v11144_v31 = vld [vmem:[%s17679_s1 + $0x88] sm:$0xff] }
  0xce   :  { %v207_v34 = vpop.f32.mrf.mxu0  ;;  %v13019_v32 = vpop.f32.mrf.mxu1  ;;  %17889 = vst [vmem:[#allocation5_spill] sm:$0xff] %v13057_v58 }
  0xcf   :  { %v13043_v54 = vadd.f32 %v207_v34, %v13023_v40  ;;  %v13142_v23 = vadd.f32 %v13019_v32, %v13023_v40 }
  0xd0   :  { %v209_v36 = vpop.f32.mrf.mxu0  ;;  %v298_v37 = vpop.f32.mrf.mxu1 }
  0xd1   :  { %17888 = vst [vmem:[#allocation4_spill] sm:$0xff] %v13043_v54  ;;  %v13060_v59 = vadd.f32 %v209_v36, %v13023_v40  ;;  %v13107_v10 = vadd.f32 %v298_v37, %v13023_v40 }
  0xd2   :  { %v213_v38 = vpop.f32.mrf.mxu0  ;;  %v302_v39 = vpop.f32.mrf.mxu1 }
  0xd3   :  { %v13031_v49 = vadd.f32 %v213_v38, %v13025_v44  ;;  %v13110_v11 = vadd.f32 %v302_v39, %v13025_v44 }
  0xd4   :  { %v215_v41 = vpop.f32.mrf.mxu0  ;;  %v304_v43 = vpop.f32.mrf.mxu1 }
  0xd5   :  { %17887 = vst [vmem:[#allocation3_spill] sm:$0xff] %v13031_v49  ;;  %v13046_v55 = vadd.f32 %v215_v41, %v13025_v44  ;;  %v13095_v6 = vadd.f32 %v304_v43, %v13025_v44  ;;  %v11137_v41 = vld [vmem:[%s17679_s1 + $0x70] sm:$0xff] }
  0xd6   :  { %v219_v45 = vpop.f32.mrf.mxu0  ;;  %v308_v47 = vpop.f32.mrf.mxu1 }
  0xd7   :  { %v13028_v46 = vadd.f32 %v219_v45, %v13021_v35  ;;  %v13098_v7 = vadd.f32 %v308_v47, %v13021_v35  ;;  %v11138_v45 = vld [vmem:[%s17679_s1 + $0x78] sm:$0xff] }
  0xd8   :  { %v221_v48 = vpop.f32.mrf.mxu0  ;;  %v310_v51 = vpop.f32.mrf.mxu1  ;;  %v11146_v47 = vld [vmem:[%s17679_s1 + $0x98] sm:$0xff] }
  0xd9   :  { %17886 = vst [vmem:[#allocation2_spill] sm:$0xff] %v13028_v46  ;;  %v13034_v50 = vadd.f32 %v221_v48, %v13021_v35  ;;  %12021 = vmatprep.subr.mxu1 %v13028_v46  ;;  %v13074_v63 = vadd.f32 %v310_v51, %v13021_v35 }
  0xda   :  { %v13039_v53 = vpop.f32.mrf.mxu0  ;;  %12022 = vmatpush3.msra.mxu1 %v13028_v46  ;;  %v13048_v56 = vpop.f32.mrf.mxu1 }
  0xdb   :  { %12007 = vmatprep.subr.mxu0 %v13034_v50  ;;  %12023 = vmatprep.subr.mxu1 %v13031_v49 }
  0xdc   :  { %v13052_v57 = vpop.f32.mrf.mxu0  ;;  %12008 = vmatpush3.msra.mxu0 %v13034_v50  ;;  %12024 = vmatpush3.msra.mxu1 %v13031_v49  ;;  %v13062_v60 = vpop.f32.mrf.mxu1 }
  0xdd   :  { %12009 = vmatprep.subr.mxu0 %v13046_v55  ;;  %12025 = vmatprep.subr.mxu1 %v13043_v54 }
  0xde   :  { %v13066_v61 = vpop.f32.mrf.mxu0  ;;  %12010 = vmatpush3.msra.mxu0 %v13046_v55  ;;  %12026 = vmatpush3.msra.mxu1 %v13043_v54  ;;  %v13076_v0 = vpop.f32.mrf.mxu1 }
  0xdf   :  { %12011 = vmatprep.subr.mxu0 %v13060_v59  ;;  %12027 = vmatprep.subr.mxu1 %v13057_v58 }
  0xe0   :  { %v13083_v2 = vpop.f32.mrf.mxu0  ;;  %12012 = vmatpush3.msra.mxu0 %v13060_v59  ;;  %12028 = vmatpush3.msra.mxu1 %v13057_v58  ;;  %v13090_v5 = vpop.f32.mrf.mxu1 }
  0xe1   :  { %12013 = vmatprep.subr.mxu0 %v13071_v62  ;;  %12049 = vmatprep.subr.mxu1 %v13074_v63 }
  0xe2   :  { %v391_v8 = vpop.f32.mrf.mxu0  ;;  %12014 = vmatpush3.msra.mxu0 %v13071_v62  ;;  %12030 = vmatmul.mubr.msk.f32.vlgmr.msra.gmra.mxu1 %vm122_vm0, %v11120_v1  ;;  %v13102_v9 = vpop.f32.mrf.mxu1  ;;  %v13228_v1 = vadd.f32 %v13066_v61, %v13023_v40  ;;  %v13244_v61 = vadd.f32 %v13039_v53, %v13037_v52  ;;  %v11159_v53 = vld [vmem:[%s17679_s1 + $0xc0] sm:$0xff] }
  0xe3   :  { %12050 = vmatpush3.msra.mxu1 %v13074_v63  ;;  %12016 = vmatmul.mubr.msk.f32.vlgmr.msra.gmra.mxu0 %vm122_vm0, %v11124_v4  ;;  %v13193_v37 = vadd.f32 %v391_v8, %v13025_v44  ;;  %v13232_v4 = vadd.f32 %v13083_v2, %v13023_v40  ;;  %v13248_v2 = vadd.f32 %v13052_v57, %v13037_v52 }
  0xe4   :  { %12035 = vmatprep.subr.mxu0 %v13098_v7  ;;  %12051 = vmatprep.subr.mxu1 %v13095_v6  ;;  %v393_v12 = vpop.f32.mrf.mxu0  ;;  %v13120_v15 = vpop.f32.mrf.mxu1  ;;  %17890 = vst [vmem:[#allocation6_spill] sm:$0xff] %v13244_v61 }
  0xe5   :  { %12036 = vmatpush3.msra.mxu0 %v13098_v7  ;;  %12052 = vmatpush3.msra.mxu1 %v13095_v6  ;;  %v13196_v38 = vadd.f32 %v393_v12, %v13025_v44 }
  0xe6   :  { %12037 = vmatprep.subr.mxu0 %v13110_v11  ;;  %12053 = vmatprep.subr.mxu1 %v13107_v10  ;;  %v397_v16 = vpop.f32.mrf.mxu0  ;;  %v13132_v20 = vpop.f32.mrf.mxu1 }
  0xe7   :  { %12018 = vmatprep.mubr.msk.f32.mxu0 %vm122_vm0, %v11125_v13  ;;  %12032 = vmatprep.mubr.msk.f32.mxu1 %vm122_vm0, %v11121_v14  ;;  %v13182_v34 = vadd.f32 %v397_v16, %v13021_v35  ;;  %v11151_v13 = vld [vmem:[%s17679_s1 + $0xa0] sm:$0xff]  ;;  %v11152_v16 = vld [vmem:[%s17679_s1 + $0xa8] sm:$0xff] }
  0xe8   :  { %12038 = vmatpush3.msra.mxu0 %v13110_v11  ;;  %12054 = vmatpush3.msra.mxu1 %v13107_v10  ;;  %v399_v24 = vpop.f32.mrf.mxu0  ;;  %v13148_v25 = vpop.f32.mrf.mxu1 }
  0xe9   :  { %12019 = vmatmul.mubr.msk.f32.gmra.mxu0 %vm122_vm0, %v11126_v18  ;;  %12033 = vmatmul.mubr.msk.f32.gmra.mxu1 %vm122_vm0, %v11122_v19  ;;  %v13165_v27 = vadd.f32 %v399_v24, %v13021_v35  ;;  %v11160_v18 = vld [vmem:[%s17679_s1 + $0xc8] sm:$0xff]  ;;  %v13274_v24 = vadd.f32 %v13132_v20, %v13021_v35  ;;  %v13290_v20 = vadd.f32 %v13102_v9, %v13025_v44 }
  0xea   :  { %12039 = vmatprep.subr.mxu0 %v13142_v23  ;;  %12055 = vmatprep.subr.mxu1 %v13138_v21  ;;  %v13159_v17 = vpop.f32.mrf.mxu0  ;;  %v13169_v29 = vpop.f32.mrf.mxu1 }
  0xeb   :  { %12040 = vmatpush3.msra.mxu0 %v13142_v23  ;;  %12056 = vmatpush3.msra.mxu1 %v13138_v21  ;;  %17891 = vst [vmem:[#allocation7_spill] sm:$0xff] %v13274_v24  ;;  %17893 = vst [vmem:[#allocation9_spill] sm:$0xff] %v13290_v20 }
  0xec   :  { %12041 = vmatprep.subr.mxu0 %v13155_v28  ;;  %12043 = vmatprep.mubr.msk.f32.mxu0 %vm122_vm0, %v11135_v26  ;;  %v13179_v33 = vpop.f32.mrf.mxu0  ;;  %v13186_v32 = vpop.f32.mrf.mxu1  ;;  %v13278_v26 = vadd.f32 %v13148_v25, %v13021_v35  ;;  %v13294_v25 = vadd.f32 %v13120_v15, %v13025_v44  ;;  %v11154_v15 = vld [vmem:[%s17679_s1 + $0xb8] sm:$0xff] }
  0xed   :  { %12042 = vmatpush3.msra.mxu0 %v13155_v28  ;;  %12057 = vmatprep.mubr.msk.f32.mxu1 %vm122_vm0, %v11143_v22 }
  0xee   :  { %12044 = vmatmul.mubr.msk.f32.vlgmr.msra.gmra.mxu0 %vm122_vm0, %v11136_v30  ;;  %12058 = vmatmul.mubr.msk.f32.vlgmr.msra.gmra.mxu1 %vm122_vm0, %v11144_v31  ;;  %v13190_v36 = vpop.f32.mrf.mxu0  ;;  %v13200_v39 = vpop.f32.mrf.mxu1  ;;  %17892 = vst [vmem:[#allocation8_spill] sm:$0xff] %v13278_v26  ;;  %17894 = vst [vmem:[#allocation10_spill] sm:$0xff] %v13294_v25  ;;  %v11153_v31 = vld [vmem:[%s17679_s1 + $0xb0] sm:$0xff] }
  0xef   :  { %12063 = vmatprep.subr.mxu0 %v13182_v34  ;;  %12077 = vmatprep.subr.mxu1 %v13165_v27  ;;  %v13414_v54 = vadd.f32 %v13190_v36, %v13023_v40  ;;  %v13432_v36 = vadd.f32 %v13179_v33, %v13037_v52  ;;  %v11184_v33 = vld [vmem:[%s17679_s1 + $0x128] sm:$0xff] }
  0xf0   :  { %12064 = vmatpush3.msra.mxu0 %v13182_v34  ;;  %12078 = vmatpush3.msra.mxu1 %v13165_v27  ;;  %v13210_v43 = vpop.f32.mrf.mxu0  ;;  %v13220_v48 = vpop.f32.mrf.mxu1 }
  0xf1   :  { %12065 = vmatprep.subr.mxu0 %v13193_v37  ;;  %12079 = vmatprep.subr.mxu1 %v13196_v38  ;;  %17903 = vst [vmem:[#allocation19_spill] sm:$0xff] %v13414_v54  ;;  %v13418_v49 = vadd.f32 %v13210_v43, %v13023_v40  ;;  %17906 = vst [vmem:[#allocation22_spill] sm:$0xff] %v13432_v36  ;;  %v11183_v43 = vld [vmem:[%s17679_s1 + $0x120] sm:$0xff] }
  0xf2   :  { %12046 = vmatprep.mubr.msk.f32.mxu0 %vm122_vm0, %v11137_v41  ;;  %12060 = vmatprep.mubr.msk.f32.mxu1 %vm122_vm0, %v11145_v42  ;;  %v13224_v51 = vpop.f32.mrf.mxu0  ;;  %v13236_v8 = vpop.f32.mrf.mxu1  ;;  %v11161_v41 = vld [vmem:[%s17679_s1 + $0xd0] sm:$0xff]  ;;  %v11162_v42 = vld [vmem:[%s17679_s1 + $0xd8] sm:$0xff] }
  0xf3   :  { %12066 = vmatpush3.msra.mxu0 %v13193_v37  ;;  %12080 = vmatpush3.msra.mxu1 %v13196_v38  ;;  %v13382_v58 = vadd.f32 %v13224_v51, %v13025_v44  ;;  %17904 = vst [vmem:[#allocation20_spill] sm:$0xff] %v13418_v49 }
  0xf4   :  { %12047 = vmatmul.mubr.msk.f32.gmra.mxu0 %vm122_vm0, %v11138_v45  ;;  %12061 = vmatmul.mubr.msk.f32.gmra.mxu1 %vm122_vm0, %v11146_v47  ;;  %v13240_v12 = vpop.f32.mrf.mxu0  ;;  %v13260_v14 = vpop.f32.mrf.mxu1 }
  0xf5   :  { %12067 = vmatprep.subr.mxu0 %v13228_v1  ;;  %12081 = vmatprep.subr.mxu1 %v13232_v4  ;;  %17901 = vst [vmem:[#allocation17_spill] sm:$0xff] %v13382_v58 }
  0xf6   :  { %12068 = vmatpush3.msra.mxu0 %v13228_v1  ;;  %12082 = vmatpush3.msra.mxu1 %v13232_v4  ;;  %v575_v57 = vpop.f32.mrf.mxu0  ;;  %v13284_v22 = vpop.f32.mrf.mxu1 }
  0xf7   :  { %12069 = vmatprep.subr.mxu0 %v13244_v61  ;;  %12083 = vmatprep.subr.mxu1 %v13248_v2 }
  0xf8   :  { %12070 = vmatpush3.msra.mxu0 %v13244_v61  ;;  %12071 = vmatprep.mubr.msk.f32.mxu0 %vm122_vm0, %v11151_v13  ;;  %v577_v19 = vpop.f32.mrf.mxu0  ;;  %v13318_v45 = vpop.f32.mrf.mxu1  ;;  %v13324_v13 = vadd.f32 %v13076_v0, %v13023_v40  ;;  %v13342_v0 = vadd.f32 %v13062_v60, %v13037_v52 }
  0xf9   :  { %12084 = vmatpush3.msra.mxu1 %v13248_v2  ;;  %12085 = vmatprep.mubr.msk.f32.mxu1 %vm122_vm0, %v11159_v53  ;;  %v13328_v53 = vadd.f32 %v13090_v5, %v13023_v40  ;;  %v11167_v5 = vld [vmem:[%s17679_s1 + $0xe0] sm:$0xff]  ;;  %v13357_v60 = vadd.f32 %v577_v19, %v13021_v35  ;;  %v13372_v19 = vadd.f32 %v575_v57, %v13021_v35  ;;  %v11169_v57 = vld [vmem:[%s17679_s1 + $0xf0] sm:$0xff] }
  0xfa   :  { %12072 = vmatmul.mubr.msk.f32.vlgmr.msra.gmra.mxu0 %vm122_vm0, %v11152_v16  ;;  %12086 = vmatmul.mubr.msk.f32.vlgmr.msra.gmra.mxu1 %vm122_vm0, %v11160_v18  ;;  %v13286_v30 = vpop.f32.mrf.mxu0  ;;  %17895 = vst [vmem:[#allocation11_spill] sm:$0xff] %v13324_v13  ;;  %v13338_v18 = vadd.f32 %v13048_v56, %v13037_v52  ;;  %17898 = vst [vmem:[#allocation14_spill] sm:$0xff] %v13342_v0  ;;  %v11175_v56 = vld [vmem:[%s17679_s1 + $0x100] sm:$0xff] }
  0xfb   :  { %12091 = vmatprep.subr.mxu0 %v13274_v24  ;;  %12105 = vmatprep.subr.mxu1 %v13278_v26  ;;  %17896 = vst [vmem:[#allocation12_spill] sm:$0xff] %v13328_v53  ;;  %17899 = vst [vmem:[#allocation15_spill] sm:$0xff] %v13357_v60 }
  0xfc   :  { %12092 = vmatpush3.msra.mxu0 %v13274_v24  ;;  %12106 = vmatpush3.msra.mxu1 %v13278_v26  ;;  %v13306_v9 = vpop.f32.mrf.mxu0  ;;  %17897 = vst [vmem:[#allocation13_spill] sm:$0xff] %v13338_v18  ;;  %17900 = vst [vmem:[#allocation16_spill] sm:$0xff] %v13372_v19 }
  0xfd   :  { %12093 = vmatprep.subr.mxu0 %v13290_v20  ;;  %12107 = vmatprep.subr.mxu1 %v13294_v25 }
  0xfe   :  { %12074 = vmatprep.mubr.msk.f32.mxu0 %vm122_vm0, %v11153_v31  ;;  %12088 = vmatprep.mubr.msk.f32.mxu1 %vm122_vm0, %v11161_v41  ;;  %v13320_v47 = vpop.f32.mrf.mxu0  ;;  %v13351_v31 = vpop.f32.mrf.mxu1  ;;  %v11168_v41 = vld [vmem:[%s17679_s1 + $0xe8] sm:$0xff] }
  0xff   :  { %12094 = vmatpush3.msra.mxu0 %v13290_v20  ;;  %12108 = vmatpush3.msra.mxu1 %v13294_v25 }
 0x100   :  { %12075 = vmatmul.mubr.msk.f32.gmra.mxu0 %vm122_vm0, %v11154_v15  ;;  %12089 = vmatmul.mubr.msk.f32.gmra.mxu1 %vm122_vm0, %v11162_v42  ;;  %v13334_v16 = vpop.f32.mrf.mxu0  ;;  %v11176_v15 = vld [vmem:[%s17679_s1 + $0x108] sm:$0xff]  ;;  %v13378_v3 = vpop.f32.mrf.mxu1 }
 0x101   :  { %12095 = vmatprep.subr.mxu0 %v13324_v13  ;;  %12109 = vmatprep.subr.mxu1 %v13328_v53 }
 0x102   :  { %12096 = vmatpush3.msra.mxu0 %v13324_v13  ;;  %12110 = vmatpush3.msra.mxu1 %v13328_v53  ;;  %v13369_v42 = vpop.f32.mrf.mxu0 }
 0x103   :  { %12097 = vmatprep.subr.mxu0 %v13338_v18  ;;  %12111 = vmatprep.subr.mxu1 %v13342_v0 }
 0x104   :  { %12098 = vmatpush3.msra.mxu0 %v13338_v18  ;;  %12099 = vmatprep.mubr.msk.f32.mxu0 %vm122_vm0, %v11167_v5  ;;  %v13386_v5 = vadd.f32 %v13240_v12, %v13025_v44  ;;  %v13398_v51 = vpop.f32.mrf.mxu0  ;;  %v11170_v12 = vld [vmem:[%s17679_s1 + $0xf8] sm:$0xff] }
 0x105   :  { %12112 = vmatpush3.msra.mxu1 %v13342_v0  ;;  %12113 = vmatprep.mubr.msk.f32.mxu1 %vm122_vm0, %v11175_v56  ;;  %v11177_v56 = vld [vmem:[%s17679_s1 + $0x110] sm:$0xff] }
 0x106   :  { %12100 = vmatmul.mubr.msk.f32.vlgmr.msra.gmra.mxu0 %vm122_vm0, %v11168_v41  ;;  %12114 = vmatmul.mubr.msk.f32.vlgmr.msra.gmra.mxu1 %vm122_vm0, %v11176_v15  ;;  %17902 = vst [vmem:[#allocation18_spill] sm:$0xff] %v13386_v5  ;;  %v11178_v41 = vld [vmem:[%s17679_s1 + $0x118] sm:$0xff]  ;;  %v13408_v15 = vpop.f32.mrf.mxu1  ;;  %v13424_v46 = vpop.f32.mrf.mxu0 }
 0x107   :  { %12119 = vmatprep.subr.mxu0 %v13372_v19  ;;  %12133 = vmatprep.subr.mxu1 %v13357_v60 }
 0x108   :  { %12120 = vmatpush3.msra.mxu0 %v13372_v19  ;;  %12134 = vmatpush3.msra.mxu1 %v13357_v60 }
 0x109   :  { %12121 = vmatprep.subr.mxu0 %v13382_v58  ;;  %12135 = vmatprep.subr.mxu1 %v13386_v5 }
 0x10a   :  { %12102 = vmatprep.mubr.msk.f32.mxu0 %vm122_vm0, %v11169_v57  ;;  %12116 = vmatprep.mubr.msk.f32.mxu1 %vm122_vm0, %v11177_v56  ;;  %v13428_v57 = vadd.f32 %v13159_v17, %v13037_v52  ;;  %v13439_v56 = vpop.f32.mrf.mxu1  ;;  %v11191_v17 = vld [vmem:[%s17679_s1 + $0x140] sm:$0xff] }
 0x10b   :  { %12122 = vmatpush3.msra.mxu0 %v13382_v58  ;;  %12136 = vmatpush3.msra.mxu1 %v13386_v5  ;;  %v13462_v5 = vadd.f32 %v13318_v45, %v13021_v35  ;;  %v11185_v45 = vld [vmem:[%s17679_s1 + $0x130] sm:$0xff] }
 0x10c   :  { %12103 = vmatmul.mubr.msk.f32.gmra.mxu0 %vm122_vm0, %v11170_v12  ;;  %12117 = vmatmul.mubr.msk.f32.gmra.mxu1 %vm122_vm0, %v11178_v41  ;;  %17905 = vst [vmem:[#allocation21_spill] sm:$0xff] %v13428_v57  ;;  %v11192_v12 = vld [vmem:[%s17679_s1 + $0x148] sm:$0xff]  ;;  %v755_v41 = vpop.f32.mrf.mxu0  ;;  %v13466_v60 = vpop.f32.mrf.mxu1 }
 0x10d   :  { %12123 = vmatprep.subr.mxu0 %v13414_v54  ;;  %12137 = vmatprep.subr.mxu1 %v13418_v49  ;;  %17908 = vst [vmem:[#allocation24_spill] sm:$0xff] %v13462_v5 }
 0x10e   :  { %12124 = vmatpush3.msra.mxu0 %v13414_v54  ;;  %12138 = vmatpush3.msra.mxu1 %v13418_v49  ;;  %v13458_v49 = vadd.f32 %v13284_v22, %v13021_v35  ;;  %v13476_v22 = vadd.f32 %v13260_v14, %v13025_v44  ;;  %v11186_v14 = vld [vmem:[%s17679_s1 + $0x138] sm:$0xff] }
 0x10f   :  { %12125 = vmatprep.subr.mxu0 %v13428_v57  ;;  %12139 = vmatprep.subr.mxu1 %v13432_v36 }
 0x110   :  { %12126 = vmatpush3.msra.mxu0 %v13428_v57  ;;  %12127 = vmatprep.mubr.msk.f32.mxu0 %vm122_vm0, %v11183_v43  ;;  %17907 = vst [vmem:[#allocation23_spill] sm:$0xff] %v13458_v49  ;;  %v13472_v43 = vadd.f32 %v13236_v8, %v13025_v44  ;;  %17910 = vst [vmem:[#allocation26_spill] sm:$0xff] %v13476_v22  ;;  %v13488_v8 = vpop.f32.mrf.mxu0 }
 0x111   :  { %12140 = vmatpush3.msra.mxu1 %v13432_v36  ;;  %12141 = vmatprep.mubr.msk.f32.mxu1 %vm122_vm0, %v11191_v17  ;;  %v11193_v17 = vld [vmem:[%s17679_s1 + $0x150] sm:$0xff]  ;;  %v13504_v36 = vadd.f32 %v13200_v39, %v13023_v40  ;;  %v13522_v39 = vadd.f32 %v13186_v32, %v13037_v52  ;;  %v13535_v32 = vadd.f32 %v755_v41, %v13021_v35 }
 0x112   :  { %12128 = vmatmul.mubr.msk.f32.vlgmr.msra.gmra.mxu0 %vm122_vm0, %v11184_v33  ;;  %12142 = vmatmul.mubr.msk.f32.vlgmr.msra.gmra.mxu1 %vm122_vm0, %v11192_v12  ;;  %17909 = vst [vmem:[#allocation25_spill] sm:$0xff] %v13472_v43  ;;  %v11194_v33 = vld [vmem:[%s17679_s1 + $0x158] sm:$0xff]  ;;  %v13498_v12 = vpop.f32.mrf.mxu1  ;;  %v13551_v41 = vadd.f32 %v13424_v46, %v13021_v35  ;;  %v11201_v46 = vld [vmem:[%s17679_s1 + $0x170] sm:$0xff] }
 0x113   :  { %12147 = vmatprep.subr.mxu0 %v13458_v49  ;;  %12161 = vmatprep.subr.mxu1 %v13462_v5  ;;  %17911 = vst [vmem:[#allocation27_spill] sm:$0xff] %v13504_v36  ;;  %17914 = vst [vmem:[#allocation30_spill] sm:$0xff] %v13522_v39 }
 0x114   :  { %12148 = vmatpush3.msra.mxu0 %v13458_v49  ;;  %12162 = vmatpush3.msra.mxu1 %v13462_v5  ;;  %v13508_v5 = vadd.f32 %v13220_v48, %v13023_v40  ;;  %v13514_v49 = vpop.f32.mrf.mxu0  ;;  %v11199_v48 = vld [vmem:[%s17679_s1 + $0x160] sm:$0xff]  ;;  %17915 = vst [vmem:[#allocation31_spill] sm:$0xff] %v13535_v32  ;;  %17916 = vst [vmem:[#allocation32_spill] sm:$0xff] %v13551_v41 }
 0x115   :  { %12149 = vmatprep.subr.mxu0 %v13472_v43  ;;  %12163 = vmatprep.subr.mxu1 %v13476_v22 }
 0x116   :  { %12130 = vmatprep.mubr.msk.f32.mxu0 %vm122_vm0, %v11185_v45  ;;  %12144 = vmatprep.mubr.msk.f32.mxu1 %vm122_vm0, %v11193_v17  ;;  %17912 = vst [vmem:[#allocation28_spill] sm:$0xff] %v13508_v5  ;;  %v13518_v45 = vadd.f32 %v13169_v29, %v13037_v52  ;;  %v842_v17 = vpop.f32.mrf.mxu1  ;;  %v11207_v29 = vld [vmem:[%s17679_s1 + $0x180] sm:$0xff] }
 0x117   :  { %12150 = vmatpush3.msra.mxu0 %v13472_v43  ;;  %12164 = vmatpush3.msra.mxu1 %v13476_v22 }
 0x118   :  { %12131 = vmatmul.mubr.msk.f32.gmra.mxu0 %vm122_vm0, %v11186_v14  ;;  %12145 = vmatmul.mubr.msk.f32.gmra.mxu1 %vm122_vm0, %v11194_v33  ;;  %17913 = vst [vmem:[#allocation29_spill] sm:$0xff] %v13518_v45  ;;  %v11200_v14 = vld [vmem:[%s17679_s1 + $0x168] sm:$0xff] }
 0x119   :  { %12151 = vmatprep.subr.mxu0 %v13504_v36  ;;  %12165 = vmatprep.subr.mxu1 %v13508_v5  ;;  %v11208_v33 = vld [vmem:[%s17679_s1 + $0x188] sm:$0xff] }
 0x11a   :  { %12152 = vmatpush3.msra.mxu0 %v13504_v36  ;;  %12166 = vmatpush3.msra.mxu1 %v13508_v5  ;;  %v13547_v5 = vpop.f32.mrf.mxu0  ;;  %v844_v36 = vpop.f32.mrf.mxu1 }
 0x11b   :  { %12153 = vmatprep.subr.mxu0 %v13518_v45  ;;  %12167 = vmatprep.subr.mxu1 %v13522_v39 }
 0x11c   :  { %12154 = vmatpush3.msra.mxu0 %v13518_v45  ;;  %12155 = vmatprep.mubr.msk.f32.mxu0 %vm122_vm0, %v11199_v48  ;;  %v13559_v45 = vadd.f32 %v13369_v42, %v13025_v44  ;;  %v13563_v48 = vadd.f32 %v13398_v51, %v13025_v44  ;;  %v13575_v42 = vpop.f32.mrf.mxu0  ;;  %v11202_v51 = vld [vmem:[%s17679_s1 + $0x178] sm:$0xff] }
 0x11d   :  { %12168 = vmatpush3.msra.mxu1 %v13522_v39  ;;  %12169 = vmatprep.mubr.msk.f32.mxu1 %vm122_vm0, %v11207_v29  ;;  %v11209_v29 = vld [vmem:[%s17679_s1 + $0x190] sm:$0xff]  ;;  %v13595_v39 = vadd.f32 %v13334_v16, %v13023_v40  ;;  %v11215_v16 = vld [vmem:[%s17679_s1 + $0x1a0] sm:$0xff] }
 0x11e   :  { %12156 = vmatmul.mubr.msk.f32.vlgmr.msra.gmra.mxu0 %vm122_vm0, %v11200_v14  ;;  %12170 = vmatmul.mubr.msk.f32.vlgmr.msra.gmra.mxu1 %vm122_vm0, %v11208_v33  ;;  %17917 = vst [vmem:[#allocation33_spill] sm:$0xff] %v13559_v45  ;;  %17918 = vst [vmem:[#allocation34_spill] sm:$0xff] %v13563_v48  ;;  %v11210_v14 = vld [vmem:[%s17679_s1 + $0x198] sm:$0xff]  ;;  %v13585_v33 = vpop.f32.mrf.mxu1  ;;  %v13601_v22 = vpop.f32.mrf.mxu0 }
 0x11f   :  { %12175 = vmatprep.subr.mxu0 %v13551_v41  ;;  %12189 = vmatprep.subr.mxu1 %v13535_v32  ;;  %17920 = vst [vmem:[#allocation36_spill] sm:$0xff] %v13595_v39 }
 0x120   :  { %12176 = vmatpush3.msra.mxu0 %v13551_v41  ;;  %12190 = vmatpush3.msra.mxu1 %v13535_v32  ;;  %v13591_v32 = vadd.f32 %v13320_v47, %v13023_v40  ;;  %v13609_v47 = vadd.f32 %v13306_v9, %v13037_v52  ;;  %v11216_v9 = vld [vmem:[%s17679_s1 + $0x1a8] sm:$0xff] }
 0x121   :  { %12177 = vmatprep.subr.mxu0 %v13559_v45  ;;  %12191 = vmatprep.subr.mxu1 %v13563_v48 }
 0x122   :  { %12158 = vmatprep.mubr.msk.f32.mxu0 %vm122_vm0, %v11201_v46  ;;  %12172 = vmatprep.mubr.msk.f32.mxu1 %vm122_vm0, %v11209_v29  ;;  %17919 = vst [vmem:[#allocation35_spill] sm:$0xff] %v13591_v32  ;;  %v13605_v46 = vadd.f32 %v13286_v30, %v13037_v52  ;;  %17922 = vst [vmem:[#allocation38_spill] sm:$0xff] %v13609_v47  ;;  %v13616_v29 = vpop.f32.mrf.mxu1  ;;  %v11223_v30 = vld [vmem:[%s17679_s1 + $0x1c0] sm:$0xff] }
 0x123   :  { %12178 = vmatpush3.msra.mxu0 %v13559_v45  ;;  %12192 = vmatpush3.msra.mxu1 %v13563_v48  ;;  %v13637_v48 = vadd.f32 %v844_v36, %v13021_v35  ;;  %v11217_v36 = vld [vmem:[%s17679_s1 + $0x1b0] sm:$0xff] }
 0x124   :  { %12159 = vmatmul.mubr.msk.f32.gmra.mxu0 %vm122_vm0, %v11202_v51  ;;  %12173 = vmatmul.mubr.msk.f32.gmra.mxu1 %vm122_vm0, %v11210_v14  ;;  %17921 = vst [vmem:[#allocation37_spill] sm:$0xff] %v13605_v46  ;;  %v11224_v51 = vld [vmem:[%s17679_s1 + $0x1c8] sm:$0xff]  ;;  %v927_v14 = vpop.f32.mrf.mxu0 }
 0x125   :  { %12179 = vmatprep.subr.mxu0 %v13591_v32  ;;  %12193 = vmatprep.subr.mxu1 %v13595_v39  ;;  %17924 = vst [vmem:[#allocation40_spill] sm:$0xff] %v13637_v48 }
 0x126   :  { %12180 = vmatpush3.msra.mxu0 %v13591_v32  ;;  %12194 = vmatpush3.msra.mxu1 %v13595_v39  ;;  %v13634_v39 = vadd.f32 %v842_v17, %v13021_v35  ;;  %v13641_v32 = vpop.f32.mrf.mxu1  ;;  %v13651_v17 = vadd.f32 %v13498_v12, %v13025_v44  ;;  %v11218_v12 = vld [vmem:[%s17679_s1 + $0x1b8] sm:$0xff] }
 0x127   :  { %12181 = vmatprep.subr.mxu0 %v13605_v46  ;;  %12195 = vmatprep.subr.mxu1 %v13609_v47 }
 0x128   :  { %12182 = vmatpush3.msra.mxu0 %v13605_v46  ;;  %12183 = vmatprep.mubr.msk.f32.mxu0 %vm122_vm0, %v11215_v16  ;;  %17923 = vst [vmem:[#allocation39_spill] sm:$0xff] %v13634_v39  ;;  %v13647_v16 = vadd.f32 %v13466_v60, %v13025_v44  ;;  %17926 = vst [vmem:[#allocation42_spill] sm:$0xff] %v13651_v17  ;;  %v931_v60 = vpop.f32.mrf.mxu0 }
 0x129   :  { %12196 = vmatpush3.msra.mxu1 %v13609_v47  ;;  %12197 = vmatprep.mubr.msk.f32.mxu1 %vm122_vm0, %v11223_v30  ;;  %v11225_v30 = vld [vmem:[%s17679_s1 + $0x1d0] sm:$0xff]  ;;  %v13681_v47 = vadd.f32 %v13439_v56, %v13023_v40  ;;  %v11231_v56 = vld [vmem:[%s17679_s1 + $0x1e0] sm:$0xff] }
 0x12a   :  { %12184 = vmatmul.mubr.msk.f32.vlgmr.msra.gmra.mxu0 %vm122_vm0, %v11216_v9  ;;  %12198 = vmatmul.mubr.msk.f32.vlgmr.msra.gmra.mxu1 %vm122_vm0, %v11224_v51  ;;  %17925 = vst [vmem:[#allocation41_spill] sm:$0xff] %v13647_v16  ;;  %v11226_v9 = vld [vmem:[%s17679_s1 + $0x1d8] sm:$0xff]  ;;  %v13671_v51 = vpop.f32.mrf.mxu1 }
 0x12b   :  { %12203 = vmatprep.subr.mxu0 %v13634_v39  ;;  %12217 = vmatprep.subr.mxu1 %v13637_v48  ;;  %17928 = vst [vmem:[#allocation44_spill] sm:$0xff] %v13681_v47 }
 0x12c   :  { %12204 = vmatpush3.msra.mxu0 %v13634_v39  ;;  %12218 = vmatpush3.msra.mxu1 %v13637_v48  ;;  %v13677_v48 = vadd.f32 %v13408_v15, %v13023_v40  ;;  %v933_v39 = vpop.f32.mrf.mxu0  ;;  %v13693_v15 = vadd.f32 %v13378_v3, %v13037_v52 }
 0x12d   :  { %12205 = vmatprep.subr.mxu0 %v13647_v16  ;;  %12219 = vmatprep.subr.mxu1 %v13651_v17  ;;  %v13706_v3 = vadd.f32 %v933_v39, %v13021_v35 }
 0x12e   :  { %12186 = vmatprep.mubr.msk.f32.mxu0 %vm122_vm0, %v11217_v36  ;;  %12200 = vmatprep.mubr.msk.f32.mxu1 %vm122_vm0, %v11225_v30  ;;  %17927 = vst [vmem:[#allocation43_spill] sm:$0xff] %v13677_v48  ;;  %v13689_v36 = vadd.f32 %v13351_v31, %v13037_v52  ;;  %17930 = vst [vmem:[#allocation46_spill] sm:$0xff] %v13693_v15  ;;  %v1014_v30 = vpop.f32.mrf.mxu1  ;;  %v11239_v31 = vld [vmem:[%s17679_s1 + $0x200] sm:$0xff] }
 0x12f   :  { %12206 = vmatpush3.msra.mxu0 %v13647_v16  ;;  %12220 = vmatpush3.msra.mxu1 %v13651_v17  ;;  %17931 = vst [vmem:[#allocation47_spill] sm:$0xff] %v13706_v3  ;;  %v13727_v17 = vadd.f32 %v13601_v22, %v13025_v44  ;;  %v11234_v22 = vld [vmem:[%s17679_s1 + $0x1f8] sm:$0xff] }
 0x130   :  { %12187 = vmatmul.mubr.msk.f32.gmra.mxu0 %vm122_vm0, %v11218_v12  ;;  %12201 = vmatmul.mubr.msk.f32.gmra.mxu1 %vm122_vm0, %v11226_v9  ;;  %17929 = vst [vmem:[#allocation45_spill] sm:$0xff] %v13689_v36  ;;  %v11232_v12 = vld [vmem:[%s17679_s1 + $0x1e8] sm:$0xff]  ;;  %v1016_v39 = vpop.f32.mrf.mxu1 }
 0x131   :  { %12207 = vmatprep.subr.mxu0 %v13677_v48  ;;  %12221 = vmatprep.subr.mxu1 %v13681_v47  ;;  %v11240_v9 = vld [vmem:[%s17679_s1 + $0x208] sm:$0xff]  ;;  %17933 = vst [vmem:[#allocation49_spill] sm:$0xff] %v13727_v17 }
 0x132   :  { %12208 = vmatpush3.msra.mxu0 %v13677_v48  ;;  %12222 = vmatpush3.msra.mxu1 %v13681_v47  ;;  %v13719_v47 = vadd.f32 %v931_v60, %v13021_v35  ;;  %v11233_v60 = vld [vmem:[%s17679_s1 + $0x1f0] sm:$0xff] }
 0x133   :  { %12209 = vmatprep.subr.mxu0 %v13689_v36  ;;  %12223 = vmatprep.subr.mxu1 %v13693_v15 }
 0x134   :  { %12210 = vmatpush3.msra.mxu0 %v13689_v36  ;;  %12211 = vmatprep.mubr.msk.f32.mxu0 %vm122_vm0, %v11231_v56  ;;  %17932 = vst [vmem:[#allocation48_spill] sm:$0xff] %v13719_v47  ;;  %v13730_v36 = vadd.f32 %v927_v14, %v13025_v44  ;;  %v11241_v56 = vld [vmem:[%s17679_s1 + $0x210] sm:$0xff]  ;;  %v11242_v14 = vld [vmem:[%s17679_s1 + $0x218] sm:$0xff] }
 0x135   :  { %12224 = vmatpush3.msra.mxu1 %v13693_v15  ;;  %12225 = vmatprep.mubr.msk.f32.mxu1 %vm122_vm0, %v11239_v31  ;;  %v1020_v31 = vpop.f32.mrf.mxu1  ;;  %v17964_v15 = vld [vmem:[#allocation3_spill] sm:$0xff] }
 0x136   :  { %12212 = vmatmul.mubr.msk.f32.vlgmr.msra.gmra.mxu0 %vm122_vm0, %v11232_v12  ;;  %12226 = vmatmul.mubr.msk.f32.vlgmr.msra.gmra.mxu1 %vm122_vm0, %v11240_v9  ;;  %17934 = vst [vmem:[#allocation50_spill] sm:$0xff] %v13730_v36  ;;  %v13754_v12 = vadd.f32 %v13547_v5, %v13023_v40  ;;  %v13758_v9 = vadd.f32 %v13575_v42, %v13023_v40  ;;  %v11247_v42 = vld [vmem:[%s17679_s1 + $0x220] sm:$0xff] }
 0x137   :  { %12231 = vmatprep.subr.mxu0 %v13719_v47  ;;  %12245 = vmatprep.subr.mxu1 %v13706_v3  ;;  %v13770_v5 = vadd.f32 %v13514_v49, %v13037_v52  ;;  %v11248_v49 = vld [vmem:[%s17679_s1 + $0x228] sm:$0xff] }
 0x138   :  { %12232 = vmatpush3.msra.mxu0 %v13719_v47  ;;  %12246 = vmatpush3.msra.mxu1 %v13706_v3  ;;  %17935 = vst [vmem:[#allocation51_spill] sm:$0xff] %v13754_v12  ;;  %17936 = vst [vmem:[#allocation52_spill] sm:$0xff] %v13758_v9  ;;  %v13806_v3 = vadd.f32 %v1016_v39, %v13025_v44  ;;  %v13830_v39 = vadd.f32 %v13641_v32, %v13023_v40  ;;  %v17963_v47 = vld [vmem:[#allocation34_spill] sm:$0xff] }
 0x139   :  { %12233 = vmatprep.subr.mxu0 %v13727_v17  ;;  %12247 = vmatprep.subr.mxu1 %v13730_v36  ;;  %17938 = vst [vmem:[#allocation54_spill] sm:$0xff] %v13770_v5  ;;  %v13846_v32 = vadd.f32 %v13616_v29, %v13037_v52  ;;  %v11272_v29 = vld [vmem:[%s17679_s1 + $0x288] sm:$0xff] }
 0x13a   :  { %12214 = vmatprep.mubr.msk.f32.mxu0 %vm122_vm0, %v11233_v60  ;;  %12228 = vmatprep.mubr.msk.f32.mxu1 %vm122_vm0, %v11241_v56  ;;  %v13766_v60 = vadd.f32 %v13488_v8, %v13037_v52  ;;  %v1022_v56 = vpop.f32.mrf.mxu1  ;;  %v11255_v8 = vld [vmem:[%s17679_s1 + $0x240] sm:$0xff]  ;;  %17942 = vst [vmem:[#allocation58_spill] sm:$0xff] %v13806_v3  ;;  %17943 = vst [vmem:[#allocation59_spill] sm:$0xff] %v13830_v39 }
 0x13b   :  { %12234 = vmatpush3.msra.mxu0 %v13727_v17  ;;  %12248 = vmatpush3.msra.mxu1 %v13730_v36  ;;  %v13803_v36 = vadd.f32 %v1014_v30, %v13025_v44  ;;  %v11250_v44 = vld [vmem:[%s17679_s1 + $0x238] sm:$0xff]  ;;  %17946 = vst [vmem:[#allocation62_spill] sm:$0xff] %v13846_v32  ;;  %v17962_v17 = vld [vmem:[#allocation2_spill] sm:$0xff] }
 0x13c   :  { %12215 = vmatmul.mubr.msk.f32.gmra.mxu0 %vm122_vm0, %v11234_v22  ;;  %12229 = vmatmul.mubr.msk.f32.gmra.mxu1 %vm122_vm0, %v11242_v14  ;;  %17937 = vst [vmem:[#allocation53_spill] sm:$0xff] %v13766_v60  ;;  %v11256_v22 = vld [vmem:[%s17679_s1 + $0x248] sm:$0xff]  ;;  %v13793_v14 = vadd.f32 %v1020_v31, %v13021_v35  ;;  %v11257_v31 = vld [vmem:[%s17679_s1 + $0x250] sm:$0xff]  ;;  %v11258_v30 = vld [vmem:[%s17679_s1 + $0x258] sm:$0xff] }
 0x13d   :  { %12235 = vmatprep.subr.mxu0 %v13754_v12  ;;  %12249 = vmatprep.subr.mxu1 %v13758_v9  ;;  %17941 = vst [vmem:[#allocation57_spill] sm:$0xff] %v13803_v36 }
 0x13e   :  { %12236 = vmatpush3.msra.mxu0 %v13754_v12  ;;  %12250 = vmatpush3.msra.mxu1 %v13758_v9  ;;  %17939 = vst [vmem:[#allocation55_spill] sm:$0xff] %v13793_v14  ;;  %v13796_v9 = vadd.f32 %v1022_v56, %v13021_v35  ;;  %v11249_v35 = vld [vmem:[%s17679_s1 + $0x230] sm:$0xff]  ;;  %v13842_v56 = vadd.f32 %v13585_v33, %v13037_v52  ;;  %v11271_v33 = vld [vmem:[%s17679_s1 + $0x280] sm:$0xff]  ;;  %v11264_v52 = vld [vmem:[%s17679_s1 + $0x268] sm:$0xff] }
 0x13f   :  { %12237 = vmatprep.subr.mxu0 %v13766_v60  ;;  %12251 = vmatprep.subr.mxu1 %v13770_v5  ;;  %v17960_v12 = vld [vmem:[#allocation39_spill] sm:$0xff] }
 0x140   :  { %12238 = vmatpush3.msra.mxu0 %v13766_v60  ;;  %12239 = vmatprep.mubr.msk.f32.mxu0 %vm122_vm0, %v11247_v42  ;;  %17940 = vst [vmem:[#allocation56_spill] sm:$0xff] %v13796_v9  ;;  %v13834_v42 = vadd.f32 %v13671_v51, %v13023_v40  ;;  %17945 = vst [vmem:[#allocation61_spill] sm:$0xff] %v13842_v56  ;;  %v11263_v40 = vld [vmem:[%s17679_s1 + $0x260] sm:$0xff]  ;;  %v11265_v51 = vld [vmem:[%s17679_s1 + $0x270] sm:$0xff] }
 0x141   :  { %12252 = vmatpush3.msra.mxu1 %v13770_v5  ;;  %12253 = vmatprep.mubr.msk.f32.mxu1 %vm122_vm0, %v11255_v8  ;;  %v11273_v8 = vld [vmem:[%s17679_s1 + $0x290] sm:$0xff]  ;;  %v17958_v5 = vld [vmem:[#allocation22_spill] sm:$0xff] }
 0x142   :  { %12240 = vmatmul.mubr.msk.f32.vlgmr.msra.gmra.mxu0 %vm122_vm0, %v11248_v49  ;;  %12254 = vmatmul.mubr.msk.f32.vlgmr.msra.gmra.mxu1 %vm122_vm0, %v11256_v22  ;;  %17944 = vst [vmem:[#allocation60_spill] sm:$0xff] %v13834_v42  ;;  %v11266_v49 = vld [vmem:[%s17679_s1 + $0x278] sm:$0xff]  ;;  %v17959_v60 = vld [vmem:[#allocation30_spill] sm:$0xff] }
 0x143   :  { %12259 = vmatprep.subr.mxu0 %v13793_v14  ;;  %12273 = vmatprep.subr.mxu1 %v13796_v9  ;;  %v11274_v22 = vld [vmem:[%s17679_s1 + $0x298] sm:$0xff] }
 0x144   :  { %12260 = vmatpush3.msra.mxu0 %v13793_v14  ;;  %12274 = vmatpush3.msra.mxu1 %v13796_v9  ;;  %v17954_v9 = vld [vmem:[#allocation35_spill] sm:$0xff]  ;;  %v17957_v14 = vld [vmem:[#allocation29_spill] sm:$0xff] }
 0x145   :  { %12261 = vmatprep.subr.mxu0 %v13803_v36  ;;  %12275 = vmatprep.subr.mxu1 %v13806_v3 }
 0x146   :  { %12242 = vmatprep.mubr.msk.f32.mxu0 %vm122_vm0, %v11249_v35  ;;  %12256 = vmatprep.mubr.msk.f32.mxu1 %vm122_vm0, %v11257_v31  ;;  %v13905_v35 = vld [vmem:[%s17679_s1 + $0x2c0] sm:$0xff]  ;;  %v17947_v31 = vmov 0.0  }
 0x147   :  { %12262 = vmatpush3.msra.mxu0 %v13803_v36  ;;  %12276 = vmatpush3.msra.mxu1 %v13806_v3  ;;  %v17953_v3 = vld [vmem:[#allocation27_spill] sm:$0xff]  ;;  %v17956_v36 = vld [vmem:[#allocation28_spill] sm:$0xff] }
 0x148   :  { %12243 = vmatmul.mubr.msk.f32.gmra.mxu0 %vm122_vm0, %v11250_v44  ;;  %12257 = vmatmul.mubr.msk.f32.gmra.mxu1 %vm122_vm0, %v11258_v30  ;;  %v13924_v44 = vld [vmem:[%s17679_s1 + $0x2c8] sm:$0xff]  ;;  %v12586_v30 = vmov 4  }
 0x149   :  { %12263 = vmatprep.subr.mxu0 %v13830_v39  ;;  %12277 = vmatprep.subr.mxu1 %v13834_v42 }
 0x14a   :  { %12264 = vmatpush3.msra.mxu0 %v13830_v39  ;;  %12278 = vmatpush3.msra.mxu1 %v13834_v42  ;;  %v17952_v42 = vld [vmem:[#allocation26_spill] sm:$0xff]  ;;  %v17955_v39 = vld [vmem:[#allocation20_spill] sm:$0xff] }
 0x14b   :  { %12265 = vmatprep.subr.mxu0 %v13842_v56  ;;  %12279 = vmatprep.subr.mxu1 %v13846_v32 }
 0x14c   :  { %12266 = vmatpush3.msra.mxu0 %v13842_v56  ;;  %12267 = vmatprep.mubr.msk.f32.mxu0 %vm122_vm0, %v11263_v40  ;;  %v13941_v40 = vld [vmem:[%s17680_s2 + $0x18] sm:$0xff]  ;;  %v14004_v56 = vld [vmem:[%s17680_s2] sm:$0xff] }
 0x14d   :  { %12280 = vmatpush3.msra.mxu1 %v13846_v32  ;;  %12281 = vmatprep.mubr.msk.f32.mxu1 %vm122_vm0, %v11271_v33  ;;  %v13949_v33 = vld [vmem:[%s17679_s1 + $0x2d0] sm:$0xff]  ;;  %v17951_v32 = vld [vmem:[#allocation18_spill] sm:$0xff] }
 0x14e   :  { %12268 = vmatmul.mubr.msk.f32.vlgmr.msra.gmra.mxu0 %vm122_vm0, %v11264_v52  ;;  %12282 = vmatmul.mubr.msk.f32.vlgmr.msra.gmra.mxu1 %vm122_vm0, %v11272_v29  ;;  %v17948_v52 = vld [vmem:[#allocation23_spill] sm:$0xff]  ;;  %v13964_v29 = vld [vmem:[%s17679_s1 + $0x2d8] sm:$0xff] }
 0x14f   :  { %3203 = vmatprep.subr.mxu0 %v13098_v7  ;;  %3292 = vmatprep.subr.mxu1 %v13182_v34 }
 0x150   :  { %3204 = vmatpush1.msra.mxu0 %v13034_v50  ;;  %3293 = vmatpush1.msra.mxu1 %v13074_v63 }
 0x151   :  { %3205 = vmatprep.subr.mxu0 %v13110_v11  ;;  %3294 = vmatprep.subr.mxu1 %v13193_v37 }
 0x152   :  { %12270 = vmatprep.mubr.msk.f32.mxu0 %vm122_vm0, %v11265_v51  ;;  %12284 = vmatprep.mubr.msk.f32.mxu1 %vm122_vm0, %v11273_v8  ;;  %v12587_v51 = vmov 5   ;;  %v13978_v8 = vld [vmem:[%s17680_s2 + $0x10] sm:$0xff] }
 0x153   :  { %3206 = vmatpush1.msra.mxu0 %v13046_v55  ;;  %3295 = vmatpush1.msra.mxu1 %v13095_v6 }
 0x154   :  { %12271 = vmatmul.mubr.msk.f32.gmra.mxu0 %vm122_vm0, %v11266_v49  ;;  %12285 = vmatmul.mubr.msk.f32.gmra.mxu1 %vm122_vm0, %v11274_v22  ;;  %v13984_v49 = vld [vmem:[%s17680_s2 + $0x8] sm:$0xff] }
 0x155   :  { %3207 = vmatprep.subr.mxu0 %v13142_v23  ;;  %3296 = vmatprep.subr.mxu1 %v13228_v1  ;;  %v17949_v22 = vld [vmem:[#allocation15_spill] sm:$0xff] }
 0x156   :  { %3208 = vmatpush1.msra.mxu0 %v13060_v59  ;;  %3297 = vmatpush1.msra.mxu1 %v13107_v10 }
 0x157   :  { %3209 = vmatprep.subr.mxu0 %v13155_v28  ;;  %3298 = vmatprep.subr.mxu1 %v13244_v61 }
 0x158   :  { %3210 = vmatpush1.msra.mxu0 %v13071_v62  ;;  %3243 = vmatprep.mubr.f32.mxu0 %v17947_v31 }
 0x159   :  { %3299 = vmatpush1.msra.mxu1 %v13138_v21  ;;  %3332 = vmatprep.mubr.f32.mxu1 %v17947_v31 }
 0x15a   :  { %11287 = vmatmul.mubr.msk.f32.vlgmr.msra.gmra.mxu0 %vm122_vm0, %v13905_v35  ;;  %11291 = vmatmul.mubr.msk.f32.vlgmr.msra.gmra.mxu1 %vm122_vm0, %v13905_v35 }
 0x15b   :  { %3381 = vmatprep.subr.mxu0 %v13274_v24  ;;  %3470 = vmatprep.subr.mxu1 %v13372_v19 }
 0x15c   :  { %3382 = vmatpush1.msra.mxu0 %v13165_v27  ;;  %3471 = vmatpush1.msra.mxu1 %v13278_v26 }
 0x15d   :  { %3383 = vmatprep.subr.mxu0 %v13290_v20  ;;  %3472 = vmatprep.subr.mxu1 %v13382_v58 }
 0x15e   :  { %3249 = vmatprep.mubr.f32.mxu0 %v17947_v31  ;;  %3338 = vmatprep.mubr.f32.mxu1 %v17947_v31 }
 0x15f   :  { %3384 = vmatpush1.msra.mxu0 %v13196_v38  ;;  %3473 = vmatpush1.msra.mxu1 %v13294_v25 }
 0x160   :  { %11288 = vmatmul.mubr.msk.f32.gmra.mxu0 %vm122_vm0, %v13924_v44  ;;  %11292 = vmatmul.mubr.msk.f32.gmra.mxu1 %vm122_vm0, %v13924_v44 }
 0x161   :  { %3385 = vmatprep.subr.mxu0 %v13324_v13  ;;  %3474 = vmatprep.subr.mxu1 %v13414_v54 }
 0x162   :  { %12555 = vset.pattern.permute.xlu1 %v12586_v30  ;;  %3386 = vmatpush1.msra.mxu0 %v13232_v4 }
 0x163   :  { %3475 = vmatpush1.msra.mxu1 %v13328_v53  ;;  %9502 = vperm.xlu1 %12555, %v13941_v40  }
 0x164   :  { %3387 = vmatprep.subr.mxu0 %v13338_v18  ;;  %3476 = vmatprep.subr.mxu1 %v13428_v57 }
 0x165   :  { %3255 = vmatprep.mubr.f32.mxu0 %v17947_v31  ;;  %3344 = vmatprep.mubr.f32.mxu1 %v17947_v31 }
 0x166   :  { %3388 = vmatpush1.msra.mxu0 %v13248_v2  ;;  %3477 = vmatpush1.msra.mxu1 %v13342_v0 }
 0x167   :  { %11289 = vmatmul.mubr.msk.f32.gmra.mxu0 %vm122_vm0, %v13949_v33  ;;  %11293 = vmatmul.mubr.msk.f32.gmra.mxu1 %vm122_vm0, %v13949_v33 }
 0x168   :  { %3559 = vmatprep.subr.mxu0 %v17948_v52  ;;  %3648 = vmatprep.subr.mxu1 %v13551_v41 }
 0x169   :  { %12557 = vset.pattern.permute.xlu1 %v12587_v51  ;;  %3261 = vmatprep.mubr.f32.mxu0 %v17947_v31 }
 0x16a   :  { %9574 = vperm.xlu1 %12557, %v13941_v40   ;;  %3350 = vmatprep.mubr.f32.mxu1 %v17947_v31 }
 0x16b   :  { %11290 = vmatmul.mubr.msk.f32.gmra.mxu0 %vm122_vm0, %v13964_v29  ;;  %11294 = vmatmul.mubr.msk.f32.gmra.mxu1 %vm122_vm0, %v13964_v29 }
 0x16c   :  { %3421 = vmatprep.mubr.f32.mxu0 %v17947_v31  ;;  %3510 = vmatprep.mubr.f32.mxu1 %v17947_v31 }
 0x16d   :  { %12556 = vset.pattern.permute.xlu0 %v12586_v30 }
 0x16e   :  { %12558 = vset.pattern.permute.xlu1 %v12586_v30  ;;  %9498 = vperm.xlu0 %12556, %v13978_v8   ;;  %v17950_v30 = vld [vmem:[#allocation24_spill] sm:$0xff] }
 0x16f   :  { %9494 = vperm.xlu1 %12558, %v13984_v49   ;;  %11295 = vmatmul.mubr.msk.f32.vlgmr.msra.gmra.mxu0 %vm122_vm0, %v13905_v35 }
 0x170   :  { %11299 = vmatmul.mubr.msk.f32.vlgmr.msra.gmra.mxu1 %vm122_vm0, %v13905_v35  ;;  %3560 = vmatpush1.msra.mxu0 %v17949_v22 }
 0x171   :  { %3649 = vmatpush1.msra.mxu1 %v17950_v30  ;;  %3561 = vmatprep.subr.mxu0 %v13472_v43 }
 0x172   :  { %3650 = vmatprep.subr.mxu1 %v13559_v45  ;;  %3562 = vmatpush1.msra.mxu0 %v17951_v32 }
 0x173   :  { %3651 = vmatpush1.msra.mxu1 %v17952_v42  ;;  %3427 = vmatprep.mubr.f32.mxu0 %v17947_v31 }
 0x174   :  { %3516 = vmatprep.mubr.f32.mxu1 %v17947_v31  ;;  %3563 = vmatprep.subr.mxu0 %v17953_v3 }
 0x175   :  { %3652 = vmatprep.subr.mxu1 %v17954_v9  ;;  %9490 = vperm.xlu1 %12558, %v14004_v56  }
 0x176   :  { %11296 = vmatmul.mubr.msk.f32.gmra.mxu0 %vm122_vm0, %v13924_v44  ;;  %11300 = vmatmul.mubr.msk.f32.gmra.mxu1 %vm122_vm0, %v13924_v44 }
 0x177   :  { %3564 = vmatpush1.msra.mxu0 %v17955_v39  ;;  %3653 = vmatpush1.msra.mxu1 %v17956_v36 }
 0x178   :  { %3565 = vmatprep.subr.mxu0 %v17957_v14  ;;  %3654 = vmatprep.subr.mxu1 %v13605_v46 }
 0x179   :  { %3566 = vmatpush1.msra.mxu0 %v17958_v5  ;;  %3655 = vmatpush1.msra.mxu1 %v17959_v60 }
 0x17a   :  { %3433 = vmatprep.mubr.f32.mxu0 %v17947_v31  ;;  %3522 = vmatprep.mubr.f32.mxu1 %v17947_v31 }
 0x17b   :  { %3737 = vmatprep.subr.mxu0 %v17960_v12  ;;  %3838 = vmatprep.subr.mxu1 %v13034_v50  ;;  %v12588_v50 = vmov 6  }
 0x17c   :  { %12560 = vset.pattern.permute.xlu1 %v12587_v51  ;;  %11297 = vmatmul.mubr.msk.f32.gmra.mxu0 %vm122_vm0, %v13949_v33 }
 0x17d   :  { %11301 = vmatmul.mubr.msk.f32.gmra.mxu1 %vm122_vm0, %v13949_v33  ;;  %9566 = vperm.xlu1 %12560, %v13984_v49  }
 0x17e   :  { %3439 = vmatprep.mubr.f32.mxu0 %v17947_v31  ;;  %3528 = vmatprep.mubr.f32.mxu1 %v17947_v31 }
 0x17f   :  { %12559 = vset.pattern.permute.xlu0 %v12587_v51  ;;  %v17961_v51 = vld [vmem:[#allocation31_spill] sm:$0xff] }
 0x180   :  { %11298 = vmatmul.mubr.msk.f32.gmra.mxu0 %vm122_vm0, %v13964_v29  ;;  %9570 = vperm.xlu0 %12559, %v13978_v8  }
 0x181   :  { %11302 = vmatmul.mubr.msk.f32.gmra.mxu1 %vm122_vm0, %v13964_v29  ;;  %12561 = vset.pattern.permute.xlu1 %v12588_v50 }
 0x182   :  { %10540 = vperm.xlu1 %12561, %v13941_v40   ;;  %3599 = vmatprep.mubr.f32.mxu0 %v17947_v31 }
 0x183   :  { %3688 = vmatprep.mubr.f32.mxu1 %v17947_v31 }
 0x184   :  { %11303 = vmatmul.mubr.msk.f32.vlgmr.msra.gmra.mxu0 %vm122_vm0, %v13905_v35  ;;  %9562 = vperm.xlu0 %12559, %v14004_v56  }
 0x185   :  { %11307 = vmatmul.mubr.msk.f32.vlgmr.msra.gmra.mxu1 %vm122_vm0, %v13905_v35  ;;  %3738 = vmatpush1.msra.mxu0 %v17961_v51 }
 0x186   :  { %3839 = vmatpush1.msra.mxu1 %v17962_v17  ;;  %3739 = vmatprep.subr.mxu0 %v13647_v16  ;;  %v17966_v17 = vld [vmem:[#allocation4_spill] sm:$0xff]  ;;  %v17967_v16 = vld [vmem:[#allocation45_spill] sm:$0xff] }
 0x187   :  { %3840 = vmatprep.subr.mxu1 %v13046_v55  ;;  %10532 = vperm.xlu1 %12561, %v13984_v49   ;;  %v17965_v55 = vld [vmem:[#allocation36_spill] sm:$0xff] }
 0x188   :  { %3740 = vmatpush1.msra.mxu0 %v17963_v47  ;;  %3841 = vmatpush1.msra.mxu1 %v17964_v15  ;;  %v17968_v15 = vld [vmem:[#allocation38_spill] sm:$0xff] }
 0x189   :  { %3605 = vmatprep.mubr.f32.mxu0 %v17947_v31  ;;  %3694 = vmatprep.mubr.f32.mxu1 %v17947_v31 }
 0x18a   :  { %3741 = vmatprep.subr.mxu0 %v13677_v48  ;;  %3842 = vmatprep.subr.mxu1 %v13060_v59  ;;  %v17969_v48 = vld [vmem:[#allocation5_spill] sm:$0xff]  ;;  %v12589_v59 = vmov 8  }
 0x18b   :  { %11304 = vmatmul.mubr.msk.f32.gmra.mxu0 %vm122_vm0, %v13924_v44  ;;  %11308 = vmatmul.mubr.msk.f32.gmra.mxu1 %vm122_vm0, %v13924_v44 }
 0x18c   :  { %3742 = vmatpush1.msra.mxu0 %v17965_v55  ;;  %3843 = vmatpush1.msra.mxu1 %v17966_v17 }
 0x18d   :  { %3743 = vmatprep.subr.mxu0 %v17967_v16  ;;  %3844 = vmatprep.subr.mxu1 %v13071_v62  ;;  %v17768_v62 = vmov 9  }
 0x18e   :  { %10528 = vperm.xlu1 %12561, %v14004_v56   ;;  %3744 = vmatpush1.msra.mxu0 %v17968_v15 }
 0x18f   :  { %3845 = vmatpush1.msra.mxu1 %v17969_v48  ;;  %3611 = vmatprep.mubr.f32.mxu0 %v17947_v31  ;;  %v14085_v48 = vld [vmem:[%s17679_s1 + $0x2a0] sm:$0xff] }
 0x190   :  { %3700 = vmatprep.mubr.f32.mxu1 %v17947_v31  ;;  %3927 = vmatprep.subr.mxu0 %v13074_v63 }
 0x191   :  { %4016 = vmatprep.subr.mxu1 %v13165_v27  ;;  %11305 = vmatmul.mubr.msk.f32.gmra.mxu0 %vm122_vm0, %v13949_v33 }
 0x192   :  { %11309 = vmatmul.mubr.msk.f32.gmra.mxu1 %vm122_vm0, %v13949_v33  ;;  %12564 = vset.pattern.permute.xlu1 %v12589_v59 }
 0x193   :  { %10788 = vperm.xlu1 %12564, %v13978_v8   ;;  %3617 = vmatprep.mubr.f32.mxu0 %v17947_v31 }
 0x194   :  { %3706 = vmatprep.mubr.f32.mxu1 %v17947_v31  ;;  %12562 = vset.pattern.permute.xlu0 %v12588_v50 }
 0x195   :  { %11306 = vmatmul.mubr.msk.f32.gmra.mxu0 %vm122_vm0, %v13964_v29  ;;  %10536 = vperm.xlu0 %12562, %v13978_v8  }
 0x196   :  { %11310 = vmatmul.mubr.msk.f32.gmra.mxu1 %vm122_vm0, %v13964_v29  ;;  %3777 = vmatprep.mubr.f32.mxu0 %v17947_v31 }
 0x197   :  { %12565 = vset.pattern.permute.xlu1 %v17768_v62  ;;  %3878 = vmatprep.mubr.f32.mxu1 %v17947_v31 }
 0x198   :  { %10816 = vperm.xlu1 %12565, %v13941_v40  }
 0x199   :  { %11311 = vmatmul.mubr.msk.f32.vlgmr.msra.gmra.mxu0 %vm122_vm0, %v13905_v35  ;;  %12563 = vset.pattern.permute.xlu0 %v12589_v59  ;;  %v14102_v35 = vld [vmem:[%s17679_s1 + $0x2a8] sm:$0xff] }
 0x19a   :  { %11315 = vmatmul.mubr.msk.f32.vlgmr.msra.gmra.mxu1 %vm122_vm0, %v14085_v48  ;;  %3928 = vmatpush1.msra.mxu0 %v13098_v7 }
 0x19b   :  { %4017 = vmatpush1.msra.mxu1 %v13182_v34  ;;  %3929 = vmatprep.subr.mxu0 %v13095_v6 }
 0x19c   :  { %4018 = vmatprep.subr.mxu1 %v13196_v38  ;;  %3930 = vmatpush1.msra.mxu0 %v13110_v11 }
 0x19d   :  { %4019 = vmatpush1.msra.mxu1 %v13193_v37  ;;  %3783 = vmatprep.mubr.f32.mxu0 %v17947_v31 }
 0x19e   :  { %3884 = vmatprep.mubr.f32.mxu1 %v17947_v31  ;;  %3931 = vmatprep.subr.mxu0 %v13107_v10 }
 0x19f   :  { %4020 = vmatprep.subr.mxu1 %v13232_v4  ;;  %10812 = vperm.xlu1 %12565, %v13978_v8  }
 0x1a0   :  { %11312 = vmatmul.mubr.msk.f32.gmra.mxu0 %vm122_vm0, %v13924_v44  ;;  %11316 = vmatmul.mubr.msk.f32.gmra.mxu1 %vm122_vm0, %v14102_v35  ;;  %v14123_v44 = vld [vmem:[%s17679_s1 + $0x2b0] sm:$0xff] }
 0x1a1   :  { %3932 = vmatpush1.msra.mxu0 %v13142_v23  ;;  %4021 = vmatpush1.msra.mxu1 %v13228_v1 }
 0x1a2   :  { %10792 = vperm.xlu0 %12563, %v13941_v40   ;;  %3933 = vmatprep.subr.mxu0 %v13138_v21  ;;  %v12031_v50 = vpop.f32.mrf.mxu1 }
 0x1a3   :  { %4022 = vmatprep.subr.mxu1 %v13248_v2  ;;  %3934 = vmatpush1.msra.mxu0 %v13155_v28  ;;  %v12017_v17 = vpop.f32.mrf.mxu0 }
 0x1a4   :  { %4023 = vmatpush1.msra.mxu1 %v13244_v61  ;;  %3789 = vmatprep.mubr.f32.mxu0 %v17947_v31  ;;  %v1216_v59 = vadd.f32 %v12031_v50, %v12017_v17  ;;  %v14129_v16 = vpop.f32.mrf.mxu1  ;;  %v14142_v50 = vld [vmem:[%s17679_s1 + $0x2b8] sm:$0xff] }
 0x1a5   :  { %3890 = vmatprep.mubr.f32.mxu1 %v17947_v31  ;;  %4105 = vmatprep.subr.mxu0 %v13278_v26  ;;  %v14127_v62 = vpop.f32.mrf.mxu0  ;;  %17971 = vst [vmem:[#allocation3_spill] sm:$0xff] %v14129_v16 }
 0x1a6   :  { %17970 = vst [vmem:[#allocation2_spill] sm:$0xff] %v14127_v62  ;;  %4194 = vmatprep.subr.mxu1 %v17949_v22  ;;  %10808 = vperm.xlu1 %12565, %v13984_v49   ;;  %v12591_v62 = vmov 1  }
 0x1a7   :  { %11313 = vmatmul.mubr.msk.f32.gmra.mxu0 %vm122_vm0, %v13949_v33  ;;  %11317 = vmatmul.mubr.msk.f32.gmra.mxu1 %vm122_vm0, %v14123_v44 }
 0x1a8   :  { %10784 = vperm.xlu0 %12563, %v13984_v49   ;;  %3795 = vmatprep.mubr.f32.mxu0 %v17947_v31 }
 0x1a9   :  { %3896 = vmatprep.mubr.f32.mxu1 %v17947_v31  ;;  %v12020_v17 = vpop.f32.mrf.mxu0  ;;  %v12034_v16 = vpop.f32.mrf.mxu1 }
 0x1aa   :  { %12567 = vset.pattern.permute.xlu1 %v12591_v62  ;;  %v1226_v12 = vadd.f32 %v12034_v16, %v12020_v17 }
 0x1ab   :  { %11314 = vmatmul.mubr.msk.f32.gmra.mxu0 %vm122_vm0, %v13964_v29  ;;  %11318 = vmatmul.mubr.msk.f32.gmra.mxu1 %vm122_vm0, %v14142_v50  ;;  %v14149_v33 = vpop.f32.mrf.mxu0  ;;  %v14151_v22 = vpop.f32.mrf.mxu1 }
 0x1ac   :  { %17972 = vst [vmem:[#allocation4_spill] sm:$0xff] %v14149_v33  ;;  %17973 = vst [vmem:[#allocation5_spill] sm:$0xff] %v14151_v22  ;;  %10780 = vperm.xlu0 %12563, %v14004_v56   ;;  %3138 = vperm.xlu1 %12567, %v14004_v56   ;;  %v17976_v33 = vmov 9  }
 0x1ad   :  { %3967 = vmatprep.mubr.f32.mxu0 %v17947_v31  ;;  %4056 = vmatprep.mubr.f32.mxu1 %v17947_v31 }
 0x1ae   :  { %v12045_v26 = vpop.f32.mrf.mxu0  ;;  %v12059_v16 = vpop.f32.mrf.mxu1 }
 0x1af   :  { %11319 = vmatmul.mubr.msk.f32.vlgmr.msra.gmra.mxu0 %vm122_vm0, %v14085_v48  ;;  %11323 = vmatmul.mubr.msk.f32.vlgmr.msra.gmra.mxu1 %vm122_vm0, %v14085_v48  ;;  %v1332_v29 = vadd.f32 %v12045_v26, %v1216_v59 }
 0x1b0   :  { %4106 = vmatpush1.msra.mxu0 %v13274_v24  ;;  %4195 = vmatpush1.msra.mxu1 %v13372_v19  ;;  %v14163_v17 = vpop.f32.mrf.mxu0  ;;  %v14165_v22 = vpop.f32.mrf.mxu1 }
 0x1b1   :  { %17974 = vst [vmem:[#allocation63_spill] sm:$0xff] %v14163_v17  ;;  %17975 = vst [vmem:[#allocation64_spill] sm:$0xff] %v14165_v22  ;;  %12566 = vset.pattern.permute.xlu0 %v17976_v33  ;;  %3142 = vperm.xlu1 %12567, %v13984_v49   ;;  %v1438_v61 = vadd.f32 %v12059_v16, %v1332_v29  ;;  %v14517_v17 = vld [vmem:[%s17679_s1 + $0x300] sm:$0xff] }
 0x1b2   :  { %4107 = vmatprep.subr.mxu0 %v13294_v25  ;;  %4196 = vmatprep.subr.mxu1 %v17951_v32 }
 0x1b3   :  { %10804 = vperm.xlu0 %12566, %v14004_v56   ;;  %4108 = vmatpush1.msra.mxu0 %v13290_v20 }
 0x1b4   :  { %4197 = vmatpush1.msra.mxu1 %v13382_v58  ;;  %3973 = vmatprep.mubr.f32.mxu0 %v17947_v31  ;;  %v12048_v26 = vpop.f32.mrf.mxu0  ;;  %v12062_v59 = vpop.f32.mrf.mxu1 }
 0x1b5   :  { %4062 = vmatprep.mubr.f32.mxu1 %v17947_v31  ;;  %4109 = vmatprep.subr.mxu0 %v13328_v53  ;;  %v1334_v49 = vadd.f32 %v12048_v26, %v1226_v12 }
 0x1b6   :  { %4198 = vmatprep.subr.mxu1 %v17955_v39  ;;  %11320 = vmatmul.mubr.msk.f32.gmra.mxu0 %vm122_vm0, %v14102_v35  ;;  %v14180_v33 = vpop.f32.mrf.mxu0  ;;  %v14182_v56 = vpop.f32.mrf.mxu1 }
 0x1b7   :  { %17977 = vst [vmem:[#allocation65_spill] sm:$0xff] %v14180_v33  ;;  %17978 = vst [vmem:[#allocation66_spill] sm:$0xff] %v14182_v56  ;;  %11324 = vmatmul.mubr.msk.f32.gmra.mxu1 %vm122_vm0, %v14102_v35  ;;  %4110 = vmatpush1.msra.mxu0 %v13324_v13  ;;  %v1440_v16 = vadd.f32 %v12062_v59, %v1334_v49 }
 0x1b8   :  { %4199 = vmatpush1.msra.mxu1 %v13414_v54  ;;  %3150 = vperm.xlu1 %12567, %v13941_v40  }
 0x1b9   :  { %4111 = vmatprep.subr.mxu0 %v13342_v0  ;;  %4200 = vmatprep.subr.mxu1 %v17958_v5 }
 0x1ba   :  { %12568 = vset.pattern.permute.xlu0 %v12591_v62  ;;  %4112 = vmatpush1.msra.mxu0 %v13338_v18  ;;  %v12073_v12 = vpop.f32.mrf.mxu0  ;;  %v12087_v29 = vpop.f32.mrf.mxu1 }
 0x1bb   :  { %4201 = vmatpush1.msra.mxu1 %v13428_v57  ;;  %3146 = vperm.xlu0 %12568, %v13978_v8   ;;  %v1544_v26 = vadd.f32 %v12073_v12, %v1438_v61 }
 0x1bc   :  { %3979 = vmatprep.mubr.f32.mxu0 %v17947_v31  ;;  %4068 = vmatprep.mubr.f32.mxu1 %v17947_v31  ;;  %v14196_v59 = vpop.f32.mrf.mxu0  ;;  %v14198_v40 = vpop.f32.mrf.mxu1 }
 0x1bd   :  { %17979 = vst [vmem:[#allocation67_spill] sm:$0xff] %v14196_v59  ;;  %17980 = vst [vmem:[#allocation68_spill] sm:$0xff] %v14198_v40  ;;  %4283 = vmatprep.subr.mxu0 %v17950_v30  ;;  %4372 = vmatprep.subr.mxu1 %v17961_v51  ;;  %v1650_v62 = vadd.f32 %v12087_v29, %v1544_v26 }
 0x1be   :  { %11321 = vmatmul.mubr.msk.f32.gmra.mxu0 %vm122_vm0, %v14123_v44  ;;  %11325 = vmatmul.mubr.msk.f32.gmra.mxu1 %vm122_vm0, %v14123_v44 }
 0x1bf   :  { %3985 = vmatprep.mubr.f32.mxu0 %v17947_v31  ;;  %4074 = vmatprep.mubr.f32.mxu1 %v17947_v31 }
 0x1c0   :  { %v12076_v61 = vpop.f32.mrf.mxu0  ;;  %v12090_v8 = vpop.f32.mrf.mxu1 }
 0x1c1   :  { %v1546_v49 = vadd.f32 %v12076_v61, %v1440_v16 }
 0x1c2   :  { %11322 = vmatmul.mubr.msk.f32.gmra.mxu0 %vm122_vm0, %v14142_v50  ;;  %11326 = vmatmul.mubr.msk.f32.gmra.mxu1 %vm122_vm0, %v14142_v50  ;;  %v14212_v12 = vpop.f32.mrf.mxu0  ;;  %v14214_v29 = vpop.f32.mrf.mxu1 }
 0x1c3   :  { %17981 = vst [vmem:[#allocation69_spill] sm:$0xff] %v14212_v12  ;;  %17982 = vst [vmem:[#allocation70_spill] sm:$0xff] %v14214_v29  ;;  %4145 = vmatprep.mubr.f32.mxu0 %v17947_v31  ;;  %4234 = vmatprep.mubr.f32.mxu1 %v17947_v31  ;;  %v1652_v26 = vadd.f32 %v12090_v8, %v1546_v49 }
 0x1c6   :  { %11327 = vmatmul.mubr.msk.f32.vlgmr.msra.gmra.mxu0 %vm122_vm0, %v14085_v48  ;;  %11331 = vmatmul.mubr.msk.f32.vlgmr.msra.gmra.mxu1 %vm122_vm0, %v14085_v48  ;;  %v12101_v16 = vpop.f32.mrf.mxu0  ;;  %v12115_v61 = vpop.f32.mrf.mxu1 }
 0x1c7   :  { %4284 = vmatpush1.msra.mxu0 %v17948_v52  ;;  %4373 = vmatpush1.msra.mxu1 %v13551_v41  ;;  %v1756_v12 = vadd.f32 %v12101_v16, %v1650_v62 }
 0x1c8   :  { %4285 = vmatprep.subr.mxu0 %v17952_v42  ;;  %4374 = vmatprep.subr.mxu1 %v17963_v47  ;;  %v14226_v29 = vpop.f32.mrf.mxu0  ;;  %v14228_v8 = vpop.f32.mrf.mxu1 }
 0x1c9   :  { %17983 = vst [vmem:[#allocation71_spill] sm:$0xff] %v14226_v29  ;;  %17984 = vst [vmem:[#allocation72_spill] sm:$0xff] %v14228_v8  ;;  %4286 = vmatpush1.msra.mxu0 %v13472_v43  ;;  %4375 = vmatpush1.msra.mxu1 %v13559_v45  ;;  %v1862_v49 = vadd.f32 %v12115_v61, %v1756_v12 }
 0x1ca   :  { %4151 = vmatprep.mubr.f32.mxu0 %v17947_v31  ;;  %4240 = vmatprep.mubr.f32.mxu1 %v17947_v31 }
 0x1cb   :  { %4287 = vmatprep.subr.mxu0 %v17956_v36  ;;  %4376 = vmatprep.subr.mxu1 %v17965_v55 }
 0x1cc   :  { %11328 = vmatmul.mubr.msk.f32.gmra.mxu0 %vm122_vm0, %v14102_v35  ;;  %11332 = vmatmul.mubr.msk.f32.gmra.mxu1 %vm122_vm0, %v14102_v35  ;;  %v12104_v62 = vpop.f32.mrf.mxu0  ;;  %v12118_v16 = vpop.f32.mrf.mxu1 }
 0x1cd   :  { %4288 = vmatpush1.msra.mxu0 %v17953_v3  ;;  %4377 = vmatpush1.msra.mxu1 %v17954_v9  ;;  %v1758_v12 = vadd.f32 %v12104_v62, %v1652_v26 }
 0x1ce   :  { %4289 = vmatprep.subr.mxu0 %v17959_v60  ;;  %4378 = vmatprep.subr.mxu1 %v17968_v15  ;;  %v14244_v61 = vpop.f32.mrf.mxu0  ;;  %v14246_v8 = vpop.f32.mrf.mxu1 }
 0x1cf   :  { %17985 = vst [vmem:[#allocation73_spill] sm:$0xff] %v14244_v61  ;;  %17986 = vst [vmem:[#allocation74_spill] sm:$0xff] %v14246_v8  ;;  %4290 = vmatpush1.msra.mxu0 %v17957_v14  ;;  %4379 = vmatpush1.msra.mxu1 %v13605_v46  ;;  %v1864_v29 = vadd.f32 %v12118_v16, %v1758_v12 }
 0x1d0   :  { %4157 = vmatprep.mubr.f32.mxu0 %v17947_v31  ;;  %4246 = vmatprep.mubr.f32.mxu1 %v17947_v31 }
 0x1d1   :  { %4478 = vmatprep.subr.mxu0 %v13074_v63  ;;  %4567 = vmatprep.subr.mxu1 %v13165_v27 }
 0x1d2   :  { %11329 = vmatmul.mubr.msk.f32.gmra.mxu0 %vm122_vm0, %v14123_v44  ;;  %11333 = vmatmul.mubr.msk.f32.gmra.mxu1 %vm122_vm0, %v14123_v44  ;;  %v12129_v26 = vpop.f32.mrf.mxu0  ;;  %v12143_v62 = vpop.f32.mrf.mxu1 }
 0x1d3   :  { %4163 = vmatprep.mubr.f32.mxu0 %v17947_v31  ;;  %4252 = vmatprep.mubr.f32.mxu1 %v17947_v31  ;;  %v1968_v16 = vadd.f32 %v12129_v26, %v1862_v49 }
 0x1d4   :  { %v14260_v12 = vpop.f32.mrf.mxu0  ;;  %v14262_v8 = vpop.f32.mrf.mxu1 }
 0x1d5   :  { %17987 = vst [vmem:[#allocation75_spill] sm:$0xff] %v14260_v12  ;;  %17988 = vst [vmem:[#allocation76_spill] sm:$0xff] %v14262_v8  ;;  %v2074_v61 = vadd.f32 %v12143_v62, %v1968_v16  ;;  %v17995_v16 = vld [vmem:[#allocation15_spill] sm:$0xff]  ;;  %v18026_v12 = vld [vmem:[#allocation45_spill] sm:$0xff] }
 0x1d6   :  { %11330 = vmatmul.mubr.msk.f32.gmra.mxu0 %vm122_vm0, %v14142_v50  ;;  %11334 = vmatmul.mubr.msk.f32.gmra.mxu1 %vm122_vm0, %v14142_v50 }
 0x1d7   :  { %4323 = vmatprep.mubr.f32.mxu0 %v17947_v31  ;;  %4412 = vmatprep.mubr.f32.mxu1 %v17947_v31 }
 0x1d8   :  { %v12132_v40 = vpop.f32.mrf.mxu0  ;;  %v12146_v56 = vpop.f32.mrf.mxu1 }
 0x1d9   :  { %v1970_v59 = vadd.f32 %v12132_v40, %v1864_v29  ;;  %v17993_v29 = vld [vmem:[#allocation6_spill] sm:$0xff] }
 0x1da   :  { %11335 = vmatmul.mubr.msk.f32.vlgmr.msra.gmra.mxu0 %vm122_vm0, %v14085_v48  ;;  %11339 = vmatmul.mubr.msk.f32.vlgmr.msra.gmra.mxu1 %vm122_vm0, %v14085_v48  ;;  %v14274_v49 = vpop.f32.mrf.mxu0  ;;  %v14278_v62 = vpop.f32.mrf.mxu1 }
 0x1db   :  { %17989 = vst [vmem:[#allocation77_spill] sm:$0xff] %v14274_v49  ;;  %4479 = vmatpush1.msra.mxu0 %v13098_v7  ;;  %4568 = vmatpush1.msra.mxu1 %v13182_v34  ;;  %v2076_v26 = vadd.f32 %v12146_v56, %v1970_v59  ;;  %17990 = vst [vmem:[#allocation78_spill] sm:$0xff] %v14278_v62 }
 0x1dc   :  { %4480 = vmatprep.subr.mxu0 %v13095_v6  ;;  %4569 = vmatprep.subr.mxu1 %v13196_v38 }
 0x1dd   :  { %4481 = vmatpush1.msra.mxu0 %v13110_v11  ;;  %4570 = vmatpush1.msra.mxu1 %v13193_v37 }
 0x1de   :  { %4329 = vmatprep.mubr.f32.mxu0 %v17947_v31  ;;  %4418 = vmatprep.mubr.f32.mxu1 %v17947_v31  ;;  %v12157_v48 = vpop.f32.mrf.mxu0  ;;  %v12171_v56 = vpop.f32.mrf.mxu1 }
 0x1df   :  { %4482 = vmatprep.subr.mxu0 %v13107_v10  ;;  %4571 = vmatprep.subr.mxu1 %v13232_v4  ;;  %v2180_v7 = vadd.f32 %v12157_v48, %v2074_v61 }
 0x1e0   :  { %11336 = vmatmul.mubr.msk.f32.gmra.mxu0 %vm122_vm0, %v14102_v35  ;;  %11340 = vmatmul.mubr.msk.f32.gmra.mxu1 %vm122_vm0, %v14102_v35  ;;  %v14292_v11 = vpop.f32.mrf.mxu0  ;;  %v14296_v40 = vpop.f32.mrf.mxu1 }
 0x1e1   :  { %17991 = vst [vmem:[#allocation79_spill] sm:$0xff] %v14292_v11  ;;  %4483 = vmatpush1.msra.mxu0 %v13142_v23  ;;  %4572 = vmatpush1.msra.mxu1 %v13228_v1  ;;  %v2286_v59 = vadd.f32 %v12171_v56, %v2180_v7  ;;  %17992 = vst [vmem:[#allocation80_spill] sm:$0xff] %v14296_v40  ;;  %v17994_v23 = vld [vmem:[#allocation8_spill] sm:$0xff] }
 0x1e2   :  { %4484 = vmatprep.subr.mxu0 %v13138_v21  ;;  %4573 = vmatprep.subr.mxu1 %v13248_v2  ;;  %v18010_v11 = vld [vmem:[#allocation40_spill] sm:$0xff] }
 0x1e3   :  { %4485 = vmatpush1.msra.mxu0 %v13155_v28  ;;  %4574 = vmatpush1.msra.mxu1 %v17993_v29 }
 0x1e4   :  { %4335 = vmatprep.mubr.f32.mxu0 %v17947_v31  ;;  %4424 = vmatprep.mubr.f32.mxu1 %v17947_v31  ;;  %v12160_v35 = vpop.f32.mrf.mxu0  ;;  %v12174_v61 = vpop.f32.mrf.mxu1 }
 0x1e5   :  { %4656 = vmatprep.subr.mxu0 %v17994_v23  ;;  %4745 = vmatprep.subr.mxu1 %v17995_v16  ;;  %v2182_v48 = vadd.f32 %v12160_v35, %v2076_v26 }
 0x1e6   :  { %11337 = vmatmul.mubr.msk.f32.gmra.mxu0 %vm122_vm0, %v14123_v44  ;;  %11341 = vmatmul.mubr.msk.f32.gmra.mxu1 %vm122_vm0, %v14123_v44  ;;  %v14310_v28 = vpop.f32.mrf.mxu0  ;;  %v14314_v56 = vpop.f32.mrf.mxu1  ;;  %v14325_v44 = vld [vmem:[%s17679_s1 + $0x2e0] sm:$0xff] }
 0x1e7   :  { %17996 = vst [vmem:[#allocation6_spill] sm:$0xff] %v14310_v28  ;;  %4341 = vmatprep.mubr.f32.mxu0 %v17947_v31  ;;  %4430 = vmatprep.mubr.f32.mxu1 %v17947_v31  ;;  %v2288_v7 = vadd.f32 %v12174_v61, %v2182_v48  ;;  %17997 = vst [vmem:[#allocation81_spill] sm:$0xff] %v14314_v56 }
 0x1ea   :  { %11338 = vmatmul.mubr.msk.f32.gmra.mxu0 %vm122_vm0, %v14142_v50  ;;  %11342 = vmatmul.mubr.msk.f32.gmra.mxu1 %vm122_vm0, %v14142_v50  ;;  %v12185_v26 = vpop.f32.mrf.mxu0  ;;  %v12199_v61 = vpop.f32.mrf.mxu1 }
 0x1eb   :  { %4518 = vmatprep.mubr.f32.mxu0 %v17947_v31  ;;  %4607 = vmatprep.mubr.f32.mxu1 %v17947_v31  ;;  %v2392_v35 = vadd.f32 %v12185_v26, %v2286_v59  ;;  %v14344_v59 = vld [vmem:[%s17679_s1 + $0x2e8] sm:$0xff] }
 0x1ec   :  { %v14327_v48 = vpop.f32.mrf.mxu0  ;;  %v14329_v28 = vpop.f32.mrf.mxu1 }
 0x1ed   :  { %17998 = vst [vmem:[#allocation82_spill] sm:$0xff] %v14327_v48  ;;  %v2498_v56 = vadd.f32 %v12199_v61, %v2392_v35  ;;  %17999 = vst [vmem:[#allocation83_spill] sm:$0xff] %v14329_v28 }
 0x1ee   :  { %11347 = vmatmul.mubr.msk.f32.vlgmr.msra.gmra.mxu0 %vm122_vm0, %v14325_v44  ;;  %11351 = vmatmul.mubr.msk.f32.vlgmr.msra.gmra.mxu1 %vm122_vm0, %v14325_v44 }
 0x1ef   :  { %4657 = vmatpush1.msra.mxu0 %v13274_v24  ;;  %4746 = vmatpush1.msra.mxu1 %v13372_v19 }
 0x1f0   :  { %4658 = vmatprep.subr.mxu0 %v13294_v25  ;;  %4747 = vmatprep.subr.mxu1 %v17951_v32  ;;  %v12188_v50 = vpop.f32.mrf.mxu0  ;;  %v12202_v35 = vpop.f32.mrf.mxu1 }
 0x1f1   :  { %4659 = vmatpush1.msra.mxu0 %v13290_v20  ;;  %4748 = vmatpush1.msra.mxu1 %v13382_v58  ;;  %v2394_v26 = vadd.f32 %v12188_v50, %v2288_v7 }
 0x1f2   :  { %4524 = vmatprep.mubr.f32.mxu0 %v17947_v31  ;;  %4613 = vmatprep.mubr.f32.mxu1 %v17947_v31  ;;  %v14348_v61 = vpop.f32.mrf.mxu0  ;;  %v14352_v48 = vpop.f32.mrf.mxu1 }
 0x1f3   :  { %18000 = vst [vmem:[#allocation84_spill] sm:$0xff] %v14348_v61  ;;  %4660 = vmatprep.subr.mxu0 %v13328_v53  ;;  %4749 = vmatprep.subr.mxu1 %v17955_v39  ;;  %v2500_v28 = vadd.f32 %v12202_v35, %v2394_v26  ;;  %18001 = vst [vmem:[#allocation85_spill] sm:$0xff] %v14352_v48  ;;  %v14367_v26 = vld [vmem:[%s17679_s1 + $0x2f0] sm:$0xff] }
 0x1f4   :  { %11348 = vmatmul.mubr.msk.f32.gmra.mxu0 %vm122_vm0, %v14344_v59  ;;  %11352 = vmatmul.mubr.msk.f32.gmra.mxu1 %vm122_vm0, %v14344_v59 }
 0x1f5   :  { %4661 = vmatpush1.msra.mxu0 %v13324_v13  ;;  %4750 = vmatpush1.msra.mxu1 %v13414_v54 }
 0x1f6   :  { %4662 = vmatprep.subr.mxu0 %v13342_v0  ;;  %4751 = vmatprep.subr.mxu1 %v17958_v5  ;;  %v12213_v7 = vpop.f32.mrf.mxu0  ;;  %v12227_v50 = vpop.f32.mrf.mxu1 }
 0x1f7   :  { %4663 = vmatpush1.msra.mxu0 %v13338_v18  ;;  %4752 = vmatpush1.msra.mxu1 %v13428_v57  ;;  %v2604_v35 = vadd.f32 %v12213_v7, %v2498_v56  ;;  %v14386_v56 = vld [vmem:[%s17679_s1 + $0x2f8] sm:$0xff] }
 0x1f8   :  { %4530 = vmatprep.mubr.f32.mxu0 %v17947_v31  ;;  %4619 = vmatprep.mubr.f32.mxu1 %v17947_v31  ;;  %v14371_v48 = vpop.f32.mrf.mxu0  ;;  %v14375_v40 = vpop.f32.mrf.mxu1 }
 0x1f9   :  { %18002 = vst [vmem:[#allocation86_spill] sm:$0xff] %v14371_v48  ;;  %4834 = vmatprep.subr.mxu0 %v17950_v30  ;;  %4923 = vmatprep.subr.mxu1 %v17961_v51  ;;  %v2710_v61 = vadd.f32 %v12227_v50, %v2604_v35  ;;  %18003 = vst [vmem:[#allocation87_spill] sm:$0xff] %v14375_v40 }
 0x1fa   :  { %11349 = vmatmul.mubr.msk.f32.gmra.mxu0 %vm122_vm0, %v14367_v26  ;;  %11353 = vmatmul.mubr.msk.f32.gmra.mxu1 %vm122_vm0, %v14367_v26 }
 0x1fb   :  { %4536 = vmatprep.mubr.f32.mxu0 %v17947_v31  ;;  %4625 = vmatprep.mubr.f32.mxu1 %v17947_v31 }
 0x1fc   :  { %v12216_v7 = vpop.f32.mrf.mxu0  ;;  %v12230_v48 = vpop.f32.mrf.mxu1 }
 0x1fd   :  { %v2606_v50 = vadd.f32 %v12216_v7, %v2500_v28 }
 0x1fe   :  { %11350 = vmatmul.mubr.msk.f32.gmra.mxu0 %vm122_vm0, %v14386_v56  ;;  %11354 = vmatmul.mubr.msk.f32.gmra.mxu1 %vm122_vm0, %v14386_v56  ;;  %v14392_v35 = vpop.f32.mrf.mxu0  ;;  %v14396_v62 = vpop.f32.mrf.mxu1 }
 0x1ff   :  { %18004 = vst [vmem:[#allocation88_spill] sm:$0xff] %v14392_v35  ;;  %4696 = vmatprep.mubr.f32.mxu0 %v17947_v31  ;;  %4785 = vmatprep.mubr.f32.mxu1 %v17947_v31  ;;  %v2712_v40 = vadd.f32 %v12230_v48, %v2606_v50  ;;  %18005 = vst [vmem:[#allocation89_spill] sm:$0xff] %v14396_v62 }
 0x202   :  { %11355 = vmatmul.mubr.msk.f32.vlgmr.msra.gmra.mxu0 %vm122_vm0, %v14325_v44  ;;  %11359 = vmatmul.mubr.msk.f32.vlgmr.msra.gmra.mxu1 %vm122_vm0, %v14325_v44  ;;  %v12241_v28 = vpop.f32.mrf.mxu0  ;;  %v12255_v35 = vpop.f32.mrf.mxu1 }
 0x203   :  { %4835 = vmatpush1.msra.mxu0 %v17948_v52  ;;  %4924 = vmatpush1.msra.mxu1 %v13551_v41  ;;  %v2816_v7 = vadd.f32 %v12241_v28, %v2710_v61 }
 0x204   :  { %4836 = vmatprep.subr.mxu0 %v17952_v42  ;;  %4925 = vmatprep.subr.mxu1 %v17963_v47  ;;  %v14406_v48 = vpop.f32.mrf.mxu0  ;;  %v14410_v62 = vpop.f32.mrf.mxu1 }
 0x205   :  { %18006 = vst [vmem:[#allocation90_spill] sm:$0xff] %v14406_v48  ;;  %4837 = vmatpush1.msra.mxu0 %v13472_v43  ;;  %4926 = vmatpush1.msra.mxu1 %v13559_v45  ;;  %v2922_v50 = vadd.f32 %v12255_v35, %v2816_v7  ;;  %18007 = vst [vmem:[#allocation91_spill] sm:$0xff] %v14410_v62 }
 0x206   :  { %4702 = vmatprep.mubr.f32.mxu0 %v17947_v31  ;;  %4791 = vmatprep.mubr.f32.mxu1 %v17947_v31 }
 0x207   :  { %4838 = vmatprep.subr.mxu0 %v17956_v36  ;;  %4927 = vmatprep.subr.mxu1 %v17965_v55 }
 0x208   :  { %11356 = vmatmul.mubr.msk.f32.gmra.mxu0 %vm122_vm0, %v14344_v59  ;;  %11360 = vmatmul.mubr.msk.f32.gmra.mxu1 %vm122_vm0, %v14344_v59  ;;  %v12244_v61 = vpop.f32.mrf.mxu0  ;;  %v12258_v28 = vpop.f32.mrf.mxu1 }
 0x209   :  { %4839 = vmatpush1.msra.mxu0 %v17953_v3  ;;  %4928 = vmatpush1.msra.mxu1 %v17954_v9  ;;  %v2818_v35 = vadd.f32 %v12244_v61, %v2712_v40 }
 0x20a   :  { %4840 = vmatprep.subr.mxu0 %v17959_v60  ;;  %4929 = vmatprep.subr.mxu1 %v17968_v15  ;;  %v14424_v7 = vpop.f32.mrf.mxu0  ;;  %v14428_v48 = vpop.f32.mrf.mxu1 }
 0x20b   :  { %18008 = vst [vmem:[#allocation92_spill] sm:$0xff] %v14424_v7  ;;  %4841 = vmatpush1.msra.mxu0 %v17957_v14  ;;  %4930 = vmatpush1.msra.mxu1 %v13605_v46  ;;  %v2924_v62 = vadd.f32 %v12258_v28, %v2818_v35  ;;  %18009 = vst [vmem:[#allocation93_spill] sm:$0xff] %v14428_v48 }
 0x20c   :  { %4708 = vmatprep.mubr.f32.mxu0 %v17947_v31  ;;  %4797 = vmatprep.mubr.f32.mxu1 %v17947_v31 }
 0x20d   :  { %5012 = vmatprep.subr.mxu0 %v18010_v11  ;;  %5174 = vmatprep.subr.mxu1 %v13182_v34 }
 0x20e   :  { %11357 = vmatmul.mubr.msk.f32.gmra.mxu0 %vm122_vm0, %v14367_v26  ;;  %11361 = vmatmul.mubr.msk.f32.gmra.mxu1 %vm122_vm0, %v14367_v26  ;;  %v12269_v40 = vpop.f32.mrf.mxu0  ;;  %v12283_v28 = vpop.f32.mrf.mxu1 }
 0x20f   :  { %4714 = vmatprep.mubr.f32.mxu0 %v17947_v31  ;;  %4803 = vmatprep.mubr.f32.mxu1 %v17947_v31  ;;  %v3028_v61 = vadd.f32 %v12269_v40, %v2922_v50 }
 0x210   :  { %v14440_v35 = vpop.f32.mrf.mxu0  ;;  %v14444_v7 = vpop.f32.mrf.mxu1 }
 0x211   :  { %18011 = vst [vmem:[#allocation94_spill] sm:$0xff] %v14440_v35  ;;  %v14442_v48 = vadd.f32 %v12283_v28, %v3028_v61  ;;  %18013 = vst [vmem:[#allocation96_spill] sm:$0xff] %v14444_v7  ;;  %v18015_v61 = vld [vmem:[#allocation39_spill] sm:$0xff]  ;;  %v18018_v35 = vld [vmem:[#allocation42_spill] sm:$0xff] }
 0x212   :  { %11358 = vmatmul.mubr.msk.f32.gmra.mxu0 %vm122_vm0, %v14386_v56  ;;  %11362 = vmatmul.mubr.msk.f32.gmra.mxu1 %vm122_vm0, %v14386_v56 }
 0x213   :  { %18012 = vst [vmem:[#allocation95_spill] sm:$0xff] %v14442_v48  ;;  %4874 = vmatprep.mubr.f32.mxu0 %v17947_v31  ;;  %4963 = vmatprep.mubr.f32.mxu1 %v17947_v31 }
 0x214   :  { %v12272_v49 = vpop.f32.mrf.mxu0  ;;  %v12286_v8 = vpop.f32.mrf.mxu1 }
 0x215   :  { %v3030_v50 = vadd.f32 %v12272_v49, %v2924_v62  ;;  %v18019_v49 = vld [vmem:[#allocation41_spill] sm:$0xff] }
 0x216   :  { %11363 = vmatmul.mubr.msk.f32.vlgmr.msra.gmra.mxu0 %vm122_vm0, %v14325_v44  ;;  %11367 = vmatmul.mubr.msk.f32.vlgmr.msra.gmra.mxu1 %vm122_vm0, %v14325_v44  ;;  %v14456_v40 = vpop.f32.mrf.mxu0  ;;  %v14462_v7 = vpop.f32.mrf.mxu1 }
 0x217   :  { %18014 = vst [vmem:[#allocation97_spill] sm:$0xff] %v14456_v40  ;;  %5013 = vmatpush1.msra.mxu0 %v18015_v61  ;;  %5175 = vmatpush1.msra.mxu1 %v13074_v63  ;;  %v14460_v28 = vadd.f32 %v12286_v8, %v3030_v50  ;;  %18017 = vst [vmem:[#allocation99_spill] sm:$0xff] %v14462_v7  ;;  %v18020_v40 = vld [vmem:[#allocation44_spill] sm:$0xff]  ;;  %v18025_v7 = vld [vmem:[#allocation46_spill] sm:$0xff] }
 0x218   :  { %5014 = vmatprep.subr.mxu0 %v18018_v35  ;;  %5176 = vmatprep.subr.mxu1 %v13193_v37 }
 0x219   :  { %18016 = vst [vmem:[#allocation98_spill] sm:$0xff] %v14460_v28  ;;  %5015 = vmatpush1.msra.mxu0 %v18019_v49  ;;  %5177 = vmatpush1.msra.mxu1 %v13095_v6  ;;  %v18023_v6 = vld [vmem:[#allocation43_spill] sm:$0xff] }
 0x21a   :  { %4880 = vmatprep.mubr.f32.mxu0 %v17947_v31  ;;  %4969 = vmatprep.mubr.f32.mxu1 %v17947_v31  ;;  %v14470_v62 = vpop.f32.mrf.mxu0  ;;  %v14474_v63 = vpop.f32.mrf.mxu1 }
 0x21b   :  { %5016 = vmatprep.subr.mxu0 %v18020_v40  ;;  %5178 = vmatprep.subr.mxu1 %v13228_v1  ;;  %18021 = vst [vmem:[#allocation100_spill] sm:$0xff] %v14474_v63 }
 0x21c   :  { %11364 = vmatmul.mubr.msk.f32.gmra.mxu0 %vm122_vm0, %v14344_v59  ;;  %11368 = vmatmul.mubr.msk.f32.gmra.mxu1 %vm122_vm0, %v14344_v59  ;;  %v14480_v8 = vpop.f32.mrf.mxu0  ;;  %v14484_v50 = vpop.f32.mrf.mxu1 }
 0x21d   :  { %18022 = vst [vmem:[#allocation101_spill] sm:$0xff] %v14480_v8  ;;  %5017 = vmatpush1.msra.mxu0 %v18023_v6  ;;  %5179 = vmatpush1.msra.mxu1 %v13107_v10  ;;  %18024 = vst [vmem:[#allocation102_spill] sm:$0xff] %v14484_v50 }
 0x21e   :  { %5018 = vmatprep.subr.mxu0 %v18025_v7  ;;  %5180 = vmatprep.subr.mxu1 %v17993_v29 }
 0x21f   :  { %5019 = vmatpush1.msra.mxu0 %v18026_v12  ;;  %5181 = vmatpush1.msra.mxu1 %v13138_v21 }
 0x220   :  { %4886 = vmatprep.mubr.f32.mxu0 %v17947_v31  ;;  %4975 = vmatprep.mubr.f32.mxu1 %v17947_v31  ;;  %v14492_v33 = vpop.f32.mrf.mxu0  ;;  %v14494_v22 = vpop.f32.mrf.mxu1 }
 0x221   :  { %18027 = vst [vmem:[#allocation103_spill] sm:$0xff] %v14494_v22  ;;  %5263 = vmatprep.subr.mxu0 %v13274_v24  ;;  %5352 = vmatprep.subr.mxu1 %v13372_v19 }
 0x222   :  { %11365 = vmatmul.mubr.msk.f32.gmra.mxu0 %vm122_vm0, %v14367_v26  ;;  %11369 = vmatmul.mubr.msk.f32.gmra.mxu1 %vm122_vm0, %v14367_v26  ;;  %v14504_v10 = vpop.f32.mrf.mxu0  ;;  %v14506_v21 = vpop.f32.mrf.mxu1 }
 0x223   :  { %4892 = vmatprep.mubr.f32.mxu0 %v17947_v31  ;;  %4981 = vmatprep.mubr.f32.mxu1 %v17947_v31  ;;  %18028 = vst [vmem:[#allocation104_spill] sm:$0xff] %v14504_v10  ;;  %18029 = vst [vmem:[#allocation105_spill] sm:$0xff] %v14506_v21 }
 0x226   :  { %11366 = vmatmul.mubr.msk.f32.gmra.mxu0 %vm122_vm0, %v14386_v56  ;;  %11370 = vmatmul.mubr.msk.f32.gmra.mxu1 %vm122_vm0, %v14386_v56 }
 0x227   :  { %5052 = vmatprep.mubr.f32.mxu0 %v17947_v31  ;;  %5214 = vmatprep.mubr.f32.mxu1 %v17947_v31  ;;  %v14519_v28 = vpop.f32.mrf.mxu0  ;;  %v14521_v48 = vpop.f32.mrf.mxu1 }
 0x228   :  { %18030 = vst [vmem:[#allocation106_spill] sm:$0xff] %v14521_v48 }
 0x229   :  { %v14527_v21 = vpop.f32.mrf.mxu0  ;;  %v14529_v50 = vpop.f32.mrf.mxu1 }
 0x22a   :  { %11371 = vmatmul.mubr.msk.f32.vlgmr.msra.gmra.mxu0 %vm122_vm0, %v14325_v44  ;;  %11379 = vmatmul.mubr.msk.f32.vlgmr.msra.gmra.mxu1 %vm122_vm0, %v14517_v17  ;;  %18031 = vst [vmem:[#allocation107_spill] sm:$0xff] %v14527_v21  ;;  %18032 = vst [vmem:[#allocation108_spill] sm:$0xff] %v14529_v50  ;;  %v14542_v44 = vld [vmem:[%s17679_s1 + $0x308] sm:$0xff] }
 0x22b   :  { %5264 = vmatpush1.msra.mxu0 %v13165_v27  ;;  %5353 = vmatpush1.msra.mxu1 %v17994_v23  ;;  %v14535_v10 = vpop.f32.mrf.mxu0  ;;  %v14544_v50 = vpop.f32.mrf.mxu1 }
 0x22c   :  { %5265 = vmatprep.subr.mxu0 %v13290_v20  ;;  %5354 = vmatprep.subr.mxu1 %v13382_v58  ;;  %18033 = vst [vmem:[#allocation109_spill] sm:$0xff] %v14544_v50 }
 0x22d   :  { %5266 = vmatpush1.msra.mxu0 %v13196_v38  ;;  %5355 = vmatpush1.msra.mxu1 %v13294_v25  ;;  %v14548_v8 = vpop.f32.mrf.mxu0  ;;  %v14552_v21 = vpop.f32.mrf.mxu1 }
 0x22e   :  { %5058 = vmatprep.mubr.f32.mxu0 %v17947_v31  ;;  %5220 = vmatprep.mubr.f32.mxu1 %v17947_v31  ;;  %18034 = vst [vmem:[#allocation110_spill] sm:$0xff] %v14548_v8  ;;  %18035 = vst [vmem:[#allocation111_spill] sm:$0xff] %v14552_v21 }
 0x22f   :  { %5267 = vmatprep.subr.mxu0 %v13324_v13  ;;  %5356 = vmatprep.subr.mxu1 %v13414_v54  ;;  %v14558_v48 = vpop.f32.mrf.mxu0 }
 0x230   :  { %11372 = vmatmul.mubr.msk.f32.gmra.mxu0 %vm122_vm0, %v14344_v59  ;;  %11380 = vmatmul.mubr.msk.f32.gmra.mxu1 %vm122_vm0, %v14542_v44  ;;  %v14562_v50 = vpop.f32.mrf.mxu1  ;;  %v14573_v59 = vld [vmem:[%s17679_s1 + $0x310] sm:$0xff] }
 0x231   :  { %5268 = vmatpush1.msra.mxu0 %v13232_v4  ;;  %5357 = vmatpush1.msra.mxu1 %v13328_v53  ;;  %18036 = vst [vmem:[#allocation112_spill] sm:$0xff] %v14562_v50  ;;  %v14566_v8 = vpop.f32.mrf.mxu0 }
 0x232   :  { %5269 = vmatprep.subr.mxu0 %v13338_v18  ;;  %5358 = vmatprep.subr.mxu1 %v13428_v57  ;;  %18037 = vst [vmem:[#allocation113_spill] sm:$0xff] %v14566_v8  ;;  %v14575_v21 = vpop.f32.mrf.mxu1 }
 0x233   :  { %5270 = vmatpush1.msra.mxu0 %v13248_v2  ;;  %5359 = vmatpush1.msra.mxu1 %v13342_v0  ;;  %18038 = vst [vmem:[#allocation114_spill] sm:$0xff] %v14575_v21  ;;  %v14592_v21 = vld [vmem:[%s17679_s1 + $0x318] sm:$0xff] }
 0x234   :  { %5064 = vmatprep.mubr.f32.mxu0 %v17947_v31  ;;  %5226 = vmatprep.mubr.f32.mxu1 %v17947_v31 }
 0x235   :  { %5441 = vmatprep.subr.mxu0 %v17948_v52  ;;  %5530 = vmatprep.subr.mxu1 %v13551_v41 }
 0x236   :  { %11373 = vmatmul.mubr.msk.f32.gmra.mxu0 %vm122_vm0, %v14367_v26  ;;  %11381 = vmatmul.mubr.msk.f32.gmra.mxu1 %vm122_vm0, %v14573_v59  ;;  %v14585_v8 = vpop.f32.mrf.mxu0  ;;  %v14594_v50 = vpop.f32.mrf.mxu1 }
 0x237   :  { %5070 = vmatprep.mubr.f32.mxu0 %v17947_v31  ;;  %5232 = vmatprep.mubr.f32.mxu1 %v17947_v31  ;;  %18039 = vst [vmem:[#allocation115_spill] sm:$0xff] %v14594_v50 }
 0x238   :  { %v14596_v22 = vpop.f32.mrf.mxu0  ;;  %v14598_v63 = vpop.f32.mrf.mxu1 }
 0x239   :  { %18040 = vst [vmem:[#allocation116_spill] sm:$0xff] %v14596_v22  ;;  %18041 = vst [vmem:[#allocation117_spill] sm:$0xff] %v14598_v63 }
 0x23a   :  { %11374 = vmatmul.mubr.msk.f32.gmra.mxu0 %vm122_vm0, %v14386_v56  ;;  %11382 = vmatmul.mubr.msk.f32.gmra.mxu1 %vm122_vm0, %v14592_v21 }
 0x23b   :  { %5303 = vmatprep.mubr.f32.mxu0 %v17947_v31  ;;  %5392 = vmatprep.mubr.f32.mxu1 %v17947_v31 }
 0x23c   :  { %v14606_v26 = vpop.f32.mrf.mxu0 }
 0x23d   :  { %18042 = vst [vmem:[#allocation118_spill] sm:$0xff] %v14606_v26  ;;  %v14608_v41 = vpop.f32.mrf.mxu1 }
 0x23e   :  { %18043 = vst [vmem:[#allocation119_spill] sm:$0xff] %v14608_v41  ;;  %11383 = vmatmul.mubr.msk.f32.vlgmr.msra.gmra.mxu0 %vm122_vm0, %v14517_v17  ;;  %11387 = vmatmul.mubr.msk.f32.vlgmr.msra.gmra.mxu1 %vm122_vm0, %v14517_v17  ;;  %v14614_v63 = vpop.f32.mrf.mxu0 }
 0x23f   :  { %18044 = vst [vmem:[#allocation120_spill] sm:$0xff] %v14614_v63  ;;  %5442 = vmatpush1.msra.mxu0 %v17995_v16  ;;  %5531 = vmatpush1.msra.mxu1 %v17950_v30  ;;  %v14618_v56 = vpop.f32.mrf.mxu1 }
 0x240   :  { %18045 = vst [vmem:[#allocation121_spill] sm:$0xff] %v14618_v56  ;;  %5443 = vmatprep.subr.mxu0 %v13472_v43  ;;  %5532 = vmatprep.subr.mxu1 %v13559_v45  ;;  %v14622_v22 = vpop.f32.mrf.mxu0 }
 0x241   :  { %18046 = vst [vmem:[#allocation122_spill] sm:$0xff] %v14622_v22  ;;  %5444 = vmatpush1.msra.mxu0 %v17951_v32  ;;  %5533 = vmatpush1.msra.mxu1 %v17952_v42  ;;  %v14626_v41 = vpop.f32.mrf.mxu1 }
 0x242   :  { %18047 = vst [vmem:[#allocation123_spill] sm:$0xff] %v14626_v41  ;;  %5309 = vmatprep.mubr.f32.mxu0 %v17947_v31  ;;  %5398 = vmatprep.mubr.f32.mxu1 %v17947_v31  ;;  %v14630_v63 = vpop.f32.mrf.mxu0 }
 0x243   :  { %18048 = vst [vmem:[#allocation124_spill] sm:$0xff] %v14630_v63  ;;  %5445 = vmatprep.subr.mxu0 %v17953_v3  ;;  %5534 = vmatprep.subr.mxu1 %v17954_v9  ;;  %v14634_v56 = vpop.f32.mrf.mxu1 }
 0x244   :  { %18049 = vst [vmem:[#allocation125_spill] sm:$0xff] %v14634_v56  ;;  %11384 = vmatmul.mubr.msk.f32.gmra.mxu0 %vm122_vm0, %v14542_v44  ;;  %11388 = vmatmul.mubr.msk.f32.gmra.mxu1 %vm122_vm0, %v14542_v44  ;;  %v14640_v22 = vpop.f32.mrf.mxu0 }
 0x245   :  { %18050 = vst [vmem:[#allocation126_spill] sm:$0xff] %v14640_v22  ;;  %5446 = vmatpush1.msra.mxu0 %v17955_v39  ;;  %5535 = vmatpush1.msra.mxu1 %v17956_v36  ;;  %v14644_v41 = vpop.f32.mrf.mxu1  ;;  %v18054_v22 = vld [vmem:[#allocation48_spill] sm:$0xff] }
 0x246   :  { %18051 = vst [vmem:[#allocation127_spill] sm:$0xff] %v14644_v41  ;;  %5447 = vmatprep.subr.mxu0 %v17957_v14  ;;  %5536 = vmatprep.subr.mxu1 %v13605_v46  ;;  %v14650_v56 = vpop.f32.mrf.mxu0 }
 0x247   :  { %5448 = vmatpush1.msra.mxu0 %v17958_v5  ;;  %5537 = vmatpush1.msra.mxu1 %v17959_v60  ;;  %18052 = vst [vmem:[#allocation128_spill] sm:$0xff] %v14650_v56  ;;  %v14652_v63 = vpop.f32.mrf.mxu1 }
 0x248   :  { %18053 = vst [vmem:[#allocation129_spill] sm:$0xff] %v14652_v63  ;;  %5315 = vmatprep.mubr.f32.mxu0 %v17947_v31  ;;  %5404 = vmatprep.mubr.f32.mxu1 %v17947_v31 }
 0x249   :  { %5619 = vmatprep.subr.mxu0 %v18015_v61  ;;  %5708 = vmatprep.subr.mxu1 %v18054_v22 }
 0x24a   :  { %11385 = vmatmul.mubr.msk.f32.gmra.mxu0 %vm122_vm0, %v14573_v59  ;;  %11389 = vmatmul.mubr.msk.f32.gmra.mxu1 %vm122_vm0, %v14573_v59 }
 0x24b   :  { %5321 = vmatprep.mubr.f32.mxu0 %v17947_v31  ;;  %5410 = vmatprep.mubr.f32.mxu1 %v17947_v31  ;;  %v14664_v56 = vpop.f32.mrf.mxu0  ;;  %v14666_v63 = vpop.f32.mrf.mxu1 }
 0x24c   :  { %18055 = vst [vmem:[#allocation130_spill] sm:$0xff] %v14666_v63 }
 0x24d   :  { %v14668_v41 = vpop.f32.mrf.mxu0  ;;  %v14674_v26 = vpop.f32.mrf.mxu1 }
 0x24e   :  { %18056 = vst [vmem:[#allocation131_spill] sm:$0xff] %v14668_v41  ;;  %11386 = vmatmul.mubr.msk.f32.gmra.mxu0 %vm122_vm0, %v14592_v21  ;;  %11390 = vmatmul.mubr.msk.f32.gmra.mxu1 %vm122_vm0, %v14592_v21  ;;  %18057 = vst [vmem:[#allocation132_spill] sm:$0xff] %v14674_v26  ;;  %v18060_v26 = vld [vmem:[#allocation49_spill] sm:$0xff] }
 0x24f   :  { %5481 = vmatprep.mubr.f32.mxu0 %v17947_v31  ;;  %5570 = vmatprep.mubr.f32.mxu1 %v17947_v31 }
 0x251   :  { %v14678_v50 = vpop.f32.mrf.mxu0 }
 0x252   :  { %11391 = vmatmul.mubr.msk.f32.vlgmr.msra.gmra.mxu0 %vm122_vm0, %v14517_v17  ;;  %11395 = vmatmul.mubr.msk.f32.vlgmr.msra.gmra.mxu1 %vm122_vm0, %v14517_v17  ;;  %v14684_v41 = vpop.f32.mrf.mxu1 }
 0x253   :  { %18058 = vst [vmem:[#allocation133_spill] sm:$0xff] %v14684_v41  ;;  %5620 = vmatpush1.msra.mxu0 %v17961_v51  ;;  %5709 = vmatpush1.msra.mxu1 %v18010_v11  ;;  %v14688_v63 = vpop.f32.mrf.mxu0 }
 0x254   :  { %18059 = vst [vmem:[#allocation134_spill] sm:$0xff] %v14688_v63  ;;  %5621 = vmatprep.subr.mxu0 %v18019_v49  ;;  %5710 = vmatprep.subr.mxu1 %v18060_v26  ;;  %v14692_v22 = vpop.f32.mrf.mxu1  ;;  %v18064_v63 = vld [vmem:[#allocation51_spill] sm:$0xff] }
 0x255   :  { %18061 = vst [vmem:[#allocation135_spill] sm:$0xff] %v14692_v22  ;;  %5622 = vmatpush1.msra.mxu0 %v17963_v47  ;;  %5711 = vmatpush1.msra.mxu1 %v18018_v35  ;;  %v14696_v46 = vpop.f32.mrf.mxu0 }
 0x256   :  { %18062 = vst [vmem:[#allocation136_spill] sm:$0xff] %v14696_v46  ;;  %5487 = vmatprep.mubr.f32.mxu0 %v17947_v31  ;;  %5576 = vmatprep.mubr.f32.mxu1 %v17947_v31  ;;  %v14700_v41 = vpop.f32.mrf.mxu1 }
 0x257   :  { %18063 = vst [vmem:[#allocation137_spill] sm:$0xff] %v14700_v41  ;;  %5623 = vmatprep.subr.mxu0 %v18023_v6  ;;  %5712 = vmatprep.subr.mxu1 %v18064_v63  ;;  %v14704_v9 = vpop.f32.mrf.mxu0  ;;  %v18067_v41 = vld [vmem:[#allocation53_spill] sm:$0xff] }
 0x258   :  { %18065 = vst [vmem:[#allocation138_spill] sm:$0xff] %v14704_v9  ;;  %11392 = vmatmul.mubr.msk.f32.gmra.mxu0 %vm122_vm0, %v14542_v44  ;;  %11396 = vmatmul.mubr.msk.f32.gmra.mxu1 %vm122_vm0, %v14542_v44  ;;  %v14710_v22 = vpop.f32.mrf.mxu1 }
 0x259   :  { %18066 = vst [vmem:[#allocation139_spill] sm:$0xff] %v14710_v22  ;;  %5624 = vmatpush1.msra.mxu0 %v17965_v55  ;;  %5713 = vmatpush1.msra.mxu1 %v18020_v40  ;;  %v14714_v26 = vpop.f32.mrf.mxu0 }
 0x25a   :  { %5625 = vmatprep.subr.mxu0 %v18026_v12  ;;  %5714 = vmatprep.subr.mxu1 %v18067_v41  ;;  %v3880_v63 = vpop.f32.mrf.mxu1 }
 0x25b   :  { %5626 = vmatpush1.msra.mxu0 %v17968_v15  ;;  %5715 = vmatpush1.msra.mxu1 %v18025_v7  ;;  %v14721_v9 = vadd.f32 %v3880_v63, %v14470_v62  ;;  %v14725_v22 = vpop.f32.mrf.mxu0 }
 0x25c   :  { %5493 = vmatprep.mubr.f32.mxu0 %v17947_v31  ;;  %5582 = vmatprep.mubr.f32.mxu1 %v17947_v31  ;;  %18068 = vst [vmem:[#allocation140_spill] sm:$0xff] %v14725_v22  ;;  %v14727_v46 = vpop.f32.mrf.mxu1 }
 0x25d   :  { %18069 = vst [vmem:[#allocation141_spill] sm:$0xff] %v14727_v46  ;;  %5870 = vmatprep.subr.mxu0 %v13165_v27  ;;  %5959 = vmatprep.subr.mxu1 %v17994_v23 }
 0x25e   :  { %11393 = vmatmul.mubr.msk.f32.gmra.mxu0 %vm122_vm0, %v14573_v59  ;;  %11397 = vmatmul.mubr.msk.f32.gmra.mxu1 %vm122_vm0, %v14573_v59 }
 0x25f   :  { %5499 = vmatprep.mubr.f32.mxu0 %v17947_v31  ;;  %5588 = vmatprep.mubr.f32.mxu1 %v17947_v31 }
 0x260   :  { %v14737_v62 = vpop.f32.mrf.mxu0  ;;  %v3886_v63 = vpop.f32.mrf.mxu1 }
 0x261   :  { %v14740_v22 = vadd.f32 %v3886_v63, %v14492_v33 }
 0x262   :  { %11394 = vmatmul.mubr.msk.f32.gmra.mxu0 %vm122_vm0, %v14592_v21  ;;  %11398 = vmatmul.mubr.msk.f32.gmra.mxu1 %vm122_vm0, %v14592_v21  ;;  %v14748_v46 = vpop.f32.mrf.mxu0  ;;  %v14750_v23 = vpop.f32.mrf.mxu1 }
 0x263   :  { %5659 = vmatprep.mubr.f32.mxu0 %v17947_v31  ;;  %5748 = vmatprep.mubr.f32.mxu1 %v17947_v31  ;;  %18070 = vst [vmem:[#allocation142_spill] sm:$0xff] %v14748_v46  ;;  %18071 = vst [vmem:[#allocation143_spill] sm:$0xff] %v14750_v23 }
 0x266   :  { %11399 = vmatmul.mubr.msk.f32.vlgmr.msra.gmra.mxu0 %vm122_vm0, %v14517_v17  ;;  %11403 = vmatmul.mubr.msk.f32.vlgmr.msra.gmra.mxu1 %vm122_vm0, %v14517_v17 }
 0x267   :  { %5871 = vmatpush1.msra.mxu0 %v13182_v34  ;;  %5960 = vmatpush1.msra.mxu1 %v13274_v24  ;;  %v14758_v33 = vpop.f32.mrf.mxu0  ;;  %v3892_v63 = vpop.f32.mrf.mxu1 }
 0x268   :  { %5872 = vmatprep.subr.mxu0 %v13196_v38  ;;  %5961 = vmatprep.subr.mxu1 %v13294_v25  ;;  %v14763_v46 = vadd.f32 %v3892_v63, %v14519_v28 }
 0x269   :  { %5873 = vmatpush1.msra.mxu0 %v13193_v37  ;;  %5962 = vmatpush1.msra.mxu1 %v13290_v20  ;;  %v14767_v23 = vpop.f32.mrf.mxu0  ;;  %v14769_v17 = vpop.f32.mrf.mxu1 }
 0x26a   :  { %18072 = vst [vmem:[#allocation144_spill] sm:$0xff] %v14767_v23  ;;  %18073 = vst [vmem:[#allocation145_spill] sm:$0xff] %v14769_v17  ;;  %5665 = vmatprep.mubr.f32.mxu0 %v17947_v31  ;;  %5754 = vmatprep.mubr.f32.mxu1 %v17947_v31 }
 0x26b   :  { %5874 = vmatprep.subr.mxu0 %v13232_v4  ;;  %5963 = vmatprep.subr.mxu1 %v13328_v53  ;;  %v14775_v34 = vpop.f32.mrf.mxu0  ;;  %v3898_v28 = vpop.f32.mrf.mxu1 }
 0x26c   :  { %11400 = vmatmul.mubr.msk.f32.gmra.mxu0 %vm122_vm0, %v14542_v44  ;;  %11404 = vmatmul.mubr.msk.f32.gmra.mxu1 %vm122_vm0, %v14542_v44  ;;  %v14782_v37 = vadd.f32 %v3898_v28, %v14535_v10 }
 0x26d   :  { %5875 = vmatpush1.msra.mxu0 %v13228_v1  ;;  %5964 = vmatpush1.msra.mxu1 %v13324_v13  ;;  %v14786_v63 = vpop.f32.mrf.mxu0  ;;  %v14788_v23 = vpop.f32.mrf.mxu1 }
 0x26e   :  { %18074 = vst [vmem:[#allocation146_spill] sm:$0xff] %v14786_v63  ;;  %18075 = vst [vmem:[#allocation147_spill] sm:$0xff] %v14788_v23  ;;  %5876 = vmatprep.subr.mxu0 %v13248_v2  ;;  %5965 = vmatprep.subr.mxu1 %v13342_v0 }
 0x26f   :  { %5877 = vmatpush1.msra.mxu0 %v17993_v29  ;;  %5966 = vmatpush1.msra.mxu1 %v13338_v18  ;;  %v14794_v44 = vpop.f32.mrf.mxu0  ;;  %v4058_v10 = vpop.f32.mrf.mxu1 }
 0x270   :  { %5671 = vmatprep.mubr.f32.mxu0 %v17947_v31  ;;  %5760 = vmatprep.mubr.f32.mxu1 %v17947_v31  ;;  %v14799_v1 = vadd.f32 %v4058_v10, %v14558_v48 }
 0x271   :  { %6048 = vmatprep.subr.mxu0 %v17995_v16  ;;  %6137 = vmatprep.subr.mxu1 %v17950_v30  ;;  %v14807_v29 = vpop.f32.mrf.mxu0  ;;  %v14811_v28 = vpop.f32.mrf.mxu1 }
 0x272   :  { %11401 = vmatmul.mubr.msk.f32.gmra.mxu0 %vm122_vm0, %v14573_v59  ;;  %11405 = vmatmul.mubr.msk.f32.gmra.mxu1 %vm122_vm0, %v14573_v59  ;;  %18076 = vst [vmem:[#allocation148_spill] sm:$0xff] %v14807_v29  ;;  %18077 = vst [vmem:[#allocation149_spill] sm:$0xff] %v14811_v28  ;;  %v14824_v59 = vld [vmem:[%s17679_s1 + $0x320] sm:$0xff] }
 0x273   :  { %5677 = vmatprep.mubr.f32.mxu0 %v17947_v31  ;;  %5766 = vmatprep.mubr.f32.mxu1 %v17947_v31 }
 0x276   :  { %11402 = vmatmul.mubr.msk.f32.gmra.mxu0 %vm122_vm0, %v14592_v21  ;;  %11406 = vmatmul.mubr.msk.f32.gmra.mxu1 %vm122_vm0, %v14592_v21  ;;  %v14817_v48 = vpop.f32.mrf.mxu0 }
 0x277   :  { %5910 = vmatprep.mubr.f32.mxu0 %v17947_v31  ;;  %5999 = vmatprep.mubr.f32.mxu1 %v17947_v31  ;;  %v4064_v10 = vpop.f32.mrf.mxu1 }
 0x278   :  { %v14827_v63 = vadd.f32 %v4064_v10, %v14585_v8  ;;  %v14833_v21 = vpop.f32.mrf.mxu0  ;;  %v14846_v8 = vld [vmem:[%s17679_s1 + $0x328] sm:$0xff] }
 0x279   :  { %18078 = vst [vmem:[#allocation150_spill] sm:$0xff] %v14833_v21  ;;  %v14835_v28 = vpop.f32.mrf.mxu1 }
 0x27a   :  { %11411 = vmatmul.mubr.msk.f32.vlgmr.msra.gmra.mxu0 %vm122_vm0, %v14824_v59  ;;  %11415 = vmatmul.mubr.msk.f32.vlgmr.msra.gmra.mxu1 %vm122_vm0, %v14824_v59  ;;  %18079 = vst [vmem:[#allocation151_spill] sm:$0xff] %v14835_v28 }
 0x27b   :  { %6049 = vmatpush1.msra.mxu0 %v13372_v19  ;;  %6138 = vmatpush1.msra.mxu1 %v17948_v52 }
 0x27c   :  { %6050 = vmatprep.subr.mxu0 %v17951_v32  ;;  %6139 = vmatprep.subr.mxu1 %v17952_v42 }
 0x27d   :  { %6051 = vmatpush1.msra.mxu0 %v13382_v58  ;;  %6140 = vmatpush1.msra.mxu1 %v13472_v43 }
 0x27e   :  { %5916 = vmatprep.mubr.f32.mxu0 %v17947_v31  ;;  %6005 = vmatprep.mubr.f32.mxu1 %v17947_v31  ;;  %v14850_v10 = vpop.f32.mrf.mxu0  ;;  %v14852_v28 = vpop.f32.mrf.mxu1 }
 0x27f   :  { %18080 = vst [vmem:[#allocation152_spill] sm:$0xff] %v14852_v28  ;;  %6052 = vmatprep.subr.mxu0 %v17955_v39  ;;  %6141 = vmatprep.subr.mxu1 %v17956_v36 }
 0x280   :  { %11412 = vmatmul.mubr.msk.f32.gmra.mxu0 %vm122_vm0, %v14846_v8  ;;  %11416 = vmatmul.mubr.msk.f32.gmra.mxu1 %vm122_vm0, %v14846_v8  ;;  %v14860_v21 = vpop.f32.mrf.mxu0  ;;  %v14862_v29 = vpop.f32.mrf.mxu1 }
 0x281   :  { %18081 = vst [vmem:[#allocation153_spill] sm:$0xff] %v14860_v21  ;;  %18082 = vst [vmem:[#allocation154_spill] sm:$0xff] %v14862_v29  ;;  %6053 = vmatpush1.msra.mxu0 %v13414_v54  ;;  %6142 = vmatpush1.msra.mxu1 %v17953_v3  ;;  %v14877_v29 = vld [vmem:[%s17679_s1 + $0x330] sm:$0xff] }
 0x282   :  { %6054 = vmatprep.subr.mxu0 %v17958_v5  ;;  %6143 = vmatprep.subr.mxu1 %v17959_v60  ;;  %v14868_v17 = vpop.f32.mrf.mxu0  ;;  %v14870_v23 = vpop.f32.mrf.mxu1 }
 0x283   :  { %18083 = vst [vmem:[#allocation155_spill] sm:$0xff] %v14870_v23  ;;  %6055 = vmatpush1.msra.mxu0 %v13428_v57  ;;  %6144 = vmatpush1.msra.mxu1 %v17957_v14 }
 0x284   :  { %5922 = vmatprep.mubr.f32.mxu0 %v17947_v31  ;;  %6011 = vmatprep.mubr.f32.mxu1 %v17947_v31  ;;  %v14881_v21 = vpop.f32.mrf.mxu0  ;;  %v14883_v60 = vpop.f32.mrf.mxu1 }
 0x285   :  { %18084 = vst [vmem:[#allocation156_spill] sm:$0xff] %v14881_v21  ;;  %18085 = vst [vmem:[#allocation157_spill] sm:$0xff] %v14883_v60  ;;  %6226 = vmatprep.subr.mxu0 %v17961_v51  ;;  %6315 = vmatprep.subr.mxu1 %v18010_v11  ;;  %v14900_v60 = vld [vmem:[%s17679_s1 + $0x338] sm:$0xff]  ;;  %v18092_v51 = vld [vmem:[#allocation32_spill] sm:$0xff] }
 0x286   :  { %11413 = vmatmul.mubr.msk.f32.gmra.mxu0 %vm122_vm0, %v14877_v29  ;;  %11417 = vmatmul.mubr.msk.f32.gmra.mxu1 %vm122_vm0, %v14877_v29  ;;  %v14891_v36 = vpop.f32.mrf.mxu0  ;;  %v14893_v23 = vpop.f32.mrf.mxu1 }
 0x287   :  { %18086 = vst [vmem:[#allocation158_spill] sm:$0xff] %v14893_v23  ;;  %5928 = vmatprep.mubr.f32.mxu0 %v17947_v31  ;;  %6017 = vmatprep.mubr.f32.mxu1 %v17947_v31 }
 0x288   :  { %v14902_v21 = vpop.f32.mrf.mxu0  ;;  %v14904_v11 = vpop.f32.mrf.mxu1 }
 0x289   :  { %18087 = vst [vmem:[#allocation159_spill] sm:$0xff] %v14902_v21  ;;  %18088 = vst [vmem:[#allocation160_spill] sm:$0xff] %v14904_v11 }
 0x28a   :  { %11414 = vmatmul.mubr.msk.f32.gmra.mxu0 %vm122_vm0, %v14900_v60  ;;  %11418 = vmatmul.mubr.msk.f32.gmra.mxu1 %vm122_vm0, %v14900_v60 }
 0x28b   :  { %6088 = vmatprep.mubr.f32.mxu0 %v17947_v31  ;;  %6177 = vmatprep.mubr.f32.mxu1 %v17947_v31 }
 0x28c   :  { %v14912_v23 = vpop.f32.mrf.mxu0  ;;  %v4242_v42 = vpop.f32.mrf.mxu1 }
 0x28d   :  { %v14915_v28 = vadd.f32 %v4242_v42, %v14664_v56 }
 0x28e   :  { %11419 = vmatmul.mubr.msk.f32.vlgmr.msra.gmra.mxu0 %vm122_vm0, %v14824_v59  ;;  %11423 = vmatmul.mubr.msk.f32.vlgmr.msra.gmra.mxu1 %vm122_vm0, %v14824_v59  ;;  %v14921_v11 = vpop.f32.mrf.mxu0  ;;  %v14923_v21 = vpop.f32.mrf.mxu1 }
 0x28f   :  { %18089 = vst [vmem:[#allocation161_spill] sm:$0xff] %v14915_v28  ;;  %18090 = vst [vmem:[#allocation162_spill] sm:$0xff] %v14921_v11  ;;  %6227 = vmatpush1.msra.mxu0 %v18092_v51  ;;  %6316 = vmatpush1.msra.mxu1 %v18015_v61  ;;  %v18096_v28 = vld [vmem:[#allocation35_spill] sm:$0xff] }
 0x290   :  { %18091 = vst [vmem:[#allocation163_spill] sm:$0xff] %v14923_v21  ;;  %6228 = vmatprep.subr.mxu0 %v17963_v47  ;;  %6317 = vmatprep.subr.mxu1 %v18018_v35 }
 0x291   :  { %6229 = vmatpush1.msra.mxu0 %v13559_v45  ;;  %6318 = vmatpush1.msra.mxu1 %v18019_v49 }
 0x292   :  { %6094 = vmatprep.mubr.f32.mxu0 %v17947_v31  ;;  %6183 = vmatprep.mubr.f32.mxu1 %v17947_v31  ;;  %v14933_v42 = vpop.f32.mrf.mxu0  ;;  %v4248_v56 = vpop.f32.mrf.mxu1 }
 0x293   :  { %6230 = vmatprep.subr.mxu0 %v17965_v55  ;;  %6319 = vmatprep.subr.mxu1 %v18020_v40  ;;  %v14938_v21 = vadd.f32 %v4248_v56, %v14678_v50  ;;  %v18097_v40 = vld [vmem:[#allocation37_spill] sm:$0xff] }
 0x294   :  { %11420 = vmatmul.mubr.msk.f32.gmra.mxu0 %vm122_vm0, %v14846_v8  ;;  %11424 = vmatmul.mubr.msk.f32.gmra.mxu1 %vm122_vm0, %v14846_v8  ;;  %v14944_v11 = vpop.f32.mrf.mxu0  ;;  %v14946_v35 = vpop.f32.mrf.mxu1 }
 0x295   :  { %18093 = vst [vmem:[#allocation164_spill] sm:$0xff] %v14938_v21  ;;  %18094 = vst [vmem:[#allocation165_spill] sm:$0xff] %v14944_v11  ;;  %6231 = vmatpush1.msra.mxu0 %v18096_v28  ;;  %6320 = vmatpush1.msra.mxu1 %v18023_v6  ;;  %v18098_v21 = vld [vmem:[#allocation136_spill] sm:$0xff] }
 0x296   :  { %18095 = vst [vmem:[#allocation166_spill] sm:$0xff] %v14946_v35  ;;  %6232 = vmatprep.subr.mxu0 %v17968_v15  ;;  %6321 = vmatprep.subr.mxu1 %v18025_v7  ;;  %v14952_v50 = vpop.f32.mrf.mxu0  ;;  %v4254_v56 = vpop.f32.mrf.mxu1  ;;  %v18102_v15 = vld [vmem:[#allocation47_spill] sm:$0xff] }
 0x297   :  { %6233 = vmatpush1.msra.mxu0 %v18097_v40  ;;  %6322 = vmatpush1.msra.mxu1 %v18026_v12  ;;  %v14957_v55 = vadd.f32 %v4254_v56, %v18098_v21 }
 0x298   :  { %6100 = vmatprep.mubr.f32.mxu0 %v17947_v31  ;;  %6189 = vmatprep.mubr.f32.mxu1 %v17947_v31  ;;  %v14961_v35 = vpop.f32.mrf.mxu0  ;;  %v14963_v11 = vpop.f32.mrf.mxu1 }
 0x299   :  { %18099 = vst [vmem:[#allocation136_spill] sm:$0xff] %v14957_v55  ;;  %18100 = vst [vmem:[#allocation167_spill] sm:$0xff] %v14961_v35  ;;  %6404 = vmatprep.subr.mxu0 %v18102_v15  ;;  %6566 = vmatprep.subr.mxu1 %v13274_v24 }
 0x29a   :  { %18101 = vst [vmem:[#allocation168_spill] sm:$0xff] %v14963_v11  ;;  %11421 = vmatmul.mubr.msk.f32.gmra.mxu0 %vm122_vm0, %v14877_v29  ;;  %11425 = vmatmul.mubr.msk.f32.gmra.mxu1 %vm122_vm0, %v14877_v29  ;;  %v14971_v21 = vpop.f32.mrf.mxu0  ;;  %v4414_v56 = vpop.f32.mrf.mxu1 }
 0x29b   :  { %6106 = vmatprep.mubr.f32.mxu0 %v17947_v31  ;;  %6195 = vmatprep.mubr.f32.mxu1 %v17947_v31  ;;  %v14976_v35 = vadd.f32 %v4414_v56, %v14714_v26 }
 0x29c   :  { %v14978_v11 = vpop.f32.mrf.mxu0  ;;  %v14980_v55 = vpop.f32.mrf.mxu1 }
 0x29d   :  { %18103 = vst [vmem:[#allocation169_spill] sm:$0xff] %v14976_v35  ;;  %18104 = vst [vmem:[#allocation170_spill] sm:$0xff] %v14978_v11  ;;  %v18109_v11 = vld [vmem:[#allocation48_spill] sm:$0xff]  ;;  %v18110_v35 = vld [vmem:[#allocation50_spill] sm:$0xff] }
 0x29e   :  { %18105 = vst [vmem:[#allocation171_spill] sm:$0xff] %v14980_v55  ;;  %11422 = vmatmul.mubr.msk.f32.gmra.mxu0 %vm122_vm0, %v14900_v60  ;;  %11426 = vmatmul.mubr.msk.f32.gmra.mxu1 %vm122_vm0, %v14900_v60 }
 0x29f   :  { %6266 = vmatprep.mubr.f32.mxu0 %v17947_v31  ;;  %6355 = vmatprep.mubr.f32.mxu1 %v17947_v31 }
 0x2a0   :  { %v14988_v24 = vpop.f32.mrf.mxu0  ;;  %v4420_v7 = vpop.f32.mrf.mxu1 }
 0x2a1   :  { %v14991_v26 = vadd.f32 %v4420_v7, %v14737_v62  ;;  %v18111_v7 = vld [vmem:[#allocation49_spill] sm:$0xff] }
 0x2a2   :  { %11427 = vmatmul.mubr.msk.f32.vlgmr.msra.gmra.mxu0 %vm122_vm0, %v14824_v59  ;;  %11431 = vmatmul.mubr.msk.f32.vlgmr.msra.gmra.mxu1 %vm122_vm0, %v14824_v59  ;;  %v14997_v56 = vpop.f32.mrf.mxu0  ;;  %v14999_v55 = vpop.f32.mrf.mxu1 }
 0x2a3   :  { %18106 = vst [vmem:[#allocation172_spill] sm:$0xff] %v14991_v26  ;;  %18107 = vst [vmem:[#allocation173_spill] sm:$0xff] %v14997_v56  ;;  %6405 = vmatpush1.msra.mxu0 %v18109_v11  ;;  %6567 = vmatpush1.msra.mxu1 %v13165_v27  ;;  %v18115_v26 = vld [vmem:[#allocation51_spill] sm:$0xff] }
 0x2a4   :  { %18108 = vst [vmem:[#allocation174_spill] sm:$0xff] %v14999_v55  ;;  %6406 = vmatprep.subr.mxu0 %v18110_v35  ;;  %6568 = vmatprep.subr.mxu1 %v13290_v20  ;;  %v18112_v55 = vld [vmem:[#allocation52_spill] sm:$0xff] }
 0x2a5   :  { %6407 = vmatpush1.msra.mxu0 %v18111_v7  ;;  %6569 = vmatpush1.msra.mxu1 %v13196_v38 }
 0x2a6   :  { %6272 = vmatprep.mubr.f32.mxu0 %v17947_v31  ;;  %6361 = vmatprep.mubr.f32.mxu1 %v17947_v31  ;;  %v15009_v62 = vpop.f32.mrf.mxu0  ;;  %v4426_v56 = vpop.f32.mrf.mxu1 }
 0x2a7   :  { %6408 = vmatprep.subr.mxu0 %v18112_v55  ;;  %6570 = vmatprep.subr.mxu1 %v13324_v13  ;;  %v15014_v27 = vadd.f32 %v4426_v56, %v14758_v33  ;;  %v18116_v55 = vld [vmem:[#allocation54_spill] sm:$0xff] }
 0x2a8   :  { %11428 = vmatmul.mubr.msk.f32.gmra.mxu0 %vm122_vm0, %v14846_v8  ;;  %11432 = vmatmul.mubr.msk.f32.gmra.mxu1 %vm122_vm0, %v14846_v8  ;;  %v15020_v38 = vpop.f32.mrf.mxu0  ;;  %v15022_v20 = vpop.f32.mrf.mxu1 }
 0x2a9   :  { %18113 = vst [vmem:[#allocation175_spill] sm:$0xff] %v15020_v38  ;;  %18114 = vst [vmem:[#allocation176_spill] sm:$0xff] %v15022_v20  ;;  %6409 = vmatpush1.msra.mxu0 %v18115_v26  ;;  %6571 = vmatpush1.msra.mxu1 %v13232_v4  ;;  %v18119_v38 = vld [vmem:[#allocation100_spill] sm:$0xff] }
 0x2aa   :  { %6410 = vmatprep.subr.mxu0 %v18116_v55  ;;  %6572 = vmatprep.subr.mxu1 %v13338_v18  ;;  %v15028_v33 = vpop.f32.mrf.mxu0  ;;  %v4432_v56 = vpop.f32.mrf.mxu1  ;;  %v3970_v18 = vadd.f32 %v14794_v44, %v18119_v38 }
 0x2ab   :  { %6411 = vmatpush1.msra.mxu0 %v18067_v41  ;;  %6573 = vmatpush1.msra.mxu1 %v13248_v2  ;;  %v15033_v13 = vadd.f32 %v4432_v56, %v14775_v34 }
 0x2ac   :  { %6278 = vmatprep.mubr.f32.mxu0 %v17947_v31  ;;  %6367 = vmatprep.mubr.f32.mxu1 %v17947_v31  ;;  %v15037_v20 = vpop.f32.mrf.mxu0  ;;  %v15039_v4 = vpop.f32.mrf.mxu1 }
 0x2ad   :  { %18117 = vst [vmem:[#allocation177_spill] sm:$0xff] %v15037_v20  ;;  %18118 = vst [vmem:[#allocation178_spill] sm:$0xff] %v15039_v4  ;;  %6655 = vmatprep.subr.mxu0 %v13372_v19  ;;  %6744 = vmatprep.subr.mxu1 %v17948_v52  ;;  %v18122_v20 = vld [vmem:[#allocation103_spill] sm:$0xff] }
 0x2ae   :  { %11429 = vmatmul.mubr.msk.f32.gmra.mxu0 %vm122_vm0, %v14877_v29  ;;  %11433 = vmatmul.mubr.msk.f32.gmra.mxu1 %vm122_vm0, %v14877_v29  ;;  %v4520_v2 = vpop.f32.mrf.mxu0  ;;  %v4609_v34 = vpop.f32.mrf.mxu1  ;;  %v3976_v52 = vadd.f32 %v14817_v48, %v18122_v20 }
 0x2af   :  { %6284 = vmatprep.mubr.f32.mxu0 %v17947_v31  ;;  %6373 = vmatprep.mubr.f32.mxu1 %v17947_v31  ;;  %v15052_v56 = vadd.f32 %v4520_v2, %v14721_v9  ;;  %v15054_v44 = vadd.f32 %v4609_v34, %v3970_v18  ;;  %v15071_v18 = vld [vmem:[%s17679_s1 + $0x340] sm:$0xff] }
 0x2b0   :  { %v15056_v38 = vpop.f32.mrf.mxu0  ;;  %v15058_v4 = vpop.f32.mrf.mxu1 }
 0x2b1   :  { %18120 = vst [vmem:[#allocation100_spill] sm:$0xff] %v15056_v38  ;;  %18121 = vst [vmem:[#allocation179_spill] sm:$0xff] %v15058_v4  ;;  %v18126_v38 = vld [vmem:[#allocation8_spill] sm:$0xff] }
 0x2b2   :  { %11430 = vmatmul.mubr.msk.f32.gmra.mxu0 %vm122_vm0, %v14900_v60  ;;  %11434 = vmatmul.mubr.msk.f32.gmra.mxu1 %vm122_vm0, %v14900_v60 }
 0x2b3   :  { %6444 = vmatprep.mubr.f32.mxu0 %v17947_v31  ;;  %6606 = vmatprep.mubr.f32.mxu1 %v17947_v31 }
 0x2b4   :  { %v4526_v9 = vpop.f32.mrf.mxu0  ;;  %v4615_v2 = vpop.f32.mrf.mxu1 }
 0x2b5   :  { %v15074_v34 = vadd.f32 %v4526_v9, %v14740_v22  ;;  %v15076_v4 = vadd.f32 %v4615_v2, %v3976_v52  ;;  %v18127_v52 = vld [vmem:[#allocation106_spill] sm:$0xff] }
 0x2b6   :  { %11435 = vmatmul.mubr.msk.f32.vlgmr.msra.gmra.mxu0 %vm122_vm0, %v14824_v59  ;;  %11443 = vmatmul.mubr.msk.f32.vlgmr.msra.gmra.mxu1 %vm122_vm0, %v15071_v18  ;;  %v15082_v20 = vpop.f32.mrf.mxu0  ;;  %v15084_v48 = vpop.f32.mrf.mxu1  ;;  %v3982_v22 = vadd.f32 %v14850_v10, %v18127_v52  ;;  %v15097_v59 = vld [vmem:[%s17679_s1 + $0x348] sm:$0xff] }
 0x2b7   :  { %18123 = vst [vmem:[#allocation103_spill] sm:$0xff] %v15076_v4  ;;  %18124 = vst [vmem:[#allocation180_spill] sm:$0xff] %v15082_v20  ;;  %6656 = vmatpush1.msra.mxu0 %v18126_v38  ;;  %6745 = vmatpush1.msra.mxu1 %v17995_v16 }
 0x2b8   :  { %18125 = vst [vmem:[#allocation181_spill] sm:$0xff] %v15084_v48  ;;  %6657 = vmatprep.subr.mxu0 %v13382_v58  ;;  %6746 = vmatprep.subr.mxu1 %v13472_v43  ;;  %v18130_v43 = vld [vmem:[#allocation109_spill] sm:$0xff] }
 0x2b9   :  { %6658 = vmatpush1.msra.mxu0 %v13294_v25  ;;  %6747 = vmatpush1.msra.mxu1 %v17951_v32  ;;  %v3988_v4 = vadd.f32 %v14868_v17, %v18130_v43 }
 0x2ba   :  { %6450 = vmatprep.mubr.f32.mxu0 %v17947_v31  ;;  %6612 = vmatprep.mubr.f32.mxu1 %v17947_v31  ;;  %v4532_v9 = vpop.f32.mrf.mxu0  ;;  %v4621_v2 = vpop.f32.mrf.mxu1 }
 0x2bb   :  { %6659 = vmatprep.subr.mxu0 %v13414_v54  ;;  %6748 = vmatprep.subr.mxu1 %v17953_v3  ;;  %v15104_v10 = vadd.f32 %v4532_v9, %v14763_v46  ;;  %v15106_v52 = vadd.f32 %v4621_v2, %v3982_v22  ;;  %v15127_v22 = vld [vmem:[%s17679_s1 + $0x350] sm:$0xff] }
 0x2bc   :  { %11436 = vmatmul.mubr.msk.f32.gmra.mxu0 %vm122_vm0, %v14846_v8  ;;  %11444 = vmatmul.mubr.msk.f32.gmra.mxu1 %vm122_vm0, %v15097_v59  ;;  %v15112_v48 = vpop.f32.mrf.mxu0  ;;  %v15114_v20 = vpop.f32.mrf.mxu1 }
 0x2bd   :  { %18128 = vst [vmem:[#allocation106_spill] sm:$0xff] %v15112_v48  ;;  %18129 = vst [vmem:[#allocation182_spill] sm:$0xff] %v15114_v20  ;;  %6660 = vmatpush1.msra.mxu0 %v13328_v53  ;;  %6749 = vmatpush1.msra.mxu1 %v17955_v39  ;;  %v18134_v20 = vld [vmem:[#allocation112_spill] sm:$0xff] }
 0x2be   :  { %6661 = vmatprep.subr.mxu0 %v13428_v57  ;;  %6750 = vmatprep.subr.mxu1 %v17957_v14  ;;  %v4538_v46 = vpop.f32.mrf.mxu0  ;;  %v4627_v8 = vpop.f32.mrf.mxu1  ;;  %v4148_v48 = vadd.f32 %v14891_v36, %v18134_v20  ;;  %v15153_v36 = vld [vmem:[%s17679_s1 + $0x358] sm:$0xff] }
 0x2bf   :  { %6662 = vmatpush1.msra.mxu0 %v13342_v0  ;;  %6751 = vmatpush1.msra.mxu1 %v17958_v5  ;;  %v15130_v43 = vadd.f32 %v4538_v46, %v14782_v37  ;;  %v15132_v17 = vadd.f32 %v4627_v8, %v3988_v4 }
 0x2c0   :  { %6456 = vmatprep.mubr.f32.mxu0 %v17947_v31  ;;  %6618 = vmatprep.mubr.f32.mxu1 %v17947_v31  ;;  %v15136_v9 = vpop.f32.mrf.mxu0  ;;  %v15138_v2 = vpop.f32.mrf.mxu1 }
 0x2c1   :  { %18131 = vst [vmem:[#allocation109_spill] sm:$0xff] %v15132_v17  ;;  %18132 = vst [vmem:[#allocation183_spill] sm:$0xff] %v15136_v9  ;;  %6833 = vmatprep.subr.mxu0 %v18092_v51  ;;  %6922 = vmatprep.subr.mxu1 %v18015_v61  ;;  %v18151_v61 = vld [vmem:[#allocation155_spill] sm:$0xff] }
 0x2c2   :  { %18133 = vst [vmem:[#allocation184_spill] sm:$0xff] %v15138_v2  ;;  %11437 = vmatmul.mubr.msk.f32.gmra.mxu0 %vm122_vm0, %v14877_v29  ;;  %11445 = vmatmul.mubr.msk.f32.gmra.mxu1 %vm122_vm0, %v15127_v22  ;;  %v4698_v37 = vpop.f32.mrf.mxu0  ;;  %v4787_v4 = vpop.f32.mrf.mxu1  ;;  %v18138_v2 = vld [vmem:[#allocation115_spill] sm:$0xff] }
 0x2c3   :  { %6462 = vmatprep.mubr.f32.mxu0 %v17947_v31  ;;  %6624 = vmatprep.mubr.f32.mxu1 %v17947_v31  ;;  %v15156_v20 = vadd.f32 %v4698_v37, %v14799_v1  ;;  %v15158_v46 = vadd.f32 %v4787_v4, %v4148_v48  ;;  %v4154_v9 = vadd.f32 %v14912_v23, %v18138_v2  ;;  %v18142_v2 = vld [vmem:[#allocation31_spill] sm:$0xff] }
 0x2c4   :  { %v15160_v29 = vpop.f32.mrf.mxu0  ;;  %v15162_v8 = vpop.f32.mrf.mxu1 }
 0x2c5   :  { %18135 = vst [vmem:[#allocation112_spill] sm:$0xff] %v15158_v46  ;;  %18136 = vst [vmem:[#allocation185_spill] sm:$0xff] %v15160_v29  ;;  %v18146_v29 = vld [vmem:[#allocation26_spill] sm:$0xff]  ;;  %v18152_v46 = vld [vmem:[#allocation123_spill] sm:$0xff] }
 0x2c6   :  { %18137 = vst [vmem:[#allocation186_spill] sm:$0xff] %v15162_v8  ;;  %11438 = vmatmul.mubr.msk.f32.gmra.mxu0 %vm122_vm0, %v14900_v60  ;;  %11446 = vmatmul.mubr.msk.f32.gmra.mxu1 %vm122_vm0, %v15153_v36 }
 0x2c7   :  { %6695 = vmatprep.mubr.f32.mxu0 %v17947_v31  ;;  %6784 = vmatprep.mubr.f32.mxu1 %v17947_v31 }
 0x2c8   :  { %v4704_v1 = vpop.f32.mrf.mxu0  ;;  %v4793_v48 = vpop.f32.mrf.mxu1 }
 0x2c9   :  { %v15173_v37 = vadd.f32 %v4704_v1, %v14827_v63  ;;  %v15175_v4 = vadd.f32 %v4793_v48, %v4154_v9  ;;  %v18143_v63 = vld [vmem:[#allocation118_spill] sm:$0xff]  ;;  %v18144_v9 = vld [vmem:[#allocation152_spill] sm:$0xff]  ;;  %v18145_v48 = vld [vmem:[#allocation119_spill] sm:$0xff] }
 0x2ca   :  { %11447 = vmatmul.mubr.msk.f32.vlgmr.msra.gmra.mxu0 %vm122_vm0, %v15071_v18  ;;  %11451 = vmatmul.mubr.msk.f32.vlgmr.msra.gmra.mxu1 %vm122_vm0, %v15071_v18  ;;  %v15181_v60 = vpop.f32.mrf.mxu0  ;;  %v15183_v23 = vpop.f32.mrf.mxu1  ;;  %v4071_v1 = vadd.f32 %v18144_v9, %v18143_v63  ;;  %v4160_v8 = vadd.f32 %v14933_v42, %v18145_v48  ;;  %v18150_v48 = vld [vmem:[#allocation122_spill] sm:$0xff] }
 0x2cb   :  { %18139 = vst [vmem:[#allocation115_spill] sm:$0xff] %v15175_v4  ;;  %18140 = vst [vmem:[#allocation187_spill] sm:$0xff] %v15181_v60  ;;  %6834 = vmatpush1.msra.mxu0 %v17950_v30  ;;  %6923 = vmatpush1.msra.mxu1 %v18142_v2  ;;  %v4077_v4 = vadd.f32 %v18151_v61, %v18150_v48  ;;  %v18160_v48 = vld [vmem:[#allocation126_spill] sm:$0xff] }
 0x2cc   :  { %18141 = vst [vmem:[#allocation188_spill] sm:$0xff] %v15183_v23  ;;  %6835 = vmatprep.subr.mxu0 %v13559_v45  ;;  %6924 = vmatprep.subr.mxu1 %v18019_v49 }
 0x2cd   :  { %6836 = vmatpush1.msra.mxu0 %v18146_v29  ;;  %6925 = vmatpush1.msra.mxu1 %v17963_v47 }
 0x2ce   :  { %6701 = vmatprep.mubr.f32.mxu0 %v17947_v31  ;;  %6790 = vmatprep.mubr.f32.mxu1 %v17947_v31  ;;  %v4710_v23 = vpop.f32.mrf.mxu0  ;;  %v4799_v60 = vpop.f32.mrf.mxu1 }
 0x2cf   :  { %6837 = vmatprep.subr.mxu0 %v18096_v28  ;;  %6926 = vmatprep.subr.mxu1 %v18023_v6  ;;  %v15199_v49 = vadd.f32 %v4710_v23, %v4071_v1  ;;  %v15201_v63 = vadd.f32 %v4799_v60, %v4160_v8  ;;  %v4166_v6 = vadd.f32 %v14952_v50, %v18152_v46  ;;  %v18153_v23 = vld [vmem:[#allocation28_spill] sm:$0xff] }
 0x2d0   :  { %11448 = vmatmul.mubr.msk.f32.gmra.mxu0 %vm122_vm0, %v15097_v59  ;;  %11452 = vmatmul.mubr.msk.f32.gmra.mxu1 %vm122_vm0, %v15097_v59  ;;  %v15207_v42 = vpop.f32.mrf.mxu0  ;;  %v15209_v9 = vpop.f32.mrf.mxu1  ;;  %v18154_v8 = vld [vmem:[#allocation36_spill] sm:$0xff] }
 0x2d1   :  { %18147 = vst [vmem:[#allocation118_spill] sm:$0xff] %v15201_v63  ;;  %18148 = vst [vmem:[#allocation152_spill] sm:$0xff] %v15207_v42  ;;  %6838 = vmatpush1.msra.mxu0 %v18153_v23  ;;  %6927 = vmatpush1.msra.mxu1 %v18154_v8  ;;  %v18155_v63 = vld [vmem:[#allocation30_spill] sm:$0xff] }
 0x2d2   :  { %18149 = vst [vmem:[#allocation119_spill] sm:$0xff] %v15209_v9  ;;  %6839 = vmatprep.subr.mxu0 %v18097_v40  ;;  %6928 = vmatprep.subr.mxu1 %v18026_v12  ;;  %v4716_v60 = vpop.f32.mrf.mxu0  ;;  %v4805_v1 = vpop.f32.mrf.mxu1  ;;  %v18156_v42 = vld [vmem:[#allocation38_spill] sm:$0xff]  ;;  %v18162_v40 = vld [vmem:[#allocation127_spill] sm:$0xff] }
 0x2d3   :  { %6840 = vmatpush1.msra.mxu0 %v18155_v63  ;;  %6929 = vmatpush1.msra.mxu1 %v18156_v42  ;;  %v15221_v9 = vadd.f32 %v4716_v60, %v4077_v4  ;;  %v15223_v61 = vadd.f32 %v4805_v1, %v4166_v6  ;;  %v18161_v12 = vld [vmem:[#allocation158_spill] sm:$0xff]  ;;  %v4326_v14 = vadd.f32 %v14971_v21, %v18162_v40  ;;  %v18163_v4 = vld [vmem:[#allocation55_spill] sm:$0xff] }
 0x2d4   :  { %6707 = vmatprep.mubr.f32.mxu0 %v17947_v31  ;;  %6796 = vmatprep.mubr.f32.mxu1 %v17947_v31  ;;  %v15227_v50 = vpop.f32.mrf.mxu0  ;;  %v15229_v46 = vpop.f32.mrf.mxu1  ;;  %v4237_v17 = vadd.f32 %v18161_v12, %v18160_v48  ;;  %v18167_v48 = vld [vmem:[#allocation130_spill] sm:$0xff] }
 0x2d5   :  { %18157 = vst [vmem:[#allocation122_spill] sm:$0xff] %v15223_v61  ;;  %18158 = vst [vmem:[#allocation155_spill] sm:$0xff] %v15227_v50  ;;  %7011 = vmatprep.subr.mxu0 %v18109_v11  ;;  %7100 = vmatprep.subr.mxu1 %v18163_v4  ;;  %v18176_v50 = vld [vmem:[#allocation59_spill] sm:$0xff]  ;;  %v18177_v4 = vld [vmem:[#allocation164_spill] sm:$0xff] }
 0x2d6   :  { %18159 = vst [vmem:[#allocation123_spill] sm:$0xff] %v15229_v46  ;;  %11449 = vmatmul.mubr.msk.f32.gmra.mxu0 %vm122_vm0, %v15127_v22  ;;  %11453 = vmatmul.mubr.msk.f32.gmra.mxu1 %vm122_vm0, %v15127_v22  ;;  %v4876_v6 = vpop.f32.mrf.mxu0  ;;  %v4965_v60 = vpop.f32.mrf.mxu1  ;;  %v4332_v46 = vadd.f32 %v14988_v24, %v18167_v48  ;;  %v18172_v48 = vld [vmem:[#allocation40_spill] sm:$0xff] }
 0x2d7   :  { %6713 = vmatprep.mubr.f32.mxu0 %v17947_v31  ;;  %6802 = vmatprep.mubr.f32.mxu1 %v17947_v31  ;;  %v15243_v12 = vadd.f32 %v4876_v6, %v4237_v17  ;;  %v15245_v1 = vadd.f32 %v4965_v60, %v4326_v14  ;;  %v18168_v6 = vld [vmem:[#allocation161_spill] sm:$0xff] }
 0x2d8   :  { %v15247_v40 = vpop.f32.mrf.mxu0  ;;  %v15249_v21 = vpop.f32.mrf.mxu1 }
 0x2d9   :  { %18164 = vst [vmem:[#allocation126_spill] sm:$0xff] %v15245_v1  ;;  %18165 = vst [vmem:[#allocation158_spill] sm:$0xff] %v15247_v40  ;;  %v18181_v1 = vld [vmem:[#allocation137_spill] sm:$0xff] }
 0x2da   :  { %18166 = vst [vmem:[#allocation127_spill] sm:$0xff] %v15249_v21  ;;  %11450 = vmatmul.mubr.msk.f32.gmra.mxu0 %vm122_vm0, %v15153_v36  ;;  %11454 = vmatmul.mubr.msk.f32.gmra.mxu1 %vm122_vm0, %v15153_v36  ;;  %v4344_v61 = vadd.f32 %v15028_v33, %v18181_v1 }
 0x2db   :  { %6873 = vmatprep.mubr.f32.mxu0 %v17947_v31  ;;  %6962 = vmatprep.mubr.f32.mxu1 %v17947_v31 }
 0x2dc   :  { %v4882_v17 = vpop.f32.mrf.mxu0  ;;  %v4971_v14 = vpop.f32.mrf.mxu1 }
 0x2dd   :  { %v15260_v60 = vadd.f32 %v4882_v17, %v18168_v6  ;;  %v15262_v40 = vadd.f32 %v4971_v14, %v4332_v46  ;;  %v18173_v17 = vld [vmem:[#allocation57_spill] sm:$0xff]  ;;  %v18175_v6 = vld [vmem:[#allocation42_spill] sm:$0xff] }
 0x2de   :  { %11455 = vmatmul.mubr.msk.f32.vlgmr.msra.gmra.mxu0 %vm122_vm0, %v15071_v18  ;;  %11459 = vmatmul.mubr.msk.f32.vlgmr.msra.gmra.mxu1 %vm122_vm0, %v15071_v18  ;;  %v15268_v21 = vpop.f32.mrf.mxu0  ;;  %v15270_v24 = vpop.f32.mrf.mxu1  ;;  %v18174_v46 = vld [vmem:[#allocation133_spill] sm:$0xff] }
 0x2df   :  { %18169 = vst [vmem:[#allocation130_spill] sm:$0xff] %v15262_v40  ;;  %18170 = vst [vmem:[#allocation161_spill] sm:$0xff] %v15268_v21  ;;  %7012 = vmatpush1.msra.mxu0 %v18172_v48  ;;  %7101 = vmatpush1.msra.mxu1 %v18102_v15  ;;  %v4338_v14 = vadd.f32 %v15009_v62, %v18174_v46 }
 0x2e0   :  { %18171 = vst [vmem:[#allocation189_spill] sm:$0xff] %v15270_v24  ;;  %7013 = vmatprep.subr.mxu0 %v18111_v7  ;;  %7102 = vmatprep.subr.mxu1 %v18173_v17 }
 0x2e1   :  { %7014 = vmatpush1.msra.mxu0 %v18175_v6  ;;  %7103 = vmatpush1.msra.mxu1 %v18110_v35 }
 0x2e2   :  { %6879 = vmatprep.mubr.f32.mxu0 %v17947_v31  ;;  %6968 = vmatprep.mubr.f32.mxu1 %v17947_v31  ;;  %v4888_v24 = vpop.f32.mrf.mxu0  ;;  %v4977_v21 = vpop.f32.mrf.mxu1 }
 0x2e3   :  { %7015 = vmatprep.subr.mxu0 %v18115_v26  ;;  %7104 = vmatprep.subr.mxu1 %v18176_v50  ;;  %v15285_v40 = vadd.f32 %v4888_v24, %v18177_v4  ;;  %v15287_v17 = vadd.f32 %v4977_v21, %v4338_v14  ;;  %v18182_v26 = vld [vmem:[#allocation44_spill] sm:$0xff]  ;;  %v18184_v4 = vld [vmem:[#allocation61_spill] sm:$0xff]  ;;  %v18185_v14 = vld [vmem:[#allocation46_spill] sm:$0xff] }
 0x2e4   :  { %11456 = vmatmul.mubr.msk.f32.gmra.mxu0 %vm122_vm0, %v15097_v59  ;;  %11460 = vmatmul.mubr.msk.f32.gmra.mxu1 %vm122_vm0, %v15097_v59  ;;  %v15293_v62 = vpop.f32.mrf.mxu0  ;;  %v15295_v46 = vpop.f32.mrf.mxu1  ;;  %v18183_v50 = vld [vmem:[#allocation52_spill] sm:$0xff] }
 0x2e5   :  { %18178 = vst [vmem:[#allocation133_spill] sm:$0xff] %v15287_v17  ;;  %18179 = vst [vmem:[#allocation164_spill] sm:$0xff] %v15293_v62  ;;  %7016 = vmatpush1.msra.mxu0 %v18182_v26  ;;  %7105 = vmatpush1.msra.mxu1 %v18183_v50  ;;  %v18186_v62 = vld [vmem:[#allocation136_spill] sm:$0xff] }
 0x2e6   :  { %18180 = vst [vmem:[#allocation190_spill] sm:$0xff] %v15295_v46  ;;  %7017 = vmatprep.subr.mxu0 %v18067_v41  ;;  %7106 = vmatprep.subr.mxu1 %v18184_v4  ;;  %v4894_v21 = vpop.f32.mrf.mxu0  ;;  %v4983_v24 = vpop.f32.mrf.mxu1 }
 0x2e7   :  { %7018 = vmatpush1.msra.mxu0 %v18185_v14  ;;  %7107 = vmatpush1.msra.mxu1 %v18116_v55  ;;  %v15306_v17 = vadd.f32 %v4894_v21, %v18186_v62  ;;  %v15308_v46 = vadd.f32 %v4983_v24, %v4344_v61  ;;  %v18190_v21 = vld [vmem:[#allocation169_spill] sm:$0xff] }
 0x2e8   :  { %6885 = vmatprep.mubr.f32.mxu0 %v17947_v31  ;;  %6974 = vmatprep.mubr.f32.mxu1 %v17947_v31  ;;  %v15312_v33 = vpop.f32.mrf.mxu0  ;;  %v15314_v1 = vpop.f32.mrf.mxu1 }
 0x2e9   :  { %18187 = vst [vmem:[#allocation137_spill] sm:$0xff] %v15308_v46  ;;  %18188 = vst [vmem:[#allocation136_spill] sm:$0xff] %v15312_v33  ;;  %7262 = vmatprep.subr.mxu0 %v18126_v38  ;;  %7351 = vmatprep.subr.mxu1 %v17995_v16 }
 0x2ea   :  { %18189 = vst [vmem:[#allocation191_spill] sm:$0xff] %v15314_v1  ;;  %11457 = vmatmul.mubr.msk.f32.gmra.mxu0 %vm122_vm0, %v15127_v22  ;;  %11461 = vmatmul.mubr.msk.f32.gmra.mxu1 %vm122_vm0, %v15127_v22  ;;  %v5054_v61 = vpop.f32.mrf.mxu0  ;;  %v5216_v62 = vpop.f32.mrf.mxu1 }
 0x2eb   :  { %6891 = vmatprep.mubr.f32.mxu0 %v17947_v31  ;;  %6980 = vmatprep.mubr.f32.mxu1 %v17947_v31  ;;  %v15325_v24 = vadd.f32 %v5054_v61, %v18190_v21  ;;  %v15328_v1 = vadd.f32 %v5216_v62, %v15052_v56  ;;  %v18193_v21 = vld [vmem:[#allocation172_spill] sm:$0xff] }
 0x2ec   :  { %v15330_v38 = vpop.f32.mrf.mxu0  ;;  %v15332_v16 = vpop.f32.mrf.mxu1 }
 0x2ed   :  { %18191 = vst [vmem:[#allocation169_spill] sm:$0xff] %v15330_v38  ;;  %18192 = vst [vmem:[#allocation192_spill] sm:$0xff] %v15332_v16  ;;  %v18195_v16 = vld [vmem:[#allocation7_spill] sm:$0xff] }
 0x2ee   :  { %11458 = vmatmul.mubr.msk.f32.gmra.mxu0 %vm122_vm0, %v15153_v36  ;;  %11462 = vmatmul.mubr.msk.f32.gmra.mxu1 %vm122_vm0, %v15153_v36 }
 0x2ef   :  { %7051 = vmatprep.mubr.f32.mxu0 %v17947_v31  ;;  %7140 = vmatprep.mubr.f32.mxu1 %v17947_v31 }
 0x2f0   :  { %v5060_v33 = vpop.f32.mrf.mxu0  ;;  %v5222_v61 = vpop.f32.mrf.mxu1 }
 0x2f1   :  { %v15341_v46 = vadd.f32 %v5060_v33, %v18193_v21  ;;  %v15344_v56 = vadd.f32 %v5222_v61, %v15074_v34  ;;  %v18196_v34 = vld [vmem:[#allocation9_spill] sm:$0xff] }
 0x2f2   :  { %11463 = vmatmul.mubr.msk.f32.vlgmr.msra.gmra.mxu0 %vm122_vm0, %v15071_v18  ;;  %11467 = vmatmul.mubr.msk.f32.vlgmr.msra.gmra.mxu1 %vm122_vm0, %v15071_v18  ;;  %v15350_v62 = vpop.f32.mrf.mxu0  ;;  %v15352_v38 = vpop.f32.mrf.mxu1 }
 0x2f3   :  { %18194 = vst [vmem:[#allocation172_spill] sm:$0xff] %v15350_v62  ;;  %7263 = vmatpush1.msra.mxu0 %v18195_v16  ;;  %7352 = vmatpush1.msra.mxu1 %v13372_v19  ;;  %v18198_v16 = vld [vmem:[#allocation11_spill] sm:$0xff] }
 0x2f4   :  { %7264 = vmatprep.subr.mxu0 %v13294_v25  ;;  %7353 = vmatprep.subr.mxu1 %v17951_v32  ;;  %v18204_v32 = vld [vmem:[#allocation23_spill] sm:$0xff] }
 0x2f5   :  { %7265 = vmatpush1.msra.mxu0 %v18196_v34  ;;  %7354 = vmatpush1.msra.mxu1 %v13382_v58 }
 0x2f6   :  { %7057 = vmatprep.mubr.f32.mxu0 %v17947_v31  ;;  %7146 = vmatprep.mubr.f32.mxu1 %v17947_v31  ;;  %v5066_v18 = vpop.f32.mrf.mxu0  ;;  %v5228_v33 = vpop.f32.mrf.mxu1 }
 0x2f7   :  { %7266 = vmatprep.subr.mxu0 %v13328_v53  ;;  %7355 = vmatprep.subr.mxu1 %v17955_v39  ;;  %v15365_v61 = vadd.f32 %v5066_v18, %v15014_v27  ;;  %v15368_v21 = vadd.f32 %v5228_v33, %v15104_v10  ;;  %v18199_v18 = vld [vmem:[#allocation13_spill] sm:$0xff] }
 0x2f8   :  { %11464 = vmatmul.mubr.msk.f32.gmra.mxu0 %vm122_vm0, %v15097_v59  ;;  %11468 = vmatmul.mubr.msk.f32.gmra.mxu1 %vm122_vm0, %v15097_v59  ;;  %v15374_v34 = vpop.f32.mrf.mxu0  ;;  %v15376_v25 = vpop.f32.mrf.mxu1 }
 0x2f9   :  { %18197 = vst [vmem:[#allocation193_spill] sm:$0xff] %v15374_v34  ;;  %7267 = vmatpush1.msra.mxu0 %v18198_v16  ;;  %7356 = vmatpush1.msra.mxu1 %v13414_v54  ;;  %v18217_v54 = vld [vmem:[#allocation39_spill] sm:$0xff] }
 0x2fa   :  { %7268 = vmatprep.subr.mxu0 %v13342_v0  ;;  %7357 = vmatprep.subr.mxu1 %v17958_v5  ;;  %v5072_v27 = vpop.f32.mrf.mxu0  ;;  %v5234_v10 = vpop.f32.mrf.mxu1  ;;  %v18233_v0 = vld [vmem:[#allocation55_spill] sm:$0xff] }
 0x2fb   :  { %7269 = vmatpush1.msra.mxu0 %v18199_v18  ;;  %7358 = vmatpush1.msra.mxu1 %v13428_v57  ;;  %v15385_v59 = vadd.f32 %v5072_v27, %v15033_v13  ;;  %v15388_v33 = vadd.f32 %v5234_v10, %v15130_v43  ;;  %v18236_v57 = vld [vmem:[#allocation58_spill] sm:$0xff] }
 0x2fc   :  { %7063 = vmatprep.mubr.f32.mxu0 %v17947_v31  ;;  %7152 = vmatprep.mubr.f32.mxu1 %v17947_v31  ;;  %v15392_v16 = vpop.f32.mrf.mxu0  ;;  %v15394_v53 = vpop.f32.mrf.mxu1 }
 0x2fd   :  { %18200 = vst [vmem:[#allocation194_spill] sm:$0xff] %v15392_v16  ;;  %7440 = vmatprep.subr.mxu0 %v17950_v30  ;;  %7529 = vmatprep.subr.mxu1 %v18142_v2 }
 0x2fe   :  { %11465 = vmatmul.mubr.msk.f32.gmra.mxu0 %vm122_vm0, %v15127_v22  ;;  %11469 = vmatmul.mubr.msk.f32.gmra.mxu1 %vm122_vm0, %v15127_v22  ;;  %v5305_v13 = vpop.f32.mrf.mxu0  ;;  %v5394_v43 = vpop.f32.mrf.mxu1 }
 0x2ff   :  { %7069 = vmatprep.mubr.f32.mxu0 %v17947_v31  ;;  %7158 = vmatprep.mubr.f32.mxu1 %v17947_v31  ;;  %v15405_v27 = vadd.f32 %v5305_v13, %v15054_v44  ;;  %v15408_v10 = vadd.f32 %v5394_v43, %v15156_v20  ;;  %v15423_v44 = vld [vmem:[%s17679_s1 + $0x360] sm:$0xff]  ;;  %v18202_v13 = vld [vmem:[#allocation103_spill] sm:$0xff] }
 0x300   :  { %v15410_v30 = vpop.f32.mrf.mxu0  ;;  %v15412_v2 = vpop.f32.mrf.mxu1 }
 0x301   :  { %18201 = vst [vmem:[#allocation195_spill] sm:$0xff] %v15412_v2 }
 0x302   :  { %11466 = vmatmul.mubr.msk.f32.gmra.mxu0 %vm122_vm0, %v15153_v36  ;;  %11470 = vmatmul.mubr.msk.f32.gmra.mxu1 %vm122_vm0, %v15153_v36 }
 0x303   :  { %7302 = vmatprep.mubr.f32.mxu0 %v17947_v31  ;;  %7391 = vmatprep.mubr.f32.mxu1 %v17947_v31 }
 0x304   :  { %v5311_v22 = vpop.f32.mrf.mxu0  ;;  %v5400_v20 = vpop.f32.mrf.mxu1 }
 0x305   :  { %v15426_v43 = vadd.f32 %v5311_v22, %v18202_v13  ;;  %v15429_v39 = vadd.f32 %v5400_v20, %v15173_v37  ;;  %v18205_v37 = vld [vmem:[#allocation25_spill] sm:$0xff]  ;;  %v15448_v22 = vld [vmem:[%s17679_s1 + $0x368] sm:$0xff] }
 0x306   :  { %11475 = vmatmul.mubr.msk.f32.vlgmr.msra.gmra.mxu0 %vm122_vm0, %v15423_v44  ;;  %11479 = vmatmul.mubr.msk.f32.vlgmr.msra.gmra.mxu1 %vm122_vm0, %v15423_v44  ;;  %v15435_v36 = vpop.f32.mrf.mxu0  ;;  %v15437_v58 = vpop.f32.mrf.mxu1 }
 0x307   :  { %18203 = vst [vmem:[#allocation103_spill] sm:$0xff] %v15437_v58  ;;  %7441 = vmatpush1.msra.mxu0 %v18204_v32  ;;  %7530 = vmatpush1.msra.mxu1 %v18092_v51 }
 0x308   :  { %7442 = vmatprep.subr.mxu0 %v18146_v29  ;;  %7531 = vmatprep.subr.mxu1 %v17963_v47 }
 0x309   :  { %7443 = vmatpush1.msra.mxu0 %v18205_v37  ;;  %7532 = vmatpush1.msra.mxu1 %v13559_v45 }
 0x30a   :  { %7308 = vmatprep.mubr.f32.mxu0 %v17947_v31  ;;  %7397 = vmatprep.mubr.f32.mxu1 %v17947_v31  ;;  %v5317_v20 = vpop.f32.mrf.mxu0  ;;  %v5406_v13 = vpop.f32.mrf.mxu1 }
 0x30b   :  { %7444 = vmatprep.subr.mxu0 %v18153_v23  ;;  %7533 = vmatprep.subr.mxu1 %v18154_v8  ;;  %v15455_v47 = vadd.f32 %v5317_v20, %v15106_v52  ;;  %v15458_v45 = vadd.f32 %v5406_v13, %v15199_v49  ;;  %v18207_v20 = vld [vmem:[#allocation29_spill] sm:$0xff]  ;;  %v15477_v8 = vld [vmem:[%s17679_s1 + $0x370] sm:$0xff] }
 0x30c   :  { %11476 = vmatmul.mubr.msk.f32.gmra.mxu0 %vm122_vm0, %v15448_v22  ;;  %11480 = vmatmul.mubr.msk.f32.gmra.mxu1 %vm122_vm0, %v15448_v22  ;;  %v15464_v51 = vpop.f32.mrf.mxu0  ;;  %v15466_v37 = vpop.f32.mrf.mxu1  ;;  %v18208_v13 = vld [vmem:[#allocation37_spill] sm:$0xff] }
 0x30d   :  { %18206 = vst [vmem:[#allocation196_spill] sm:$0xff] %v15466_v37  ;;  %7445 = vmatpush1.msra.mxu0 %v17953_v3  ;;  %7534 = vmatpush1.msra.mxu1 %v18096_v28  ;;  %v18209_v23 = vld [vmem:[#allocation109_spill] sm:$0xff] }
 0x30e   :  { %7446 = vmatprep.subr.mxu0 %v18155_v63  ;;  %7535 = vmatprep.subr.mxu1 %v18156_v42  ;;  %v5323_v49 = vpop.f32.mrf.mxu0  ;;  %v5412_v52 = vpop.f32.mrf.mxu1 }
 0x30f   :  { %7447 = vmatpush1.msra.mxu0 %v18207_v20  ;;  %7536 = vmatpush1.msra.mxu1 %v18208_v13  ;;  %v15480_v29 = vadd.f32 %v5323_v49, %v18209_v23  ;;  %v15483_v28 = vadd.f32 %v5412_v52, %v15221_v9  ;;  %v15502_v49 = vld [vmem:[%s17679_s1 + $0x378] sm:$0xff]  ;;  %v18211_v52 = vld [vmem:[#allocation112_spill] sm:$0xff] }
 0x310   :  { %7314 = vmatprep.mubr.f32.mxu0 %v17947_v31  ;;  %7403 = vmatprep.mubr.f32.mxu1 %v17947_v31  ;;  %v15487_v42 = vpop.f32.mrf.mxu0  ;;  %v15489_v20 = vpop.f32.mrf.mxu1 }
 0x311   :  { %18210 = vst [vmem:[#allocation109_spill] sm:$0xff] %v15489_v20  ;;  %7618 = vmatprep.subr.mxu0 %v18172_v48  ;;  %7707 = vmatprep.subr.mxu1 %v18102_v15 }
 0x312   :  { %11477 = vmatmul.mubr.msk.f32.gmra.mxu0 %vm122_vm0, %v15477_v8  ;;  %11481 = vmatmul.mubr.msk.f32.gmra.mxu1 %vm122_vm0, %v15477_v8  ;;  %v5483_v9 = vpop.f32.mrf.mxu0  ;;  %v5572_v23 = vpop.f32.mrf.mxu1 }
 0x313   :  { %7320 = vmatprep.mubr.f32.mxu0 %v17947_v31  ;;  %7409 = vmatprep.mubr.f32.mxu1 %v17947_v31  ;;  %v15505_v13 = vadd.f32 %v5483_v9, %v18211_v52  ;;  %v15508_v15 = vadd.f32 %v5572_v23, %v15243_v12  ;;  %v18214_v52 = vld [vmem:[#allocation115_spill] sm:$0xff] }
 0x314   :  { %v15510_v48 = vpop.f32.mrf.mxu0  ;;  %v15512_v63 = vpop.f32.mrf.mxu1 }
 0x315   :  { %18212 = vst [vmem:[#allocation112_spill] sm:$0xff] %v15510_v48  ;;  %18213 = vst [vmem:[#allocation197_spill] sm:$0xff] %v15512_v63 }
 0x316   :  { %11478 = vmatmul.mubr.msk.f32.gmra.mxu0 %vm122_vm0, %v15502_v49  ;;  %11482 = vmatmul.mubr.msk.f32.gmra.mxu1 %vm122_vm0, %v15502_v49 }
 0x317   :  { %7480 = vmatprep.mubr.f32.mxu0 %v17947_v31  ;;  %7569 = vmatprep.mubr.f32.mxu1 %v17947_v31 }
 0x318   :  { %v5489_v3 = vpop.f32.mrf.mxu0  ;;  %v5578_v9 = vpop.f32.mrf.mxu1 }
 0x319   :  { %v15521_v32 = vadd.f32 %v5489_v3, %v18214_v52  ;;  %v15524_v12 = vadd.f32 %v5578_v9, %v15260_v60  ;;  %v18218_v3 = vld [vmem:[#allocation41_spill] sm:$0xff]  ;;  %v18219_v52 = vld [vmem:[#allocation118_spill] sm:$0xff] }
 0x31a   :  { %11483 = vmatmul.mubr.msk.f32.vlgmr.msra.gmra.mxu0 %vm122_vm0, %v15423_v44  ;;  %11487 = vmatmul.mubr.msk.f32.vlgmr.msra.gmra.mxu1 %vm122_vm0, %v15423_v44  ;;  %v15530_v23 = vpop.f32.mrf.mxu0  ;;  %v15532_v19 = vpop.f32.mrf.mxu1 }
 0x31b   :  { %18215 = vst [vmem:[#allocation115_spill] sm:$0xff] %v15530_v23  ;;  %18216 = vst [vmem:[#allocation198_spill] sm:$0xff] %v15532_v19  ;;  %7619 = vmatpush1.msra.mxu0 %v18217_v54  ;;  %7708 = vmatpush1.msra.mxu1 %v18109_v11 }
 0x31c   :  { %7620 = vmatprep.subr.mxu0 %v18175_v6  ;;  %7709 = vmatprep.subr.mxu1 %v18110_v35 }
 0x31d   :  { %7621 = vmatpush1.msra.mxu0 %v18218_v3  ;;  %7710 = vmatpush1.msra.mxu1 %v18111_v7  ;;  %v18222_v3 = vld [vmem:[#allocation43_spill] sm:$0xff] }
 0x31e   :  { %7486 = vmatprep.mubr.f32.mxu0 %v17947_v31  ;;  %7575 = vmatprep.mubr.f32.mxu1 %v17947_v31  ;;  %v5495_v60 = vpop.f32.mrf.mxu0  ;;  %v5584_v9 = vpop.f32.mrf.mxu1 }
 0x31f   :  { %7622 = vmatprep.subr.mxu0 %v18182_v26  ;;  %7711 = vmatprep.subr.mxu1 %v18183_v50  ;;  %v15545_v11 = vadd.f32 %v5495_v60, %v18219_v52  ;;  %v15548_v6 = vadd.f32 %v5584_v9, %v15285_v40  ;;  %v18223_v26 = vld [vmem:[#allocation51_spill] sm:$0xff]  ;;  %v18224_v9 = vld [vmem:[#allocation45_spill] sm:$0xff]  ;;  %v18225_v52 = vld [vmem:[#allocation122_spill] sm:$0xff] }
 0x320   :  { %11484 = vmatmul.mubr.msk.f32.gmra.mxu0 %vm122_vm0, %v15448_v22  ;;  %11488 = vmatmul.mubr.msk.f32.gmra.mxu1 %vm122_vm0, %v15448_v22  ;;  %v15554_v7 = vpop.f32.mrf.mxu0  ;;  %v15556_v35 = vpop.f32.mrf.mxu1 }
 0x321   :  { %18220 = vst [vmem:[#allocation118_spill] sm:$0xff] %v15554_v7  ;;  %18221 = vst [vmem:[#allocation199_spill] sm:$0xff] %v15556_v35  ;;  %7623 = vmatpush1.msra.mxu0 %v18222_v3  ;;  %7712 = vmatpush1.msra.mxu1 %v18223_v26 }
 0x322   :  { %7624 = vmatprep.subr.mxu0 %v18185_v14  ;;  %7713 = vmatprep.subr.mxu1 %v18116_v55  ;;  %v5501_v40 = vpop.f32.mrf.mxu0  ;;  %v5590_v60 = vpop.f32.mrf.mxu1  ;;  %v18228_v55 = vld [vmem:[#allocation56_spill] sm:$0xff] }
 0x323   :  { %7625 = vmatpush1.msra.mxu0 %v18224_v9  ;;  %7714 = vmatpush1.msra.mxu1 %v18067_v41  ;;  %v15565_v50 = vadd.f32 %v5501_v40, %v18225_v52  ;;  %v15568_v54 = vadd.f32 %v5590_v60, %v15306_v17  ;;  %v18229_v60 = vld [vmem:[#allocation126_spill] sm:$0xff] }
 0x324   :  { %7492 = vmatprep.mubr.f32.mxu0 %v17947_v31  ;;  %7581 = vmatprep.mubr.f32.mxu1 %v17947_v31  ;;  %v15572_v26 = vpop.f32.mrf.mxu0  ;;  %v15574_v14 = vpop.f32.mrf.mxu1 }
 0x325   :  { %18226 = vst [vmem:[#allocation122_spill] sm:$0xff] %v15572_v26  ;;  %18227 = vst [vmem:[#allocation200_spill] sm:$0xff] %v15574_v14  ;;  %7796 = vmatprep.subr.mxu0 %v18228_v55  ;;  %11485 = vmatmul.mubr.msk.f32.gmra.mxu0 %vm122_vm0, %v15477_v8 }
 0x326   :  { %11489 = vmatmul.mubr.msk.f32.gmra.mxu1 %vm122_vm0, %v15477_v8  ;;  %7498 = vmatprep.mubr.f32.mxu0 %v17947_v31  ;;  %v5661_v17 = vpop.f32.mrf.mxu0  ;;  %v5750_v40 = vpop.f32.mrf.mxu1 }
 0x327   :  { %7587 = vmatprep.mubr.f32.mxu1 %v17947_v31  ;;  %v15584_v52 = vadd.f32 %v5661_v17, %v18229_v60  ;;  %v15587_v41 = vadd.f32 %v5750_v40, %v15325_v24  ;;  %v18232_v24 = vld [vmem:[#allocation130_spill] sm:$0xff] }
 0x328   :  { %v15589_v9 = vpop.f32.mrf.mxu0  ;;  %v15591_v55 = vpop.f32.mrf.mxu1 }
 0x329   :  { %18230 = vst [vmem:[#allocation126_spill] sm:$0xff] %v15589_v9  ;;  %18231 = vst [vmem:[#allocation201_spill] sm:$0xff] %v15591_v55  ;;  %11486 = vmatmul.mubr.msk.f32.gmra.mxu0 %vm122_vm0, %v15502_v49  ;;  %v18237_v55 = vld [vmem:[#allocation57_spill] sm:$0xff] }
 0x32a   :  { %11490 = vmatmul.mubr.msk.f32.gmra.mxu1 %vm122_vm0, %v15502_v49  ;;  %7658 = vmatprep.mubr.f32.mxu0 %v17947_v31 }
 0x32b   :  { %7747 = vmatprep.mubr.f32.mxu1 %v17947_v31 }
 0x32c   :  { %v5667_v3 = vpop.f32.mrf.mxu0  ;;  %v5756_v17 = vpop.f32.mrf.mxu1 }
 0x32d   :  { %11491 = vmatmul.mubr.msk.f32.vlgmr.msra.gmra.mxu0 %vm122_vm0, %v15423_v44  ;;  %v15602_v40 = vadd.f32 %v5667_v3, %v18232_v24  ;;  %v15605_v60 = vadd.f32 %v5756_v17, %v15341_v46  ;;  %v18238_v3 = vld [vmem:[#allocation60_spill] sm:$0xff]  ;;  %v18239_v46 = vld [vmem:[#allocation59_spill] sm:$0xff] }
 0x32e   :  { %11495 = vmatmul.mubr.msk.f32.vlgmr.msra.gmra.mxu1 %vm122_vm0, %v15423_v44  ;;  %7797 = vmatpush1.msra.mxu0 %v18233_v0  ;;  %v15610_v5 = vpop.f32.mrf.mxu0  ;;  %v15612_v18 = vpop.f32.mrf.mxu1  ;;  %v18240_v0 = vld [vmem:[#allocation62_spill] sm:$0xff] }
 0x32f   :  { %18234 = vst [vmem:[#allocation130_spill] sm:$0xff] %v15610_v5  ;;  %18235 = vst [vmem:[#allocation202_spill] sm:$0xff] %v15612_v18  ;;  %7798 = vmatprep.subr.mxu0 %v18236_v57  ;;  %7664 = vmatprep.mubr.f32.mxu0 %v17947_v31  ;;  %v18241_v57 = vld [vmem:[#allocation133_spill] sm:$0xff] }
 0x330   :  { %7799 = vmatpush1.msra.mxu0 %v18237_v55  ;;  %7753 = vmatprep.mubr.f32.mxu1 %v17947_v31 }
 0x331   :  { %7800 = vmatprep.subr.mxu0 %v18238_v3  ;;  %11492 = vmatmul.mubr.msk.f32.gmra.mxu0 %vm122_vm0, %v15448_v22 }
 0x332   :  { %11496 = vmatmul.mubr.msk.f32.gmra.mxu1 %vm122_vm0, %v15448_v22  ;;  %7801 = vmatpush1.msra.mxu0 %v18239_v46  ;;  %v5673_v17 = vpop.f32.mrf.mxu0  ;;  %v5762_v24 = vpop.f32.mrf.mxu1 }
 0x333   :  { %7802 = vmatprep.subr.mxu0 %v18240_v0  ;;  %7670 = vmatprep.mubr.f32.mxu0 %v17947_v31  ;;  %v15627_v55 = vadd.f32 %v5673_v17, %v18241_v57  ;;  %v15630_v18 = vadd.f32 %v5762_v24, %v15365_v61  ;;  %v18244_v61 = vld [vmem:[#allocation137_spill] sm:$0xff] }
 0x334   :  { %7803 = vmatpush1.msra.mxu0 %v18184_v4  ;;  %7759 = vmatprep.mubr.f32.mxu1 %v17947_v31  ;;  %v15634_v3 = vpop.f32.mrf.mxu0  ;;  %v15636_v5 = vpop.f32.mrf.mxu1 }
 0x335   :  { %18242 = vst [vmem:[#allocation133_spill] sm:$0xff] %v15634_v3  ;;  %18243 = vst [vmem:[#allocation203_spill] sm:$0xff] %v15636_v5  ;;  %11493 = vmatmul.mubr.msk.f32.gmra.mxu0 %vm122_vm0, %v15477_v8 }
 0x336   :  { %11497 = vmatmul.mubr.msk.f32.gmra.mxu1 %vm122_vm0, %v15477_v8  ;;  %7676 = vmatprep.mubr.f32.mxu0 %v17947_v31  ;;  %v5679_v57 = vpop.f32.mrf.mxu0  ;;  %v5768_v17 = vpop.f32.mrf.mxu1 }
 0x337   :  { %7765 = vmatprep.mubr.f32.mxu1 %v17947_v31  ;;  %v15645_v24 = vadd.f32 %v5679_v57, %v18244_v61  ;;  %v15648_v4 = vadd.f32 %v5768_v17, %v15385_v59 }
 0x338   :  { %v15650_v0 = vpop.f32.mrf.mxu0  ;;  %v15652_v46 = vpop.f32.mrf.mxu1 }
 0x339   :  { %18245 = vst [vmem:[#allocation137_spill] sm:$0xff] %v15650_v0  ;;  %18246 = vst [vmem:[#allocation204_spill] sm:$0xff] %v15652_v46  ;;  %11494 = vmatmul.mubr.msk.f32.gmra.mxu0 %vm122_vm0, %v15502_v49 }
 0x33a   :  { %11498 = vmatmul.mubr.msk.f32.gmra.mxu1 %vm122_vm0, %v15502_v49  ;;  %7836 = vmatprep.mubr.f32.mxu0 %v17947_v31  ;;  %v5912_v5 = vpop.f32.mrf.mxu0  ;;  %v6001_v3 = vpop.f32.mrf.mxu1 }
 0x33b   :  { %v15660_v57 = vadd.f32 %v5912_v5, %v15328_v1  ;;  %v15663_v59 = vadd.f32 %v6001_v3, %v15405_v27 }
 0x33c   :  { %v15665_v17 = vpop.f32.mrf.mxu0  ;;  %v15667_v61 = vpop.f32.mrf.mxu1 }
 0x33d   :  { %18247 = vst [vmem:[#allocation205_spill] sm:$0xff] %v15667_v61  ;;  %11499 = vmatmul.mubr.msk.f32.vlgmr.msra.gmra.mxu0 %vm122_vm0, %v15423_v44  ;;  %v18334_v61 = vld [vmem:[#allocation120_spill] sm:$0xff] }
 0x33e   :  { %7842 = vmatprep.mubr.f32.mxu0 %v17947_v31 }
 0x340   :  { %v5918_v46 = vpop.f32.mrf.mxu0  ;;  %v6007_v0 = vpop.f32.mrf.mxu1 }
 0x341   :  { %11500 = vmatmul.mubr.msk.f32.gmra.mxu0 %vm122_vm0, %v15448_v22  ;;  %v15675_v5 = vadd.f32 %v5918_v46, %v15344_v56  ;;  %v15678_v1 = vadd.f32 %v6007_v0, %v15426_v43 }
 0x342   :  { %7848 = vmatprep.mubr.f32.mxu0 %v17947_v31  ;;  %v15681_v27 = vpop.f32.mrf.mxu0  ;;  %v15683_v3 = vpop.f32.mrf.mxu1 }
 0x343   :  { %18248 = vst [vmem:[#allocation206_spill] sm:$0xff] %v15683_v3 }
 0x345   :  { %11501 = vmatmul.mubr.msk.f32.gmra.mxu0 %vm122_vm0, %v15477_v8 }
 0x346   :  { %7854 = vmatprep.mubr.f32.mxu0 %v17947_v31  ;;  %v5924_v44 = vpop.f32.mrf.mxu0  ;;  %v6013_v9 = vpop.f32.mrf.mxu1 }
 0x347   :  { %v15689_v22 = vadd.f32 %v5924_v44, %v15368_v21  ;;  %v15692_v56 = vadd.f32 %v6013_v9, %v15455_v47 }
 0x348   :  { %v15694_v0 = vpop.f32.mrf.mxu0  ;;  %v15696_v43 = vpop.f32.mrf.mxu1 }
 0x349   :  { %11502 = vmatmul.mubr.msk.f32.gmra.mxu0 %vm122_vm0, %v15502_v49 }
 0x34a   :  { %v5930_v46 = vpop.f32.mrf.mxu0  ;;  %v6019_v14 = vpop.f32.mrf.mxu1 }
 0x34b   :  { %v15701_v8 = vadd.f32 %v5930_v46, %v15388_v33  ;;  %v15704_v31 = vadd.f32 %v6019_v14, %v15480_v29 }
 0x34c   :  { %v15706_v21 = vpop.f32.mrf.mxu0  ;;  %v15708_v44 = vpop.f32.mrf.mxu1 }
 0x34e   :  { %v6090_v47 = vpop.f32.mrf.mxu0  ;;  %v6179_v9 = vpop.f32.mrf.mxu1 }
 0x34f   :  { %v15711_v26 = vadd.f32 %v6090_v47, %v15408_v10  ;;  %v15714_v35 = vadd.f32 %v6179_v9, %v15505_v13 }
 0x350   :  { %v15716_v49 = vpop.f32.mrf.mxu0  ;;  %v15718_v7 = vpop.f32.mrf.mxu1 }
 0x351   :  { %18249 = vst [vmem:[#allocation207_spill] sm:$0xff] %v15716_v49  ;;  %18250 = vst [vmem:[#allocation208_spill] sm:$0xff] %v15718_v7 }
 0x354   :  { %v6096_v33 = vpop.f32.mrf.mxu0  ;;  %v6185_v46 = vpop.f32.mrf.mxu1 }
 0x355   :  { %v15721_v29 = vadd.f32 %v6096_v33, %v15429_v39  ;;  %v15724_v14 = vadd.f32 %v6185_v46, %v15521_v32 }
 0x356   :  { %v15726_v19 = vpop.f32.mrf.mxu0  ;;  %v15728_v23 = vpop.f32.mrf.mxu1 }
 0x357   :  { %18251 = vst [vmem:[#allocation209_spill] sm:$0xff] %v15726_v19  ;;  %18252 = vst [vmem:[#allocation210_spill] sm:$0xff] %v15728_v23 }
 0x35a   :  { %v6102_v10 = vpop.f32.mrf.mxu0  ;;  %v6191_v47 = vpop.f32.mrf.mxu1 }
 0x35b   :  { %v15731_v13 = vadd.f32 %v6102_v10, %v15458_v45  ;;  %v15734_v9 = vadd.f32 %v6191_v47, %v15545_v11 }
 0x35c   :  { %v15736_v7 = vpop.f32.mrf.mxu0  ;;  %v15738_v49 = vpop.f32.mrf.mxu1 }
 0x35d   :  { %18253 = vst [vmem:[#allocation211_spill] sm:$0xff] %v15736_v7  ;;  %18254 = vst [vmem:[#allocation212_spill] sm:$0xff] %v15738_v49 }
 0x35e   :  { %v6108_v39 = vpop.f32.mrf.mxu0  ;;  %v6197_v33 = vpop.f32.mrf.mxu1 }
 0x35f   :  { %v15741_v32 = vadd.f32 %v6108_v39, %v15483_v28  ;;  %v15744_v46 = vadd.f32 %v6197_v33, %v15565_v50  ;;  %v11507_v28 = vld [vmem:[%s17679_s1 + $0x3a0] sm:$0xff] }
 0x360   :  { %v15746_v23 = vpop.f32.mrf.mxu0  ;;  %v15748_v19 = vpop.f32.mrf.mxu1  ;;  %12295 = vmatprep.mubr.msk.f32.mxu1 %vm122_vm0, %v11507_v28 }
 0x361   :  { %18255 = vst [vmem:[#allocation213_spill] sm:$0xff] %v15744_v46  ;;  %18256 = vst [vmem:[#allocation214_spill] sm:$0xff] %v15746_v23 }
 0x362   :  { %18257 = vst [vmem:[#allocation215_spill] sm:$0xff] %v15748_v19  ;;  %v6268_v45 = vpop.f32.mrf.mxu0  ;;  %v6357_v10 = vpop.f32.mrf.mxu1 }
 0x363   :  { %v15751_v11 = vadd.f32 %v6268_v45, %v15508_v15  ;;  %v15754_v47 = vadd.f32 %v6357_v10, %v15584_v52  ;;  %v11519_v10 = vld [vmem:[%s17679_s1 + $0x3c0] sm:$0xff] }
 0x364   :  { %v15756_v49 = vpop.f32.mrf.mxu0  ;;  %v15758_v63 = vpop.f32.mrf.mxu1  ;;  %12323 = vmatprep.mubr.msk.f32.mxu0 %vm122_vm0, %v11519_v10 }
 0x365   :  { %18258 = vst [vmem:[#allocation216_spill] sm:$0xff] %v15756_v49  ;;  %18259 = vst [vmem:[#allocation217_spill] sm:$0xff] %v15758_v63 }
 0x368   :  { %v6274_v50 = vpop.f32.mrf.mxu0  ;;  %v6363_v39 = vpop.f32.mrf.mxu1 }
 0x369   :  { %v15765_v33 = vadd.f32 %v6274_v50, %v15524_v12  ;;  %v15768_v15 = vadd.f32 %v6363_v39, %v15602_v40 }
 0x36a   :  { %v15770_v52 = vpop.f32.mrf.mxu0  ;;  %v15772_v45 = vpop.f32.mrf.mxu1 }
 0x36b   :  { %18260 = vst [vmem:[#allocation218_spill] sm:$0xff] %v15770_v52  ;;  %18261 = vst [vmem:[#allocation219_spill] sm:$0xff] %v15772_v45 }
 0x36e   :  { %v6280_v63 = vpop.f32.mrf.mxu0  ;;  %v6369_v49 = vpop.f32.mrf.mxu1 }
 0x36f   :  { %v15779_v28 = vadd.f32 %v6280_v63, %v15548_v6  ;;  %v15782_v12 = vadd.f32 %v6369_v49, %v15627_v55 }
 0x370   :  { %v15784_v40 = vpop.f32.mrf.mxu0  ;;  %v15786_v50 = vpop.f32.mrf.mxu1 }
 0x371   :  { %18262 = vst [vmem:[#allocation220_spill] sm:$0xff] %v15784_v40  ;;  %18263 = vst [vmem:[#allocation221_spill] sm:$0xff] %v15786_v50 }
 0x372   :  { %v6286_v39 = vpop.f32.mrf.mxu0  ;;  %v6375_v45 = vpop.f32.mrf.mxu1 }
 0x373   :  { %v15789_v52 = vadd.f32 %v6286_v39, %v15568_v54  ;;  %v15792_v19 = vadd.f32 %v6375_v45, %v15645_v24 }
 0x374   :  { %v15794_v10 = vpop.f32.mrf.mxu0  ;;  %v15796_v48 = vpop.f32.mrf.mxu1 }
 0x375   :  { %18264 = vst [vmem:[#allocation222_spill] sm:$0xff] %v15794_v10  ;;  %18265 = vst [vmem:[#allocation223_spill] sm:$0xff] %v15796_v48 }
 0x376   :  { %v6446_v63 = vpop.f32.mrf.mxu0  ;;  %v6608_v6 = vpop.f32.mrf.mxu1 }
 0x377   :  { %v15799_v55 = vadd.f32 %v6446_v63, %v15587_v41  ;;  %v15802_v49 = vadd.f32 %v6608_v6, %v15660_v57 }
 0x378   :  { %v15804_v50 = vpop.f32.mrf.mxu0  ;;  %v15806_v40 = vpop.f32.mrf.mxu1 }
 0x379   :  { %18266 = vst [vmem:[#allocation224_spill] sm:$0xff] %v15804_v50 }
 0x37c   :  { %v6452_v54 = vpop.f32.mrf.mxu0  ;;  %v6614_v39 = vpop.f32.mrf.mxu1 }
 0x37d   :  { %v15809_v24 = vadd.f32 %v6452_v54, %v15605_v60  ;;  %v15812_v45 = vadd.f32 %v6614_v39, %v15675_v5 }
 0x37e   :  { %v15814_v48 = vpop.f32.mrf.mxu0  ;;  %v15816_v10 = vpop.f32.mrf.mxu1 }
 0x37f   :  { %18267 = vst [vmem:[#allocation225_spill] sm:$0xff] %v15814_v48 }
 0x382   :  { %v6458_v41 = vpop.f32.mrf.mxu0  ;;  %v6620_v63 = vpop.f32.mrf.mxu1 }
 0x383   :  { %v15819_v57 = vadd.f32 %v6458_v41, %v15630_v18  ;;  %v15822_v6 = vadd.f32 %v6620_v63, %v15689_v22 }
 0x384   :  { %v15824_v50 = vpop.f32.mrf.mxu0  ;;  %v15826_v58 = vpop.f32.mrf.mxu1 }
 0x385   :  { %18268 = vst [vmem:[#allocation226_spill] sm:$0xff] %v15824_v50 }
 0x386   :  { %v6464_v60 = vpop.f32.mrf.mxu0  ;;  %v6626_v54 = vpop.f32.mrf.mxu1 }
 0x387   :  { %v15829_v5 = vadd.f32 %v6464_v60, %v15648_v4  ;;  %v15832_v39 = vadd.f32 %v6626_v54, %v15701_v8 }
 0x388   :  { %v15834_v48 = vpop.f32.mrf.mxu0  ;;  %v15836_v7 = vpop.f32.mrf.mxu1 }
 0x389   :  { %18269 = vst [vmem:[#allocation227_spill] sm:$0xff] %v15834_v48 }
 0x38a   :  { %v6697_v18 = vpop.f32.mrf.mxu0  ;;  %v6786_v41 = vpop.f32.mrf.mxu1 }
 0x38b   :  { %v15839_v22 = vadd.f32 %v6697_v18, %v15663_v59  ;;  %v15842_v63 = vadd.f32 %v6786_v41, %v15711_v26 }
 0x38c   :  { %v15844_v50 = vpop.f32.mrf.mxu0  ;;  %v15846_v2 = vpop.f32.mrf.mxu1 }
 0x38d   :  { %18270 = vst [vmem:[#allocation228_spill] sm:$0xff] %v15842_v63  ;;  %18271 = vst [vmem:[#allocation229_spill] sm:$0xff] %v15844_v50 }
 0x38e   :  { %18272 = vst [vmem:[#allocation230_spill] sm:$0xff] %v15846_v2 }
 0x390   :  { %v15848_v4 = vpop.f32.mrf.mxu0  ;;  %v6792_v8 = vpop.f32.mrf.mxu1 }
 0x391   :  { %v15851_v60 = vadd.f32 %v6792_v8, %v15721_v29 }
 0x392   :  { %v15853_v54 = vpop.f32.mrf.mxu0  ;;  %v15855_v48 = vpop.f32.mrf.mxu1 }
 0x393   :  { %18273 = vst [vmem:[#allocation231_spill] sm:$0xff] %v15851_v60  ;;  %18274 = vst [vmem:[#allocation232_spill] sm:$0xff] %v15853_v54  ;;  %v18333_v54 = vld [vmem:[#allocation180_spill] sm:$0xff] }
 0x394   :  { %18275 = vst [vmem:[#allocation233_spill] sm:$0xff] %v15855_v48 }
 0x396   :  { %v15857_v16 = vpop.f32.mrf.mxu0  ;;  %v6798_v59 = vpop.f32.mrf.mxu1 }
 0x397   :  { %v15860_v26 = vadd.f32 %v6798_v59, %v15731_v13 }
 0x398   :  { %v15862_v18 = vpop.f32.mrf.mxu0  ;;  %v15864_v41 = vpop.f32.mrf.mxu1 }
 0x399   :  { %18276 = vst [vmem:[#allocation234_spill] sm:$0xff] %v15864_v41 }
 0x39a   :  { %v15866_v2 = vpop.f32.mrf.mxu0  ;;  %v6804_v37 = vpop.f32.mrf.mxu1 }
 0x39b   :  { %v15869_v29 = vadd.f32 %v6804_v37, %v15741_v32 }
 0x39c   :  { %v15871_v8 = vpop.f32.mrf.mxu0  ;;  %v15873_v34 = vpop.f32.mrf.mxu1 }
 0x39d   :  { %18277 = vst [vmem:[#allocation235_spill] sm:$0xff] %v15873_v34 }
 0x39e   :  { %v6875_v48 = vpop.f32.mrf.mxu0  ;;  %v6964_v46 = vpop.f32.mrf.mxu1 }
 0x39f   :  { %v15876_v23 = vadd.f32 %v6875_v48, %v15714_v35  ;;  %v15879_v13 = vadd.f32 %v6964_v46, %v15751_v11 }
 0x3a0   :  { %v15881_v59 = vpop.f32.mrf.mxu0  ;;  %v15883_v41 = vpop.f32.mrf.mxu1 }
 0x3a1   :  { %18278 = vst [vmem:[#allocation236_spill] sm:$0xff] %v15876_v23  ;;  %18279 = vst [vmem:[#allocation237_spill] sm:$0xff] %v15879_v13 }
 0x3a2   :  { %18280 = vst [vmem:[#allocation238_spill] sm:$0xff] %v15881_v59  ;;  %18281 = vst [vmem:[#allocation239_spill] sm:$0xff] %v15883_v41 }
 0x3a4   :  { %v6881_v62 = vpop.f32.mrf.mxu0  ;;  %v6970_v63 = vpop.f32.mrf.mxu1 }
 0x3a5   :  { %v15886_v37 = vadd.f32 %v6881_v62, %v15724_v14  ;;  %v15889_v32 = vadd.f32 %v6970_v63, %v15765_v33 }
 0x3a6   :  { %v15891_v34 = vpop.f32.mrf.mxu0  ;;  %v15893_v50 = vpop.f32.mrf.mxu1 }
 0x3a7   :  { %18282 = vst [vmem:[#allocation240_spill] sm:$0xff] %v15886_v37  ;;  %18283 = vst [vmem:[#allocation241_spill] sm:$0xff] %v15889_v32  ;;  %v18321_v37 = vld [vmem:[#allocation106_spill] sm:$0xff] }
 0x3a8   :  { %18284 = vst [vmem:[#allocation242_spill] sm:$0xff] %v15891_v34  ;;  %18285 = vst [vmem:[#allocation243_spill] sm:$0xff] %v15893_v50 }
 0x3aa   :  { %v6887_v35 = vpop.f32.mrf.mxu0  ;;  %v6976_v48 = vpop.f32.mrf.mxu1 }
 0x3ab   :  { %v15896_v46 = vadd.f32 %v6887_v35, %v15734_v9  ;;  %v15899_v11 = vadd.f32 %v6976_v48, %v15779_v28 }
 0x3ac   :  { %v15901_v41 = vpop.f32.mrf.mxu0  ;;  %v15903_v13 = vpop.f32.mrf.mxu1 }
 0x3ad   :  { %18286 = vst [vmem:[#allocation244_spill] sm:$0xff] %v15896_v46  ;;  %18287 = vst [vmem:[#allocation245_spill] sm:$0xff] %v15899_v11 }
 0x3ae   :  { %18288 = vst [vmem:[#allocation246_spill] sm:$0xff] %v15901_v41  ;;  %18289 = vst [vmem:[#allocation247_spill] sm:$0xff] %v15903_v13  ;;  %v15905_v62 = vpop.f32.mrf.mxu0  ;;  %v6982_v14 = vpop.f32.mrf.mxu1 }
 0x3af   :  { %18290 = vst [vmem:[#allocation248_spill] sm:$0xff] %v15905_v62  ;;  %v15908_v33 = vadd.f32 %v6982_v14, %v15789_v52  ;;  %v18323_v62 = vld [vmem:[#allocation148_spill] sm:$0xff] }
 0x3b0   :  { %v15910_v63 = vpop.f32.mrf.mxu0  ;;  %v15912_v50 = vpop.f32.mrf.mxu1 }
 0x3b1   :  { %18291 = vst [vmem:[#allocation249_spill] sm:$0xff] %v15908_v33  ;;  %18292 = vst [vmem:[#allocation250_spill] sm:$0xff] %v15910_v63  ;;  %v18319_v63 = vld [vmem:[#allocation104_spill] sm:$0xff]  ;;  %v18320_v33 = vld [vmem:[#allocation143_spill] sm:$0xff] }
 0x3b2   :  { %18293 = vst [vmem:[#allocation251_spill] sm:$0xff] %v15912_v50  ;;  %v7053_v59 = vpop.f32.mrf.mxu0  ;;  %v7142_v9 = vpop.f32.mrf.mxu1  ;;  %v3889_v23 = vadd.f32 %v18320_v33, %v18319_v63  ;;  %v18329_v33 = vld [vmem:[#allocation116_spill] sm:$0xff]  ;;  %v18330_v63 = vld [vmem:[#allocation151_spill] sm:$0xff] }
 0x3b3   :  { %v15915_v35 = vadd.f32 %v7053_v59, %v15754_v47  ;;  %v15918_v28 = vadd.f32 %v7142_v9, %v15799_v55 }
 0x3b4   :  { %v15920_v48 = vpop.f32.mrf.mxu0  ;;  %v15922_v13 = vpop.f32.mrf.mxu1 }
 0x3b5   :  { %18294 = vst [vmem:[#allocation252_spill] sm:$0xff] %v15915_v35  ;;  %18295 = vst [vmem:[#allocation253_spill] sm:$0xff] %v15918_v28 }
 0x3b6   :  { %18296 = vst [vmem:[#allocation254_spill] sm:$0xff] %v15920_v48  ;;  %18297 = vst [vmem:[#allocation255_spill] sm:$0xff] %v15922_v13 }
 0x3b8   :  { %v7059_v32 = vpop.f32.mrf.mxu0  ;;  %v7148_v34 = vpop.f32.mrf.mxu1 }
 0x3b9   :  { %v15925_v52 = vadd.f32 %v7059_v32, %v15768_v15  ;;  %v15928_v14 = vadd.f32 %v7148_v34, %v15809_v24 }
 0x3ba   :  { %v15930_v50 = vpop.f32.mrf.mxu0  ;;  %v15932_v11 = vpop.f32.mrf.mxu1 }
 0x3bb   :  { %18298 = vst [vmem:[#allocation256_spill] sm:$0xff] %v15925_v52  ;;  %18299 = vst [vmem:[#allocation257_spill] sm:$0xff] %v15928_v14 }
 0x3bc   :  { %18300 = vst [vmem:[#allocation258_spill] sm:$0xff] %v15930_v50  ;;  %18301 = vst [vmem:[#allocation259_spill] sm:$0xff] %v15932_v11  ;;  %v18316_v50 = vld [vmem:[#allocation183_spill] sm:$0xff] }
 0x3be   :  { %v7065_v47 = vpop.f32.mrf.mxu0  ;;  %v7154_v59 = vpop.f32.mrf.mxu1 }
 0x3bf   :  { %v15935_v55 = vadd.f32 %v7065_v47, %v15782_v12  ;;  %v15938_v9 = vadd.f32 %v7154_v59, %v15819_v57 }
 0x3c0   :  { %v15940_v28 = vpop.f32.mrf.mxu0  ;;  %v15942_v35 = vpop.f32.mrf.mxu1 }
 0x3c1   :  { %18302 = vst [vmem:[#allocation260_spill] sm:$0xff] %v15935_v55  ;;  %18303 = vst [vmem:[#allocation261_spill] sm:$0xff] %v15938_v9  ;;  %v18317_v55 = vld [vmem:[#allocation101_spill] sm:$0xff] }
 0x3c2   :  { %18304 = vst [vmem:[#allocation262_spill] sm:$0xff] %v15940_v28  ;;  %18305 = vst [vmem:[#allocation263_spill] sm:$0xff] %v15942_v35  ;;  %v7071_v15 = vpop.f32.mrf.mxu0  ;;  %v7160_v32 = vpop.f32.mrf.mxu1  ;;  %v18315_v28 = vld [vmem:[#allocation145_spill] sm:$0xff] }
 0x3c3   :  { %v15945_v34 = vadd.f32 %v7071_v15, %v15792_v19  ;;  %v15948_v24 = vadd.f32 %v7160_v32, %v15829_v5  ;;  %v18312_v5 = vld [vmem:[#allocation110_spill] sm:$0xff]  ;;  %v18313_v32 = vld [vmem:[#allocation147_spill] sm:$0xff] }
 0x3c4   :  { %v15950_v14 = vpop.f32.mrf.mxu0  ;;  %v15952_v11 = vpop.f32.mrf.mxu1 }
 0x3c5   :  { %18306 = vst [vmem:[#allocation264_spill] sm:$0xff] %v15945_v34  ;;  %18307 = vst [vmem:[#allocation265_spill] sm:$0xff] %v15948_v24  ;;  %v3901_v24 = vadd.f32 %v18313_v32, %v18312_v5  ;;  %v18318_v34 = vld [vmem:[#allocation141_spill] sm:$0xff] }
 0x3c6   :  { %18308 = vst [vmem:[#allocation266_spill] sm:$0xff] %v15950_v14  ;;  %18309 = vst [vmem:[#allocation267_spill] sm:$0xff] %v15952_v11  ;;  %v15954_v12 = vpop.f32.mrf.mxu0  ;;  %v15956_v57 = vpop.f32.mrf.mxu1  ;;  %v18314_v14 = vld [vmem:[#allocation107_spill] sm:$0xff]  ;;  %v3883_v41 = vadd.f32 %v18318_v34, %v18317_v55  ;;  %v18324_v5 = vld [vmem:[#allocation113_spill] sm:$0xff] }
 0x3c7   :  { %v3895_v11 = vadd.f32 %v18315_v28, %v18314_v14  ;;  %v5120_v13 = vadd.f32 %v18316_v50, %v3901_v24  ;;  %v18325_v32 = vld [vmem:[#allocation149_spill] sm:$0xff]  ;;  %v18327_v14 = vld [vmem:[#allocation150_spill] sm:$0xff] }
 0x3c8   :  { %v15958_v47 = vpop.f32.mrf.mxu0  ;;  %v15960_v59 = vpop.f32.mrf.mxu1  ;;  %v15984_v28 = vadd.f32 %v18325_v32, %v18324_v5  ;;  %v18326_v50 = vld [vmem:[#allocation105_spill] sm:$0xff]  ;;  %v5092_v5 = vadd.f32 %v18333_v54, %v3889_v23  ;;  %v18339_v54 = vld [vmem:[#allocation124_spill] sm:$0xff] }
 0x3c9   :  { %18310 = vst [vmem:[#allocation268_spill] sm:$0xff] %v15960_v59  ;;  %v5106_v46 = vadd.f32 %v18321_v37, %v3895_v11  ;;  %v18322_v59 = vld [vmem:[#allocation102_spill] sm:$0xff]  ;;  %v15988_v24 = vadd.f32 %v18327_v14, %v18326_v50  ;;  %v5816_v20 = vadd.f32 %v15394_v53, %v5120_v13  ;;  %v15995_v37 = vadd.f32 %v18330_v63, %v18329_v33  ;;  %v18331_v11 = vld [vmem:[#allocation108_spill] sm:$0xff]  ;;  %v18336_v53 = vld [vmem:[#allocation111_spill] sm:$0xff] }
 0x3ca   :  { %v18335_v50 = vld [vmem:[#allocation154_spill] sm:$0xff]  ;;  %v18337_v13 = vld [vmem:[#allocation156_spill] sm:$0xff]  ;;  %v7209_v33 = vadd.f32 %v15866_v2, %v15704_v31  ;;  %v5788_v23 = vadd.f32 %v15352_v38, %v5092_v5  ;;  %v16030_v38 = vpop.permute.xlu1 %7926 }
 0x3cb   :  { %v5802_v32 = vadd.f32 %v15376_v25, %v5106_v46  ;;  %v16005_v14 = vadd.f32 %v18335_v50, %v18334_v61  ;;  %v16009_v60 = vadd.f32 %v18337_v13, %v18336_v53  ;;  %v7195_v61 = vadd.f32 %v15857_v16, %v15692_v56  ;;  %v18340_v46 = vld [vmem:[#allocation157_spill] sm:$0xff]  ;;  %v18341_v53 = vld [vmem:[#allocation114_spill] sm:$0xff]  ;;  %v18343_v5 = vld [vmem:[#allocation192_spill] sm:$0xff] }
 0x3cc   :  { %v15962_v9 = vpop.f32.mrf.mxu0  ;;  %v7399_v35 = vpop.f32.mrf.mxu1  ;;  %v16021_v50 = vadd.f32 %v18340_v46, %v18339_v54  ;;  %v6484_v56 = vadd.f32 %v15681_v27, %v5788_v23  ;;  %v18344_v54 = vld [vmem:[#allocation128_spill] sm:$0xff]  ;;  %v18349_v27 = vld [vmem:[#allocation162_spill] sm:$0xff] }
 0x3cd   :  { %v6498_v25 = vadd.f32 %v15694_v0, %v5802_v32  ;;  %v16032_v0 = vpop.permute.xlu0 %7930  ;;  %v18345_v46 = vld [vmem:[#allocation160_spill] sm:$0xff] }
 0x3ce   :  { %v7312_v19 = vpop.f32.mrf.mxu0  ;;  %v15964_v15 = vpop.f32.mrf.mxu1 }
 0x3cf   :  { %18311 = vst [vmem:[#allocation269_spill] sm:$0xff] %v15964_v15  ;;  %v15980_v15 = vadd.f32 %v18323_v62, %v18322_v59  ;;  %v18332_v62 = vld [vmem:[#allocation153_spill] sm:$0xff]  ;;  %v7194_v32 = vadd.f32 %v15826_v58, %v6498_v25 }
 0x3d0   :  { %v15999_v59 = vadd.f32 %v18332_v62, %v18331_v11  ;;  %v18338_v62 = vld [vmem:[#allocation100_spill] sm:$0xff] }
 0x3d1   :  { %v5078_v3 = vadd.f32 %v18338_v62, %v3883_v41 }
 0x3d2   :  { %v15971_v52 = vpop.f32.mrf.mxu0  ;;  %v7405_v48 = vpop.f32.mrf.mxu1 }
 0x3d3   :  { %v5774_v16 = vadd.f32 %v18343_v5, %v5078_v3  ;;  %v7891_v62 = vadd.f32 %v7405_v48, %v7195_v61  ;;  %v18348_v3 = vld [vmem:[#allocation117_spill] sm:$0xff]  ;;  %v7180_v48 = vadd.f32 %v15816_v10, %v6484_v56  ;;  %v18350_v61 = vld [vmem:[#allocation131_spill] sm:$0xff]  ;;  %v18357_v10 = vld [vmem:[#allocation134_spill] sm:$0xff] }
 0x3d4   :  { %v7318_v55 = vpop.f32.mrf.mxu0  ;;  %v15991_v34 = vpop.f32.mrf.mxu1  ;;  %v16052_v23 = vadd.f32 %v18349_v27, %v18348_v3  ;;  %v18351_v5 = vld [vmem:[#allocation163_spill] sm:$0xff]  ;;  %v18362_v27 = vld [vmem:[#allocation138_spill] sm:$0xff] }
 0x3d5   :  { %18328 = vst [vmem:[#allocation110_spill] sm:$0xff] %v15991_v34  ;;  %v6512_v34 = vadd.f32 %v15706_v21, %v5816_v20  ;;  %v18342_v20 = vld [vmem:[#allocation159_spill] sm:$0xff]  ;;  %v6470_v58 = vadd.f32 %v15665_v17, %v5774_v16  ;;  %v7890_v25 = vadd.f32 %v7318_v55, %v7194_v32  ;;  %v18358_v55 = vld [vmem:[#allocation166_spill] sm:$0xff]  ;;  %v7876_v32 = vadd.f32 %v7312_v19, %v7180_v48  ;;  %v16096_v19 = vpop.permute.xlu1 %7922 }
 0x3d6   :  { %v7322_v63 = vpop.f32.mrf.mxu0  ;;  %v7411_v11 = vpop.f32.mrf.mxu1  ;;  %v16025_v21 = vadd.f32 %v18342_v20, %v18341_v53  ;;  %v16039_v53 = vadd.f32 %v18345_v46, %v18344_v54  ;;  %v16074_v16 = vadd.f32 %v18358_v55, %v18357_v10  ;;  %v16078_v3 = vadd.f32 %v16030_v38, %v7891_v62  ;;  %v18366_v62 = vld [vmem:[#allocation140_spill] sm:$0xff] }
 0x3d7   :  { %v7208_v31 = vadd.f32 %v15836_v7, %v6512_v34  ;;  %v7905_v2 = vadd.f32 %v7411_v11, %v7209_v33  ;;  %v7181_v7 = vadd.f32 %v15848_v4, %v15678_v1  ;;  %v16058_v1 = vadd.f32 %v18351_v5, %v18350_v61  ;;  %v18352_v4 = vld [vmem:[#allocation121_spill] sm:$0xff]  ;;  %v18363_v61 = vld [vmem:[#allocation168_spill] sm:$0xff] }
 0x3d8   :  { %v7324_v13 = vpop.f32.mrf.mxu0  ;;  %v16028_v41 = vpop.f32.mrf.mxu1  ;;  %v7166_v56 = vadd.f32 %v15806_v40, %v6470_v58  ;;  %18359 = vst [vmem:[#allocation141_spill] sm:$0xff] %v16078_v3  ;;  %v16087_v5 = vadd.f32 %v18363_v61, %v18362_v27  ;;  %v7863_v40 = vadd.f32 %v15956_v57, %v15839_v22  ;;  %v18367_v58 = vld [vmem:[#allocation171_spill] sm:$0xff]  ;;  %v18368_v55 = vld [vmem:[#allocation132_spill] sm:$0xff]  ;;  %v16108_v61 = vadd.f32 %v16030_v38, %v7890_v25  ;;  %v18371_v22 = vld [vmem:[#allocation142_spill] sm:$0xff] }
 0x3d9   :  { %v16044_v34 = vadd.f32 %v16032_v0, %v7905_v2  ;;  %v7904_v33 = vadd.f32 %v7324_v13, %v7208_v31  ;;  %v18353_v2 = vld [vmem:[#allocation165_spill] sm:$0xff]  ;;  %v7877_v13 = vadd.f32 %v7399_v35, %v7181_v7  ;;  %v18361_v7 = vld [vmem:[#allocation167_spill] sm:$0xff]  ;;  %v16100_v48 = vadd.f32 %v18367_v58, %v18366_v62  ;;  %v18372_v57 = vld [vmem:[#allocation174_spill] sm:$0xff] }
 0x3da   :  { %v16046_v11 = vpop.f32.mrf.mxu0  ;;  %v16048_v20 = vpop.f32.mrf.mxu1  ;;  %v16062_v31 = vadd.f32 %v18353_v2, %v18352_v4  ;;  %v18360_v35 = vld [vmem:[#allocation125_spill] sm:$0xff]  ;;  %v18365_v2 = vld [vmem:[#allocation170_spill] sm:$0xff]  ;;  %v7862_v27 = vadd.f32 %v15958_v47, %v7166_v56  ;;  %18370 = vst [vmem:[#allocation104_spill] sm:$0xff] %v16108_v61  ;;  %v18376_v25 = vld [vmem:[#allocation144_spill] sm:$0xff] }
 0x3db   :  { %18346 = vst [vmem:[#allocation147_spill] sm:$0xff] %v16044_v34  ;;  %18347 = vst [vmem:[#allocation107_spill] sm:$0xff] %v16048_v20  ;;  %v16065_v54 = vadd.f32 %v16032_v0, %v7904_v33  ;;  %12315 = vmatprep.subr.mxu0 %v16044_v34  ;;  %v16083_v33 = vadd.f32 %v18361_v7, %v18360_v35  ;;  %v18364_v4 = vld [vmem:[#allocation129_spill] sm:$0xff]  ;;  %v16120_v62 = vadd.f32 %v16096_v19, %v7877_v13  ;;  %v16128_v47 = vpop.permute.xlu0 %7918  ;;  %v18377_v56 = vld [vmem:[#allocation176_spill] sm:$0xff] }
 0x3dc   :  { %v16068_v46 = vpop.f32.mrf.mxu0  ;;  %v16070_v17 = vpop.f32.mrf.mxu1  ;;  %12316 = vmatpush3.msra.mxu0 %v16044_v34  ;;  %v16091_v10 = vadd.f32 %v18365_v2, %v18364_v4  ;;  %v18369_v35 = vld [vmem:[#allocation173_spill] sm:$0xff]  ;;  %v16113_v4 = vadd.f32 %v18372_v57, %v18371_v22  ;;  %v18373_v2 = vld [vmem:[#allocation135_spill] sm:$0xff]  ;;  %v16139_v13 = vadd.f32 %v16096_v19, %v7876_v32 }
 0x3dd   :  { %18354 = vst [vmem:[#allocation145_spill] sm:$0xff] %v16065_v54  ;;  %18355 = vst [vmem:[#allocation183_spill] sm:$0xff] %v16068_v46  ;;  %12287 = vmatprep.subr.mxu1 %v16065_v54  ;;  %v16104_v7 = vadd.f32 %v18369_v35, %v18368_v55  ;;  %12317 = vmatprep.subr.mxu0 %v16078_v3  ;;  %v18374_v34 = vld [vmem:[#allocation175_spill] sm:$0xff]  ;;  %v16132_v35 = vadd.f32 %v18377_v56, %v18376_v25  ;;  %v18382_v46 = vld [vmem:[#allocation178_spill] sm:$0xff] }
 0x3de   :  { %18356 = vst [vmem:[#allocation101_spill] sm:$0xff] %v16070_v17  ;;  %v16117_v17 = vadd.f32 %v18374_v34, %v18373_v2  ;;  %12288 = vmatpush3.msra.mxu1 %v16065_v54  ;;  %12318 = vmatpush3.msra.mxu0 %v16078_v3  ;;  %v18378_v22 = vld [vmem:[#allocation139_spill] sm:$0xff]  ;;  %v18379_v34 = vld [vmem:[#allocation177_spill] sm:$0xff]  ;;  %18380 = vst [vmem:[#allocation106_spill] sm:$0xff] %v16139_v13  ;;  %v7903_v2 = vadd.f32 %v7322_v63, %v15832_v39 }
 0x3df   :  { %v16136_v57 = vadd.f32 %v18379_v34, %v18378_v22  ;;  %12289 = vmatprep.subr.mxu1 %v16108_v61  ;;  %v18381_v54 = vld [vmem:[#allocation146_spill] sm:$0xff]  ;;  %v18383_v20 = vld [vmem:[#allocation179_spill] sm:$0xff]  ;;  %v16152_v25 = vadd.f32 %v16128_v47, %v7863_v40  ;;  %12319 = vmatprep.subr.mxu0 %v16120_v62  ;;  %v18384_v39 = vld [vmem:[#allocation181_spill] sm:$0xff] }
 0x3e0   :  { %v16122_v58 = vpop.f32.mrf.mxu0  ;;  %v16124_v55 = vpop.f32.mrf.mxu1  ;;  %v16145_v3 = vadd.f32 %v18382_v46, %v18381_v54  ;;  %12290 = vmatpush3.msra.mxu1 %v16108_v61  ;;  %v5094_v63 = vadd.f32 %v18384_v39, %v15988_v24  ;;  %v16163_v54 = vadd.f32 %v16128_v47, %v7862_v27  ;;  %12320 = vmatpush3.msra.mxu0 %v16120_v62  ;;  %v18385_v46 = vld [vmem:[#allocation182_spill] sm:$0xff]  ;;  %v18386_v22 = vld [vmem:[#allocation184_spill] sm:$0xff]  ;;  %v18387_v27 = vld [vmem:[#allocation185_spill] sm:$0xff] }
 0x3e1   :  { %18375 = vst [vmem:[#allocation143_spill] sm:$0xff] %v16124_v55  ;;  %v16149_v55 = vadd.f32 %v18383_v20, %v15980_v15  ;;  %v7889_v15 = vadd.f32 %v15971_v52, %v15822_v6  ;;  %12291 = vmatprep.subr.mxu1 %v16139_v13  ;;  %v11520_v20 = vld [vmem:[%s17679_s1 + $0x3c8] sm:$0xff]  ;;  %v5108_v40 = vadd.f32 %v18385_v46, %v15999_v59  ;;  %v18388_v52 = vld [vmem:[#allocation186_spill] sm:$0xff] }
 0x3e2   :  { %v16155_v56 = vpop.f32.mrf.mxu0  ;;  %v16157_v32 = vpop.f32.mrf.mxu1  ;;  %v5122_v24 = vadd.f32 %v18386_v22, %v16009_v60  ;;  %v16178_v34 = vadd.f32 %v18387_v27, %v15984_v28  ;;  %12321 = vmatprep.subr.mxu0 %v16152_v25  ;;  %12292 = vmatpush3.msra.mxu1 %v16139_v13  ;;  %v11508_v6 = vld [vmem:[%s17679_s1 + $0x3a8] sm:$0xff]  ;;  %v16187_v39 = vadd.f32 %v18388_v52, %v16025_v21  ;;  %v18391_v27 = vld [vmem:[#allocation188_spill] sm:$0xff] }
 0x3e3   :  { %v7875_v59 = vadd.f32 %v15962_v9, %v15812_v45  ;;  %v16192_v60 = vadd.f32 %v16032_v0, %v7903_v2  ;;  %12322 = vmatpush3.msra.mxu0 %v16152_v25  ;;  %12293 = vmatprep.subr.mxu1 %v16163_v54  ;;  %v18390_v46 = vld [vmem:[#allocation187_spill] sm:$0xff]  ;;  %v16202_v61 = vadd.f32 %v18391_v27, %v16052_v23  ;;  %v11509_v45 = vld [vmem:[%s17679_s1 + $0x3b0] sm:$0xff] }
 0x3e4   :  { %v16198_v22 = vadd.f32 %v18390_v46, %v15995_v37  ;;  %v5818_v21 = vadd.f32 %v15487_v42, %v5122_v24  ;;  %12294 = vmatpush3.msra.mxu1 %v16163_v54  ;;  %12324 = vmatmul.mubr.msk.f32.vlgmr.msra.gmra.mxu0 %vm122_vm0, %v11520_v20  ;;  %v18392_v9 = vld [vmem:[#allocation152_spill] sm:$0xff]  ;;  %v7861_v23 = vadd.f32 %v15954_v12, %v15802_v49  ;;  %v18394_v24 = vld [vmem:[#allocation119_spill] sm:$0xff] }
 0x3e5   :  { %18389 = vst [vmem:[#allocation102_spill] sm:$0xff] %v16192_v60  ;;  %v7494_v28 = vpop.f32.mrf.mxu0  ;;  %v16214_v37 = vadd.f32 %v18392_v9, %v16005_v14  ;;  %v16219_v2 = vadd.f32 %v16030_v38, %v7889_v15  ;;  %12296 = vmatmul.mubr.msk.f32.vlgmr.msra.gmra.mxu1 %vm122_vm0, %v11508_v6  ;;  %12301 = vmatprep.subr.mxu1 %v16192_v60  ;;  %v11521_v20 = vld [vmem:[%s17679_s1 + $0x3d0] sm:$0xff]  ;;  %v18395_v46 = vld [vmem:[#allocation155_spill] sm:$0xff]  ;;  %v11510_v6 = vld [vmem:[%s17679_s1 + $0x3b8] sm:$0xff] }
 0x3e6   :  { %v16205_v52 = vpop.f32.mrf.mxu1  ;;  %v16230_v14 = vadd.f32 %v18394_v24, %v16062_v31  ;;  %v5124_v49 = vadd.f32 %v18395_v46, %v16021_v50  ;;  %v5804_v12 = vadd.f32 %v15464_v51, %v5108_v40  ;;  %v6514_v15 = vadd.f32 %v15708_v44, %v5818_v21  ;;  %12302 = vmatpush3.msra.mxu1 %v16192_v60  ;;  %v18396_v9 = vld [vmem:[#allocation123_spill] sm:$0xff]  ;;  %v18397_v31 = vld [vmem:[#allocation158_spill] sm:$0xff] }
 0x3e7   :  { %18393 = vst [vmem:[#allocation148_spill] sm:$0xff] %v16219_v2  ;;  %v16221_v42 = vpop.f32.mrf.mxu0  ;;  %v16244_v13 = vadd.f32 %v18396_v9, %v16083_v33  ;;  %v16248_v24 = vadd.f32 %v18397_v31, %v16039_v53  ;;  %v16251_v51 = vadd.f32 %v16096_v19, %v7875_v59  ;;  %12303 = vmatprep.subr.mxu1 %v16219_v2  ;;  %v18398_v53 = vld [vmem:[#allocation127_spill] sm:$0xff]  ;;  %v18404_v31 = vld [vmem:[#allocation110_spill] sm:$0xff] }
 0x3e8   :  { %v16236_v27 = vpop.f32.mrf.mxu1  ;;  %12298 = vmatprep.mubr.msk.f32.mxu1 %vm122_vm0, %v11509_v45  ;;  %v6500_v50 = vadd.f32 %v15696_v43, %v5804_v12  ;;  %v7210_v40 = vadd.f32 %v15871_v8, %v6514_v15  ;;  %12304 = vmatpush3.msra.mxu1 %v16219_v2  ;;  %v16264_v59 = vadd.f32 %v18398_v53, %v16091_v10  ;;  %v18401_v12 = vld [vmem:[#allocation189_spill] sm:$0xff] }
 0x3e9   :  { %v7500_v44 = vpop.f32.mrf.mxu0  ;;  %12326 = vmatprep.mubr.msk.f32.mxu0 %vm122_vm0, %v11521_v20  ;;  %v5790_v46 = vadd.f32 %v15435_v36, %v5094_v63  ;;  %v16268_v45 = vadd.f32 %v16128_v47, %v7861_v23  ;;  %12299 = vmatmul.mubr.msk.f32.gmra.mxu1 %vm122_vm0, %v11510_v6  ;;  %v7893_v20 = vadd.f32 %v7494_v28, %v15860_v26  ;;  %v11503_v36 = vld [vmem:[%s17679_s1 + $0x380] sm:$0xff]  ;;  %v18400_v63 = vld [vmem:[#allocation161_spill] sm:$0xff]  ;;  %v11504_v6 = vld [vmem:[%s17679_s1 + $0x388] sm:$0xff] }
 0x3ea   :  { %v7907_v21 = vadd.f32 %v7500_v44, %v15869_v29  ;;  %v16258_v33 = vpop.f32.mrf.mxu1  ;;  %12305 = vmatprep.subr.mxu1 %v16251_v51  ;;  %v7196_v29 = vadd.f32 %v15862_v18, %v6500_v50  ;;  %v7906_v8 = vadd.f32 %v16028_v41, %v7210_v40  ;;  %v16286_v23 = vadd.f32 %v18400_v63, %v16058_v1  ;;  %v18402_v41 = vld [vmem:[#allocation206_spill] sm:$0xff]  ;;  %v18403_v1 = vld [vmem:[#allocation164_spill] sm:$0xff]  ;;  %v18405_v44 = vld [vmem:[#allocation231_spill] sm:$0xff] }
 0x3eb   :  { %v16270_v43 = vpop.f32.mrf.mxu0  ;;  %12306 = vmatpush3.msra.mxu1 %v16251_v51  ;;  %v16290_v18 = vadd.f32 %v18401_v12, %v16104_v7  ;;  %v5776_v26 = vadd.f32 %v15410_v30, %v16149_v55  ;;  %v6486_v28 = vadd.f32 %v18402_v41, %v5790_v46  ;;  %v16303_v9 = vadd.f32 %v18403_v1, %v16074_v16  ;;  %v11522_v55 = vld [vmem:[%s17679_s1 + $0x3d8] sm:$0xff]  ;;  %v18406_v40 = vld [vmem:[#allocation190_spill] sm:$0xff]  ;;  %v18408_v46 = vld [vmem:[#allocation232_spill] sm:$0xff] }
 0x3ec   :  { %v16278_v10 = vadd.f32 %v16032_v0, %v7907_v21  ;;  %12307 = vmatprep.subr.mxu1 %v16268_v45  ;;  %v7892_v7 = vadd.f32 %v18404_v31, %v7196_v29  ;;  %v7879_v50 = vadd.f32 %v16122_v58, %v18405_v44  ;;  %v16308_v30 = vpop.f32.mrf.mxu1  ;;  %v16317_v21 = vadd.f32 %v18406_v40, %v16117_v17  ;;  %v18407_v16 = vld [vmem:[#allocation205_spill] sm:$0xff]  ;;  %v18409_v58 = vld [vmem:[#allocation136_spill] sm:$0xff]  ;;  %v18410_v41 = vld [vmem:[#allocation191_spill] sm:$0xff] }
 0x3ed   :  { %v16295_v15 = vpop.f32.mrf.mxu0  ;;  %12308 = vmatpush3.msra.mxu1 %v16268_v45  ;;  %v6472_v53 = vadd.f32 %v18407_v16, %v5776_v26  ;;  %v7182_v29 = vadd.f32 %v18408_v46, %v6486_v28  ;;  %12309 = vmatprep.mubr.msk.f32.mxu1 %vm122_vm0, %v11503_v36  ;;  %v16327_v12 = vadd.f32 %v18409_v58, %v16087_v5  ;;  %v18412_v36 = vld [vmem:[#allocation169_spill] sm:$0xff] }
 0x3ee   :  { %18399 = vst [vmem:[#allocation113_spill] sm:$0xff] %v16278_v10  ;;  %12343 = vmatprep.subr.mxu0 %v16278_v10  ;;  %v16331_v1 = vadd.f32 %v18410_v41, %v16136_v57  ;;  %v16334_v17 = vadd.f32 %v16032_v0, %v7906_v8  ;;  %v16337_v26 = vadd.f32 %v16030_v38, %v7893_v20  ;;  %v18413_v31 = vld [vmem:[#allocation109_spill] sm:$0xff]  ;;  %v18416_v20 = vld [vmem:[#allocation228_spill] sm:$0xff] }
 0x3ef   :  { %v16321_v63 = vpop.f32.mrf.mxu0  ;;  %12344 = vmatpush3.msra.mxu0 %v16278_v10  ;;  %12310 = vmatmul.mubr.msk.f32.vlgmr.msra.gmra.mxu1 %vm122_vm0, %v11504_v6  ;;  %v16342_v28 = vadd.f32 %v18412_v36, %v16100_v48  ;;  %v5820_v44 = vadd.f32 %v18413_v31, %v5124_v49  ;;  %v18414_v5 = vld [vmem:[#allocation229_spill] sm:$0xff]  ;;  %v16351_v8 = vadd.f32 %v16030_v38, %v7892_v7  ;;  %v16358_v48 = vpop.f32.mrf.mxu1  ;;  %v11505_v49 = vld [vmem:[%s17679_s1 + $0x390] sm:$0xff] }
 0x3f0   :  { %18411 = vst [vmem:[#allocation149_spill] sm:$0xff] %v16337_v26  ;;  %v7168_v40 = vadd.f32 %v18414_v5, %v6472_v53  ;;  %v18415_v16 = vld [vmem:[#allocation269_spill] sm:$0xff]  ;;  %12327 = vmatmul.mubr.msk.f32.gmra.mxu0 %vm122_vm0, %v11522_v55  ;;  %v7865_v6 = vadd.f32 %v16046_v11, %v18416_v20  ;;  %v16356_v58 = vadd.f32 %v16096_v19, %v7879_v50  ;;  %v18418_v55 = vld [vmem:[#allocation172_spill] sm:$0xff]  ;;  %v18419_v53 = vld [vmem:[#allocation214_spill] sm:$0xff] }
 0x3f1   :  { %v7878_v46 = vadd.f32 %v18415_v16, %v7182_v29  ;;  %v16348_v57 = vpop.f32.mrf.mxu0  ;;  %12329 = vmatprep.subr.mxu1 %v16334_v17  ;;  %12345 = vmatprep.subr.mxu0 %v16337_v26  ;;  %v16367_v7 = vadd.f32 %v18418_v55, %v16113_v4  ;;  %v6516_v29 = vadd.f32 %v18419_v53, %v5820_v44  ;;  %v18420_v11 = vld [vmem:[#allocation213_spill] sm:$0xff]  ;;  %v18421_v41 = vld [vmem:[#allocation248_spill] sm:$0xff]  ;;  %v18425_v53 = vld [vmem:[#allocation194_spill] sm:$0xff] }
 0x3f2   :  { %18417 = vst [vmem:[#allocation105_spill] sm:$0xff] %v16356_v58  ;;  %v7213_v50 = vadd.f32 %v18421_v41, %v18420_v11  ;;  %12330 = vmatpush3.msra.mxu1 %v16334_v17  ;;  %12346 = vmatpush3.msra.mxu0 %v16337_v26  ;;  %v18422_v31 = vld [vmem:[#allocation193_spill] sm:$0xff]  ;;  %v18423_v16 = vld [vmem:[#allocation196_spill] sm:$0xff]  ;;  %v16390_v11 = vadd.f32 %v18425_v53, %v16145_v3  ;;  %v18426_v41 = vld [vmem:[#allocation235_spill] sm:$0xff]  ;;  %v16406_v3 = vpop.f32.mrf.mxu1 }
 0x3f3   :  { %v16374_v36 = vpop.f32.mrf.mxu0  ;;  %v16378_v5 = vadd.f32 %v18422_v31, %v16132_v35  ;;  %v5806_v20 = vadd.f32 %v18423_v16, %v16214_v37  ;;  %v18424_v4 = vld [vmem:[#allocation268_spill] sm:$0xff]  ;;  %12331 = vmatprep.subr.mxu1 %v16351_v8  ;;  %12347 = vmatprep.subr.mxu0 %v16356_v58  ;;  %v11506_v44 = vld [vmem:[%s17679_s1 + $0x398] sm:$0xff]  ;;  %v7212_v35 = vadd.f32 %v18426_v41, %v6516_v29  ;;  %v18427_v16 = vld [vmem:[#allocation195_spill] sm:$0xff] }
 0x3f4   :  { %v7864_v55 = vadd.f32 %v18424_v4, %v7168_v40  ;;  %v16394_v31 = vadd.f32 %v16096_v19, %v7878_v46  ;;  %v7909_v37 = vadd.f32 %v16258_v33, %v7213_v50  ;;  %12312 = vmatprep.mubr.msk.f32.mxu1 %vm122_vm0, %v11505_v49  ;;  %v5778_v4 = vadd.f32 %v18427_v16, %v16178_v34  ;;  %v18428_v26 = vld [vmem:[#allocation211_spill] sm:$0xff]  ;;  %v11535_v33 = vld [vmem:[%s17679_s1 + $0x400] sm:$0xff]  ;;  %v18432_v34 = vld [vmem:[#allocation112_spill] sm:$0xff] }
 0x3f5   :  { %v16398_v40 = vpop.f32.mrf.mxu0  ;;  %v6502_v60 = vadd.f32 %v18428_v26, %v5806_v20  ;;  %v16404_v10 = vadd.f32 %v16128_v47, %v7865_v6  ;;  %18430 = vst [vmem:[#allocation116_spill] sm:$0xff] %v16406_v3  ;;  %12332 = vmatpush3.msra.mxu1 %v16351_v8  ;;  %12348 = vmatpush3.msra.mxu0 %v16356_v58  ;;  %v18431_v46 = vld [vmem:[#allocation103_spill] sm:$0xff]  ;;  %v18433_v20 = vld [vmem:[#allocation234_spill] sm:$0xff]  ;;  %v18434_v41 = vld [vmem:[#allocation244_spill] sm:$0xff] }
 0x3f6   :  { %v5792_v49 = vadd.f32 %v18431_v46, %v16198_v22  ;;  %v16417_v29 = vadd.f32 %v18432_v34, %v16187_v39  ;;  %v7908_v26 = vadd.f32 %v16270_v43, %v7212_v35  ;;  %12313 = vmatmul.mubr.msk.f32.gmra.mxu1 %vm122_vm0, %v11506_v44  ;;  %12333 = vmatprep.subr.mxu1 %v16394_v31  ;;  %v11536_v6 = vld [vmem:[%s17679_s1 + $0x408] sm:$0xff]  ;;  %v18435_v43 = vld [vmem:[#allocation197_spill] sm:$0xff]  ;;  %v18447_v58 = vld [vmem:[#allocation122_spill] sm:$0xff] }
 0x3f7   :  { %18429 = vst [vmem:[#allocation150_spill] sm:$0xff] %v16404_v10  ;;  %v16425_v50 = vpop.f32.mrf.mxu0  ;;  %v7198_v53 = vadd.f32 %v18433_v20, %v6502_v60  ;;  %v16429_v22 = vadd.f32 %v16128_v47, %v7864_v55  ;;  %v7895_v39 = vadd.f32 %v16205_v52, %v18434_v41  ;;  %12349 = vmatprep.subr.mxu0 %v16404_v10  ;;  %v18436_v35 = vld [vmem:[#allocation209_spill] sm:$0xff]  ;;  %v11527_v60 = vld [vmem:[%s17679_s1 + $0x3e0] sm:$0xff]  ;;  %v18438_v55 = vld [vmem:[#allocation115_spill] sm:$0xff] }
 0x3f8   :  { %12334 = vmatpush3.msra.mxu1 %v16394_v31  ;;  %v16437_v44 = vadd.f32 %v18435_v43, %v16248_v24  ;;  %v6488_v16 = vadd.f32 %v18436_v35, %v5792_v49  ;;  %v16441_v46 = vadd.f32 %v16032_v0, %v7909_v37  ;;  %12350 = vmatpush3.msra.mxu0 %v16404_v10  ;;  %v18439_v24 = vld [vmem:[#allocation198_spill] sm:$0xff]  ;;  %v16457_v49 = vpop.f32.mrf.mxu1  ;;  %v18440_v41 = vld [vmem:[#allocation233_spill] sm:$0xff]  ;;  %v18442_v35 = vld [vmem:[#allocation143_spill] sm:$0xff] }
 0x3f9   :  { %12351 = vmatprep.mubr.msk.f32.mxu0 %vm122_vm0, %v11535_v33  ;;  %v7678_v52 = vpop.f32.mrf.mxu0  ;;  %v16450_v34 = vadd.f32 %v18438_v55, %v16202_v61  ;;  %v16454_v20 = vadd.f32 %v18439_v24, %v16286_v23  ;;  %v7894_v37 = vadd.f32 %v16221_v42, %v7198_v53  ;;  %12335 = vmatprep.subr.mxu1 %v16429_v22  ;;  %v11528_v33 = vld [vmem:[%s17679_s1 + $0x3e8] sm:$0xff]  ;;  %v18441_v61 = vld [vmem:[#allocation240_spill] sm:$0xff]  ;;  %v18443_v53 = vld [vmem:[#allocation118_spill] sm:$0xff] }
 0x3fa   :  { %18437 = vst [vmem:[#allocation151_spill] sm:$0xff] %v16441_v46  ;;  %12352 = vmatmul.mubr.msk.f32.vlgmr.msra.gmra.mxu0 %vm122_vm0, %v11536_v6  ;;  %v7184_v43 = vadd.f32 %v18440_v41, %v6488_v16  ;;  %v7881_v55 = vadd.f32 %v18442_v35, %v18441_v61  ;;  %v16468_v23 = vadd.f32 %v16032_v0, %v7908_v26  ;;  %v11537_v42 = vld [vmem:[%s17679_s1 + $0x410] sm:$0xff]  ;;  %v18444_v16 = vld [vmem:[#allocation207_spill] sm:$0xff] }
 0x3fb   :  { %12371 = vmatprep.subr.mxu0 %v16441_v46  ;;  %12336 = vmatpush3.msra.mxu1 %v16429_v22  ;;  %v16475_v6 = vpop.f32.mrf.mxu0  ;;  %v5808_v24 = vadd.f32 %v18443_v53, %v16230_v14  ;;  %v6474_v41 = vadd.f32 %v18444_v16, %v5778_v4  ;;  %v16481_v61 = vadd.f32 %v16030_v38, %v7895_v39  ;;  %v18446_v26 = vld [vmem:[#allocation199_spill] sm:$0xff]  ;;  %v11538_v14 = vld [vmem:[%s17679_s1 + $0x418] sm:$0xff]  ;;  %v16499_v39 = vpop.permute.xlu1 %9502  ;;  %v18450_v53 = vld [vmem:[#allocation236_spill] sm:$0xff] }
 0x3fc   :  { %12337 = vmatprep.mubr.msk.f32.mxu1 %vm122_vm0, %v11527_v60  ;;  %12372 = vmatpush3.msra.mxu0 %v16441_v46  ;;  %v16487_v35 = vadd.f32 %v18446_v26, %v16303_v9  ;;  %v5822_v10 = vadd.f32 %v18447_v58, %v16244_v13  ;;  %v7880_v2 = vadd.f32 %v16155_v56, %v7184_v43  ;;  %v18449_v60 = vld [vmem:[#allocation230_spill] sm:$0xff]  ;;  %v18451_v16 = vld [vmem:[#allocation107_spill] sm:$0xff]  ;;  %v16507_v56 = vpop.f32.mrf.mxu1  ;;  %v11529_v58 = vld [vmem:[%s17679_s1 + $0x3f0] sm:$0xff] }
 0x3fd   :  { %18445 = vst [vmem:[#allocation108_spill] sm:$0xff] %v16481_v61  ;;  %12338 = vmatmul.mubr.msk.f32.vlgmr.msra.gmra.mxu1 %vm122_vm0, %v11528_v33  ;;  %12357 = vmatprep.subr.mxu1 %v16468_v23  ;;  %v16497_v4 = vpop.f32.mrf.mxu0  ;;  %v7170_v9 = vadd.f32 %v18449_v60, %v6474_v41  ;;  %v7867_v26 = vadd.f32 %v18451_v16, %v18450_v53  ;;  %v18452_v33 = vld [vmem:[#allocation215_spill] sm:$0xff]  ;;  %v18454_v60 = vld [vmem:[#allocation249_spill] sm:$0xff] }
 0x3fe   :  { %18448 = vst [vmem:[#allocation153_spill] sm:$0xff] %v16497_v4  ;;  %v16505_v13 = vadd.f32 %v16030_v38, %v7894_v37  ;;  %12373 = vmatprep.subr.mxu0 %v16481_v61  ;;  %12354 = vmatprep.mubr.msk.f32.mxu0 %vm122_vm0, %v11537_v42  ;;  %v6518_v43 = vadd.f32 %v18452_v33, %v5822_v10  ;;  %v18455_v37 = vld [vmem:[#allocation200_spill] sm:$0xff]  ;;  %v18456_v42 = vld [vmem:[#allocation126_spill] sm:$0xff]  ;;  %v18457_v3 = vld [vmem:[#allocation183_spill] sm:$0xff] }
 0x3ff   :  { %v16516_v41 = vadd.f32 %v16096_v19, %v7881_v55  ;;  %v7911_v53 = vadd.f32 %v7678_v52, %v18454_v60  ;;  %12358 = vmatpush3.msra.mxu1 %v16468_v23  ;;  %12374 = vmatpush3.msra.mxu0 %v16481_v61  ;;  %v16523_v16 = vadd.f32 %v18455_v37, %v16327_v12  ;;  %v11530_v10 = vld [vmem:[%s17679_s1 + $0x3f8] sm:$0xff]  ;;  %v16533_v52 = vpop.f32.mrf.mxu0  ;;  %v18460_v12 = vld [vmem:[#allocation250_spill] sm:$0xff]  ;;  %v16551_v61 = vpop.f32.mrf.mxu1 }
 0x400   :  { %v5784_v46 = vadd.f32 %v18456_v42, %v16264_v59  ;;  %v7866_v4 = vadd.f32 %v18457_v3, %v7170_v9  ;;  %12355 = vmatmul.mubr.msk.f32.gmra.mxu0 %vm122_vm0, %v11538_v14  ;;  %12359 = vmatprep.subr.mxu1 %v16505_v13  ;;  %18458 = vst [vmem:[#allocation120_spill] sm:$0xff] %v16533_v52  ;;  %v18459_v55 = vld [vmem:[#allocation201_spill] sm:$0xff]  ;;  %v18461_v3 = vld [vmem:[#allocation130_spill] sm:$0xff]  ;;  %v18462_v9 = vld [vmem:[#allocation212_spill] sm:$0xff] }
 0x401   :  { %18453 = vst [vmem:[#allocation180_spill] sm:$0xff] %v16516_v41  ;;  %v16537_v33 = vadd.f32 %v18459_v55, %v16342_v28  ;;  %v7214_v60 = vadd.f32 %v18460_v12, %v6518_v43  ;;  %v16541_v59 = vadd.f32 %v16096_v19, %v7880_v2  ;;  %12375 = vmatprep.subr.mxu0 %v16516_v41  ;;  %v11551_v2 = vld [vmem:[%s17679_s1 + $0x440] sm:$0xff]  ;;  %v16571_v43 = vpop.permute.xlu1 %9574 }
 0x402   :  { %12340 = vmatprep.mubr.msk.f32.mxu1 %vm122_vm0, %v11529_v58  ;;  %v5798_v14 = vadd.f32 %v18461_v3, %v16290_v18  ;;  %v6504_v37 = vadd.f32 %v18462_v9, %v5808_v24  ;;  %v16549_v42 = vadd.f32 %v16128_v47, %v7867_v26  ;;  %12360 = vmatpush3.msra.mxu1 %v16505_v13  ;;  %v18464_v28 = vld [vmem:[#allocation202_spill] sm:$0xff]  ;;  %v11552_v26 = vld [vmem:[%s17679_s1 + $0x448] sm:$0xff]  ;;  %v18468_v3 = vld [vmem:[#allocation245_spill] sm:$0xff] }
 0x403   :  { %12376 = vmatpush3.msra.mxu0 %v16516_v41  ;;  %v16560_v58 = vadd.f32 %v18464_v28, %v16367_v7  ;;  %v7910_v18 = vadd.f32 %v16308_v30, %v7214_v60  ;;  %v16564_v24 = vadd.f32 %v16032_v0, %v7911_v53  ;;  %12341 = vmatmul.mubr.msk.f32.gmra.mxu1 %vm122_vm0, %v11530_v10  ;;  %v18466_v55 = vld [vmem:[#allocation246_spill] sm:$0xff]  ;;  %v16581_v53 = vpop.f32.mrf.mxu0  ;;  %v18469_v10 = vld [vmem:[#allocation133_spill] sm:$0xff]  ;;  %v18470_v9 = vld [vmem:[#allocation203_spill] sm:$0xff] }
 0x404   :  { %18463 = vst [vmem:[#allocation154_spill] sm:$0xff] %v16549_v42  ;;  %12361 = vmatprep.subr.mxu1 %v16541_v59  ;;  %v7200_v12 = vadd.f32 %v18466_v55, %v6504_v37  ;;  %v16575_v7 = vadd.f32 %v16128_v47, %v7866_v4  ;;  %v7897_v30 = vadd.f32 %v16398_v40, %v18468_v3  ;;  %v18471_v37 = vld [vmem:[#allocation210_spill] sm:$0xff]  ;;  %v18472_v55 = vld [vmem:[#allocation137_spill] sm:$0xff] }
 0x405   :  { %18465 = vst [vmem:[#allocation111_spill] sm:$0xff] %v16564_v24  ;;  %12377 = vmatprep.subr.mxu0 %v16549_v42  ;;  %12362 = vmatpush3.msra.mxu1 %v16541_v59  ;;  %v5812_v60 = vadd.f32 %v18469_v10, %v16317_v21  ;;  %v16587_v28 = vadd.f32 %v18470_v9, %v16378_v5  ;;  %v11543_v40 = vld [vmem:[%s17679_s1 + $0x420] sm:$0xff]  ;;  %v18473_v21 = vld [vmem:[#allocation204_spill] sm:$0xff]  ;;  %v16603_v9 = vpop.f32.mrf.mxu1 }
 0x406   :  { %18467 = vst [vmem:[#allocation156_spill] sm:$0xff] %v16575_v7  ;;  %v6490_v4 = vadd.f32 %v18471_v37, %v16450_v34  ;;  %12378 = vmatpush3.msra.mxu0 %v16549_v42  ;;  %12379 = vmatprep.mubr.msk.f32.mxu0 %vm122_vm0, %v11551_v2  ;;  %v5826_v3 = vadd.f32 %v18472_v55, %v16331_v1  ;;  %v11544_v34 = vld [vmem:[%s17679_s1 + $0x428] sm:$0xff]  ;;  %v18474_v2 = vld [vmem:[#allocation242_spill] sm:$0xff]  ;;  %v18475_v55 = vld [vmem:[#allocation241_spill] sm:$0xff] }
 0x407   :  { %v16600_v10 = vadd.f32 %v18473_v21, %v16390_v11  ;;  %v7896_v5 = vadd.f32 %v16236_v27, %v7200_v12  ;;  %12363 = vmatprep.subr.mxu1 %v16575_v7  ;;  %12380 = vmatmul.mubr.msk.f32.vlgmr.msra.gmra.mxu0 %vm122_vm0, %v11552_v26  ;;  %v16612_v1 = vadd.f32 %v16032_v0, %v7910_v18  ;;  %v11553_v27 = vld [vmem:[%s17679_s1 + $0x450] sm:$0xff]  ;;  %v16621_v26 = vpop.permute.xlu0 %9498  ;;  %v18480_v42 = vld [vmem:[#allocation218_spill] sm:$0xff] }
 0x408   :  { %v7186_v37 = vadd.f32 %v18474_v2, %v6490_v4  ;;  %v7883_v11 = vadd.f32 %v16348_v57, %v18475_v55  ;;  %12399 = vmatprep.subr.mxu0 %v16564_v24  ;;  %12364 = vmatpush3.msra.mxu1 %v16575_v7  ;;  %v18476_v12 = vld [vmem:[#allocation208_spill] sm:$0xff]  ;;  %v16628_v2 = vadd.f32 %v16030_v38, %v7897_v30  ;;  %v16632_v57 = vpop.f32.mrf.mxu0  ;;  %v18479_v55 = vld [vmem:[#allocation217_spill] sm:$0xff]  ;;  %v16645_v30 = vpop.permute.xlu1 %9494 }
 0x409   :  { %v6476_v21 = vadd.f32 %v18476_v12, %v16417_v29  ;;  %v18477_v4 = vld [vmem:[#allocation216_spill] sm:$0xff]  ;;  %12365 = vmatprep.mubr.msk.f32.mxu1 %vm122_vm0, %v11543_v40  ;;  %12400 = vmatpush3.msra.mxu0 %v16564_v24  ;;  %v16635_v41 = vadd.f32 %v18479_v55, %v5784_v46  ;;  %v6492_v7 = vadd.f32 %v18480_v42, %v16454_v20  ;;  %v18481_v40 = vld [vmem:[#allocation238_spill] sm:$0xff]  ;;  %v7767_v42 = vpop.f32.mrf.mxu1  ;;  %v18488_v24 = vld [vmem:[#allocation101_spill] sm:$0xff] }
 0x40a   :  { %v6478_v18 = vadd.f32 %v18477_v4, %v16437_v44  ;;  %18478 = vst [vmem:[#allocation100_spill] sm:$0xff] %v16628_v2  ;;  %v7882_v29 = vadd.f32 %v16157_v32, %v7186_v37  ;;  %12366 = vmatmul.mubr.msk.f32.vlgmr.msra.gmra.mxu1 %vm122_vm0, %v11544_v34  ;;  %12385 = vmatprep.subr.mxu1 %v16612_v1  ;;  %v11554_v44 = vld [vmem:[%s17679_s1 + $0x458] sm:$0xff]  ;;  %v11545_v32 = vld [vmem:[%s17679_s1 + $0x430] sm:$0xff]  ;;  %v18483_v34 = vld [vmem:[#allocation219_spill] sm:$0xff] }
 0x40b   :  { %v7172_v12 = vadd.f32 %v18481_v40, %v6476_v21  ;;  %v16649_v46 = vadd.f32 %v16030_v38, %v7896_v5  ;;  %v18482_v4 = vld [vmem:[#allocation237_spill] sm:$0xff]  ;;  %12401 = vmatprep.subr.mxu0 %v16628_v2  ;;  %12382 = vmatprep.mubr.msk.f32.mxu0 %vm122_vm0, %v11553_v27  ;;  %v6494_v37 = vadd.f32 %v18483_v34, %v5798_v14  ;;  %v18484_v55 = vld [vmem:[#allocation222_spill] sm:$0xff]  ;;  %v16677_v14 = vpop.f32.mrf.mxu0 }
 0x40c   :  { %v7869_v20 = vadd.f32 %v16295_v15, %v18482_v4  ;;  %v6520_v21 = vadd.f32 %v18484_v55, %v16523_v16  ;;  %v16662_v5 = vadd.f32 %v16096_v19, %v7883_v11  ;;  %12386 = vmatpush3.msra.mxu1 %v16612_v1  ;;  %12402 = vmatpush3.msra.mxu0 %v16628_v2  ;;  %v18486_v15 = vld [vmem:[#allocation220_spill] sm:$0xff]  ;;  %v18487_v27 = vld [vmem:[#allocation221_spill] sm:$0xff]  ;;  %v18489_v11 = vld [vmem:[#allocation251_spill] sm:$0xff] }
 0x40d   :  { %v6506_v40 = vadd.f32 %v18486_v15, %v16487_v35  ;;  %v16669_v4 = vadd.f32 %v18487_v27, %v5812_v60  ;;  %v7868_v52 = vadd.f32 %v18488_v24, %v7172_v12  ;;  %12383 = vmatmul.mubr.msk.f32.gmra.mxu0 %vm122_vm0, %v11554_v44  ;;  %12387 = vmatprep.subr.mxu1 %v16649_v46  ;;  %v11546_v16 = vld [vmem:[%s17679_s1 + $0x438] sm:$0xff]  ;;  %v18490_v35 = vld [vmem:[#allocation264_spill] sm:$0xff]  ;;  %v16686_v24 = vpop.permute.xlu0 %9570  ;;  %v18491_v44 = vld [vmem:[#allocation223_spill] sm:$0xff] }
 0x40e   :  { %18485 = vst [vmem:[#allocation124_spill] sm:$0xff] %v16662_v5  ;;  %v7216_v34 = vadd.f32 %v18489_v11, %v6520_v21  ;;  %v16681_v55 = vadd.f32 %v16096_v19, %v7882_v29  ;;  %v7913_v60 = vadd.f32 %v7767_v42, %v18490_v35  ;;  %12403 = vmatprep.subr.mxu0 %v16662_v5  ;;  %v18492_v15 = vld [vmem:[#allocation224_spill] sm:$0xff]  ;;  %v11567_v29 = vld [vmem:[%s17679_s1 + $0x480] sm:$0xff]  ;;  %v18494_v42 = vld [vmem:[#allocation225_spill] sm:$0xff] }
 0x40f   :  { %12368 = vmatprep.mubr.msk.f32.mxu1 %vm122_vm0, %v11545_v32  ;;  %v16689_v12 = vadd.f32 %v18491_v44, %v5826_v3  ;;  %v6482_v27 = vadd.f32 %v18492_v15, %v16537_v33  ;;  %v16694_v2 = vadd.f32 %v16128_v47, %v7869_v20  ;;  %12388 = vmatpush3.msra.mxu1 %v16649_v46  ;;  %v18495_v3 = vld [vmem:[#allocation226_spill] sm:$0xff]  ;;  %v11568_v33 = vld [vmem:[%s17679_s1 + $0x488] sm:$0xff]  ;;  %v16711_v20 = vpop.permute.xlu1 %9490 }
 0x410   :  { %12404 = vmatpush3.msra.mxu0 %v16662_v5  ;;  %v6496_v32 = vadd.f32 %v18494_v42, %v16560_v58  ;;  %v6510_v21 = vadd.f32 %v18495_v3, %v16587_v28  ;;  %v7912_v11 = vadd.f32 %v16475_v6, %v7216_v34  ;;  %12369 = vmatmul.mubr.msk.f32.gmra.mxu1 %vm122_vm0, %v11546_v16  ;;  %v18496_v35 = vld [vmem:[#allocation247_spill] sm:$0xff]  ;;  %v18497_v58 = vld [vmem:[#allocation260_spill] sm:$0xff]  ;;  %v16721_v6 = vpop.f32.mrf.mxu0 }
 0x411   :  { %18493 = vst [vmem:[#allocation157_spill] sm:$0xff] %v16694_v2  ;;  %12389 = vmatprep.subr.mxu1 %v16681_v55  ;;  %v7202_v44 = vadd.f32 %v18496_v35, %v6506_v40  ;;  %v16715_v15 = vadd.f32 %v16128_v47, %v7868_v52  ;;  %v7899_v28 = vadd.f32 %v16551_v61, %v18497_v58  ;;  %v18498_v16 = vld [vmem:[#allocation227_spill] sm:$0xff]  ;;  %v11559_v61 = vld [vmem:[%s17679_s1 + $0x460] sm:$0xff] }
 0x412   :  { %12405 = vmatprep.subr.mxu0 %v16694_v2  ;;  %12390 = vmatpush3.msra.mxu1 %v16681_v55  ;;  %v6524_v34 = vadd.f32 %v18498_v16, %v16600_v10  ;;  %v9507_v42 = vmul.f32 %v16711_v20, %v16152_v25  ;;  %v16728_v40 = vadd.f32 %v16032_v0, %v7913_v60  ;;  %v18499_v52 = vld [vmem:[#allocation239_spill] sm:$0xff]  ;;  %v18501_v60 = vld [vmem:[#allocation254_spill] sm:$0xff]  ;;  %v18502_v16 = vld [vmem:[#allocation256_spill] sm:$0xff] }
 0x413   :  { %12406 = vmatpush3.msra.mxu0 %v16694_v2  ;;  %12407 = vmatprep.mubr.msk.f32.mxu0 %vm122_vm0, %v11567_v29  ;;  %v7174_v3 = vadd.f32 %v18499_v52, %v6478_v18  ;;  %v18500_v35 = vld [vmem:[#allocation243_spill] sm:$0xff]  ;;  %v7898_v10 = vadd.f32 %v16425_v50, %v7202_v44  ;;  %v16745_v29 = vadd.f32 %v18501_v60, %v16635_v41  ;;  %v11569_v50 = vld [vmem:[%s17679_s1 + $0x490] sm:$0xff]  ;;  %v18504_v41 = vld [vmem:[#allocation258_spill] sm:$0xff] }
 0x414   :  { %v7188_v58 = vadd.f32 %v18500_v35, %v6492_v7  ;;  %12391 = vmatprep.subr.mxu1 %v16715_v15  ;;  %12408 = vmatmul.mubr.msk.f32.vlgmr.msra.gmra.mxu0 %vm122_vm0, %v11568_v33  ;;  %v11560_v25 = vld [vmem:[%s17679_s1 + $0x468] sm:$0xff]  ;;  %v7885_v5 = vadd.f32 %v16457_v49, %v18502_v16  ;;  %v16750_v18 = vadd.f32 %v16032_v0, %v7912_v11  ;;  %v16757_v7 = vpop.permute.xlu0 %9562  ;;  %v7856_v11 = vpop.f32.mrf.mxu0 }
 0x415   :  { %12427 = vmatprep.subr.mxu0 %v16728_v40  ;;  %12392 = vmatpush3.msra.mxu1 %v16715_v15  ;;  %v18503_v33 = vld [vmem:[#allocation255_spill] sm:$0xff]  ;;  %v16763_v52 = vadd.f32 %v18504_v41, %v6494_v37  ;;  %v16766_v49 = vadd.f32 %v16030_v38, %v7899_v28  ;;  %v9579_v16 = vadd.f32 %v16757_v7, %v9507_v42  ;;  %v11570_v37 = vld [vmem:[%s17679_s1 + $0x498] sm:$0xff]  ;;  %v18506_v28 = vld [vmem:[#allocation252_spill] sm:$0xff] }
 0x416   :  { %v16760_v44 = vadd.f32 %v18503_v33, %v6482_v27  ;;  %12393 = vmatprep.mubr.msk.f32.mxu1 %vm122_vm0, %v11559_v61  ;;  %12428 = vmatpush3.msra.mxu0 %v16728_v40  ;;  %v18505_v35 = vld [vmem:[#allocation259_spill] sm:$0xff]  ;;  %v7884_v2 = vadd.f32 %v16374_v36, %v7188_v58  ;;  %v9505_v27 = vmul.f32 %v16711_v20, %v16268_v45  ;;  %v11561_v36 = vld [vmem:[%s17679_s1 + $0x470] sm:$0xff]  ;;  %v18507_v42 = vld [vmem:[#allocation262_spill] sm:$0xff] }
 0x417   :  { %v16771_v60 = vadd.f32 %v18505_v35, %v6496_v32  ;;  %12394 = vmatmul.mubr.msk.f32.vlgmr.msra.gmra.mxu1 %vm122_vm0, %v11560_v25  ;;  %12413 = vmatprep.subr.mxu1 %v16750_v18  ;;  %v7871_v61 = vadd.f32 %v16358_v48, %v18506_v28  ;;  %v16785_v32 = vadd.f32 %v16030_v38, %v7898_v10  ;;  %v18508_v45 = vld [vmem:[#allocation265_spill] sm:$0xff]  ;;  %v18509_v48 = vld [vmem:[#allocation263_spill] sm:$0xff]  ;;  %v7769_v35 = vpop.f32.mrf.mxu1 }
 0x418   :  { %12429 = vmatprep.subr.mxu0 %v16766_v49  ;;  %12410 = vmatprep.mubr.msk.f32.mxu0 %vm122_vm0, %v11569_v50  ;;  %v7204_v58 = vadd.f32 %v18507_v42, %v16669_v4  ;;  %v16795_v25 = vadd.f32 %v16096_v19, %v7885_v5  ;;  %v7915_v33 = vadd.f32 %v7856_v11, %v18508_v45  ;;  %v11562_v5 = vld [vmem:[%s17679_s1 + $0x478] sm:$0xff]  ;;  %v18510_v4 = vld [vmem:[#allocation266_spill] sm:$0xff] }
 0x419   :  { %12414 = vmatpush3.msra.mxu1 %v16750_v18  ;;  %12430 = vmatpush3.msra.mxu0 %v16766_v49  ;;  %v16801_v10 = vadd.f32 %v18509_v48, %v6510_v21  ;;  %v9508_v50 = vmul.f32 %v16711_v20, %v16429_v22  ;;  %v7870_v41 = vadd.f32 %v16321_v63, %v7174_v3  ;;  %v9635_v63 = vmax.f32 %v9579_v16, 0.0  ;;  %v18511_v22 = vld [vmem:[#allocation267_spill] sm:$0xff]  ;;  %v18513_v48 = vld [vmem:[#allocation21_spill] sm:$0xff] }
 0x41a   :  { %12411 = vmatmul.mubr.msk.f32.gmra.mxu0 %vm122_vm0, %v11570_v37  ;;  %12415 = vmatprep.subr.mxu1 %v16785_v32  ;;  %v7218_v11 = vadd.f32 %v18510_v4, %v16689_v12  ;;  %v9506_v21 = vmul.f32 %v16711_v20, %v16163_v54  ;;  %v16816_v28 = vadd.f32 %v16096_v19, %v7884_v2  ;;  %v11583_v54 = vld [vmem:[%s17679_s1 + $0x4c0] sm:$0xff]  ;;  %v11584_v16 = vld [vmem:[%s17679_s1 + $0x4c8] sm:$0xff] }
 0x41b   :  { %12431 = vmatprep.subr.mxu0 %v16795_v25  ;;  %12396 = vmatprep.mubr.msk.f32.mxu1 %vm122_vm0, %v11561_v36  ;;  %v16821_v3 = vadd.f32 %v18511_v22, %v6524_v34  ;;  %v9577_v37 = vadd.f32 %v16757_v7, %v9505_v27  ;;  %v16825_v42 = vadd.f32 %v16128_v47, %v7871_v61  ;;  %v18512_v61 = vld [vmem:[#allocation261_spill] sm:$0xff] }
 0x41c   :  { %12416 = vmatpush3.msra.mxu1 %v16785_v32  ;;  %12432 = vmatpush3.msra.mxu0 %v16795_v25  ;;  %v9521_v2 = vmul.f32 %v16645_v30, %v16120_v62  ;;  %v7914_v12 = vadd.f32 %v7769_v35, %v7218_v11  ;;  %v16835_v34 = vadd.f32 %v16032_v0, %v7915_v33  ;;  %v11575_v33 = vld [vmem:[%s17679_s1 + $0x4a0] sm:$0xff]  ;;  %v16861_v35 = vpop.permute.xlu1 %9566  ;;  %v11576_v11 = vld [vmem:[%s17679_s1 + $0x4a8] sm:$0xff] }
 0x41d   :  { %12397 = vmatmul.mubr.msk.f32.gmra.mxu1 %vm122_vm0, %v11562_v5  ;;  %12417 = vmatprep.subr.mxu1 %v16816_v28  ;;  %v16843_v27 = vadd.f32 %v16128_v47, %v7870_v41  ;;  %v7901_v36 = vadd.f32 %v16677_v14, %v18512_v61  ;;  %v9580_v62 = vadd.f32 %v16757_v7, %v9508_v50  ;;  %v18514_v5 = vld [vmem:[#allocation147_spill] sm:$0xff] }
 0x41e   :  { %12433 = vmatprep.subr.mxu0 %v16825_v42  ;;  %12418 = vmatpush3.msra.mxu1 %v16816_v28  ;;  %v9550_v45 = vmul.f32 %v16499_v39, %v16334_v17  ;;  %v16858_v41 = vadd.f32 %v9635_v63, %v18513_v48  ;;  %v9578_v14 = vadd.f32 %v16757_v7, %v9506_v21 }
 0x41f   :  { %12434 = vmatpush3.msra.mxu0 %v16825_v42  ;;  %12435 = vmatprep.mubr.msk.f32.mxu0 %vm122_vm0, %v11583_v54  ;;  %v9519_v50 = vmul.f32 %v16645_v30, %v16251_v51  ;;  %v9549_v17 = vmul.f32 %v16499_v39, %v18514_v5  ;;  %v7900_v4 = vadd.f32 %v16603_v9, %v7204_v58  ;;  %v18515_v51 = vld [vmem:[#allocation257_spill] sm:$0xff]  ;;  %v11585_v9 = vld [vmem:[%s17679_s1 + $0x4d0] sm:$0xff]  ;;  %v9633_v58 = vmax.f32 %v9577_v37, 0.0 }
 0x420   :  { %12419 = vmatprep.subr.mxu1 %v16843_v27  ;;  %12436 = vmatmul.mubr.msk.f32.vlgmr.msra.gmra.mxu0 %vm122_vm0, %v11584_v16  ;;  %v16874_v21 = vadd.f32 %v16861_v35, %v9521_v2  ;;  %v16877_v63 = vadd.f32 %v16032_v0, %v7914_v12  ;;  %v7887_v22 = vadd.f32 %v16581_v53, %v18515_v51  ;;  %v18516_v54 = vld [vmem:[#allocation141_spill] sm:$0xff] }
 0x421   :  { %12455 = vmatprep.subr.mxu0 %v16835_v34  ;;  %12420 = vmatpush3.msra.mxu1 %v16843_v27  ;;  %v9535_v16 = vmul.f32 %v16621_v26, %v18516_v54  ;;  %v9536_v2 = vmul.f32 %v16621_v26, %v16351_v8  ;;  %v16891_v12 = vadd.f32 %v16030_v38, %v7901_v36  ;;  %v11586_v8 = vld [vmem:[%s17679_s1 + $0x4d8] sm:$0xff]  ;;  %v9636_v36 = vmax.f32 %v9580_v62, 0.0  ;;  %v18523_v54 = vld [vmem:[#allocation116_spill] sm:$0xff] }
 0x422   :  { %12421 = vmatprep.mubr.msk.f32.mxu1 %vm122_vm0, %v11575_v33  ;;  %12456 = vmatpush3.msra.mxu0 %v16835_v34  ;;  %v9522_v53 = vmul.f32 %v16645_v30, %v16394_v31  ;;  %v7886_v61 = vadd.f32 %v16507_v56, %v16763_v52  ;;  %v9622_v37 = vadd.f32 %v16571_v43, %v9550_v45  ;;  %v18518_v31 = vld [vmem:[#allocation253_spill] sm:$0xff]  ;;  %v11577_v56 = vld [vmem:[%s17679_s1 + $0x4b0] sm:$0xff]  ;;  %v9634_v52 = vmax.f32 %v9578_v14, 0.0 }
 0x423   :  { %18517 = vst [vmem:[#allocation114_spill] sm:$0xff] %v16891_v12  ;;  %12422 = vmatmul.mubr.msk.f32.vlgmr.msra.gmra.mxu1 %vm122_vm0, %v11576_v11  ;;  %12441 = vmatprep.subr.mxu1 %v16877_v63  ;;  %v9621_v33 = vadd.f32 %v16571_v43, %v9549_v17  ;;  %v16907_v48 = vadd.f32 %v16030_v38, %v7900_v4  ;;  %v18519_v5 = vld [vmem:[#allocation153_spill] sm:$0xff]  ;;  %v18520_v11 = vld [vmem:[#allocation106_spill] sm:$0xff] }
 0x424   :  { %v7873_v51 = vadd.f32 %v18519_v5, %v18518_v31  ;;  %12457 = vmatprep.subr.mxu0 %v16891_v12  ;;  %12438 = vmatprep.mubr.msk.f32.mxu0 %vm122_vm0, %v11585_v9  ;;  %v9520_v62 = vmul.f32 %v16645_v30, %v18520_v11  ;;  %v16919_v45 = vadd.f32 %v16096_v19, %v7887_v22  ;;  %v18522_v17 = vld [vmem:[#allocation13_spill] sm:$0xff]  ;;  %v7858_v5 = vpop.f32.mrf.mxu0  ;;  %v9649_v11 = vmax.f32 %v16874_v21, 0.0 }
 0x425   :  { %12442 = vmatpush3.msra.mxu1 %v16877_v63  ;;  %12458 = vmatpush3.msra.mxu0 %v16891_v12  ;;  %v16924_v4 = vadd.f32 %v9633_v58, %v18522_v17  ;;  %v9607_v9 = vadd.f32 %v16686_v24, %v9535_v16  ;;  %v7872_v31 = vadd.f32 %v18523_v54, %v16745_v29  ;;  %v11578_v14 = vld [vmem:[%s17679_s1 + $0x4b8] sm:$0xff]  ;;  %v9678_v29 = vmax.f32 %v9622_v37, 0.0  ;;  %v18527_v37 = vld [vmem:[#allocation148_spill] sm:$0xff]  ;;  %v11591_v12 = vld [vmem:[%s17679_s1 + $0x4e0] sm:$0xff] }
 0x426   :  { %18521 = vst [vmem:[#allocation159_spill] sm:$0xff] %v16919_v45  ;;  %12439 = vmatmul.mubr.msk.f32.gmra.mxu0 %vm122_vm0, %v11586_v8  ;;  %12443 = vmatprep.subr.mxu1 %v16907_v48  ;;  %v9608_v22 = vadd.f32 %v16686_v24, %v9536_v2  ;;  %v16937_v58 = vadd.f32 %v16861_v35, %v9519_v50  ;;  %v18524_v8 = vld [vmem:[#allocation22_spill] sm:$0xff]  ;;  %v9677_v21 = vmax.f32 %v9621_v33, 0.0 }
 0x427   :  { %v16940_v16 = vadd.f32 %v16096_v19, %v7886_v61  ;;  %12459 = vmatprep.subr.mxu0 %v16919_v45  ;;  %12424 = vmatprep.mubr.msk.f32.mxu1 %vm122_vm0, %v11577_v56  ;;  %v16945_v17 = vadd.f32 %v9636_v36, %v18524_v8  ;;  %v16948_v54 = vadd.f32 %v16128_v47, %v7873_v51  ;;  %v11599_v50 = vld [vmem:[%s17679_s1 + $0x500] sm:$0xff]  ;;  %v11600_v8 = vld [vmem:[%s17679_s1 + $0x508] sm:$0xff] }
 0x428   :  { %12444 = vmatpush3.msra.mxu1 %v16907_v48  ;;  %12460 = vmatpush3.msra.mxu0 %v16919_v45  ;;  %v9594_v2 = vadd.f32 %v16861_v35, %v9522_v53  ;;  %v18526_v61 = vld [vmem:[#allocation14_spill] sm:$0xff]  ;;  %v16961_v36 = vmul.f32 %v16621_v26, %v18527_v37  ;;  %v7916_v51 = vadd.f32 %v7858_v5, %v16821_v3  ;;  %v9663_v3 = vmax.f32 %v9607_v9, 0.0  ;;  %v18528_v5 = vld [vmem:[#allocation19_spill] sm:$0xff] }
 0x429   :  { %18525 = vst [vmem:[#allocation192_spill] sm:$0xff] %v16948_v54  ;;  %v16957_v56 = vadd.f32 %v9634_v52, %v18526_v61  ;;  %12425 = vmatmul.mubr.msk.f32.gmra.mxu1 %vm122_vm0, %v11578_v14  ;;  %12445 = vmatprep.subr.mxu1 %v16940_v16  ;;  %v16970_v33 = vadd.f32 %v16861_v35, %v9520_v62  ;;  %v9664_v52 = vmax.f32 %v9608_v22, 0.0  ;;  %v18529_v61 = vld [vmem:[#allocation104_spill] sm:$0xff]  ;;  %v18530_v62 = vld [vmem:[#allocation15_spill] sm:$0xff]  ;;  %v18531_v22 = vld [vmem:[#allocation113_spill] sm:$0xff] }
 0x42a   :  { %v16973_v53 = vadd.f32 %v16128_v47, %v7872_v31  ;;  %12461 = vmatprep.subr.mxu0 %v16948_v54  ;;  %12446 = vmatpush3.msra.mxu1 %v16940_v16  ;;  %v9705_v14 = vadd.f32 %v9649_v11, %v18528_v5  ;;  %v9534_v37 = vmul.f32 %v16621_v26, %v18529_v61 }
 0x42b   :  { %v9552_v45 = vmul.f32 %v16499_v39, %v16468_v23  ;;  %12462 = vmatpush3.msra.mxu0 %v16948_v54  ;;  %12463 = vmatprep.mubr.msk.f32.mxu0 %vm122_vm0, %v11599_v50  ;;  %v9734_v31 = vadd.f32 %v9678_v29, %v18530_v62  ;;  %v9551_v9 = vmul.f32 %v16499_v39, %v18531_v22  ;;  %v18532_v23 = vld [vmem:[#allocation16_spill] sm:$0xff]  ;;  %v11592_v29 = vld [vmem:[%s17679_s1 + $0x4e8] sm:$0xff]  ;;  %v18533_v50 = vld [vmem:[#allocation102_spill] sm:$0xff] }
 0x42c   :  { %v7902_v11 = vadd.f32 %v16721_v6, %v16801_v10  ;;  %12447 = vmatprep.subr.mxu1 %v16973_v53  ;;  %12464 = vmatmul.mubr.msk.f32.vlgmr.msra.gmra.mxu0 %vm122_vm0, %v11600_v8  ;;  %v9733_v5 = vadd.f32 %v9677_v21, %v18532_v23  ;;  %v9547_v61 = vmul.f32 %v16499_v39, %v18533_v50  ;;  %v18534_v62 = vld [vmem:[#allocation145_spill] sm:$0xff]  ;;  %v11601_v6 = vld [vmem:[%s17679_s1 + $0x510] sm:$0xff]  ;;  %v9650_v10 = vmax.f32 %v9594_v2, 0.0  ;;  %v18535_v8 = vld [vmem:[#allocation18_spill] sm:$0xff] }
 0x42d   :  { %v9548_v54 = vmul.f32 %v16499_v39, %v18534_v62  ;;  %v17003_v22 = vadd.f32 %v16032_v0, %v7916_v51  ;;  %9791 = vmatprep.subr.mxu0 %v9734_v31  ;;  %12448 = vmatpush3.msra.mxu1 %v16973_v53  ;;  %v9538_v21 = vmul.f32 %v16621_v26, %v16505_v13  ;;  %v18536_v50 = vld [vmem:[#allocation17_spill] sm:$0xff]  ;;  %v18538_v2 = vld [vmem:[#allocation150_spill] sm:$0xff] }
 0x42e   :  { %12449 = vmatprep.mubr.msk.f32.mxu1 %vm122_vm0, %v11591_v12  ;;  %9792 = vmatpush1.msra.mxu0 %v9733_v5  ;;  %v9720_v23 = vadd.f32 %v9664_v52, %v18535_v8  ;;  %v9719_v62 = vadd.f32 %v9663_v3, %v18536_v50  ;;  %v18537_v0 = vld [vmem:[#allocation149_spill] sm:$0xff]  ;;  %v7888_v31 = vadd.f32 %v16632_v57, %v16771_v60  ;;  %v11593_v57 = vld [vmem:[%s17679_s1 + $0x4f0] sm:$0xff] }
 0x42f   :  { %v9537_v51 = vmul.f32 %v16621_v26, %v18537_v0  ;;  %12450 = vmatmul.mubr.msk.f32.vlgmr.msra.gmra.mxu1 %vm122_vm0, %v11592_v29  ;;  %12469 = vmatprep.subr.mxu1 %v17003_v22  ;;  %v11602_v13 = vld [vmem:[%s17679_s1 + $0x518] sm:$0xff]  ;;  %v9624_v12 = vadd.f32 %v16571_v43, %v9552_v45  ;;  %v9509_v52 = vmul.f32 %v16711_v20, %v18538_v2  ;;  %v18539_v45 = vld [vmem:[#allocation20_spill] sm:$0xff] }
 0x430   :  { %v9623_v3 = vadd.f32 %v16571_v43, %v9551_v9  ;;  %v17028_v5 = vadd.f32 %v16030_v38, %v7902_v11  ;;  %9793 = vmatprep.subr.mxu0 %v9720_v23  ;;  %12466 = vmatprep.mubr.msk.f32.mxu0 %vm122_vm0, %v11601_v6  ;;  %v9524_v60 = vmul.f32 %v16645_v30, %v16541_v59  ;;  %v18540_v8 = vld [vmem:[#allocation105_spill] sm:$0xff]  ;;  %v18541_v11 = vld [vmem:[#allocation120_spill] sm:$0xff] }
 0x431   :  { %12470 = vmatpush3.msra.mxu1 %v17003_v22  ;;  %9794 = vmatpush1.msra.mxu0 %v9719_v62  ;;  %v9706_v29 = vadd.f32 %v9650_v10, %v18539_v45  ;;  %v9620_v9 = vadd.f32 %v16571_v43, %v9548_v54  ;;  %v9523_v38 = vmul.f32 %v16645_v30, %v18540_v8  ;;  %v11594_v59 = vld [vmem:[%s17679_s1 + $0x4f8] sm:$0xff]  ;;  %v9647_v10 = vmax.f32 %v16937_v58, 0.0 }
 0x432   :  { %v7874_v6 = vadd.f32 %v18541_v11, %v16760_v44  ;;  %12467 = vmatmul.mubr.msk.f32.gmra.mxu0 %vm122_vm0, %v11602_v13  ;;  %12471 = vmatprep.subr.mxu1 %v17028_v5  ;;  %v9610_v23 = vadd.f32 %v16686_v24, %v9538_v21  ;;  %v9619_v54 = vadd.f32 %v16571_v43, %v9547_v61  ;;  %v9680_v44 = vmax.f32 %v9624_v12, 0.0  ;;  %v18542_v13 = vld [vmem:[#allocation156_spill] sm:$0xff] }
 0x433   :  { %v9609_v50 = vadd.f32 %v16686_v24, %v9537_v51  ;;  %v17053_v62 = vadd.f32 %v16096_v19, %v7888_v31  ;;  %9795 = vmatprep.subr.mxu0 %v9706_v29  ;;  %12452 = vmatprep.mubr.msk.f32.mxu1 %vm122_vm0, %v11593_v57  ;;  %v17058_v0 = vadd.f32 %v16686_v24, %v16961_v36  ;;  %v9679_v61 = vmax.f32 %v9623_v3, 0.0  ;;  %v18543_v31 = vld [vmem:[#allocation154_spill] sm:$0xff]  ;;  %v18545_v29 = vld [vmem:[#allocation24_spill] sm:$0xff] }
 0x434   :  { %v9510_v21 = vmul.f32 %v16711_v20, %v18542_v13  ;;  %12472 = vmatpush3.msra.mxu1 %v17028_v5  ;;  %9796 = vmatpush1.msra.mxu0 %v9705_v14  ;;  %v9606_v51 = vadd.f32 %v16686_v24, %v9534_v37  ;;  %v17065_v19 = vadd.f32 %v16757_v7, %v9509_v52  ;;  %v11619_v36 = vld [vmem:[%s17679_s1 + $0x560] sm:$0xff]  ;;  %v9676_v12 = vmax.f32 %v9620_v9, 0.0 }
 0x435   :  { %v17069_v2 = vmul.f32 %v16711_v20, %v18543_v31  ;;  %12453 = vmatmul.mubr.msk.f32.gmra.mxu1 %vm122_vm0, %v11594_v59  ;;  %12473 = vmatprep.subr.mxu1 %v17053_v62  ;;  %v9596_v14 = vadd.f32 %v16861_v35, %v9524_v60  ;;  %v17079_v37 = vmul.f32 %v16711_v20, %v16715_v15  ;;  %v9666_v57 = vmax.f32 %v9610_v23, 0.0  ;;  %v11607_v9 = vld [vmem:[%s17679_s1 + $0x520] sm:$0xff]  ;;  %v18547_v59 = vld [vmem:[#allocation108_spill] sm:$0xff] }
 0x436   :  { %v9595_v52 = vadd.f32 %v16861_v35, %v9523_v38  ;;  %v17083_v3 = vadd.f32 %v16128_v47, %v7874_v6  ;;  %9797 = vmatprep.subr.mxu0 %v16945_v17  ;;  %12474 = vmatpush3.msra.mxu1 %v17053_v62  ;;  %v9556_v45 = vmul.f32 %v16499_v39, %v16750_v18  ;;  %v18544_v60 = vmov 0.0   ;;  %v18546_v18 = vld [vmem:[#allocation23_spill] sm:$0xff] }
 0x437   :  { %9798 = vmatpush1.msra.mxu0 %v16858_v41  ;;  %9831 = vmatprep.mubr.f32.mxu0 %v18544_v60  ;;  %v9736_v15 = vadd.f32 %v9680_v44, %v18545_v29  ;;  %v9675_v47 = vmax.f32 %v9619_v54, 0.0  ;;  %v9665_v8 = vmax.f32 %v9609_v50, 0.0  ;;  %v9554_v17 = vmul.f32 %v16499_v39, %v16612_v1  ;;  %v11608_v41 = vld [vmem:[%s17679_s1 + $0x528] sm:$0xff]  ;;  %v18548_v1 = vld [vmem:[#allocation8_spill] sm:$0xff] }
 0x438   :  { %12475 = vmatprep.subr.mxu1 %v17083_v3  ;;  %11623 = vmatmul.mubr.msk.f32.vlgmr.msra.gmra.mxu0 %vm122_vm0, %v11619_v36  ;;  %v9735_v38 = vadd.f32 %v9679_v61, %v18546_v18  ;;  %v9662_v11 = vmax.f32 %v9606_v51, 0.0  ;;  %v9582_v6 = vadd.f32 %v16757_v7, %v9510_v21  ;;  %v9539_v23 = vmul.f32 %v16621_v26, %v18547_v59  ;;  %v18549_v61 = vld [vmem:[#allocation151_spill] sm:$0xff]  ;;  %v18550_v21 = vld [vmem:[#allocation26_spill] sm:$0xff]  ;;  %v18555_v59 = vld [vmem:[#allocation28_spill] sm:$0xff] }
 0x439   :  { %9998 = vmatprep.subr.mxu0 %v9736_v15  ;;  %12476 = vmatpush3.msra.mxu1 %v17083_v3  ;;  %v9732_v54 = vadd.f32 %v9676_v12, %v18548_v1  ;;  %v9652_v50 = vmax.f32 %v9596_v14, 0.0  ;;  %v9661_v44 = vmax.f32 %v17058_v0, 0.0  ;;  %v9540_v13 = vmul.f32 %v16621_v26, %v16649_v46  ;;  %v18551_v29 = vld [vmem:[#allocation7_spill] sm:$0xff]  ;;  %v18552_v14 = vld [vmem:[#allocation25_spill] sm:$0xff] }
 0x43a   :  { %v9553_v31 = vmul.f32 %v16499_v39, %v18549_v61  ;;  %12477 = vmatprep.mubr.msk.f32.mxu1 %vm122_vm0, %v11607_v9  ;;  %9999 = vmatpush1.msra.mxu0 %v9735_v38  ;;  %v9722_v51 = vadd.f32 %v9666_v57, %v18550_v21  ;;  %v9651_v36 = vmax.f32 %v9595_v52, 0.0  ;;  %v9731_v12 = vadd.f32 %v9675_v47, %v18551_v29  ;;  %v11620_v46 = vld [vmem:[%s17679_s1 + $0x568] sm:$0xff]  ;;  %v18553_v9 = vld [vmem:[#allocation180_spill] sm:$0xff]  ;;  %v18554_v52 = vld [vmem:[#allocation10_spill] sm:$0xff] }
 0x43b   :  { %12478 = vmatmul.mubr.msk.f32.vlgmr.msra.gmra.mxu1 %vm122_vm0, %v11608_v41  ;;  %9892 = vmatprep.subr.mxu1 %v9732_v54  ;;  %v9721_v15 = vadd.f32 %v9665_v8, %v18552_v14  ;;  %v9648_v0 = vmax.f32 %v16970_v33, 0.0  ;;  %v9628_v18 = vadd.f32 %v16571_v43, %v9556_v45  ;;  %v9525_v38 = vmul.f32 %v16645_v30, %v18553_v9  ;;  %v11609_v47 = vld [vmem:[%s17679_s1 + $0x530] sm:$0xff]  ;;  %v18561_v14 = vld [vmem:[#allocation30_spill] sm:$0xff]  ;;  %v18562_v9 = vld [vmem:[#allocation11_spill] sm:$0xff] }
 0x43c   :  { %10000 = vmatprep.subr.mxu0 %v9722_v51  ;;  %9837 = vmatprep.mubr.f32.mxu0 %v18544_v60  ;;  %v9718_v57 = vadd.f32 %v9662_v11, %v18554_v52  ;;  %v9638_v8 = vmax.f32 %v9582_v6, 0.0  ;;  %v9626_v41 = vadd.f32 %v16571_v43, %v9554_v17  ;;  %v9526_v33 = vmul.f32 %v16645_v30, %v16681_v55  ;;  %v18556_v6 = vld [vmem:[#allocation9_spill] sm:$0xff]  ;;  %v18557_v17 = vld [vmem:[#allocation27_spill] sm:$0xff]  ;;  %v11621_v52 = vld [vmem:[%s17679_s1 + $0x570] sm:$0xff] }
 0x43d   :  { %v17134_v45 = vadd.f32 %v16686_v24, %v9539_v23  ;;  %9893 = vmatpush1.msra.mxu1 %v9731_v12  ;;  %10001 = vmatpush1.msra.mxu0 %v9721_v15  ;;  %v9708_v1 = vadd.f32 %v9652_v50, %v18555_v59  ;;  %v9637_v54 = vmax.f32 %v17065_v19, 0.0  ;;  %v9625_v11 = vadd.f32 %v16571_v43, %v9553_v31  ;;  %v11610_v55 = vld [vmem:[%s17679_s1 + $0x538] sm:$0xff]  ;;  %v18558_v23 = vld [vmem:[#allocation111_spill] sm:$0xff]  ;;  %v18559_v19 = vld [vmem:[#allocation12_spill] sm:$0xff] }
 0x43e   :  { %11624 = vmatmul.mubr.msk.f32.gmra.mxu0 %vm122_vm0, %v11620_v46  ;;  %9894 = vmatprep.subr.mxu1 %v9718_v57  ;;  %v9717_v61 = vadd.f32 %v9661_v44, %v18556_v6  ;;  %v9707_v21 = vadd.f32 %v9651_v36, %v18557_v17  ;;  %v9555_v51 = vmul.f32 %v16499_v39, %v18558_v23  ;;  %v9684_v31 = vmax.f32 %v9628_v18, 0.0  ;;  %v18560_v12 = vld [vmem:[#allocation100_spill] sm:$0xff]  ;;  %v18563_v18 = vld [vmem:[#allocation29_spill] sm:$0xff] }
 0x43f   :  { %10002 = vmatprep.subr.mxu0 %v9708_v1  ;;  %12480 = vmatprep.mubr.msk.f32.mxu1 %vm122_vm0, %v11609_v47  ;;  %v9704_v50 = vadd.f32 %v9648_v0, %v18559_v19  ;;  %v9612_v29 = vadd.f32 %v16686_v24, %v9540_v13  ;;  %v9541_v44 = vmul.f32 %v16621_v26, %v18560_v12  ;;  %v9682_v46 = vmax.f32 %v9626_v41, 0.0  ;;  %v18564_v41 = vld [vmem:[#allocation40_spill] sm:$0xff] }
 0x440   :  { %v9542_v36 = vmul.f32 %v16621_v26, %v16785_v32  ;;  %9895 = vmatpush1.msra.mxu1 %v9717_v61  ;;  %10003 = vmatpush1.msra.mxu0 %v9707_v21  ;;  %v9694_v15 = vadd.f32 %v9638_v8, %v18561_v14  ;;  %v9703_v0 = vadd.f32 %v9647_v10, %v18562_v9  ;;  %v9681_v58 = vmax.f32 %v9625_v11, 0.0  ;;  %v18566_v11 = vld [vmem:[#allocation31_spill] sm:$0xff]  ;;  %v18567_v17 = vld [vmem:[#allocation124_spill] sm:$0xff]  ;;  %v18570_v14 = vld [vmem:[#allocation33_spill] sm:$0xff] }
 0x441   :  { %12481 = vmatmul.mubr.msk.f32.gmra.mxu1 %vm122_vm0, %v11610_v55  ;;  %9896 = vmatprep.subr.mxu1 %v9704_v50  ;;  %v9693_v13 = vadd.f32 %v9637_v54, %v18563_v18  ;;  %v9598_v32 = vadd.f32 %v16861_v35, %v9526_v33  ;;  %v9597_v57 = vadd.f32 %v16861_v35, %v9525_v38  ;;  %v9668_v1 = vmax.f32 %v9612_v29, 0.0  ;;  %v18565_v33 = vld [vmem:[#allocation157_spill] sm:$0xff]  ;;  %v11615_v54 = vld [vmem:[%s17679_s1 + $0x540] sm:$0xff]  ;;  %v18571_v18 = vld [vmem:[#allocation36_spill] sm:$0xff] }
 0x442   :  { %v9528_v47 = vmul.f32 %v16645_v30, %v16816_v28  ;;  %v9558_v8 = vmul.f32 %v16499_v39, %v16877_v63  ;;  %10004 = vmatprep.subr.mxu0 %v9694_v15  ;;  %9843 = vmatprep.mubr.f32.mxu0 %v18544_v60  ;;  %v9627_v10 = vadd.f32 %v16571_v43, %v9555_v51  ;;  %v9667_v61 = vmax.f32 %v17134_v45, 0.0  ;;  %v18568_v45 = vld [vmem:[#allocation32_spill] sm:$0xff] }
 0x443   :  { %9897 = vmatpush1.msra.mxu1 %v9703_v0  ;;  %10005 = vmatpush1.msra.mxu0 %v9693_v13  ;;  %v9740_v59 = vadd.f32 %v9684_v31, %v18564_v41  ;;  %v9584_v38 = vadd.f32 %v16757_v7, %v17079_v37  ;;  %v9583_v28 = vadd.f32 %v16757_v7, %v17069_v2  ;;  %v9654_v21 = vmax.f32 %v9598_v32, 0.0 }
 0x444   :  { %v9513_v63 = vmul.f32 %v16711_v20, %v18565_v33  ;;  %11625 = vmatmul.mubr.msk.f32.gmra.mxu0 %vm122_vm0, %v11621_v52  ;;  %9898 = vmatprep.subr.mxu1 %v16957_v56  ;;  %v9738_v6 = vadd.f32 %v9682_v46, %v18566_v11  ;;  %v9527_v37 = vmul.f32 %v16645_v30, %v18567_v17  ;;  %v11622_v56 = vld [vmem:[%s17679_s1 + $0x578] sm:$0xff]  ;;  %v9653_v19 = vmax.f32 %v9597_v57, 0.0  ;;  %v11616_v46 = vld [vmem:[%s17679_s1 + $0x548] sm:$0xff] }
 0x445   :  { %v9613_v2 = vadd.f32 %v16686_v24, %v9541_v44  ;;  %10226 = vmatprep.subr.mxu0 %v9740_v59  ;;  %9899 = vmatpush1.msra.mxu1 %v16924_v4  ;;  %v9614_v55 = vadd.f32 %v16686_v24, %v9542_v36  ;;  %v9514_v23 = vmul.f32 %v16711_v20, %v16843_v27  ;;  %v18569_v4 = vld [vmem:[#allocation34_spill] sm:$0xff]  ;;  %v9640_v29 = vmax.f32 %v9584_v38, 0.0  ;;  %v18574_v38 = vld [vmem:[#allocation39_spill] sm:$0xff] }
 0x446   :  { %9932 = vmatprep.mubr.f32.mxu1 %v18544_v60  ;;  %10112 = vmatprep.subr.mxu1 %v9738_v6  ;;  %v9737_v51 = vadd.f32 %v9681_v58, %v18568_v45  ;;  %v9630_v50 = vadd.f32 %v16571_v43, %v9558_v8  ;;  %v9724_v31 = vadd.f32 %v9668_v1, %v18569_v4  ;;  %v9683_v12 = vmax.f32 %v9627_v10, 0.0  ;;  %v18573_v59 = vld [vmem:[#allocation38_spill] sm:$0xff] }
 0x447   :  { %11627 = vmatmul.mubr.msk.f32.vlgmr.msra.gmra.mxu1 %vm122_vm0, %v11615_v54  ;;  %9849 = vmatprep.mubr.f32.mxu0 %v18544_v60  ;;  %v9600_v44 = vadd.f32 %v16861_v35, %v9528_v47  ;;  %v17203_v27 = vadd.f32 %v16757_v7, %v9513_v63  ;;  %v9560_v36 = vmul.f32 %v16499_v39, %v17003_v22  ;;  %v9639_v9 = vmax.f32 %v9583_v28, 0.0  ;;  %v11631_v22 = vld [vmem:[%s17679_s1 + $0x580] sm:$0xff]  ;;  %v18572_v47 = vld [vmem:[#allocation35_spill] sm:$0xff]  ;;  %v18575_v63 = vld [vmem:[#allocation37_spill] sm:$0xff] }
 0x448   :  { %10113 = vmatpush1.msra.mxu1 %v9737_v51  ;;  %11626 = vmatmul.mubr.msk.f32.gmra.mxu0 %vm122_vm0, %v11622_v56  ;;  %v9723_v15 = vadd.f32 %v9667_v61, %v18570_v14  ;;  %v9599_v0 = vadd.f32 %v16861_v35, %v9527_v37  ;;  %v9710_v13 = vadd.f32 %v9654_v21, %v18571_v18  ;;  %v9670_v52 = vmax.f32 %v9614_v55, 0.0  ;;  %v18577_v56 = vld [vmem:[#allocation41_spill] sm:$0xff]  ;;  %v18578_v55 = vld [vmem:[#allocation47_spill] sm:$0xff] }
 0x449   :  { %10114 = vmatprep.subr.mxu1 %v9724_v31  ;;  %9938 = vmatprep.mubr.f32.mxu1 %v18544_v60  ;;  %v9669_v32 = vmax.f32 %v9613_v2, 0.0  ;;  %v9557_v57 = vmul.f32 %v16499_v39, %v16728_v40  ;;  %v9709_v8 = vadd.f32 %v9653_v19, %v18572_v47  ;;  %v9686_v58 = vmax.f32 %v9630_v50, 0.0  ;;  %v11632_v19 = vld [vmem:[%s17679_s1 + $0x588] sm:$0xff]  ;;  %v18583_v18 = vld [vmem:[#allocation45_spill] sm:$0xff] }
 0x44a   :  { %10115 = vmatpush1.msra.mxu1 %v9723_v15  ;;  %10038 = vmatprep.mubr.f32.mxu0 %v18544_v60  ;;  %v9586_v10 = vadd.f32 %v16757_v7, %v9514_v23  ;;  %v9544_v41 = vmul.f32 %v16621_v26, %v16907_v48  ;;  %v9696_v1 = vadd.f32 %v9640_v29, %v18573_v59  ;;  %v9656_v33 = vmax.f32 %v9600_v44, 0.0  ;;  %v11617_v48 = vld [vmem:[%s17679_s1 + $0x550] sm:$0xff] }
 0x44b   :  { %11628 = vmatmul.mubr.msk.f32.gmra.mxu1 %vm122_vm0, %v11616_v46  ;;  %10116 = vmatprep.subr.mxu1 %v9710_v13  ;;  %v9739_v28 = vadd.f32 %v9683_v12, %v18574_v38  ;;  %v9543_v40 = vmul.f32 %v16621_v26, %v16766_v49  ;;  %v9695_v54 = vadd.f32 %v9639_v9, %v18575_v63  ;;  %v18576_v49 = vld [vmem:[#allocation42_spill] sm:$0xff]  ;;  %v9655_v37 = vmax.f32 %v9599_v0, 0.0  ;;  %v18587_v38 = vld [vmem:[#allocation48_spill] sm:$0xff] }
 0x44c   :  { %10117 = vmatpush1.msra.mxu1 %v9709_v8  ;;  %11635 = vmatmul.mubr.msk.f32.vlgmr.msra.gmra.mxu0 %vm122_vm0, %v11631_v22  ;;  %v9632_v11 = vadd.f32 %v16571_v43, %v9560_v36  ;;  %v9529_v6 = vmul.f32 %v16645_v30, %v16795_v25  ;;  %v9530_v61 = vmul.f32 %v16645_v30, %v16940_v16  ;;  %v9642_v45 = vmax.f32 %v9586_v10, 0.0  ;;  %v18579_v16 = vld [vmem:[#allocation44_spill] sm:$0xff]  ;;  %v18581_v46 = vld [vmem:[#allocation46_spill] sm:$0xff]  ;;  %v18586_v10 = vld [vmem:[#allocation159_spill] sm:$0xff] }
 0x44d   :  { %10118 = vmatprep.subr.mxu1 %v9696_v1  ;;  %10227 = vmatpush1.msra.mxu0 %v9739_v28  ;;  %v9726_v17 = vadd.f32 %v9670_v52, %v18576_v49  ;;  %v9629_v2 = vadd.f32 %v16571_v43, %v9557_v57  ;;  %v9725_v21 = vadd.f32 %v9669_v32, %v18577_v56  ;;  %v9641_v50 = vmax.f32 %v17203_v27, 0.0  ;;  %v18580_v27 = vld [vmem:[#allocation43_spill] sm:$0xff]  ;;  %v11633_v22 = vld [vmem:[%s17679_s1 + $0x590] sm:$0xff]  ;;  %v11639_v8 = vld [vmem:[%s17679_s1 + $0x5a0] sm:$0xff] }
 0x44e   :  { %9944 = vmatprep.mubr.f32.mxu1 %v18544_v60  ;;  %10119 = vmatpush1.msra.mxu1 %v9695_v54  ;;  %v9742_v23 = vadd.f32 %v9686_v58, %v18578_v55  ;;  %v9516_v25 = vmul.f32 %v16711_v20, %v16973_v53  ;;  %v9712_v51 = vadd.f32 %v9656_v33, %v18579_v16  ;;  %v11618_v53 = vld [vmem:[%s17679_s1 + $0x558] sm:$0xff]  ;;  %v9688_v12 = vmax.f32 %v9632_v11, 0.0  ;;  %v18588_v63 = vld [vmem:[#allocation192_spill] sm:$0xff]  ;;  %v18589_v54 = vld [vmem:[#allocation50_spill] sm:$0xff] }
 0x44f   :  { %10228 = vmatprep.subr.mxu0 %v9726_v17  ;;  %11629 = vmatmul.mubr.msk.f32.gmra.mxu1 %vm122_vm0, %v11617_v48  ;;  %v9616_v4 = vadd.f32 %v16686_v24, %v9544_v41  ;;  %v9515_v31 = vmul.f32 %v16711_v20, %v16825_v42  ;;  %v9615_v29 = vadd.f32 %v16686_v24, %v9543_v40  ;;  %v9685_v0 = vmax.f32 %v9629_v2, 0.0  ;;  %v11634_v48 = vld [vmem:[%s17679_s1 + $0x598] sm:$0xff]  ;;  %v18592_v55 = vld [vmem:[#allocation51_spill] sm:$0xff] }
 0x450   :  { %10229 = vmatpush1.msra.mxu0 %v9725_v21  ;;  %10340 = vmatprep.subr.mxu1 %v9742_v23  ;;  %v9559_v44 = vmul.f32 %v16499_v39, %v16835_v34  ;;  %v9711_v36 = vadd.f32 %v9655_v37, %v18580_v27  ;;  %v9602_v14 = vadd.f32 %v16861_v35, %v9530_v61  ;;  %v18582_v39 = vld [vmem:[#allocation114_spill] sm:$0xff]  ;;  %v18591_v37 = vld [vmem:[#allocation52_spill] sm:$0xff]  ;;  %v12592_v21 = vmov 3  }
 0x451   :  { %10044 = vmatprep.mubr.f32.mxu0 %v18544_v60  ;;  %10230 = vmatprep.subr.mxu0 %v9712_v51  ;;  %v9601_v42 = vadd.f32 %v16861_v35, %v9529_v6  ;;  %v9546_v15 = vmul.f32 %v16621_v26, %v17028_v5  ;;  %v9698_v9 = vadd.f32 %v9642_v45, %v18581_v46  ;;  %v9672_v5 = vmax.f32 %v9616_v4, 0.0  ;;  %v18590_v6 = vld [vmem:[#allocation49_spill] sm:$0xff]  ;;  %v18597_v27 = vld [vmem:[#allocation58_spill] sm:$0xff]  ;;  %v11648_v46 = vld [vmem:[%s17679_s1 + $0x5c8] sm:$0xff] }
 0x452   :  { %11636 = vmatmul.mubr.msk.f32.gmra.mxu0 %vm122_vm0, %v11632_v19  ;;  %9950 = vmatprep.mubr.f32.mxu1 %v18544_v60  ;;  %v9545_v34 = vmul.f32 %v16621_v26, %v18582_v39  ;;  %v9697_v13 = vadd.f32 %v9641_v50, %v18583_v18  ;;  %v9588_v52 = vadd.f32 %v16757_v7, %v9516_v25  ;;  %v18584_v26 = vld [vmem:[#allocation56_spill] sm:$0xff]  ;;  %v9671_v58 = vmax.f32 %v9615_v29, 0.0  ;;  %v11647_v19 = vld [vmem:[%s17679_s1 + $0x5c0] sm:$0xff]  ;;  %v18594_v4 = vld [vmem:[#allocation53_spill] sm:$0xff] }
 0x453   :  { %10231 = vmatpush1.msra.mxu0 %v9711_v36  ;;  %11630 = vmatmul.mubr.msk.f32.gmra.mxu1 %vm122_vm0, %v11618_v53  ;;  %v9587_v32 = vadd.f32 %v16757_v7, %v9515_v31  ;;  %v9532_v57 = vmul.f32 %v16645_v30, %v17053_v62  ;;  %v17284_v47 = vadd.f32 %v9688_v12, %v18584_v26  ;;  %v9658_v62 = vmax.f32 %v9602_v14, 0.0  ;;  %v11641_v29 = vld [vmem:[%s17679_s1 + $0x5b0] sm:$0xff]  ;;  %v18595_v53 = vld [vmem:[#allocation55_spill] sm:$0xff]  ;;  %v11655_v26 = vld [vmem:[%s17679_s1 + $0x5e0] sm:$0xff] }
 0x454   :  { %10232 = vmatprep.subr.mxu0 %v9698_v9  ;;  %10050 = vmatprep.mubr.f32.mxu0 %v18544_v60  ;;  %v9531_v41 = vmul.f32 %v16645_v30, %v18586_v10  ;;  %v9631_v59 = vadd.f32 %v16571_v43, %v9559_v44  ;;  %v9518_v1 = vmul.f32 %v16711_v20, %v17083_v3  ;;  %v9657_v33 = vmax.f32 %v9601_v42, 0.0  ;;  %v18599_v42 = vld [vmem:[#allocation57_spill] sm:$0xff]  ;;  %v18603_v18 = vld [vmem:[#allocation59_spill] sm:$0xff] }
 0x455   :  { %18585 = vst [vmem:[#allocation128_spill] sm:$0xff] %v17284_v47  ;;  %10233 = vmatpush1.msra.mxu0 %v9697_v13  ;;  %10152 = vmatprep.mubr.f32.mxu1 %v18544_v60  ;;  %v9741_v28 = vadd.f32 %v9685_v0, %v18587_v38  ;;  %v9618_v40 = vadd.f32 %v16686_v24, %v9546_v15  ;;  %v9644_v11 = vmax.f32 %v9588_v52, 0.0  ;;  %v18601_v0 = vld [vmem:[#allocation60_spill] sm:$0xff]  ;;  %v18607_v52 = vld [vmem:[#allocation61_spill] sm:$0xff]  ;;  %v11656_v10 = vld [vmem:[%s17679_s1 + $0x5e8] sm:$0xff] }
 0x456   :  { %10454 = vmatprep.subr.mxu0 %v17284_v47  ;;  %11637 = vmatmul.mubr.msk.f32.gmra.mxu0 %vm122_vm0, %v11633_v22  ;;  %v9517_v30 = vmul.f32 %v16711_v20, %v18588_v63  ;;  %v9617_v43 = vadd.f32 %v16686_v24, %v9545_v34  ;;  %v9728_v3 = vadd.f32 %v9672_v5, %v18589_v54  ;;  %v11640_v24 = vld [vmem:[%s17679_s1 + $0x5a8] sm:$0xff]  ;;  %v9643_v20 = vmax.f32 %v9587_v32, 0.0  ;;  %v11642_v34 = vld [vmem:[%s17679_s1 + $0x5b8] sm:$0xff]  ;;  %v18605_v22 = vld [vmem:[#allocation62_spill] sm:$0xff] }
 0x457   :  { %11643 = vmatmul.mubr.msk.f32.vlgmr.msra.gmra.mxu1 %vm122_vm0, %v11639_v8  ;;  %10056 = vmatprep.mubr.f32.mxu0 %v18544_v60  ;;  %v9727_v61 = vadd.f32 %v9671_v58, %v18590_v6  ;;  %v9604_v49 = vadd.f32 %v16861_v35, %v9532_v57  ;;  %v9603_v17 = vadd.f32 %v16861_v35, %v9531_v41  ;;  %v9687_v56 = vmax.f32 %v9631_v59, 0.0  ;;  %v18593_v35 = vld [vmem:[#allocation54_spill] sm:$0xff]  ;;  %v11649_v57 = vld [vmem:[%s17679_s1 + $0x5d0] sm:$0xff]  ;;  %v11650_v58 = vld [vmem:[%s17679_s1 + $0x5d8] sm:$0xff] }
 0x458   :  { %10341 = vmatpush1.msra.mxu1 %v9741_v28  ;;  %10158 = vmatprep.mubr.f32.mxu1 %v18544_v60  ;;  %v9714_v2 = vadd.f32 %v9658_v62, %v18591_v37  ;;  %v9713_v23 = vadd.f32 %v9657_v33, %v18592_v55  ;;  %v9674_v45 = vmax.f32 %v9618_v40, 0.0  ;;  %v9590_v25 = vadd.f32 %v16757_v7, %v9518_v1  ;;  %v17383_v8 = vld [vmem:[%s17680_s2] sm:$0xff]  ;;  %v17398_v41 = vld [vmem:[%s17680_s2 + $0x8] sm:$0xff]  ;;  %v17405_v59 = vld [vmem:[%s17680_s2 + $0x10] sm:$0xff] }
 0x459   :  { %10342 = vmatprep.subr.mxu1 %v9728_v3  ;;  %12569 = vset.pattern.permute.xlu1 %v12592_v21  ;;  %v9589_v16 = vadd.f32 %v16757_v7, %v9517_v30  ;;  %v9700_v51 = vadd.f32 %v9644_v11, %v18593_v35  ;;  %v9673_v50 = vmax.f32 %v9617_v43, 0.0  ;;  %v9699_v31 = vadd.f32 %v9643_v20, %v18594_v4  ;;  %v11663_v62 = vld [vmem:[%s17679_s1 + $0x600] sm:$0xff]  ;;  %v11657_v1 = vld [vmem:[%s17679_s1 + $0x5f0] sm:$0xff]  ;;  %v17421_v38 = vld [vmem:[%s17680_s2 + $0x18] sm:$0xff] }
 0x45a   :  { %11638 = vmatmul.mubr.msk.f32.gmra.mxu0 %vm122_vm0, %v11634_v48  ;;  %10343 = vmatpush1.msra.mxu1 %v9727_v61  ;;  %v9660_v7 = vmax.f32 %v9604_v49, 0.0  ;;  %v17331_v12 = vadd.f32 %v9687_v56, %v18595_v53  ;;  %v9659_v44 = vmax.f32 %v9603_v17, 0.0  ;;  %v17336_v36 = vadd.f32 %v9674_v45, %v18597_v27  ;;  %v11664_v28 = vld [vmem:[%s17679_s1 + $0x608] sm:$0xff]  ;;  %v11658_v33 = vld [vmem:[%s17679_s1 + $0x5f8] sm:$0xff]  ;;  %v11665_v40 = vld [vmem:[%s17679_s1 + $0x610] sm:$0xff] }
 0x45b   :  { %10344 = vmatprep.subr.mxu1 %v9714_v2  ;;  %11644 = vmatmul.mubr.msk.f32.gmra.mxu1 %vm122_vm0, %v11640_v24  ;;  %v9646_v14 = vmax.f32 %v9590_v25, 0.0  ;;  %v17341_v15 = vadd.f32 %v9673_v50, %v18599_v42  ;;  %v9645_v9 = vmax.f32 %v9589_v16, 0.0  ;;  %v11666_v63 = vld [vmem:[%s17679_s1 + $0x618] sm:$0xff] }
 0x45c   :  { %10345 = vmatpush1.msra.mxu1 %v9713_v23  ;;  %10266 = vmatprep.mubr.f32.mxu0 %v18544_v60  ;;  %18596 = vst [vmem:[#allocation160_spill] sm:$0xff] %v17331_v12  ;;  %18598 = vst [vmem:[#allocation117_spill] sm:$0xff] %v17336_v36  ;;  %v17349_v39 = vadd.f32 %v9660_v7, %v18601_v0  ;;  %v17356_v13 = vadd.f32 %v9659_v44, %v18603_v18  ;;  %v11675_v18 = vld [vmem:[%s17679_s1 + $0x640] sm:$0xff] }
 0x45d   :  { %10346 = vmatprep.subr.mxu1 %v9700_v51  ;;  %10164 = vmatprep.mubr.f32.mxu1 %v18544_v60  ;;  %18600 = vst [vmem:[#allocation162_spill] sm:$0xff] %v17341_v15  ;;  %v17362_v5 = vadd.f32 %v9646_v14, %v18605_v22  ;;  %v17367_v32 = vadd.f32 %v9645_v9, %v18607_v52 }
 0x45e   :  { %11651 = vmatmul.mubr.msk.f32.vlgmr.msra.gmra.mxu0 %vm122_vm0, %v11647_v19  ;;  %10347 = vmatpush1.msra.mxu1 %v9699_v31  ;;  %18602 = vst [vmem:[#allocation131_spill] sm:$0xff] %v17349_v39  ;;  %18604 = vst [vmem:[#allocation163_spill] sm:$0xff] %v17356_v13 }
 0x45f   :  { %10455 = vmatpush1.msra.mxu0 %v17331_v12  ;;  %11645 = vmatmul.mubr.msk.f32.gmra.mxu1 %vm122_vm0, %v11641_v29  ;;  %18606 = vst [vmem:[#allocation121_spill] sm:$0xff] %v17362_v5  ;;  %18608 = vst [vmem:[#allocation165_spill] sm:$0xff] %v17367_v32 }
 0x460   :  { %10456 = vmatprep.subr.mxu0 %v17336_v36  ;;  %10272 = vmatprep.mubr.f32.mxu0 %v18544_v60 }
 0x461   :  { %10457 = vmatpush1.msra.mxu0 %v17341_v15  ;;  %10170 = vmatprep.mubr.f32.mxu1 %v18544_v60 }
 0x462   :  { %10458 = vmatprep.subr.mxu0 %v17349_v39  ;;  %11652 = vmatmul.mubr.msk.f32.gmra.mxu0 %vm122_vm0, %v11648_v46 }
 0x463   :  { %10459 = vmatpush1.msra.mxu0 %v17356_v13  ;;  %11646 = vmatmul.mubr.msk.f32.gmra.mxu1 %vm122_vm0, %v11642_v34 }
 0x464   :  { %10460 = vmatprep.subr.mxu0 %v17362_v5  ;;  %10278 = vmatprep.mubr.f32.mxu0 %v18544_v60 }
 0x465   :  { %10461 = vmatpush1.msra.mxu0 %v17367_v32  ;;  %10380 = vmatprep.mubr.f32.mxu1 %v18544_v60 }
 0x466   :  { %11653 = vmatmul.mubr.msk.f32.gmra.mxu0 %vm122_vm0, %v11649_v57  ;;  %9466 = vperm.xlu1 %12569, %v17383_v8  }
 0x467   :  { %11659 = vmatmul.mubr.msk.f32.vlgmr.msra.gmra.mxu1 %vm122_vm0, %v11655_v26  ;;  %10284 = vmatprep.mubr.f32.mxu0 %v18544_v60 }
 0x468   :  { %10386 = vmatprep.mubr.f32.mxu1 %v18544_v60  ;;  %12570 = vset.pattern.permute.xlu0 %v12592_v21  ;;  %v17445_v21 = vpop.permute.xlu1 %10540 }
 0x469   :  { %9470 = vperm.xlu0 %12570, %v17398_v41   ;;  %18609 = vst [vmem:[#allocation134_spill] sm:$0xff] %v17445_v21 }
 0x46a   :  { %11654 = vmatmul.mubr.msk.f32.gmra.mxu0 %vm122_vm0, %v11650_v58  ;;  %9474 = vperm.xlu1 %12569, %v17405_v59  }
 0x46b   :  { %11660 = vmatmul.mubr.msk.f32.gmra.mxu1 %vm122_vm0, %v11656_v10  ;;  %10494 = vmatprep.mubr.f32.mxu0 %v18544_v60 }
 0x46c   :  { %10392 = vmatprep.mubr.f32.mxu1 %v18544_v60  ;;  %v17447_v50 = vpop.permute.xlu1 %10532 }
 0x46e   :  { %11667 = vmatmul.mubr.msk.f32.vlgmr.msra.gmra.mxu0 %vm122_vm0, %v11663_v62  ;;  %9478 = vperm.xlu1 %12569, %v17421_v38  }
 0x46f   :  { %11661 = vmatmul.mubr.msk.f32.gmra.mxu1 %vm122_vm0, %v11657_v1  ;;  %10500 = vmatprep.mubr.f32.mxu0 %v18544_v60 }
 0x470   :  { %10398 = vmatprep.mubr.f32.mxu1 %v18544_v60  ;;  %v17449_v42 = vpop.permute.xlu1 %10528 }
 0x471   :  { %18610 = vst [vmem:[#allocation166_spill] sm:$0xff] %v17449_v42 }
 0x472   :  { %11668 = vmatmul.mubr.msk.f32.gmra.mxu0 %vm122_vm0, %v11664_v28 }
 0x473   :  { %11662 = vmatmul.mubr.msk.f32.gmra.mxu1 %vm122_vm0, %v11658_v33  ;;  %10506 = vmatprep.mubr.f32.mxu0 %v18544_v60 }
 0x474   :  { %12491 = vmatprep.mubr.msk.f32.mxu1 %vm122_vm0, %v11675_v18  ;;  %v17455_v58 = vpop.permute.xlu1 %10788 }
 0x475   :  { %18611 = vst [vmem:[#allocation125_spill] sm:$0xff] %v17455_v58 }
 0x476   :  { %11669 = vmatmul.mubr.msk.f32.gmra.mxu0 %vm122_vm0, %v11665_v40 }
 0x477   :  { %10512 = vmatprep.mubr.f32.mxu0 %v18544_v60 }
 0x47a   :  { %11670 = vmatmul.mubr.msk.f32.gmra.mxu0 %vm122_vm0, %v11666_v63 }
 0x4a4   :  { %v12325_v3 = vpop.f32.mrf.mxu0 }
 0x4a5   :  { %v12297_v30 = vpop.f32.mrf.mxu1 }
 0x4a6   :  { %v8276_v11 = vpop.f32.mrf.mxu0 }
 0x4a7   :  { %v8077_v43 = vpop.f32.mrf.mxu1 }
 0x4a9   :  { %v12300_v54 = vpop.f32.mrf.mxu1 }
 0x4ab   :  { %v8087_v48 = vpop.f32.mrf.mxu1 }
 0x4af   :  { %v12311_v6 = vpop.f32.mrf.mxu1 }
 0x4b0   :  { %v8180_v61 = vadd.f32 %v12311_v6, %v12297_v30  ;;  %v12328_v17 = vpop.f32.mrf.mxu0 }
 0x4b1   :  { %v8174_v24 = vpop.f32.mrf.mxu1 }
 0x4b2   :  { %v8175_v20 = vadd.f32 %v8174_v24, %v8077_v43  ;;  %v8296_v49 = vadd.f32 %v12325_v3, %v8180_v61  ;;  %v8286_v2 = vpop.f32.mrf.mxu0  ;;  %v17457_v43 = vpop.permute.xlu1 %10816 }
 0x4b3   :  { %18612 = vst [vmem:[#allocation167_spill] sm:$0xff] %v17457_v43 }
 0x4b4   :  { %v8295_v37 = vadd.f32 %v8276_v11, %v8175_v20  ;;  %v17459_v20 = vpop.permute.xlu0 %10536 }
 0x4b6   :  { %v12314_v60 = vpop.f32.mrf.mxu1 }
 0x4b7   :  { %v8190_v56 = vadd.f32 %v12314_v60, %v12300_v54  ;;  %v11691_v60 = vld [vmem:[%s17679_s1 + $0x680] sm:$0xff] }
 0x4b8   :  { %v8184_v55 = vpop.f32.mrf.mxu1  ;;  %12519 = vmatprep.mubr.msk.f32.mxu0 %vm122_vm0, %v11691_v60 }
 0x4b9   :  { %v8185_v23 = vadd.f32 %v8184_v55, %v8087_v48  ;;  %v8298_v25 = vadd.f32 %v12328_v17, %v8190_v56  ;;  %v17461_v17 = vpop.permute.xlu1 %10812 }
 0x4ba   :  { %v12353_v45 = vpop.f32.mrf.mxu0  ;;  %18613 = vst [vmem:[#allocation138_spill] sm:$0xff] %v17461_v17 }
 0x4bb   :  { %v8297_v35 = vadd.f32 %v8286_v2, %v8185_v23 }
 0x4bc   :  { %v8488_v16 = vpop.f32.mrf.mxu0 }
 0x4bd   :  { %v12339_v51 = vpop.f32.mrf.mxu1 }
 0x4be   :  { %v8402_v19 = vadd.f32 %v12339_v51, %v8296_v49  ;;  %v17469_v51 = vpop.permute.xlu1 %10808 }
 0x4bf   :  { %v8382_v4 = vpop.f32.mrf.mxu1  ;;  %18615 = vst [vmem:[#allocation129_spill] sm:$0xff] %v17469_v51 }
 0x4c0   :  { %v8401_v31 = vadd.f32 %v8382_v4, %v8295_v37  ;;  %v12356_v29 = vpop.f32.mrf.mxu0  ;;  %v8508_v7 = vadd.f32 %v12353_v45, %v8402_v19 }
 0x4c2   :  { %v8498_v53 = vpop.f32.mrf.mxu0  ;;  %v8507_v44 = vadd.f32 %v8488_v16, %v8401_v31  ;;  %v17467_v16 = vpop.permute.xlu0 %10792 }
 0x4c3   :  { %v12342_v27 = vpop.f32.mrf.mxu1  ;;  %18614 = vst [vmem:[#allocation168_spill] sm:$0xff] %v17467_v16 }
 0x4c4   :  { %v8404_v14 = vadd.f32 %v12342_v27, %v8298_v25 }
 0x4c5   :  { %v8392_v46 = vpop.f32.mrf.mxu1 }
 0x4c6   :  { %v8403_v9 = vadd.f32 %v8392_v46, %v8297_v35  ;;  %v8510_v34 = vadd.f32 %v12356_v29, %v8404_v14  ;;  %v17473_v14 = vpop.permute.xlu0 %10784 }
 0x4c7   :  { %v12381_v0 = vpop.f32.mrf.mxu0  ;;  %18616 = vst [vmem:[#allocation170_spill] sm:$0xff] %v17473_v14 }
 0x4c8   :  { %v8509_v52 = vadd.f32 %v8498_v53, %v8403_v9  ;;  %v17475_v9 = vpop.permute.xlu1 %3138 }
 0x4c9   :  { %v8700_v22 = vpop.f32.mrf.mxu0  ;;  %18617 = vst [vmem:[#allocation140_spill] sm:$0xff] %v17475_v9 }
 0x4ca   :  { %v12367_v57 = vpop.f32.mrf.mxu1 }
 0x4cb   :  { %v8614_v26 = vadd.f32 %v12367_v57, %v8508_v7  ;;  %v12593_v7 = vmov 7  }
 0x4cc   :  { %v8594_v10 = vpop.f32.mrf.mxu1  ;;  %12572 = vset.pattern.permute.xlu1 %v12593_v7  ;;  %12571 = vset.pattern.permute.xlu0 %v12593_v7 }
 0x4cd   :  { %v8613_v62 = vadd.f32 %v8594_v10, %v8507_v44  ;;  %v12384_v1 = vpop.f32.mrf.mxu0  ;;  %v8720_v28 = vadd.f32 %v12381_v0, %v8614_v26  ;;  %10760 = vperm.xlu1 %12572, %v17398_v41   ;;  %10756 = vperm.xlu0 %12571, %v17383_v8   ;;  %v12594_v10 = vmov 10  }
 0x4cf   :  { %v8710_v33 = vpop.f32.mrf.mxu0  ;;  %v8719_v40 = vadd.f32 %v8700_v22, %v8613_v62  ;;  %v17479_v62 = vpop.permute.xlu0 %10780 }
 0x4d0   :  { %v12370_v63 = vpop.f32.mrf.mxu1  ;;  %18618 = vst [vmem:[#allocation171_spill] sm:$0xff] %v17479_v62 }
 0x4d1   :  { %v8616_v30 = vadd.f32 %v12370_v63, %v8510_v34  ;;  %10764 = vperm.xlu1 %12572, %v17405_v59   ;;  %10768 = vperm.xlu0 %12571, %v17421_v38  }
 0x4d2   :  { %v8604_v54 = vpop.f32.mrf.mxu1 }
 0x4d3   :  { %v8615_v3 = vadd.f32 %v8604_v54, %v8509_v52  ;;  %v8722_v11 = vadd.f32 %v12384_v1, %v8616_v30 }
 0x4d4   :  { %v12409_v48 = vpop.f32.mrf.mxu0 }
 0x4d5   :  { %v8721_v61 = vadd.f32 %v8710_v33, %v8615_v3  ;;  %12573 = vset.pattern.permute.xlu1 %v12594_v10  ;;  %12574 = vset.pattern.permute.xlu0 %v12594_v10 }
 0x4d6   :  { %v8912_v6 = vpop.f32.mrf.mxu0  ;;  %11048 = vperm.xlu1 %12573, %v17383_v8   ;;  %11052 = vperm.xlu0 %12574, %v17398_v41  }
 0x4d7   :  { %v12395_v24 = vpop.f32.mrf.mxu1 }
 0x4d8   :  { %v8826_v49 = vadd.f32 %v12395_v24, %v8720_v28  ;;  %v3143_v28 = vpop.permute.xlu1 %3142 }
 0x4d9   :  { %v8806_v37 = vpop.f32.mrf.mxu1 }
 0x4da   :  { %v8825_v2 = vadd.f32 %v8806_v37, %v8719_v40  ;;  %v12412_v56 = vpop.f32.mrf.mxu0  ;;  %v8932_v55 = vadd.f32 %v12409_v48, %v8826_v49  ;;  %11056 = vperm.xlu1 %12573, %v17405_v59  }
 0x4dc   :  { %v8922_v23 = vpop.f32.mrf.mxu0  ;;  %v8931_v45 = vadd.f32 %v8912_v6, %v8825_v2 }
 0x4dd   :  { %v12398_v25 = vpop.f32.mrf.mxu1 }
 0x4de   :  { %v8828_v35 = vadd.f32 %v12398_v25, %v8722_v11  ;;  %v17484_v11 = vpop.permute.xlu0 %10804  ;;  %11060 = vperm.xlu1 %12573, %v17421_v38  }
 0x4df   :  { %v8816_v19 = vpop.f32.mrf.mxu1  ;;  %18619 = vst [vmem:[#allocation132_spill] sm:$0xff] %v17484_v11 }
 0x4e0   :  { %v8827_v4 = vadd.f32 %v8816_v19, %v8721_v61  ;;  %v12437_v31 = vpop.f32.mrf.mxu0  ;;  %v8934_v29 = vadd.f32 %v12412_v56, %v8828_v35  ;;  %v3151_v61 = vpop.permute.xlu1 %3150 }
 0x4e2   :  { %v9124_v53 = vpop.f32.mrf.mxu0  ;;  %v8933_v44 = vadd.f32 %v8922_v23, %v8827_v4 }
 0x4e3   :  { %v12423_v27 = vpop.f32.mrf.mxu1 }
 0x4e4   :  { %v9038_v46 = vadd.f32 %v12423_v27, %v8932_v55  ;;  %v17487_v56 = vpop.permute.xlu1 %9466  ;;  %v17489_v55 = vpop.permute.xlu0 %3146 }
 0x4e5   :  { %v9018_v0 = vpop.f32.mrf.mxu1  ;;  %18620 = vst [vmem:[#allocation173_spill] sm:$0xff] %v17487_v56  ;;  %18621 = vst [vmem:[#allocation142_spill] sm:$0xff] %v17489_v55 }
 0x4e6   :  { %v9037_v34 = vadd.f32 %v9018_v0, %v8931_v45  ;;  %v12440_v18 = vpop.f32.mrf.mxu0  ;;  %v9144_v22 = vadd.f32 %v12437_v31, %v9038_v46 }
 0x4e8   :  { %v9134_v52 = vpop.f32.mrf.mxu0  ;;  %v9143_v57 = vadd.f32 %v9124_v53, %v9037_v34  ;;  %v9471_v4 = vpop.permute.xlu0 %9470 }
 0x4e9   :  { %v12426_v26 = vpop.f32.mrf.mxu1  ;;  %v17495_v7 = vpop.permute.xlu1 %9474 }
 0x4ea   :  { %v9040_v1 = vadd.f32 %v12426_v26, %v8934_v29  ;;  %18622 = vst [vmem:[#allocation174_spill] sm:$0xff] %v17495_v7 }
 0x4eb   :  { %v9028_v33 = vpop.f32.mrf.mxu1 }
 0x4ec   :  { %v9039_v40 = vadd.f32 %v9028_v33, %v8933_v44  ;;  %v12465_v63 = vpop.f32.mrf.mxu0  ;;  %v9146_v30 = vadd.f32 %v12440_v18, %v9040_v1  ;;  %v18623_v44 = vld [vmem:[#allocation95_spill] sm:$0xff]  ;;  %v18626_v1 = vld [vmem:[#allocation98_spill] sm:$0xff] }
 0x4ed   :  { %v3154_v27 = vadd.f32 %v3143_v28, %v18623_v44  ;;  %v3156_v33 = vadd.f32 %v3151_v61, %v18626_v1 }
 0x4ee   :  { %v9336_v54 = vpop.f32.mrf.mxu0  ;;  %v9145_v3 = vadd.f32 %v9134_v52, %v9039_v40 }
 0x4ef   :  { %v12451_v48 = vpop.f32.mrf.mxu1 }
 0x4f0   :  { %v9250_v6 = vadd.f32 %v12451_v48, %v9144_v22 }
 0x4f1   :  { %v9230_v24 = vpop.f32.mrf.mxu1 }
 0x4f2   :  { %v9249_v49 = vadd.f32 %v9230_v24, %v9143_v57  ;;  %v12468_v37 = vpop.f32.mrf.mxu0  ;;  %v9356_v8 = vadd.f32 %v12465_v63, %v9250_v6  ;;  %v9479_v57 = vpop.permute.xlu1 %9478 }
 0x4f4   :  { %v9346_v41 = vpop.f32.mrf.mxu0  ;;  %v9355_v60 = vadd.f32 %v9336_v54, %v9249_v49 }
 0x4f5   :  { %v12454_v2 = vpop.f32.mrf.mxu1 }
 0x4f6   :  { %v9252_v23 = vadd.f32 %v12454_v2, %v9146_v30 }
 0x4f7   :  { %v9240_v59 = vpop.f32.mrf.mxu1 }
 0x4f8   :  { %v9251_v45 = vadd.f32 %v9240_v59, %v9145_v3  ;;  %v17491_v25 = vpop.f32.mrf.mxu0  ;;  %v9358_v35 = vadd.f32 %v12468_v37, %v9252_v23 }
 0x4fa   :  { %v17493_v19 = vpop.f32.mrf.mxu0  ;;  %v9357_v31 = vadd.f32 %v9346_v41, %v9251_v45 }
 0x4fb   :  { %v12479_v29 = vpop.f32.mrf.mxu1 }
 0x4fc   :  { %v9462_v38 = vadd.f32 %v12479_v29, %v9356_v8 }
 0x4fd   :  { %v9442_v53 = vpop.f32.mrf.mxu1 }
 0x4fe   :  { %v9482_v46 = vadd.f32 %v9471_v4, %v9462_v38  ;;  %v17498_v0 = vadd.f32 %v9442_v53, %v9355_v60  ;;  %v17500_v34 = vpop.f32.mrf.mxu0 }
 0x500   :  { %18624 = vst [vmem:[#allocation135_spill] sm:$0xff] %v17498_v0  ;;  %v17502_v18 = vadd.f32 %v9482_v46, %v3154_v27  ;;  %v9841_v22 = vpop.f32.mrf.mxu0 }
 0x501   :  { %v12482_v52 = vpop.f32.mrf.mxu1 }
 0x502   :  { %18625 = vst [vmem:[#allocation175_spill] sm:$0xff] %v17502_v18  ;;  %v9464_v26 = vadd.f32 %v12482_v52, %v9358_v35 }
 0x503   :  { %v9452_v10 = vpop.f32.mrf.mxu1 }
 0x504   :  { %v9484_v40 = vadd.f32 %v9479_v57, %v9464_v26  ;;  %v17505_v63 = vadd.f32 %v9452_v10, %v9357_v31  ;;  %v9845_v30 = vpop.f32.mrf.mxu0 }
 0x506   :  { %18627 = vst [vmem:[#allocation144_spill] sm:$0xff] %v17505_v63  ;;  %v17507_v54 = vadd.f32 %v9484_v40, %v3156_v33  ;;  %v9847_v28 = vpop.f32.mrf.mxu0 }
 0x507   :  { %v17509_v3 = vpop.f32.mrf.mxu1 }
 0x508   :  { %18628 = vst [vmem:[#allocation176_spill] sm:$0xff] %v17507_v54  ;;  %v9851_v48 = vpop.f32.mrf.mxu0 }
 0x509   :  { %v9936_v6 = vpop.f32.mrf.mxu1 }
 0x50a   :  { %v9853_v24 = vpop.f32.mrf.mxu0  ;;  %v9937_v5 = vadd.f32 %v9936_v6, %v17493_v19 }
 0x50b   :  { %v9940_v49 = vpop.f32.mrf.mxu1 }
 0x50c   :  { %v17511_v37 = vpop.f32.mrf.mxu0  ;;  %v9941_v19 = vadd.f32 %v9940_v49, %v17500_v34 }
 0x50d   :  { %v9942_v8 = vpop.f32.mrf.mxu1 }
 0x50e   :  { %v10042_v41 = vpop.f32.mrf.mxu0  ;;  %v9943_v13 = vadd.f32 %v9942_v8, %v9841_v22 }
 0x50f   :  { %v9946_v60 = vpop.f32.mrf.mxu1  ;;  %v10064_v51 = vadd.f32 %v10042_v41, %v9937_v5 }
 0x511   :  { %v9948_v2 = vpop.f32.mrf.mxu1 }
 0x512   :  { %v10046_v61 = vpop.f32.mrf.mxu0  ;;  %v9949_v15 = vadd.f32 %v9948_v2, %v9847_v28 }
 0x513   :  { %v9952_v23 = vpop.f32.mrf.mxu1 }
 0x514   :  { %v10048_v59 = vpop.f32.mrf.mxu0  ;;  %v9953_v62 = vadd.f32 %v9952_v23, %v9851_v48 }
 0x515   :  { %v9954_v45 = vpop.f32.mrf.mxu1  ;;  %v10066_v36 = vadd.f32 %v10048_v59, %v9943_v13 }
 0x516   :  { %v10052_v35 = vpop.f32.mrf.mxu0  ;;  %v9955_v17 = vadd.f32 %v9954_v45, %v9853_v24  ;;  %v18632_v45 = vld [vmem:[#allocation166_spill] sm:$0xff] }
 0x517   :  { %v17513_v4 = vpop.f32.mrf.mxu1 }
 0x518   :  { %v10054_v31 = vpop.f32.mrf.mxu0 }
 0x519   :  { %v10156_v29 = vpop.f32.mrf.mxu1  ;;  %v10068_v11 = vadd.f32 %v10054_v31, %v9949_v15 }
 0x51a   :  { %v10058_v38 = vpop.f32.mrf.mxu0  ;;  %v10178_v21 = vadd.f32 %v10156_v29, %v10064_v51 }
 0x51b   :  { %v10160_v53 = vpop.f32.mrf.mxu1 }
 0x51c   :  { %v10060_v44 = vpop.f32.mrf.mxu0 }
 0x51d   :  { %v10162_v27 = vpop.f32.mrf.mxu1  ;;  %v10070_v22 = vadd.f32 %v10060_v44, %v9955_v17 }
 0x51e   :  { %v17515_v46 = vpop.f32.mrf.mxu0  ;;  %v10180_v16 = vadd.f32 %v10162_v27, %v10066_v36  ;;  %v9935_v36 = vadd.f32 %v17509_v3, %v17491_v25  ;;  %v18636_v27 = vld [vmem:[#allocation168_spill] sm:$0xff] }
 0x51f   :  { %v10166_v52 = vpop.f32.mrf.mxu1 }
 0x520   :  { %v10270_v57 = vpop.f32.mrf.mxu0 }
 0x521   :  { %v10168_v26 = vpop.f32.mrf.mxu1  ;;  %v10292_v13 = vadd.f32 %v10270_v57, %v10178_v21 }
 0x522   :  { %v10274_v10 = vpop.f32.mrf.mxu0  ;;  %v10182_v14 = vadd.f32 %v10168_v26, %v10068_v11  ;;  %v10065_v11 = vadd.f32 %v10046_v61, %v9941_v19  ;;  %v18641_v19 = vld [vmem:[#allocation129_spill] sm:$0xff] }
 0x523   :  { %v10172_v1 = vpop.f32.mrf.mxu1 }
 0x524   :  { %v10276_v33 = vpop.f32.mrf.mxu0  ;;  %v10179_v21 = vadd.f32 %v10160_v53, %v10065_v11  ;;  %v18635_v53 = vld [vmem:[#allocation170_spill] sm:$0xff]  ;;  %v11677_v11 = vld [vmem:[%s17679_s1 + $0x650] sm:$0xff] }
 0x525   :  { %v10174_v40 = vpop.f32.mrf.mxu1  ;;  %v10294_v28 = vadd.f32 %v10276_v33, %v10180_v16 }
 0x526   :  { %v10280_v54 = vpop.f32.mrf.mxu0  ;;  %v10184_v5 = vadd.f32 %v10174_v40, %v10070_v22  ;;  %v10293_v3 = vadd.f32 %v10274_v10, %v10179_v21  ;;  %v18639_v10 = vld [vmem:[#allocation171_spill] sm:$0xff] }
 0x527   :  { %v17517_v55 = vpop.f32.mrf.mxu1  ;;  %v18640_v40 = vld [vmem:[#allocation167_spill] sm:$0xff] }
 0x528   :  { %18629 = vst [vmem:[#allocation139_spill] sm:$0xff] %v17517_v55  ;;  %v10282_v18 = vpop.f32.mrf.mxu0  ;;  %v9947_v55 = vadd.f32 %v9946_v60, %v9845_v30 }
 0x529   :  { %v10384_v7 = vpop.f32.mrf.mxu1  ;;  %v10296_v8 = vadd.f32 %v10282_v18, %v10182_v14 }
 0x52a   :  { %v10286_v63 = vpop.f32.mrf.mxu0  ;;  %v10067_v6 = vadd.f32 %v10052_v35, %v9947_v55  ;;  %v10406_v30 = vadd.f32 %v10384_v7, %v10292_v13  ;;  %v10063_v55 = vadd.f32 %v17511_v37, %v9935_v36  ;;  %v18631_v37 = vld [vmem:[#allocation125_spill] sm:$0xff]  ;;  %v18633_v35 = vld [vmem:[#allocation134_spill] sm:$0xff]  ;;  %v11676_v13 = vld [vmem:[%s17679_s1 + $0x648] sm:$0xff] }
 0x52b   :  { %v10388_v9 = vpop.f32.mrf.mxu1 }
 0x52c   :  { %v10288_v56 = vpop.f32.mrf.mxu0  ;;  %v10181_v51 = vadd.f32 %v10166_v52, %v10067_v6  ;;  %v10177_v25 = vadd.f32 %v17513_v4, %v10063_v55  ;;  %v18645_v55 = vld [vmem:[#allocation131_spill] sm:$0xff] }
 0x52d   :  { %v10390_v0 = vpop.f32.mrf.mxu1  ;;  %v10298_v16 = vadd.f32 %v10288_v56, %v10184_v5  ;;  %v18642_v5 = vld [vmem:[#allocation128_spill] sm:$0xff] }
 0x52e   :  { %v17519_v32 = vpop.f32.mrf.mxu0  ;;  %v10408_v41 = vadd.f32 %v10390_v0, %v10294_v28  ;;  %v10295_v34 = vadd.f32 %v10280_v54, %v10181_v51  ;;  %v10291_v23 = vadd.f32 %v17515_v46, %v10177_v25  ;;  %v10407_v54 = vadd.f32 %v10388_v9, %v10293_v3  ;;  %v18637_v46 = vld [vmem:[#allocation138_spill] sm:$0xff]  ;;  %v11672_v3 = vld [vmem:[%s17679_s1 + $0x628] sm:$0xff] }
 0x52f   :  { %18630 = vst [vmem:[#allocation177_spill] sm:$0xff] %v17519_v32  ;;  %v10394_v12 = vpop.f32.mrf.mxu1  ;;  %v10069_v32 = vadd.f32 %v10058_v38, %v9953_v62  ;;  %v18634_v29 = vld [vmem:[#allocation139_spill] sm:$0xff] }
 0x530   :  { %v10498_v39 = vpop.f32.mrf.mxu0  ;;  %v10409_v61 = vadd.f32 %v10394_v12, %v10295_v34  ;;  %v10405_v38 = vadd.f32 %v18634_v29, %v10291_v23  ;;  %v18648_v23 = vld [vmem:[#allocation162_spill] sm:$0xff]  ;;  %v18650_v29 = vld [vmem:[#allocation165_spill] sm:$0xff] }
 0x531   :  { %v10396_v47 = vpop.f32.mrf.mxu1  ;;  %v10183_v2 = vadd.f32 %v10172_v1, %v10069_v32  ;;  %v10520_v49 = vadd.f32 %v10498_v39, %v10406_v30 }
 0x532   :  { %v10502_v43 = vpop.f32.mrf.mxu0  ;;  %v10410_v48 = vadd.f32 %v10396_v47, %v10296_v8 }
 0x533   :  { %v10400_v42 = vpop.f32.mrf.mxu1  ;;  %v10297_v17 = vadd.f32 %v10286_v63, %v10183_v2  ;;  %v10544_v39 = vadd.f32 %v18632_v45, %v10520_v49  ;;  %v10521_v4 = vadd.f32 %v10502_v43, %v10407_v54  ;;  %v18646_v49 = vld [vmem:[#allocation121_spill] sm:$0xff]  ;;  %v11693_v54 = vld [vmem:[%s17679_s1 + $0x690] sm:$0xff] }
 0x534   :  { %v10504_v58 = vpop.f32.mrf.mxu0 }
 0x535   :  { %v10402_v24 = vpop.f32.mrf.mxu1  ;;  %v10522_v14 = vadd.f32 %v10504_v58, %v10408_v41  ;;  %v10411_v0 = vadd.f32 %v10400_v42, %v10297_v17  ;;  %v10796_v1 = vmul.f32 %v18639_v10, %v10544_v39  ;;  %v10545_v43 = vadd.f32 %v17447_v50, %v10521_v4  ;;  %v11688_v4 = vld [vmem:[%s17679_s1 + $0x668] sm:$0xff] }
 0x536   :  { %v10508_v15 = vpop.f32.mrf.mxu0  ;;  %v10412_v47 = vadd.f32 %v10402_v24, %v10298_v16  ;;  %v18638_v26 = vld [vmem:[#allocation177_spill] sm:$0xff] }
 0x537   :  { %v10546_v63 = vadd.f32 %v17447_v50, %v10522_v14  ;;  %v10523_v42 = vadd.f32 %v10508_v15, %v10409_v61  ;;  %v10519_v9 = vadd.f32 %v18638_v26, %v10405_v38  ;;  %v18643_v50 = vld [vmem:[#allocation132_spill] sm:$0xff]  ;;  %v10797_v36 = vmul.f32 %v18635_v53, %v10545_v43  ;;  %v18644_v24 = vld [vmem:[#allocation117_spill] sm:$0xff] }
 0x538   :  { %v10510_v62 = vpop.f32.mrf.mxu0  ;;  %v11678_v16 = vld [vmem:[%s17679_s1 + $0x658] sm:$0xff]  ;;  %v18654_v26 = vld [vmem:[#allocation4_spill] sm:$0xff] }
 0x539   :  { %v10524_v18 = vadd.f32 %v10510_v62, %v10410_v48  ;;  %v10798_v44 = vmul.f32 %v18635_v53, %v10546_v63  ;;  %v10547_v33 = vadd.f32 %v17459_v20, %v10523_v42  ;;  %v10820_v48 = vadd.f32 %v18643_v50, %v10796_v1  ;;  %v11689_v53 = vld [vmem:[%s17679_s1 + $0x670] sm:$0xff] }
 0x53a   :  { %v10514_v32 = vpop.f32.mrf.mxu0  ;;  %v18656_v1 = vld [vmem:[#allocation64_spill] sm:$0xff] }
 0x53b   :  { %v10548_v60 = vadd.f32 %v17459_v20, %v10524_v18  ;;  %v10525_v56 = vadd.f32 %v10514_v32, %v10411_v0  ;;  %v10822_v6 = vadd.f32 %v18641_v19, %v10798_v44  ;;  %v10543_v20 = vadd.f32 %v18632_v45, %v10519_v9  ;;  %v11674_v45 = vld [vmem:[%s17679_s1 + $0x638] sm:$0xff] }
 0x53c   :  { %v10516_v7 = vpop.f32.mrf.mxu0  ;;  %v10799_v2 = vmul.f32 %v18631_v37, %v10547_v33  ;;  %v10828_v14 = vmax.f32 %v10820_v48, 0.0  ;;  %v10821_v32 = vadd.f32 %v18641_v19, %v10797_v36  ;;  %v11690_v44 = vld [vmem:[%s17679_s1 + $0x678] sm:$0xff]  ;;  %v18664_v48 = vld [vmem:[#allocation72_spill] sm:$0xff] }
 0x53d   :  { %v10526_v58 = vadd.f32 %v10516_v7, %v10412_v47  ;;  %v10800_v59 = vmul.f32 %v18631_v37, %v10548_v60  ;;  %v10549_v12 = vadd.f32 %v18633_v35, %v10525_v56  ;;  %v10830_v51 = vmax.f32 %v10822_v6, 0.0  ;;  %v11671_v47 = vld [vmem:[%s17679_s1 + $0x620] sm:$0xff]  ;;  %v18647_v7 = vld [vmem:[#allocation160_spill] sm:$0xff]  ;;  %v18655_v9 = vld [vmem:[#allocation5_spill] sm:$0xff] }
 0x53e   :  { %v10795_v17 = vmul.f32 %v18639_v10, %v10543_v20  ;;  %v10823_v18 = vadd.f32 %v18637_v46, %v10799_v2  ;;  %v10836_v0 = vadd.f32 %v10828_v14, %v18646_v49  ;;  %v10829_v56 = vmax.f32 %v10821_v32, 0.0  ;;  %v18660_v6 = vld [vmem:[#allocation68_spill] sm:$0xff]  ;;  %v18662_v2 = vld [vmem:[#allocation71_spill] sm:$0xff]  ;;  %v18671_v32 = vld [vmem:[#allocation78_spill] sm:$0xff] }
 0x53f   :  { %v10550_v31 = vadd.f32 %v18633_v35, %v10526_v58  ;;  %v10824_v57 = vadd.f32 %v18637_v46, %v10800_v59  ;;  %v10801_v28 = vmul.f32 %v18636_v27, %v10549_v12  ;;  %v10838_v21 = vadd.f32 %v10830_v51, %v18645_v55  ;;  %v11692_v58 = vld [vmem:[%s17679_s1 + $0x688] sm:$0xff]  ;;  %v11687_v35 = vld [vmem:[%s17679_s1 + $0x660] sm:$0xff] }
 0x540   :  { %v10819_v25 = vadd.f32 %v18643_v50, %v10795_v17  ;;  %v18653_v46 = vld [vmem:[#allocation63_spill] sm:$0xff]  ;;  %v1221_v10 = vadd.f32 %v18655_v9, %v18654_v26 }
 0x541   :  { %v10802_v52 = vmul.f32 %v18636_v27, %v10550_v31  ;;  %12483 = vmatprep.subr.mxu1 %v10550_v31  ;;  %v10832_v15 = vmax.f32 %v10824_v57, 0.0  ;;  %v10825_v30 = vadd.f32 %v18640_v40, %v10801_v28  ;;  %v18652_v27 = vld [vmem:[#allocation3_spill] sm:$0xff] }
 0x542   :  { %12484 = vmatpush3.msra.mxu1 %v10550_v31  ;;  %v10827_v59 = vmax.f32 %v10819_v25, 0.0  ;;  %v11694_v31 = vld [vmem:[%s17679_s1 + $0x698] sm:$0xff] }
 0x543   :  { %12485 = vmatprep.subr.mxu1 %v10548_v60  ;;  %v10826_v22 = vadd.f32 %v18640_v40, %v10802_v52  ;;  %v10840_v62 = vadd.f32 %v10832_v15, %v18644_v24  ;;  %v10833_v34 = vmax.f32 %v10825_v30, 0.0  ;;  %v18657_v40 = vld [vmem:[#allocation65_spill] sm:$0xff]  ;;  %v18666_v30 = vld [vmem:[#allocation75_spill] sm:$0xff] }
 0x544   :  { %12486 = vmatpush3.msra.mxu1 %v10548_v60  ;;  %v10831_v60 = vmax.f32 %v10823_v18, 0.0  ;;  %v10835_v38 = vadd.f32 %v10827_v59, %v18650_v29  ;;  %v18661_v15 = vld [vmem:[#allocation69_spill] sm:$0xff]  ;;  %v18678_v59 = vld [vmem:[#allocation86_spill] sm:$0xff] }
 0x545   :  { %12487 = vmatprep.subr.mxu1 %v10546_v63  ;;  %v10834_v8 = vmax.f32 %v10826_v22, 0.0  ;;  %v10841_v61 = vadd.f32 %v10833_v34, %v18647_v7  ;;  %v1333_v22 = vadd.f32 %v18657_v40, %v1221_v10  ;;  %v18669_v18 = vld [vmem:[#allocation77_spill] sm:$0xff]  ;;  %v18684_v10 = vld [vmem:[#allocation91_spill] sm:$0xff] }
 0x546   :  { %12488 = vmatpush3.msra.mxu1 %v10546_v63  ;;  %v11673_v63 = vld [vmem:[%s17679_s1 + $0x630] sm:$0xff]  ;;  %v10839_v37 = vadd.f32 %v10831_v60, %v18648_v23  ;;  %v18673_v60 = vld [vmem:[#allocation6_spill] sm:$0xff] }
 0x547   :  { %12489 = vmatprep.subr.mxu1 %v10544_v39  ;;  %v10842_v41 = vadd.f32 %v10834_v8, %v18642_v5  ;;  %v18659_v8 = vld [vmem:[#allocation66_spill] sm:$0xff]  ;;  %v18677_v23 = vld [vmem:[#allocation84_spill] sm:$0xff] }
 0x548   :  { %12490 = vmatpush3.msra.mxu1 %v10544_v39  ;;  %v18649_v39 = vld [vmem:[#allocation163_spill] sm:$0xff]  ;;  %v1439_v19 = vadd.f32 %v18659_v8, %v1333_v22  ;;  %v18686_v22 = vld [vmem:[#allocation94_spill] sm:$0xff] }
 0x549   :  { %12492 = vmatmul.mubr.msk.f32.vlgmr.msra.gmra.mxu1 %vm122_vm0, %v11676_v13  ;;  %12497 = vmatprep.subr.mxu1 %v10549_v12  ;;  %v10837_v42 = vadd.f32 %v10829_v56, %v18649_v39  ;;  %v18676_v56 = vld [vmem:[#allocation83_spill] sm:$0xff]  ;;  %v18679_v39 = vld [vmem:[#allocation85_spill] sm:$0xff] }
 0x54a   :  { %12511 = vmatprep.subr.mxu0 %v10842_v41  ;;  %12498 = vmatpush3.msra.mxu1 %v10549_v12  ;;  %v18651_v12 = vld [vmem:[#allocation2_spill] sm:$0xff] }
 0x54b   :  { %12512 = vmatpush3.msra.mxu0 %v10842_v41  ;;  %12499 = vmatprep.subr.mxu1 %v10547_v33  ;;  %v1211_v52 = vadd.f32 %v18652_v27, %v18651_v12  ;;  %v18663_v41 = vld [vmem:[#allocation70_spill] sm:$0xff]  ;;  %v10757_v27 = vpop.permute.xlu0 %10756 }
 0x54c   :  { %12513 = vmatprep.subr.mxu0 %v10840_v62  ;;  %12494 = vmatprep.mubr.msk.f32.mxu1 %vm122_vm0, %v11677_v11  ;;  %v18665_v11 = vld [vmem:[#allocation73_spill] sm:$0xff] }
 0x54d   :  { %12500 = vmatpush3.msra.mxu1 %v10547_v33  ;;  %12514 = vmatpush3.msra.mxu0 %v10840_v62  ;;  %v1331_v57 = vadd.f32 %v18653_v46, %v1211_v52  ;;  %v18667_v62 = vld [vmem:[#allocation74_spill] sm:$0xff] }
 0x54e   :  { %12495 = vmatmul.mubr.msk.f32.gmra.mxu1 %vm122_vm0, %v11678_v16  ;;  %12501 = vmatprep.subr.mxu1 %v10545_v43  ;;  %v18668_v16 = vld [vmem:[#allocation76_spill] sm:$0xff] }
 0x54f   :  { %12515 = vmatprep.subr.mxu0 %v10838_v21  ;;  %12502 = vmatpush3.msra.mxu1 %v10545_v43  ;;  %v1437_v33 = vadd.f32 %v18656_v1, %v1331_v57  ;;  %v18658_v43 = vld [vmem:[#allocation67_spill] sm:$0xff]  ;;  %v18683_v57 = vld [vmem:[#allocation89_spill] sm:$0xff]  ;;  %v10769_v8 = vpop.permute.xlu0 %10768 }
 0x550   :  { %12516 = vmatpush3.msra.mxu0 %v10838_v21  ;;  %12503 = vmatprep.subr.mxu1 %v10543_v20  ;;  %v18670_v21 = vld [vmem:[#allocation79_spill] sm:$0xff] }
 0x551   :  { %12517 = vmatprep.subr.mxu0 %v10836_v0  ;;  %12504 = vmatpush3.msra.mxu1 %v10543_v20  ;;  %v1543_v28 = vadd.f32 %v18658_v43, %v1437_v33  ;;  %v1545_v20 = vadd.f32 %v18661_v15, %v1439_v19  ;;  %v18685_v33 = vld [vmem:[#allocation92_spill] sm:$0xff] }
 0x552   :  { %12505 = vmatprep.mubr.msk.f32.mxu1 %vm122_vm0, %v11671_v47  ;;  %12518 = vmatpush3.msra.mxu0 %v10836_v0  ;;  %v18672_v0 = vld [vmem:[#allocation80_spill] sm:$0xff] }
 0x553   :  { %12506 = vmatmul.mubr.msk.f32.vlgmr.msra.gmra.mxu1 %vm122_vm0, %v11672_v3  ;;  %12525 = vmatprep.subr.mxu1 %v10841_v61  ;;  %v1649_v13 = vadd.f32 %v18660_v6, %v1543_v28  ;;  %v1651_v50 = vadd.f32 %v18663_v41, %v1545_v20  ;;  %v18674_v3 = vld [vmem:[#allocation82_spill] sm:$0xff]  ;;  %v18687_v6 = vld [vmem:[#allocation93_spill] sm:$0xff] }
 0x554   :  { %12526 = vmatpush3.msra.mxu1 %v10841_v61  ;;  %12508 = vmatprep.mubr.msk.f32.mxu1 %vm122_vm0, %v11673_v63  ;;  %v18675_v61 = vld [vmem:[#allocation81_spill] sm:$0xff] }
 0x555   :  { %12527 = vmatprep.subr.mxu1 %v10839_v37  ;;  %12520 = vmatmul.mubr.msk.f32.vlgmr.msra.gmra.mxu0 %vm122_vm0, %v11692_v58  ;;  %v1755_v5 = vadd.f32 %v18662_v2, %v1649_v13  ;;  %v1757_v51 = vadd.f32 %v18665_v11, %v1651_v50  ;;  %v18689_v50 = vld [vmem:[#allocation97_spill] sm:$0xff] }
 0x556   :  { %12528 = vmatpush3.msra.mxu1 %v10839_v37  ;;  %12522 = vmatprep.mubr.msk.f32.mxu0 %vm122_vm0, %v11693_v54 }
 0x557   :  { %12509 = vmatmul.mubr.msk.f32.gmra.mxu1 %vm122_vm0, %v11674_v45  ;;  %12529 = vmatprep.subr.mxu1 %v10837_v42  ;;  %v1861_v36 = vadd.f32 %v18664_v48, %v1755_v5  ;;  %v1863_v17 = vadd.f32 %v18667_v62, %v1757_v51  ;;  %v10761_v45 = vpop.permute.xlu1 %10760  ;;  %v18688_v5 = vld [vmem:[#allocation96_spill] sm:$0xff]  ;;  %v18690_v51 = vld [vmem:[#allocation135_spill] sm:$0xff] }
 0x558   :  { %12530 = vmatpush3.msra.mxu1 %v10837_v42  ;;  %12533 = vmatprep.mubr.msk.f32.mxu1 %vm122_vm0, %v11687_v35 }
 0x559   :  { %12531 = vmatprep.subr.mxu1 %v10835_v38  ;;  %12523 = vmatmul.mubr.msk.f32.gmra.mxu0 %vm122_vm0, %v11694_v31  ;;  %v1967_v24 = vadd.f32 %v18666_v30, %v1861_v36  ;;  %v1969_v55 = vadd.f32 %v18669_v18, %v1863_v17  ;;  %v18680_v31 = vld [vmem:[#allocation87_spill] sm:$0xff]  ;;  %v18691_v30 = vld [vmem:[#allocation173_spill] sm:$0xff] }
 0x55a   :  { %12532 = vmatpush3.msra.mxu1 %v10835_v38  ;;  %v18681_v38 = vld [vmem:[#allocation88_spill] sm:$0xff] }
 0x55b   :  { %12534 = vmatmul.mubr.msk.f32.vlgmr.msra.gmra.mxu1 %vm122_vm0, %v11688_v4  ;;  %v2073_v14 = vadd.f32 %v18668_v16, %v1967_v24  ;;  %v2075_v49 = vadd.f32 %v18671_v32, %v1969_v55  ;;  %v10765_v46 = vpop.permute.xlu1 %10764  ;;  %v9481_v24 = vadd.f32 %v18691_v30, %v18690_v51  ;;  %v18692_v55 = vld [vmem:[#allocation140_spill] sm:$0xff] }
 0x55c   :  { %12536 = vmatprep.mubr.msk.f32.mxu1 %vm122_vm0, %v11689_v53 }
 0x55d   :  { %v2179_v34 = vadd.f32 %v18670_v21, %v2073_v14  ;;  %v2181_v25 = vadd.f32 %v18673_v60, %v2075_v49 }
 0x55f   :  { %12537 = vmatmul.mubr.msk.f32.gmra.mxu1 %vm122_vm0, %v11690_v44  ;;  %v2285_v47 = vadd.f32 %v18672_v0, %v2179_v34  ;;  %v2287_v63 = vadd.f32 %v18675_v61, %v2181_v25  ;;  %v18682_v44 = vld [vmem:[#allocation90_spill] sm:$0xff]  ;;  %v11049_v19 = vpop.permute.xlu1 %11048  ;;  %v18693_v34 = vld [vmem:[#allocation99_spill] sm:$0xff] }
 0x560   :  { %v18695_v61 = vld [vmem:[#allocation174_spill] sm:$0xff] }
 0x561   :  { %v2391_v7 = vadd.f32 %v18674_v3, %v2285_v47  ;;  %v2393_v37 = vadd.f32 %v18677_v23, %v2287_v63  ;;  %v11053_v47 = vpop.permute.xlu0 %11052 }
 0x563   :  { %v2497_v58 = vadd.f32 %v18676_v56, %v2391_v7  ;;  %v2499_v42 = vadd.f32 %v18679_v39, %v2393_v37  ;;  %v11057_v18 = vpop.permute.xlu1 %11056  ;;  %v18694_v7 = vld [vmem:[#allocation144_spill] sm:$0xff]  ;;  %v18696_v37 = vld [vmem:[#allocation175_spill] sm:$0xff]  ;;  %v18697_v39 = vld [vmem:[#allocation142_spill] sm:$0xff] }
 0x564   :  { %v9483_v63 = vadd.f32 %v18695_v61, %v18694_v7 }
 0x565   :  { %v2603_v54 = vadd.f32 %v18678_v59, %v2497_v58  ;;  %v2605_v4 = vadd.f32 %v18681_v38, %v2499_v42 }
 0x567   :  { %v2709_v29 = vadd.f32 %v18680_v31, %v2603_v54  ;;  %v2711_v26 = vadd.f32 %v18683_v57, %v2605_v4  ;;  %v18698_v57 = vld [vmem:[#allocation176_spill] sm:$0xff] }
 0x569   :  { %v2815_v12 = vadd.f32 %v18682_v44, %v2709_v29  ;;  %v2817_v40 = vadd.f32 %v18685_v33, %v2711_v26  ;;  %v11061_v44 = vpop.permute.xlu1 %11060 }
 0x56b   :  { %v2921_v1 = vadd.f32 %v18684_v10, %v2815_v12  ;;  %v2923_v13 = vadd.f32 %v18687_v6, %v2817_v40 }
 0x56d   :  { %v3027_v43 = vadd.f32 %v18686_v22, %v2921_v1  ;;  %v3029_v48 = vadd.f32 %v18689_v50, %v2923_v13 }
 0x56f   :  { %v3133_v41 = vadd.f32 %v18688_v5, %v3027_v43  ;;  %v3135_v32 = vadd.f32 %v18693_v34, %v3029_v48 }
 0x571   :  { %v3153_v21 = vadd.f32 %v18692_v55, %v3133_v41  ;;  %v3155_v42 = vadd.f32 %v18697_v39, %v3135_v32 }
 0x573   :  { %v9485_v3 = vadd.f32 %v9481_v24, %v3153_v21  ;;  %v9487_v12 = vadd.f32 %v9483_v63, %v3155_v42 }
 0x609   :  { %v12493_v35 = vpop.f32.mrf.mxu1 }
 0x60b   :  { %v10639_v53 = vpop.f32.mrf.mxu1 }
 0x60e   :  { %v12496_v52 = vpop.f32.mrf.mxu1 }
 0x610   :  { %v10649_v9 = vpop.f32.mrf.mxu1 }
 0x613   :  { %v12507_v28 = vpop.f32.mrf.mxu1 }
 0x614   :  { %v10742_v2 = vadd.f32 %v12507_v28, %v12493_v35 }
 0x615   :  { %v10736_v15 = vpop.f32.mrf.mxu1  ;;  %v12521_v20 = vpop.f32.mrf.mxu0 }
 0x616   :  { %v10737_v36 = vadd.f32 %v10736_v15, %v10639_v53  ;;  %v10772_v16 = vadd.f32 %v10761_v45, %v10742_v2 }
 0x617   :  { %v12510_v11 = vpop.f32.mrf.mxu1  ;;  %v10931_v17 = vpop.f32.mrf.mxu0 }
 0x618   :  { %v10752_v14 = vadd.f32 %v12510_v11, %v12496_v52  ;;  %v10771_v49 = vadd.f32 %v10757_v27, %v10737_v36  ;;  %v10776_v59 = vadd.f32 %v10772_v16, %v18696_v37 }
 0x619   :  { %v10746_v62 = vpop.f32.mrf.mxu1  ;;  %v12524_v58 = vpop.f32.mrf.mxu0 }
 0x61a   :  { %v10747_v60 = vadd.f32 %v10746_v62, %v10649_v9  ;;  %v10774_v23 = vadd.f32 %v10769_v8, %v10752_v14  ;;  %v10775_v35 = vadd.f32 %v10771_v49, %v9485_v3 }
 0x61b   :  { %v12535_v0 = vpop.f32.mrf.mxu1  ;;  %v10941_v27 = vpop.f32.mrf.mxu0 }
 0x61c   :  { %v11034_v25 = vadd.f32 %v12535_v0, %v12521_v20  ;;  %v10773_v29 = vadd.f32 %v10765_v46, %v10747_v60  ;;  %v10778_v26 = vadd.f32 %v10774_v23, %v18698_v57 }
 0x61d   :  { %v11028_v56 = vpop.f32.mrf.mxu1 }
 0x61e   :  { %v11064_v54 = vadd.f32 %v11053_v47, %v11034_v25  ;;  %v11029_v45 = vadd.f32 %v11028_v56, %v10931_v17  ;;  %v10777_v33 = vadd.f32 %v10773_v29, %v9487_v12 }
 0x61f   :  { %v12538_v31 = vpop.f32.mrf.mxu1 }
 0x620   :  { %v11068_v38 = vadd.f32 %v11064_v54, %v10776_v59  ;;  %v11063_v4 = vadd.f32 %v11049_v19, %v11029_v45  ;;  %v11044_v53 = vadd.f32 %v12538_v31, %v12524_v58 }
 0x621   :  { %v11038_v52 = vpop.f32.mrf.mxu1 }
 0x622   :  { %11072 = vst [vmem:[%s17681_s3 + $0x8] sm:$0xff] %v11068_v38  ;;  %v11067_v9 = vadd.f32 %v11063_v4, %v10775_v35  ;;  %v11066_v10 = vadd.f32 %v11061_v44, %v11044_v53  ;;  %v11039_v1 = vadd.f32 %v11038_v52, %v10941_v27 }
 0x624   :  { %11071 = vst [vmem:[%s17681_s3] sm:$0xff] %v11067_v9  ;;  %v11070_v46 = vadd.f32 %v11066_v10, %v10778_v26  ;;  %v11065_v40 = vadd.f32 %v11057_v18, %v11039_v1 }
 0x626   :  { %11074 = vst [vmem:[%s17681_s3 + $0x18] sm:$0xff] %v11070_v46  ;;  %v11069_v22 = vadd.f32 %v11065_v40, %v10777_v33 }
 0x628   :  { %11073 = vst [vmem:[%s17681_s3 + $0x10] sm:$0xff] %v11069_v22 }

</bundles_post_ra>
